<compile_context>
chip_gen: v7x
topology: tpu7x:2x2x1
jax: 0.10.0
libtpu: 0.0.40
codegen_flags: <defaults>
</compile_context>

<pallas_src>
import math
import numpy as np
import jax
import jax.numpy as jnp
from jax import lax
from jax.experimental import pallas as pl
from jax.experimental.pallas import tpu as pltpu


def _conv3x3_bn_gelu_kernel(xp_ref, wt_ref, bias_ref, out_ref):
    # xp_ref:   (H+2, W+2, Cin)  padded input image (batch dim squeezed)
    # wt_ref:   (Cout, 9*Cin)    bf16 weights * BN scale, cols ordered (kh,kw,cin)
    # bias_ref: (Cout, 1)        f32 folded conv-bias + BatchNorm bias
    # out_ref:  (Cout, TH*W)     channel-major output rows [t*TH, (t+1)*TH)
    wp, cin = xp_ref.shape[1], xp_ref.shape[2]
    w_out = wp - 2
    m = out_ref.shape[1]
    th = m // w_out                       # output rows handled per grid step
    row0 = pl.multiple_of(pl.program_id(1) * th, th)

    # One wide load of this tile's halo band; all 9 conv taps are value
    # slices of it (no further VMEM loads, no masked narrow stores).
    xb = xp_ref[pl.ds(row0, th + 2), :, :].astype(jnp.bfloat16)  # (TH+2, W+2, Cin)

    # Register/VMEM-resident im2col operand: 9 shifted slices concatenated
    # along the last axis -> one K = 9*Cin MXU contraction.
    taps = []
    for kh in range(3):
        for kw in range(3):
            v = xb[kh:kh + th, kw:kw + w_out, :]          # (TH, W, Cin)
            taps.append(v.reshape(th * w_out, cin))
    xcol = jnp.concatenate(taps, axis=-1)                 # (TH*W, 9*Cin) bf16

    # (Cout, 9Cin) x (TH*W, 9Cin)^T -> (Cout, TH*W); bf16 MXU, f32 accumulate.
    # Keep the lane-dense (Cout, TH*W) orientation: unmasked stores matter
    # more than nominal MXU fill at Cout = 64/16.
    y = lax.dot_general(
        wt_ref[...], xcol,
        dimension_numbers=(((1,), (1,)), ((), ())),
        preferred_element_type=jnp.float32)

    y = y + bias_ref[...]                 # folded conv-bias + BatchNorm bias
    # exact (erf-based) GELU, matching torch.nn.GELU default numerics
    y = 0.5 * y * (1.0 + lax.erf(y * (1.0 / math.sqrt(2.0))))
    out_ref[...] = y.astype(out_ref.dtype)


def _pick_row_tile(h_out, w_out, n_batch, target_lanes=2048, min_lanes=512):
    """Largest TH dividing H with TH*W a lane-dense multiple of 128 and
    TH*W <= target_lanes. Splits into >=2 row bands only if the whole grid
    would otherwise collapse to a single step (v7x megacore), and only if
    each band keeps >= min_lanes of output width."""
    cands = [t for t in range(1, h_out + 1)
             if h_out % t == 0 and (t * w_out) % 128 == 0]
    if not cands:
        # Fallback: whole image (full-dim block). Correct, but stores become
        # masked if H*W isn't a multiple of 128 — a perf cliff, not a bug.
        return h_out
    fit = [t for t in cands if t * w_out <= target_lanes]
    th = max(fit) if fit else min(cands)
    if n_batch * (h_out // th) < 2:
        smaller = [t for t in cands if t < th and t * w_out >= min_lanes]
        if smaller:
            th = max(smaller)
    return th


def conv3x3_bn_gelu(x_nhwc, w_oihw, b_conv, gamma, beta, mean, var,
                    eps=1e-5, out_dtype=jnp.float32):
    """3x3 conv (stride 1, pad 1) + eval-mode BatchNorm + exact GELU.

    Input NHWC; output channel-major (N, Cout, H*W), i.e. flat NCHW.
    """
    N, H, W, Cin = x_nhwc.shape
    Cout = w_oihw.shape[0]

    # Pad once in HBM (tiny, 1x copy); im2col happens inside the kernel.
    xp = jnp.pad(x_nhwc, ((0, 0), (1, 1), (1, 1), (0, 0)))  # (N, H+2, W+2, Cin)

    # Fold eval-mode BatchNorm: scale into the weights (multiply in f32, THEN
    # cast to bf16 — no double rounding); bias stays a per-channel add in the
    # kernel epilogue.
    scale = gamma / jnp.sqrt(var + eps)                      # (Cout,)
    bias = (b_conv - mean) * scale + beta                    # (Cout,)
    wt = jnp.transpose(w_oihw, (0, 2, 3, 1)).reshape(Cout, 9 * Cin)
    wt = (wt.astype(jnp.float32) * scale[:, None]).astype(jnp.bfloat16)
    bias2 = bias.reshape(Cout, 1).astype(jnp.float32)

    th = _pick_row_tile(H, W, N)
    grid = (N, H // th)

    out = pl.pallas_call(
        _conv3x3_bn_gelu_kernel,
        out_shape=jax.ShapeDtypeStruct((N, Cout, H * W), out_dtype),
        grid_spec=pltpu.PrefetchScalarGridSpec(
            num_scalar_prefetch=0,
            grid=grid,
            in_specs=[
                # Full padded image per batch element; block index is constant
                # along the row-tile axis -> re-fetched only when n changes.
                pl.BlockSpec((None, H + 2, W + 2, Cin),
                             lambda n, t: (n, 0, 0, 0)),
                pl.BlockSpec((Cout, 9 * Cin), lambda n, t: (0, 0)),
                pl.BlockSpec((Cout, 1), lambda n, t: (0, 0)),
            ],
            out_specs=pl.BlockSpec((None, Cout, th * W),
                                   lambda n, t: (n, 0, t)),
        ),
        compiler_params=pltpu.CompilerParams(
            dimension_semantics=("parallel", "parallel"),
            vmem_limit_bytes=32 * 1024 * 1024),
    )(xp, wt, bias2)
    return out                                               # (N, Cout, H*W)


def pixel_shuffle_to_nhwc(y_cmaj, H, W, r=2):
    """(N, C*r*r, H*W) channel-major -> NHWC (N, H*r, W*r, C).

    Matches torch.nn.PixelShuffle on NCHW:
      out[n, c, h*r+i, w*r+j] = in[n, c*r*r + i*r + j, h, w]
    and simultaneously converts to the NHWC layout the next conv consumes
    (single XLA transpose; bf16 halves its traffic).
    """
    N, Crr, _ = y_cmaj.shape
    C = Crr // (r * r)
    y = y_cmaj.reshape(N, C, r, r, H, W)
    y = jnp.transpose(y, (0, 4, 2, 5, 3, 1))                 # (N, H, r, W, r, C)
    return y.reshape(N, H * r, W * r, C)


def oaa1_forward(x_nchw, p):
    """Input NCHW (N, 32, H, W) like the PyTorch module; output NCHW."""
    N, _, H, W = x_nchw.shape
    x_nhwc = jnp.transpose(x_nchw, (0, 2, 3, 1))
    # conv1 intermediate in bf16: halves its HBM writeback / reload; conv2
    # casts its im2col operand to bf16 anyway, so no extra precision loss on
    # the path that matters.
    y = conv3x3_bn_gelu(x_nhwc, p["w1"], p["b1"], p["g1"], p["bt1"],
                        p["m1"], p["v1"], out_dtype=jnp.bfloat16)  # (N,64,H*W)
    y = pixel_shuffle_to_nhwc(y, H, W, 2)                     # (N, 2H, 2W, 16)
    z = conv3x3_bn_gelu(y, p["w2"], p["b2"], p["g2"], p["bt2"],
                        p["m2"], p["v2"], out_dtype=jnp.float32)   # (N,16,4HW)
    return z.reshape(N, 16, 2 * H, 2 * W)                     # NCHW


# ----------------------- plain-JAX reference (for checking) ------------------
def _ref_conv_bn_gelu(x_nhwc, w_oihw, b, gamma, beta, mean, var, eps=1e-5):
    w_hwio = jnp.transpose(w_oihw, (2, 3, 1, 0))
    y = lax.conv_general_dilated(
        x_nhwc.astype(jnp.float32), w_hwio, (1, 1), "SAME",
        dimension_numbers=("NHWC", "HWIO", "NHWC"),
        precision=lax.Precision.HIGHEST)
    y = y + b
    y = (y - mean) / jnp.sqrt(var + eps) * gamma + beta
    return 0.5 * y * (1.0 + lax.erf(y * (1.0 / math.sqrt(2.0))))


def _ref_pixel_shuffle_nhwc(x, r=2):
    N, H, W, C = x.shape
    Cout = C // (r * r)
    x = x.reshape(N, H, W, Cout, r, r)
    x = jnp.transpose(x, (0, 1, 4, 2, 5, 3))
    return x.reshape(N, H * r, W * r, Cout)


def oaa1_reference(x_nchw, p):
    x = jnp.transpose(x_nchw, (0, 2, 3, 1))                   # NCHW -> NHWC
    y = _ref_conv_bn_gelu(x, p["w1"], p["b1"], p["g1"], p["bt1"],
                          p["m1"], p["v1"])
    y = _ref_pixel_shuffle_nhwc(y, 2)
    y = _ref_conv_bn_gelu(y, p["w2"], p["b2"], p["g2"], p["bt2"],
                          p["m2"], p["v2"])
    return jnp.transpose(y, (0, 3, 1, 2))                     # NHWC -> NCHW


if __name__ == "__main__":
    key = jax.random.PRNGKey(0)
    ks = jax.random.split(key, 13)

    params = {
        # cur_conv: Conv2d(32 -> 64, 3x3) + BN(64)
        "w1": 0.1 * jax.random.normal(ks[0], (64, 32, 3, 3), jnp.float32),
        "b1": 0.1 * jax.random.normal(ks[1], (64,), jnp.float32),
        "g1": 1.0 + 0.1 * jax.random.normal(ks[2], (64,), jnp.float32),
        "bt1": 0.1 * jax.random.normal(ks[3], (64,), jnp.float32),
        "m1": 0.1 * jax.random.normal(ks[4], (64,), jnp.float32),
        "v1": jax.random.uniform(ks[5], (64,), jnp.float32, 0.5, 1.5),
        # out_conv: Conv2d(16 -> 16, 3x3) + BN(16)
        "w2": 0.1 * jax.random.normal(ks[6], (16, 16, 3, 3), jnp.float32),
        "b2": 0.1 * jax.random.normal(ks[7], (16,), jnp.float32),
        "g2": 1.0 + 0.1 * jax.random.normal(ks[8], (16,), jnp.float32),
        "bt2": 0.1 * jax.random.normal(ks[9], (16,), jnp.float32),
        "m2": 0.1 * jax.random.normal(ks[10], (16,), jnp.float32),
        "v2": jax.random.uniform(ks[11], (16,), jnp.float32, 0.5, 1.5),
    }

    # NCHW input, exactly as the PyTorch module expects: (2, 32, 16, 16).
    x = jax.random.normal(ks[12], (2, 32, 16, 16), jnp.float32)

    out = jax.block_until_ready(jax.jit(oaa1_forward)(x, params))
    assert out.shape == (2, 16, 32, 32), out.shape

    ref = jax.block_until_ready(jax.jit(oaa1_reference)(x, params))
    # tolerance loose enough for bf16 MXU operands / bf16 intermediate
    np.testing.assert_allclose(np.asarray(out), np.asarray(ref),
                               rtol=5e-2, atol=1e-1)

    print("KERNEL_OK")
</pallas_src>

<mosaic_0001>
module attributes {stable_mosaic.version = 11 : i64} {
  func.func @_conv3x3_bn_gelu_kernel(%arg0: i32, %arg1: i32, %arg2: memref<1x18x18x32xf32, #tpu.memory_space<vmem>>, %arg3: memref<64x288xbf16, #tpu.memory_space<vmem>>, %arg4: memref<64x1xf32, #tpu.memory_space<vmem>>, %arg5: memref<1x64x256xbf16, #tpu.memory_space<vmem>>) attributes {dimension_semantics = [#tpu.dimension_semantics<parallel>, #tpu.dimension_semantics<parallel>], iteration_bounds = array<i64: 2, 1>, scalar_prefetch = 0 : i64, scratch_operands = 0 : i64, tpu.core_type = #tpu.core_type<tc>, window_params = [{transform_indices = @transform_0, window_bounds = array<i64: 1, 18, 18, 32>}, {pipeline_mode = #tpu.pipeline_mode<synchronous>, transform_indices = @transform_1, window_bounds = array<i64: 64, 288>}, {pipeline_mode = #tpu.pipeline_mode<synchronous>, transform_indices = @transform_2, window_bounds = array<i64: 64, 1>}, {transform_indices = @transform_3, window_bounds = array<i64: 1, 64, 256>}]} {
    %c16_i32 = arith.constant 16 : i32
    %0 = arith.muli %arg1, %c16_i32 : i32
    %1 = tpu.assume_multiple %0, 16 : i32
    %c0 = arith.constant 0 : index
    %2 = arith.index_cast %1 : i32 to index
    %c0_0 = arith.constant 0 : index
    %c0_1 = arith.constant 0 : index
    %3 = vector.load %arg2[%c0, %2, %c0_0, %c0_1] : memref<1x18x18x32xf32, #tpu.memory_space<vmem>>, vector<1x18x18x32xf32>
    %4 = vector.shape_cast %3 : vector<1x18x18x32xf32> to vector<18x18x32xf32>
    %5 = arith.truncf %4 : vector<18x18x32xf32> to vector<18x18x32xbf16>
    %6 = vector.extract_strided_slice %5 {offsets = [0, 0, 0], sizes = [16, 16, 32], strides = [1, 1, 1]} : vector<18x18x32xbf16> to vector<16x16x32xbf16>
    %7 = vector.shape_cast %6 : vector<16x16x32xbf16> to vector<256x32xbf16>
    %8 = vector.extract_strided_slice %5 {offsets = [0, 1, 0], sizes = [16, 16, 32], strides = [1, 1, 1]} : vector<18x18x32xbf16> to vector<16x16x32xbf16>
    %9 = vector.shape_cast %8 : vector<16x16x32xbf16> to vector<256x32xbf16>
    %10 = vector.extract_strided_slice %5 {offsets = [0, 2, 0], sizes = [16, 16, 32], strides = [1, 1, 1]} : vector<18x18x32xbf16> to vector<16x16x32xbf16>
    %11 = vector.shape_cast %10 : vector<16x16x32xbf16> to vector<256x32xbf16>
    %12 = vector.extract_strided_slice %5 {offsets = [1, 0, 0], sizes = [16, 16, 32], strides = [1, 1, 1]} : vector<18x18x32xbf16> to vector<16x16x32xbf16>
    %13 = vector.shape_cast %12 : vector<16x16x32xbf16> to vector<256x32xbf16>
    %14 = vector.extract_strided_slice %5 {offsets = [1, 1, 0], sizes = [16, 16, 32], strides = [1, 1, 1]} : vector<18x18x32xbf16> to vector<16x16x32xbf16>
    %15 = vector.shape_cast %14 : vector<16x16x32xbf16> to vector<256x32xbf16>
    %16 = vector.extract_strided_slice %5 {offsets = [1, 2, 0], sizes = [16, 16, 32], strides = [1, 1, 1]} : vector<18x18x32xbf16> to vector<16x16x32xbf16>
    %17 = vector.shape_cast %16 : vector<16x16x32xbf16> to vector<256x32xbf16>
    %18 = vector.extract_strided_slice %5 {offsets = [2, 0, 0], sizes = [16, 16, 32], strides = [1, 1, 1]} : vector<18x18x32xbf16> to vector<16x16x32xbf16>
    %19 = vector.shape_cast %18 : vector<16x16x32xbf16> to vector<256x32xbf16>
    %20 = vector.extract_strided_slice %5 {offsets = [2, 1, 0], sizes = [16, 16, 32], strides = [1, 1, 1]} : vector<18x18x32xbf16> to vector<16x16x32xbf16>
    %21 = vector.shape_cast %20 : vector<16x16x32xbf16> to vector<256x32xbf16>
    %22 = vector.extract_strided_slice %5 {offsets = [2, 2, 0], sizes = [16, 16, 32], strides = [1, 1, 1]} : vector<18x18x32xbf16> to vector<16x16x32xbf16>
    %23 = vector.shape_cast %22 : vector<16x16x32xbf16> to vector<256x32xbf16>
    %24 = tpu.concatenate %7, %9, %11, %13, %15, %17, %19, %21, %23 in 1 : vector<256x32xbf16>, vector<256x32xbf16>, vector<256x32xbf16>, vector<256x32xbf16>, vector<256x32xbf16>, vector<256x32xbf16>, vector<256x32xbf16>, vector<256x32xbf16>, vector<256x32xbf16> -> vector<256x288xbf16>
    %c0_2 = arith.constant 0 : index
    %c0_3 = arith.constant 0 : index
    %25 = vector.load %arg3[%c0_2, %c0_3] : memref<64x288xbf16, #tpu.memory_space<vmem>>, vector<64x288xbf16>
    %cst = arith.constant dense<0.000000e+00> : vector<64x256xf32>
    %26 = tpu.matmul %25, %24, %cst {dimension_numbers = #tpu.dot_dimension_numbers<[1], [1], [0], [0], [0, 0, 1, 0], [], []>} : vector<64x288xbf16>, vector<256x288xbf16>, vector<64x256xf32> -> vector<64x256xf32>
    %c0_4 = arith.constant 0 : index
    %c0_5 = arith.constant 0 : index
    %27 = vector.load %arg4[%c0_4, %c0_5] : memref<64x1xf32, #tpu.memory_space<vmem>>, vector<64x1xf32>
    %28 = vector.broadcast %27 : vector<64x1xf32> to vector<64x256xf32>
    %29 = arith.addf %26, %28 : vector<64x256xf32>
    %cst_6 = arith.constant 5.000000e-01 : f32
    %30 = vector.broadcast %cst_6 : f32 to vector<64x256xf32>
    %31 = arith.mulf %30, %29 : vector<64x256xf32>
    %cst_7 = arith.constant 0.707106769 : f32
    %32 = vector.broadcast %cst_7 : f32 to vector<64x256xf32>
    %33 = arith.mulf %29, %32 : vector<64x256xf32>
    %34 = math.erf %33 : vector<64x256xf32>
    %cst_8 = arith.constant 1.000000e+00 : f32
    %35 = vector.broadcast %cst_8 : f32 to vector<64x256xf32>
    %36 = arith.addf %35, %34 : vector<64x256xf32>
    %37 = arith.mulf %31, %36 : vector<64x256xf32>
    %38 = arith.truncf %37 : vector<64x256xf32> to vector<64x256xbf16>
    %c0_9 = arith.constant 0 : index
    %c0_10 = arith.constant 0 : index
    %c0_11 = arith.constant 0 : index
    %39 = vector.load %arg5[%c0_9, %c0_10, %c0_11] : memref<1x64x256xbf16, #tpu.memory_space<vmem>>, vector<1x64x256xbf16>
    %40 = vector.shape_cast %39 : vector<1x64x256xbf16> to vector<64x256xbf16>
    %41 = vector.shape_cast %38 : vector<64x256xbf16> to vector<1x64x256xbf16>
    tpu.vector_store %arg5[%c0_9, %c0_10, %c0_11], %41 {strides = array<i32>} : memref<1x64x256xbf16, #tpu.memory_space<vmem>>, vector<1x64x256xbf16>,
    return
  }
  func.func @transform_0(%arg0: i32, %arg1: i32) -> (i32, i32, i32, i32) {
    %c0_i32 = arith.constant 0 : i32
    %c0_i32_0 = arith.constant 0 : i32
    %c0_i32_1 = arith.constant 0 : i32
    %c0_i32_2 = arith.constant 0 : i32
    return %arg0, %c0_i32, %c0_i32_0, %c0_i32_1 : i32, i32, i32, i32
  }
  func.func @transform_1(%arg0: i32, %arg1: i32) -> (i32, i32) {
    %c0_i32 = arith.constant 0 : i32
    %c0_i32_0 = arith.constant 0 : i32
    %c0_i32_1 = arith.constant 0 : i32
    return %c0_i32, %c0_i32_0 : i32, i32
  }
  func.func @transform_2(%arg0: i32, %arg1: i32) -> (i32, i32) {
    %c0_i32 = arith.constant 0 : i32
    %c0_i32_0 = arith.constant 0 : i32
    %c0_i32_1 = arith.constant 0 : i32
    return %c0_i32, %c0_i32_0 : i32, i32
  }
  func.func @transform_3(%arg0: i32, %arg1: i32) -> (i32, i32, i32) {
    %c0_i32 = arith.constant 0 : i32
    %c0_i32_0 = arith.constant 0 : i32
    return %arg0, %c0_i32, %arg1 : i32, i32, i32
  }
}

module attributes {stable_mosaic.version = 11 : i64} {
  func.func @_conv3x3_bn_gelu_kernel(%arg0: i32, %arg1: i32, %arg2: memref<1x34x34x16xbf16, #tpu.memory_space<vmem>>, %arg3: memref<16x144xbf16, #tpu.memory_space<vmem>>, %arg4: memref<16x1xf32, #tpu.memory_space<vmem>>, %arg5: memref<1x16x1024xf32, #tpu.memory_space<vmem>>) attributes {dimension_semantics = [#tpu.dimension_semantics<parallel>, #tpu.dimension_semantics<parallel>], iteration_bounds = array<i64: 2, 1>, scalar_prefetch = 0 : i64, scratch_operands = 0 : i64, tpu.core_type = #tpu.core_type<tc>, window_params = [{transform_indices = @transform_0, window_bounds = array<i64: 1, 34, 34, 16>}, {pipeline_mode = #tpu.pipeline_mode<synchronous>, transform_indices = @transform_1, window_bounds = array<i64: 16, 144>}, {pipeline_mode = #tpu.pipeline_mode<synchronous>, transform_indices = @transform_2, window_bounds = array<i64: 16, 1>}, {transform_indices = @transform_3, window_bounds = array<i64: 1, 16, 1024>}]} {
    %c32_i32 = arith.constant 32 : i32
    %0 = arith.muli %arg1, %c32_i32 : i32
    %1 = tpu.assume_multiple %0, 32 : i32
    %c0 = arith.constant 0 : index
    %2 = arith.index_cast %1 : i32 to index
    %c0_0 = arith.constant 0 : index
    %c0_1 = arith.constant 0 : index
    %3 = vector.load %arg2[%c0, %2, %c0_0, %c0_1] : memref<1x34x34x16xbf16, #tpu.memory_space<vmem>>, vector<1x34x34x16xbf16>
    %4 = vector.shape_cast %3 : vector<1x34x34x16xbf16> to vector<34x34x16xbf16>
    %5 = vector.extract_strided_slice %4 {offsets = [0, 0, 0], sizes = [32, 32, 16], strides = [1, 1, 1]} : vector<34x34x16xbf16> to vector<32x32x16xbf16>
    %6 = vector.shape_cast %5 : vector<32x32x16xbf16> to vector<1024x16xbf16>
    %7 = vector.extract_strided_slice %4 {offsets = [0, 1, 0], sizes = [32, 32, 16], strides = [1, 1, 1]} : vector<34x34x16xbf16> to vector<32x32x16xbf16>
    %8 = vector.shape_cast %7 : vector<32x32x16xbf16> to vector<1024x16xbf16>
    %9 = vector.extract_strided_slice %4 {offsets = [0, 2, 0], sizes = [32, 32, 16], strides = [1, 1, 1]} : vector<34x34x16xbf16> to vector<32x32x16xbf16>
    %10 = vector.shape_cast %9 : vector<32x32x16xbf16> to vector<1024x16xbf16>
    %11 = vector.extract_strided_slice %4 {offsets = [1, 0, 0], sizes = [32, 32, 16], strides = [1, 1, 1]} : vector<34x34x16xbf16> to vector<32x32x16xbf16>
    %12 = vector.shape_cast %11 : vector<32x32x16xbf16> to vector<1024x16xbf16>
    %13 = vector.extract_strided_slice %4 {offsets = [1, 1, 0], sizes = [32, 32, 16], strides = [1, 1, 1]} : vector<34x34x16xbf16> to vector<32x32x16xbf16>
    %14 = vector.shape_cast %13 : vector<32x32x16xbf16> to vector<1024x16xbf16>
    %15 = vector.extract_strided_slice %4 {offsets = [1, 2, 0], sizes = [32, 32, 16], strides = [1, 1, 1]} : vector<34x34x16xbf16> to vector<32x32x16xbf16>
    %16 = vector.shape_cast %15 : vector<32x32x16xbf16> to vector<1024x16xbf16>
    %17 = vector.extract_strided_slice %4 {offsets = [2, 0, 0], sizes = [32, 32, 16], strides = [1, 1, 1]} : vector<34x34x16xbf16> to vector<32x32x16xbf16>
    %18 = vector.shape_cast %17 : vector<32x32x16xbf16> to vector<1024x16xbf16>
    %19 = vector.extract_strided_slice %4 {offsets = [2, 1, 0], sizes = [32, 32, 16], strides = [1, 1, 1]} : vector<34x34x16xbf16> to vector<32x32x16xbf16>
    %20 = vector.shape_cast %19 : vector<32x32x16xbf16> to vector<1024x16xbf16>
    %21 = vector.extract_strided_slice %4 {offsets = [2, 2, 0], sizes = [32, 32, 16], strides = [1, 1, 1]} : vector<34x34x16xbf16> to vector<32x32x16xbf16>
    %22 = vector.shape_cast %21 : vector<32x32x16xbf16> to vector<1024x16xbf16>
    %23 = tpu.concatenate %6, %8, %10, %12, %14, %16, %18, %20, %22 in 1 : vector<1024x16xbf16>, vector<1024x16xbf16>, vector<1024x16xbf16>, vector<1024x16xbf16>, vector<1024x16xbf16>, vector<1024x16xbf16>, vector<1024x16xbf16>, vector<1024x16xbf16>, vector<1024x16xbf16> -> vector<1024x144xbf16>
    %c0_2 = arith.constant 0 : index
    %c0_3 = arith.constant 0 : index
    %24 = vector.load %arg3[%c0_2, %c0_3] : memref<16x144xbf16, #tpu.memory_space<vmem>>, vector<16x144xbf16>
    %cst = arith.constant dense<0.000000e+00> : vector<16x1024xf32>
    %25 = tpu.matmul %24, %23, %cst {dimension_numbers = #tpu.dot_dimension_numbers<[1], [1], [0], [0], [0, 0, 1, 0], [], []>} : vector<16x144xbf16>, vector<1024x144xbf16>, vector<16x1024xf32> -> vector<16x1024xf32>
    %c0_4 = arith.constant 0 : index
    %c0_5 = arith.constant 0 : index
    %26 = vector.load %arg4[%c0_4, %c0_5] : memref<16x1xf32, #tpu.memory_space<vmem>>, vector<16x1xf32>
    %27 = vector.broadcast %26 : vector<16x1xf32> to vector<16x1024xf32>
    %28 = arith.addf %25, %27 : vector<16x1024xf32>
    %cst_6 = arith.constant 5.000000e-01 : f32
    %29 = vector.broadcast %cst_6 : f32 to vector<16x1024xf32>
    %30 = arith.mulf %29, %28 : vector<16x1024xf32>
    %cst_7 = arith.constant 0.707106769 : f32
    %31 = vector.broadcast %cst_7 : f32 to vector<16x1024xf32>
    %32 = arith.mulf %28, %31 : vector<16x1024xf32>
    %33 = math.erf %32 : vector<16x1024xf32>
    %cst_8 = arith.constant 1.000000e+00 : f32
    %34 = vector.broadcast %cst_8 : f32 to vector<16x1024xf32>
    %35 = arith.addf %34, %33 : vector<16x1024xf32>
    %36 = arith.mulf %30, %35 : vector<16x1024xf32>
    %c0_9 = arith.constant 0 : index
    %c0_10 = arith.constant 0 : index
    %c0_11 = arith.constant 0 : index
    %37 = vector.load %arg5[%c0_9, %c0_10, %c0_11] : memref<1x16x1024xf32, #tpu.memory_space<vmem>>, vector<1x16x1024xf32>
    %38 = vector.shape_cast %37 : vector<1x16x1024xf32> to vector<16x1024xf32>
    %39 = vector.shape_cast %36 : vector<16x1024xf32> to vector<1x16x1024xf32>
    tpu.vector_store %arg5[%c0_9, %c0_10, %c0_11], %39 {strides = array<i32>} : memref<1x16x1024xf32, #tpu.memory_space<vmem>>, vector<1x16x1024xf32>,
    return
  }
  func.func @transform_0(%arg0: i32, %arg1: i32) -> (i32, i32, i32, i32) {
    %c0_i32 = arith.constant 0 : i32
    %c0_i32_0 = arith.constant 0 : i32
    %c0_i32_1 = arith.constant 0 : i32
    %c0_i32_2 = arith.constant 0 : i32
    return %arg0, %c0_i32, %c0_i32_0, %c0_i32_1 : i32, i32, i32, i32
  }
  func.func @transform_1(%arg0: i32, %arg1: i32) -> (i32, i32) {
    %c0_i32 = arith.constant 0 : i32
    %c0_i32_0 = arith.constant 0 : i32
    %c0_i32_1 = arith.constant 0 : i32
    return %c0_i32, %c0_i32_0 : i32, i32
  }
  func.func @transform_2(%arg0: i32, %arg1: i32) -> (i32, i32) {
    %c0_i32 = arith.constant 0 : i32
    %c0_i32_0 = arith.constant 0 : i32
    %c0_i32_1 = arith.constant 0 : i32
    return %c0_i32, %c0_i32_0 : i32, i32
  }
  func.func @transform_3(%arg0: i32, %arg1: i32) -> (i32, i32, i32) {
    %c0_i32 = arith.constant 0 : i32
    %c0_i32_0 = arith.constant 0 : i32
    return %arg0, %c0_i32, %arg1 : i32, i32, i32
  }
}

</mosaic_0001>

<bundles_post_ra>
// kernel: oaa1_forward.2
= control target key start
LH: loop header
LB: loop body
LE: loop exit
PB: predicated region body
PF: predicated region fallthrough
CT: control target
= control target key end

     0   :  { %s1814_s12 = smov 0   ;;  %s1816_s13 = smov 0   ;;  %s2587_s0 = inlined_call_operand.vmem [shape: f32[2,18,18,32], index: 0, kind: input, shape index: {}]   ;;  %s2588_s1 = inlined_call_operand.vmem [shape: bf16[64,288], index: 1, kind: input, shape index: {}]   ;;  %s2589_s2 = inlined_call_operand.vmem [shape: f32[64,1], index: 2, kind: input, shape index: {}]   ;;  %s2590_s3 = inlined_call_operand.vmem [shape: bf16[2,64,256], index: 3, kind: output, shape index: {}]  }
   0x1   :  { %s1818_s14 = smov 0  }
   0x2 LB: > { %s25_s15 = sadd.s32 1, %s1784_s13  ;;  %p1584_p0 = scmp.ge.s32.totalorder %s1788_s14, 1  ;;  %s1788_s14 = sphi %s1818_s14, %s13_s14   ;;  %s1784_s13 = sphi %s1816_s13, %s2592_s13   ;;  %s1780_s12 = sphi %s1814_s12, %s2591_s12  }
   0x3   : > { %p27_p1 = scmp.ge.s32.totalorder %s25_s15, 2  ;;  %p151_p2 = scmp.lt.s32.totalorder %s1788_s14, 3 }
   0x5   : > { %s2594_s15 = smov (%p27_p1, %s25_s15), 0  ;;  %p152_p3 = pnand %p1584_p0, %p151_p2 }
   0x6   : > { %p179_p4 = scmp.lt.s32.totalorder (!%p152_p3), %s1780_s12, 1  ;;  %s1790_s20 = smov (!%p152_p3), 64   ;;  %vm513_vm0 = vcmask (!%p152_p3), 1046528   ;;  %vm288_vm1 = vsmask.f32 (!%p152_p3), 7424  ;;  %vm788_vm2 = vcmask (!%p152_p3), 261120  }
   0x7   : > { %155 = sbr.rel (%p152_p3) target bundleno = 597 (0x255), region = 32  ;;  %s1791_s21 = smov (!%p152_p3), 96   ;;  %vm821_vm3 = vcmask (!%p152_p3), 523264   ;;  %vm854_vm4 = vcmask (!%p152_p3), 785408  }
   0x8   : > { %s1792_s22 = smov (!%p152_p3), 32  }
   0xe   : > { %s2596_s12 = smov (!%p179_p4, %s1780_s12), 1 }
   0xf   : > { %s1687_s16 = smul.u32 432, %s2596_s12  ;;  %s1614_s17 = sshll.u32 %s2596_s12, 6 }
  0x11   : > { %s1838_s19 = scalar_lea.vmem %s2587_s0, %s1687_s16 }
  0x12   : > { %v207_v0 = vld [vmem:[%s1838_s19 + $0x48] sm:$0xff]  ;;  %v208_v1 = vld [vmem:[%s1838_s19 + $0x50] sm:$0xff]  ;;  %v205_v4 = vld [vmem:[%s1838_s19 + $0x38] sm:$0xff] }
  0x13   : > { %v204_v2 = vld [vmem:[%s1838_s19 + $0x30] sm:$0xff]  ;;  %v1843_v3 = vpack.c.bf16 %v208_v1, %v207_v0  ;;  %v201_v5 = vld [vmem:[%s1838_s19 + $0x18] sm:$0xff]  ;;  %v202_v6 = vld [vmem:[%s1838_s19 + $0x20] sm:$0xff] }
  0x14   : > { %v1848_v7 = vpack.c.bf16 %v205_v4, %v204_v2  ;;  %v1850_v8 = vpack.c.bf16 %v202_v6, %v201_v5  ;;  %v203_v9 = vld [vmem:[%s1838_s19 + $0x28] sm:$0x3]  ;;  %v206_v10 = vld [vmem:[%s1838_s19 + $0x40] sm:$0x3]  ;;  %v200_v15 = vld [vmem:[%s1838_s19 + $0x10] sm:$0x3] }
  0x15   : > { %v198_v11 = vld [vmem:[%s1838_s19] sm:$0xff]  ;;  %726 = vrot.lane.b32.xlu0 %v1843_v3, %s1790_s20  ;;  %v255_v12 = vpack.c.bf16 %v203_v9, %v203_v9  ;;  %v257_v13 = vpack.c.bf16 %v206_v10, %v206_v10  ;;  %v199_v14 = vld [vmem:[%s1838_s19 + $0x8] sm:$0xff]  ;;  %v253_v19 = vpack.c.bf16 %v200_v15, %v200_v15  ;;  %v209_v31 = vld [vmem:[%s1838_s19 + $0x58] sm:$0x3]  ;;  %v328_v42 = vshll.u32 %v1843_v3, 16 }
  0x16   : > { %724 = vrot.lane.b32.xlu1 %v1848_v7, %s1790_s20  ;;  %v517_v16 = vrot.slane %v1850_v8, 1  ;;  %v520_v17 = vrot.slane %v1848_v7, 1  ;;  %v1863_v18 = vpack.c.bf16 %v199_v14, %v198_v11  ;;  %v304_v22 = vshll.u32 %v1850_v8, 16  ;;  %v210_v52 = vld [vmem:[%s1838_s19 + $0x60] sm:$0xff]  ;;  %v211_v53 = vld [vmem:[%s1838_s19 + $0x68] sm:$0xff]  ;;  %v213_v6 = vld [vmem:[%s1838_s19 + $0x78] sm:$0xff] }
  0x17   : > { %v518_v20 = vrot.slane %v255_v12, 1  ;;  %v521_v21 = vrot.slane %v257_v13, 1  ;;  %v515_v24 = vrot.slane %v253_v19, 1  ;;  %v297_v29 = vshll.u32 %v253_v19, 16  ;;  %v212_v55 = vld [vmem:[%s1838_s19 + $0x70] sm:$0x3] }
  0x18   : > { %v514_v23 = vrot.slane %v1863_v18, 1  ;;  %v290_v25 = vshrl.u32 %v1863_v18, 16  ;;  %v292_v26 = vshll.u32 %v1863_v18, 16  ;;  %v302_v30 = vshrl.u32 %v1850_v8, 16  ;;  %v222_v61 = vld [vmem:[%s1838_s19 + $0xc0] sm:$0xff]  ;;  %v223_v63 = vld [vmem:[%s1838_s19 + $0xc8] sm:$0xff] }
  0x19   : > { %v519_v27 = vsel %vm513_vm0, %v517_v16, %v518_v20  ;;  %v1871_v28 = vsel %vm513_vm0, %v520_v17, %v521_v21  ;;  %v306_v34 = vrot.slane %v304_v22, 1  ;;  %v309_v35 = vshll.u32 %v255_v12, 16  ;;  %v224_v0 = vld [vmem:[%s1838_s19 + $0xd0] sm:$0x3]  ;;  %v214_v9 = vld [vmem:[%s1838_s19 + $0x80] sm:$0xff]  ;;  %v225_v14 = vld [vmem:[%s1838_s19 + $0xd8] sm:$0xff] }
  0x1a   : > { %660 = vrot.lane.b32.xlu1 %v1850_v8, %s1791_s21  ;;  %692 = vrot.lane.b32.xlu0 %v519_v27, %s1792_s22  ;;  %v516_v32 = vsel %vm513_vm0, %v514_v23, %v515_v24  ;;  %v294_v33 = vrot.slane %v292_v26, 1  ;;  %v299_v36 = vrot.slane %v297_v29, 1  ;;  %v314_v37 = vshrl.u32 %v1848_v7, 16  ;;  %v226_v15 = vld [vmem:[%s1838_s19 + $0xe0] sm:$0xff]  ;;  %v227_v20 = vld [vmem:[%s1838_s19 + $0xe8] sm:$0x3] }
  0x1b   : > { %v316_v38 = vshll.u32 %v1848_v7, 16  ;;  %v321_v39 = vshll.u32 %v257_v13, 16  ;;  %v259_v41 = vpack.c.bf16 %v209_v31, %v209_v31  ;;  %v307_v44 = vor.u32 %v306_v34, %v302_v30  ;;  %v215_v22 = vld [vmem:[%s1838_s19 + $0x88] sm:$0x3]  ;;  %v228_v29 = vld [vmem:[%s1838_s19 + $0xf0] sm:$0xff]  ;;  %v229_v30 = vld [vmem:[%s1838_s19 + $0xf8] sm:$0xff] }
  0x1c   : > { %v295_v40 = vor.u32 %v294_v33, %v290_v25  ;;  %v311_v45 = vrot.slane %v309_v35, 1  ;;  %v326_v47 = vshrl.u32 %v1843_v3, 16  ;;  %v330_v50 = vrot.slane %v328_v42, 1  ;;  %v230_v31 = vld [vmem:[%s1838_s19 + $0x100] sm:$0x3] }
  0x1d   : > { %v318_v43 = vrot.slane %v316_v38, 1  ;;  %v323_v46 = vrot.slane %v321_v39, 1  ;;  %v333_v51 = vshll.u32 %v259_v41, 16  ;;  %v1891_v54 = vpack.c.bf16 %v211_v53, %v210_v52  ;;  %v233_v42 = vld [vmem:[%s1838_s19 + $0x118] sm:$0x3] }
  0x1e   : > { %694 = vrot.lane.b32.xlu0 %v1871_v28, %s1792_s22  ;;  %628 = vrot.lane.b32.xlu1 %v516_v32, %s1790_s20  ;;  %v300_v48 = vsel %vm288_vm1, %v295_v40, %v299_v36  ;;  %v1895_v56 = vsel %vm288_vm1, %v307_v44, %v311_v45  ;;  %v331_v58 = vor.u32 %v330_v50, %v326_v47  ;;  %v523_v2 = vrot.slane %v1843_v3, 1  ;;  %v231_v36 = vld [vmem:[%s1838_s19 + $0x108] sm:$0xff] }
  0x1f   : > { %v319_v49 = vor.u32 %v318_v43, %v314_v37  ;;  %v335_v59 = vrot.slane %v333_v51, 1  ;;  %v261_v60 = vpack.c.bf16 %v212_v55, %v212_v55  ;;  %v340_v62 = vshll.u32 %v1891_v54, 16  ;;  %v232_v37 = vld [vmem:[%s1838_s19 + $0x110] sm:$0xff] }
  0x20   : > { %v524_v4 = vrot.slane %v259_v41, 1  ;;  %v1914_v10 = vpack.c.bf16 %v223_v63, %v222_v61  ;;  %v1916_v11 = vpack.c.bf16 %v224_v0, %v224_v0  ;;  %v338_v12 = vshrl.u32 %v1891_v54, 16  ;;  %v234_v0 = vld [vmem:[%s1838_s19 + $0x120] sm:$0xff] }
  0x21   : > { %v1898_v57 = vsel %vm288_vm1, %v319_v49, %v323_v46  ;;  %v1909_v1 = vsel %vm288_vm1, %v331_v58, %v335_v59  ;;  %v345_v5 = vshll.u32 %v261_v60, 16  ;;  %v342_v13 = vrot.slane %v340_v62, 1  ;;  %v216_v58 = vld [vmem:[%s1838_s19 + $0x90] sm:$0xff]  ;;  %v218_v59 = vld [vmem:[%s1838_s19 + $0xa0] sm:$0x3] }
  0x22   : > { %630 = vrot.lane.b32.xlu1 %v519_v27, %s1790_s20  ;;  %596 = vrot.lane.b32.xlu0 %v300_v48, %s1792_s22  ;;  %v1926_v16 = vsel %vm513_vm0, %v523_v2, %v524_v4  ;;  %v526_v17 = vrot.slane %v1891_v54, 1  ;;  %v527_v19 = vrot.slane %v261_v60, 1  ;;  %v1930_v21 = vpack.c.bf16 %v214_v9, %v213_v6  ;;  %v235_v2 = vld [vmem:[%s1838_s19 + $0x128] sm:$0xff] }
  0x23   : > { %v386_v23 = vshrl.u32 %v1914_v10, 16  ;;  %v388_v24 = vshll.u32 %v1914_v10, 16  ;;  %v393_v25 = vshll.u32 %v1916_v11, 16  ;;  %v347_v26 = vrot.slane %v345_v5, 1 }
  0x24   : > { %v1936_v27 = vpack.c.bf16 %v226_v15, %v225_v14  ;;  %v343_v32 = vor.u32 %v342_v13, %v338_v12  ;;  %v1945_v35 = vpack.c.bf16 %v227_v20, %v227_v20  ;;  %v1950_v38 = vsel %vm513_vm0, %v526_v17, %v527_v19  ;;  %v236_v12 = vld [vmem:[%s1838_s19 + $0x130] sm:$0x3]  ;;  %v217_v13 = vld [vmem:[%s1838_s19 + $0x98] sm:$0xff] }
  0x25   : > { %v390_v33 = vrot.slane %v388_v24, 1  ;;  %v395_v34 = vrot.slane %v393_v25, 1  ;;  %v1952_v39 = vpack.c.bf16 %v215_v22, %v215_v22  ;;  %v350_v43 = vshrl.u32 %v1930_v21, 16  ;;  %v237_v20 = vld [vmem:[%s1838_s19 + $0x138] sm:$0xff]  ;;  %v238_v22 = vld [vmem:[%s1838_s19 + $0x140] sm:$0xff] }
  0x26   : > { %598 = vrot.lane.b32.xlu1 %v1895_v56, %s1792_s22  ;;  %756 = vrot.lane.b32.xlu0 %v1898_v57, %s1791_s21  ;;  %v398_v40 = vshrl.u32 %v1936_v27, 16  ;;  %v400_v41 = vshll.u32 %v1936_v27, 16  ;;  %v352_v44 = vshll.u32 %v1930_v21, 16  ;;  %v405_v46 = vshll.u32 %v1945_v35, 16 }
  0x27   : > { %v391_v45 = vor.u32 %v390_v33, %v386_v23  ;;  %v1960_v48 = vpack.c.bf16 %v229_v30, %v228_v29  ;;  %v273_v49 = vpack.c.bf16 %v230_v31, %v230_v31  ;;  %v1962_v50 = vpack.c.bf16 %v232_v37, %v231_v36  ;;  %v239_v33 = vld [vmem:[%s1838_s19 + $0x148] sm:$0x3] }
  0x28   : > { %v402_v47 = vrot.slane %v400_v41, 1  ;;  %v1969_v51 = vsel %vm288_vm1, %v343_v32, %v347_v26  ;;  %v407_v53 = vrot.slane %v405_v46, 1  ;;  %v1974_v55 = vpack.c.bf16 %v233_v42, %v233_v42  ;;  %v240_v41 = vld [vmem:[%s1838_s19 + $0x150] sm:$0xff] }
  0x29   : > { %v1972_v52 = vsel %vm288_vm1, %v391_v45, %v395_v34  ;;  %v410_v61 = vshrl.u32 %v1960_v48, 16  ;;  %v412_v62 = vshll.u32 %v1960_v48, 16  ;;  %v417_v63 = vshll.u32 %v273_v49, 16 }
  0x2a   : > { %662 = vrot.lane.b32.xlu1 %v1848_v7, %s1791_s21  ;;  %758 = vrot.lane.b32.xlu0 %v1909_v1, %s1791_s21  ;;  %v403_v60 = vor.u32 %v402_v47, %v398_v40  ;;  %v544_v4 = vrot.slane %v1960_v48, 1  ;;  %v545_v5 = vrot.slane %v273_v49, 1  ;;  %v422_v6 = vshrl.u32 %v1962_v50, 16  ;;  %v241_v47 = vld [vmem:[%s1838_s19 + $0x158] sm:$0xff]  ;;  %v242_v49 = vld [vmem:[%s1838_s19 + $0x160] sm:$0x3] }
  0x2b   : > { %v424_v9 = vshll.u32 %v1962_v50, 16  ;;  %v414_v15 = vrot.slane %v412_v62, 1  ;;  %v419_v17 = vrot.slane %v417_v63, 1  ;;  %v429_v19 = vshll.u32 %v1974_v55, 16  ;;  %v244_v62 = vld [vmem:[%s1838_s19 + $0x170] sm:$0xff] }
  0x2c   : > { %v1988_v14 = vsel %vm288_vm1, %v403_v60, %v407_v53  ;;  %v354_v23 = vrot.slane %v352_v44, 1  ;;  %v357_v24 = vshll.u32 %v1952_v39, 16  ;;  %v1999_v25 = vsel %vm513_vm0, %v544_v4, %v545_v5  ;;  %v245_v5 = vld [vmem:[%s1838_s19 + $0x178] sm:$0x3] }
  0x2d   : > { %v426_v26 = vrot.slane %v424_v9, 1  ;;  %v415_v29 = vor.u32 %v414_v15, %v410_v61  ;;  %v431_v30 = vrot.slane %v429_v19, 1  ;;  %v2001_v31 = vpack.c.bf16 %v235_v2, %v234_v0  ;;  %1679 = vmatprep.subr.msk.bf16.mxu0 %vm788_vm2, %v1999_v25  ;;  %v243_v61 = vld [vmem:[%s1838_s19 + $0x168] sm:$0xff] }
  0x2e   : > { %600 = vrot.lane.b32.xlu1 %v1898_v57, %s1792_s22  ;;  %696 = vrot.lane.b32.xlu0 %v1926_v16, %s1792_s22  ;;  %v2003_v32 = vpack.c.bf16 %v236_v12, %v236_v12  ;;  %v2008_v34 = vpack.c.bf16 %v217_v13, %v216_v58  ;;  %v2010_v36 = vpack.c.bf16 %v218_v59, %v218_v59  ;;  %v359_v58 = vrot.slane %v357_v24, 1 }
  0x2f   : > { %v427_v37 = vor.u32 %v426_v26, %v422_v6  ;;  %v2012_v40 = vpack.c.bf16 %v238_v22, %v237_v20  ;;  %v2016_v42 = vsel %vm288_vm1, %v415_v29, %v419_v17  ;;  %v434_v44 = vshrl.u32 %v2001_v31, 16 }
  0x30   : > { %v436_v45 = vshll.u32 %v2001_v31, 16  ;;  %v441_v46 = vshll.u32 %v2003_v32, 16  ;;  %v355_v53 = vor.u32 %v354_v23, %v350_v43  ;;  %v2030_v60 = vpack.c.bf16 %v239_v33, %v239_v33 }
  0x31   : > { %v2028_v59 = vsel %vm288_vm1, %v427_v37, %v431_v30  ;;  %v446_v2 = vshrl.u32 %v2012_v40, 16  ;;  %v448_v4 = vshll.u32 %v2012_v40, 16  ;;  %v529_v6 = vrot.slane %v1930_v21, 1 }
  0x32   : > { %632 = vrot.lane.b32.xlu1 %v1871_v28, %s1790_s20  ;;  %728 = vrot.lane.b32.xlu0 %v1891_v54, %s1790_s20  ;;  %v438_v63 = vrot.slane %v436_v45, 1  ;;  %v443_v0 = vrot.slane %v441_v46, 1  ;;  %v530_v9 = vrot.slane %v1952_v39, 1  ;;  %v364_v43 = vshll.u32 %v2008_v34, 16  ;;  %v247_v45 = vld [vmem:[%s1838_s19 + $0x188] sm:$0xff] }
  0x33   : > { %v453_v12 = vshll.u32 %v2030_v60, 16  ;;  %v450_v15 = vrot.slane %v448_v4, 1  ;;  %v2041_v17 = vpack.c.bf16 %v241_v47, %v240_v41  ;;  %v2043_v19 = vpack.c.bf16 %v242_v49, %v242_v49 }
  0x34   : > { %v439_v13 = vor.u32 %v438_v63, %v434_v44  ;;  %v2050_v39 = vsel %vm288_vm1, %v355_v53, %v359_v58  ;;  %v2052_v22 = vpack.c.bf16 %v244_v62, %v243_v61  ;;  %v2054_v23 = vpack.c.bf16 %v245_v5, %v245_v5  ;;  %v246_v44 = vld [vmem:[%s1838_s19 + $0x180] sm:$0xff]  ;;  %v248_v58 = vld [vmem:[%s1838_s19 + $0x190] sm:$0x3] }
  0x35   : > { %v455_v20 = vrot.slane %v453_v12, 1  ;;  %v451_v26 = vor.u32 %v450_v15, %v446_v2  ;;  %v458_v29 = vshrl.u32 %v2041_v17, 16  ;;  %v460_v30 = vshll.u32 %v2041_v17, 16  ;;  %v220_v15 = vld [vmem:[%s1838_s19 + $0xb0] sm:$0xff] }
  0x36   : > { %664 = vrot.lane.b32.xlu1 %v1843_v3, %s1791_s21  ;;  %760 = vrot.lane.b32.xlu0 %v1969_v51, %s1791_s21  ;;  %v2057_v24 = vsel %vm288_vm1, %v439_v13, %v443_v0  ;;  %v362_v33 = vshrl.u32 %v2008_v34, 16  ;;  %v465_v37 = vshll.u32 %v2043_v19, 16  ;;  %v470_v41 = vshrl.u32 %v2052_v22, 16  ;;  %v219_v13 = vld [vmem:[%s1838_s19 + $0xa8] sm:$0xff] }
  0x37   : > { %v2067_v46 = vsel %vm288_vm1, %v451_v26, %v455_v20  ;;  %v462_v47 = vrot.slane %v460_v30, 1  ;;  %v472_v49 = vshll.u32 %v2052_v22, 16  ;;  %v477_v53 = vshll.u32 %v2054_v23, 16 }
  0x38   : > { %v2077_v61 = vsel %vm513_vm0, %v529_v6, %v530_v9  ;;  %v366_v62 = vrot.slane %v364_v43, 1  ;;  %v369_v63 = vshll.u32 %v2010_v36, 16  ;;  %v467_v0 = vrot.slane %v465_v37, 1 }
  0x39   : > { %v463_v2 = vor.u32 %v462_v47, %v458_v29  ;;  %v474_v4 = vrot.slane %v472_v49, 1  ;;  %v479_v5 = vrot.slane %v477_v53, 1  ;;  %v2080_v12 = vpack.c.bf16 %v247_v45, %v246_v44  ;;  %v221_v47 = vld [vmem:[%s1838_s19 + $0xb8] sm:$0x3] }
  0x3a   : > { %602 = vrot.lane.b32.xlu1 %v1909_v1, %s1792_s22  ;;  %698 = vrot.lane.b32.xlu0 %v1950_v38, %s1792_s22  ;;  %v2084_v20 = vpack.c.bf16 %v248_v58, %v248_v58  ;;  %v371_v29 = vrot.slane %v369_v63, 1  ;;  %v367_v37 = vor.u32 %v366_v62, %v362_v33  ;;  %v2096_v44 = vpack.c.bf16 %v220_v15, %v219_v13  ;;  %v249_v58 = vld [vmem:[%s1838_s19 + $0x198] sm:$0xff]  ;;  %v251_v15 = vld [vmem:[%s1838_s19 + $0x1a8] sm:$0x3] }
  0x3b   : > { %v2087_v26 = vsel %vm288_vm1, %v463_v2, %v467_v0  ;;  %v475_v6 = vor.u32 %v474_v4, %v470_v41  ;;  %v563_v9 = vshrl.u32 %v2080_v12, 16  ;;  %v565_v43 = vshll.u32 %v2080_v12, 16  ;;  %v250_v0 = vld [vmem:[%s1838_s19 + $0x1a0] sm:$0xff]  ;;  %s2554_s19 = scalar_lea.vmem %s2590_s3, %s1614_s17 }
  0x3c   : > { %v570_v30 = vshll.u32 %v2084_v20, 16  ;;  %v532_v33 = vrot.slane %v2008_v34, 1  ;;  %v533_v62 = vrot.slane %v2010_v36, 1  ;;  %v2110_v63 = vpack.c.bf16 %v250_v0, %v249_v58 }
  0x3d   : > { %v2099_v45 = vsel %vm288_vm1, %v475_v6, %v479_v5  ;;  %v567_v41 = vrot.slane %v565_v43, 1  ;;  %v2113_v2 = vsel %vm288_vm1, %v367_v37, %v371_v29  ;;  %v267_v4 = vpack.c.bf16 %v221_v47, %v221_v47 }
  0x3e   : > { %634 = vrot.lane.b32.xlu1 %v1926_v16, %s1790_s20  ;;  %730 = vrot.lane.b32.xlu0 %v1930_v21, %s1790_s20  ;;  %v572_v49 = vrot.slane %v570_v30, 1  ;;  %v376_v5 = vshll.u32 %v2096_v44, 16  ;;  %v2120_v6 = vpack.c.bf16 %v251_v15, %v251_v15  ;;  %v580_v36 = vshrl.u32 %v2110_v63, 16 }
  0x3f   : > { %v568_v53 = vor.u32 %v567_v41, %v563_v9  ;;  %v582_v9 = vshll.u32 %v2110_v63, 16  ;;  %v2130_v30 = vsel %vm513_vm0, %v532_v33, %v533_v62  ;;  %v374_v37 = vshrl.u32 %v2096_v44, 16 }
  0x40   : > { %v587_v29 = vshll.u32 %v2120_v6, 16  ;;  %v378_v41 = vrot.slane %v376_v5, 1  ;;  %v381_v47 = vshll.u32 %v267_v4, 16  ;;  %v535_v62 = vrot.slane %v2096_v44, 1 }
  0x41   : > { %v2117_v13 = vsel %vm288_vm1, %v568_v53, %v572_v49  ;;  %v584_v43 = vrot.slane %v582_v9, 1  ;;  %v536_v5 = vrot.slane %v267_v4, 1  ;;  %v538_v4 = vrot.slane %v1914_v10, 1 }
  0x42   : > { %666 = vrot.lane.b32.xlu1 %v1891_v54, %s1791_s21  ;;  %762 = vrot.lane.b32.xlu0 %v2050_v39, %s1791_s21  ;;  %v589_v53 = vrot.slane %v587_v29, 1  ;;  %v379_v0 = vor.u32 %v378_v41, %v374_v37  ;;  %v383_v15 = vrot.slane %v381_v47, 1  ;;  %v542_v29 = vrot.slane %v1945_v35, 1 }
  0x43   : > { %v585_v49 = vor.u32 %v584_v43, %v580_v36  ;;  %v2153_v9 = vsel %vm513_vm0, %v535_v62, %v536_v5  ;;  %v539_v36 = vrot.slane %v1916_v11, 1  ;;  %v541_v11 = vrot.slane %v1936_v27, 1 }
  0x44   : > { %v2145_v33 = vsel %vm288_vm1, %v379_v0, %v383_v15  ;;  %v547_v41 = vrot.slane %v1962_v50, 1  ;;  %v548_v47 = vrot.slane %v1974_v55, 1  ;;  %v1168_v62 = vsel %vm788_vm2, %v1871_v28, 0 }
  0x45   : > { %v2138_v58 = vsel %vm288_vm1, %v585_v49, %v589_v53  ;;  %v2170_v43 = vsel %vm513_vm0, %v538_v4, %v539_v36  ;;  %v2187_v37 = vsel %vm513_vm0, %v541_v11, %v542_v29  ;;  %1624 = vmatpush3.bf16.xpose.msra.mxu0 %v1168_v62  ;;  %v550_v4 = vrot.slane %v2001_v31, 1 }
  0x46   : > { %604 = vrot.lane.b32.xlu1 %v1969_v51, %s1792_s22  ;;  %700 = vrot.lane.b32.xlu0 %v2077_v61, %s1792_s22  ;;  %v549_v53 = vsel %vm513_vm0, %v547_v41, %v548_v47  ;;  %v551_v28 = vrot.slane %v2003_v32, 1 }
  0x47   : > { %1680 = vmatprep.subr.msk.bf16.mxu0 %vm788_vm2, %v549_v53 }
  0x48   : > { %v552_v32 = vsel %vm513_vm0, %v550_v4, %v551_v28  ;;  %v553_v4 = vrot.slane %v2012_v40, 1 }
  0x4a   : > { %636 = vrot.lane.b32.xlu1 %v1950_v38, %s1790_s20  ;;  %732 = vrot.lane.b32.xlu0 %v2008_v34, %s1790_s20 }
  0x4e   : > { %668 = vrot.lane.b32.xlu1 %v1930_v21, %s1791_s21  ;;  %764 = vrot.lane.b32.xlu0 %v2113_v2, %s1791_s21 }
  0x52   : > { %606 = vrot.lane.b32.xlu1 %v2050_v39, %s1792_s22  ;;  %702 = vrot.lane.b32.xlu0 %v2130_v30, %s1792_s22 }
  0x56   : > { %638 = vrot.lane.b32.xlu1 %v2077_v61, %s1790_s20  ;;  %734 = vrot.lane.b32.xlu0 %v2096_v44, %s1790_s20 }
  0x5a   : > { %670 = vrot.lane.b32.xlu1 %v2008_v34, %s1791_s21  ;;  %766 = vrot.lane.b32.xlu0 %v2145_v33, %s1791_s21 }
  0x5e   : > { %608 = vrot.lane.b32.xlu1 %v2113_v2, %s1792_s22  ;;  %704 = vrot.lane.b32.xlu0 %v2153_v9, %s1792_s22 }
  0x62   : > { %640 = vrot.lane.b32.xlu1 %v2130_v30, %s1790_s20  ;;  %736 = vrot.lane.b32.xlu0 %v1914_v10, %s1790_s20 }
  0x66   : > { %672 = vrot.lane.b32.xlu1 %v2096_v44, %s1791_s21  ;;  %768 = vrot.lane.b32.xlu0 %v1972_v52, %s1791_s21 }
  0x6a   : > { %610 = vrot.lane.b32.xlu1 %v2145_v33, %s1792_s22  ;;  %706 = vrot.lane.b32.xlu0 %v2170_v43, %s1792_s22 }
  0x6e   : > { %642 = vrot.lane.b32.xlu1 %v2153_v9, %s1790_s20  ;;  %738 = vrot.lane.b32.xlu0 %v1936_v27, %s1790_s20 }
  0x72   : > { %674 = vrot.lane.b32.xlu1 %v1914_v10, %s1791_s21  ;;  %770 = vrot.lane.b32.xlu0 %v1988_v14, %s1791_s21 }
  0x76   : > { %612 = vrot.lane.b32.xlu1 %v1972_v52, %s1792_s22  ;;  %708 = vrot.lane.b32.xlu0 %v2187_v37, %s1792_s22 }
  0x7a   : > { %644 = vrot.lane.b32.xlu1 %v2170_v43, %s1790_s20  ;;  %740 = vrot.lane.b32.xlu0 %v1960_v48, %s1790_s20 }
  0x7e   : > { %676 = vrot.lane.b32.xlu1 %v1936_v27, %s1791_s21  ;;  %772 = vrot.lane.b32.xlu0 %v2016_v42, %s1791_s21 }
  0x82   : > { %614 = vrot.lane.b32.xlu1 %v1988_v14, %s1792_s22  ;;  %710 = vrot.lane.b32.xlu0 %v1999_v25, %s1792_s22 }
  0x86   : > { %646 = vrot.lane.b32.xlu1 %v2187_v37, %s1790_s20  ;;  %742 = vrot.lane.b32.xlu0 %v1962_v50, %s1790_s20 }
  0x87   : > { %v727_v35 = vpop.permute.xlu0 %726 }
  0x88   : > { %v725_v49 = vpop.permute.xlu1 %724 }
  0x8a   : > { %678 = vrot.lane.b32.xlu1 %v1960_v48, %s1791_s21  ;;  %774 = vrot.lane.b32.xlu0 %v2028_v59, %s1791_s21 }
  0x8c   : > { %v661_v0 = vpop.permute.xlu1 %660  ;;  %v693_v15 = vpop.permute.xlu0 %692 }
  0x8d   : > { %v905_v29 = vsel %vm788_vm2, %v1895_v56, %v693_v15 }
  0x8e   : > { %616 = vrot.lane.b32.xlu1 %v2016_v42, %s1792_s22  ;;  %712 = vrot.lane.b32.xlu0 %v549_v53, %s1792_s22  ;;  %v952_v56 = vsel %vm821_vm3, %v905_v29, %v725_v49  ;;  %v554_v49 = vrot.slane %v2030_v60, 1 }
  0x90   : > { %v695_v55 = vpop.permute.xlu0 %694  ;;  %v629_v5 = vpop.permute.xlu1 %628  ;;  %v555_v60 = vsel %vm513_vm0, %v553_v4, %v554_v49  ;;  %v560_v49 = vrot.slane %v2054_v23, 1 }
  0x91   : > { %v908_v15 = vsel %vm788_vm2, %v1898_v57, %v695_v55  ;;  %v1174_v55 = vsel %vm788_vm2, %v1950_v38, 0 }
  0x92   : > { %648 = vrot.lane.b32.xlu1 %v1999_v25, %s1790_s20  ;;  %744 = vrot.lane.b32.xlu0 %v2001_v31, %s1790_s20  ;;  %v1171_v25 = vsel %vm788_vm2, %v1926_v16, 0  ;;  %v954_v29 = vsel %vm821_vm3, %v908_v15, %v727_v35 }
  0x93   : > { %1626 = vmatpush3.bf16.xpose.msra.mxu0 %v1171_v25 }
  0x94   : > { %v631_v36 = vpop.permute.xlu1 %630  ;;  %v597_v11 = vpop.permute.xlu0 %596  ;;  %1681 = vmatprep.subr.msk.bf16.mxu0 %vm788_vm2, %v552_v32 }
  0x95   : > { %v790_v41 = vsel %vm788_vm2, %v1863_v18, %v597_v11 }
  0x96   : > { %680 = vrot.lane.b32.xlu1 %v1962_v50, %s1791_s21  ;;  %776 = vrot.lane.b32.xlu0 %v2057_v24, %s1791_s21  ;;  %v823_v18 = vsel %vm821_vm3, %v790_v41, %v629_v5 }
  0x97   : > { %v856_v16 = vsel %vm854_vm4, %v823_v18, %v661_v0 }
  0x98   : > { %v599_v47 = vpop.permute.xlu1 %598  ;;  %v757_v62 = vpop.permute.xlu0 %756 }
  0x99   : > { %v984_v11 = vsel %vm854_vm4, %v952_v56, %v757_v62  ;;  %v792_v0 = vsel %vm788_vm2, %v1850_v8, %v599_v47  ;;  %v556_v8 = vrot.slane %v2041_v17, 1  ;;  %v1177_v56 = vsel %vm788_vm2, %v2077_v61, 0 }
  0x9a   : > { %618 = vrot.lane.b32.xlu1 %v2028_v59, %s1792_s22  ;;  %714 = vrot.lane.b32.xlu0 %v552_v32, %s1792_s22  ;;  %v825_v38 = vsel %vm821_vm3, %v792_v0, %v631_v36  ;;  %v576_v0 = vrot.slane %v2080_v12, 1 }
  0x9b   : > { %1215 = vmatprep.subr.bf16.mxu1 %v984_v11  ;;  %1628 = vmatpush3.bf16.xpose.msra.mxu0 %v1174_v55 }
  0x9c   : > { %1216 = vmatpush1.bf16.xpose.msra.mxu1 %v856_v16  ;;  %v663_v5 = vpop.permute.xlu1 %662  ;;  %v759_v28 = vpop.permute.xlu0 %758  ;;  %1682 = vmatprep.subr.msk.bf16.mxu0 %vm788_vm2, %v555_v60 }
  0x9d   : > { %v987_v57 = vsel %vm854_vm4, %v954_v29, %v759_v28  ;;  %v859_v35 = vsel %vm854_vm4, %v825_v38, %v663_v5 }
  0x9e   : > { %650 = vrot.lane.b32.xlu1 %v549_v53, %s1790_s20  ;;  %746 = vrot.lane.b32.xlu0 %v2012_v40, %s1790_s20  ;;  %v557_v53 = vrot.slane %v2043_v19, 1 }
  0x9f   : > { %1217 = vmatprep.subr.bf16.mxu1 %v987_v57 }
  0xa0   : > { %v601_v41 = vpop.permute.xlu1 %600  ;;  %v697_v25 = vpop.permute.xlu0 %696  ;;  %v2280_v15 = vsel %vm513_vm0, %v556_v8, %v557_v53 }
  0xa1   : > { %v794_v36 = vsel %vm788_vm2, %v1848_v7, %v601_v41  ;;  %v911_v18 = vsel %vm788_vm2, %v1909_v1, %v697_v25  ;;  %v559_v1 = vrot.slane %v2052_v22, 1  ;;  %v577_v41 = vrot.slane %v2084_v20, 1 }
  0xa2   : > { %682 = vrot.lane.b32.xlu1 %v2001_v31, %s1791_s21  ;;  %778 = vrot.lane.b32.xlu0 %v2067_v46, %s1791_s21 }
  0xa3   : > { %1630 = vmatpush3.bf16.xpose.msra.mxu0 %v1177_v56  ;;  %v2300_v29 = vsel %vm513_vm0, %v559_v1, %v560_v49  ;;  %v1186_v56 = vsel %vm788_vm2, %v2170_v43, 0 }
  0xa4   : > { %1218 = vmatpush1.bf16.xpose.msra.mxu1 %v859_v35  ;;  %v633_v47 = vpop.permute.xlu1 %632  ;;  %v729_v62 = vpop.permute.xlu0 %728  ;;  %1683 = vmatprep.subr.msk.bf16.mxu0 %vm788_vm2, %v2280_v15 }
  0xa5   : > { %v827_v19 = vsel %vm821_vm3, %v794_v36, %v633_v47  ;;  %v956_v11 = vsel %vm821_vm3, %v911_v18, %v729_v62 }
  0xa6   : > { %620 = vrot.lane.b32.xlu1 %v2057_v24, %s1792_s22  ;;  %716 = vrot.lane.b32.xlu0 %v555_v60, %s1792_s22 }
  0xa8   : > { %v665_v61 = vpop.permute.xlu1 %664  ;;  %v761_v16 = vpop.permute.xlu0 %760 }
  0xa9   : > { %v990_v4 = vsel %vm854_vm4, %v956_v11, %v761_v16  ;;  %v862_v7 = vsel %vm854_vm4, %v827_v19, %v665_v61 }
  0xaa   : > { %652 = vrot.lane.b32.xlu1 %v552_v32, %s1790_s20  ;;  %748 = vrot.lane.b32.xlu0 %v2041_v17, %s1790_s20  ;;  %v1180_v32 = vsel %vm788_vm2, %v2130_v30, 0 }
  0xab   : > { %1219 = vmatprep.subr.bf16.mxu1 %v990_v4  ;;  %1632 = vmatpush3.bf16.xpose.msra.mxu0 %v1180_v32 }
  0xac   : > { %1220 = vmatpush1.bf16.xpose.msra.mxu1 %v862_v7  ;;  %v603_v5 = vpop.permute.xlu1 %602  ;;  %v699_v28 = vpop.permute.xlu0 %698  ;;  %1684 = vmatprep.subr.msk.bf16.mxu0 %vm788_vm2, %v2300_v29 }
  0xad   : > { %v796_v23 = vsel %vm788_vm2, %v1843_v3, %v603_v5  ;;  %v914_v30 = vsel %vm788_vm2, %v1969_v51, %v699_v28  ;;  %v1183_v3 = vsel %vm788_vm2, %v2153_v9, 0  ;;  %v578_v51 = vsel %vm513_vm0, %v576_v0, %v577_v41  ;;  %v1721_v5 = vld [vmem:[%s2588_s1 + $0x4] ss:$12 sps:$4 sm:$0xff]  }
  0xae   : > { %684 = vrot.lane.b32.xlu1 %v2012_v40, %s1791_s21  ;;  %780 = vrot.lane.b32.xlu0 %v2087_v26, %s1791_s21 }
  0xaf   : > { %1247 = vmatprep.mubr.bf16.mxu1 %v1721_v5  ;;  %v1052_v5 = vld [vmem:[%s2589_s2 + $0x28] sm:$0xff] }
  0xb0   : > { %v635_v57 = vpop.permute.xlu1 %634  ;;  %v731_v55 = vpop.permute.xlu0 %730 }
  0xb1   : > { %v829_v25 = vsel %vm821_vm3, %v796_v23, %v635_v57  ;;  %v958_v38 = vsel %vm821_vm3, %v914_v30, %v731_v55 }
  0xb2   : > { %622 = vrot.lane.b32.xlu1 %v2067_v46, %s1792_s22  ;;  %718 = vrot.lane.b32.xlu0 %v2280_v15, %s1792_s22 }
  0xb3   : > { %1634 = vmatpush3.bf16.xpose.msra.mxu0 %v1183_v3 }
  0xb4   : > { %v667_v35 = vpop.permute.xlu1 %666  ;;  %v763_v8 = vpop.permute.xlu0 %762  ;;  %1685 = vmatprep.subr.msk.bf16.mxu0 %vm788_vm2, %v578_v51 }
  0xb5   : > { %v993_v53 = vsel %vm854_vm4, %v958_v38, %v763_v8  ;;  %v865_v47 = vsel %vm854_vm4, %v829_v25, %v667_v35  ;;  %v1726_v35 = vld [vmem:[%s2588_s1 + $0x38] ss:$12 sps:$4 sm:$0xff]  }
  0xb6   : > { %654 = vrot.lane.b32.xlu1 %v555_v60, %s1790_s20  ;;  %750 = vrot.lane.b32.xlu0 %v2052_v22, %s1790_s20 }
  0xb7   : > { %1221 = vmatprep.subr.bf16.mxu1 %v993_v53 }
  0xb8   : > { %1222 = vmatpush1.bf16.xpose.msra.mxu1 %v865_v47  ;;  %v605_v20 = vpop.permute.xlu1 %604  ;;  %v701_v62 = vpop.permute.xlu0 %700 }
  0xb9   : > { %v798_v36 = vsel %vm788_vm2, %v1891_v54, %v605_v20  ;;  %v917_v18 = vsel %vm788_vm2, %v2050_v39, %v701_v62  ;;  %v593_v54 = vrot.slane %v2110_v63, 1  ;;  %v594_v39 = vrot.slane %v2120_v6, 1  ;;  %v1718_v6 = vld [vmem:[%s2588_s1 + $0x8] ss:$12 sps:$4 sm:$0xff]  }
  0xba   : > { %686 = vrot.lane.b32.xlu1 %v2041_v17, %s1791_s21  ;;  %782 = vrot.lane.b32.xlu0 %v2099_v45, %s1791_s21 }
  0xbb   : > { %1636 = vmatpush3.bf16.xpose.msra.mxu0 %v1186_v56  ;;  %v595_v49 = vsel %vm513_vm0, %v593_v54, %v594_v39  ;;  %1639 = vmatprep.mubr.msk.bf16.mxu0 %vm788_vm2, %v1718_v6  ;;  %v1793_v39 = vmov 0  }
  0xbc   : > { %v637_v9 = vpop.permute.xlu1 %636  ;;  %v733_v60 = vpop.permute.xlu0 %732  ;;  %1686 = vmatprep.subr.msk.bf16.mxu0 %vm788_vm2, %v595_v49  ;;  %1716 = vset.pattern.permute.xlu0 %v1793_v39 }
  0xbd   : > { %v831_v19 = vsel %vm821_vm3, %v798_v36, %v637_v9  ;;  %v960_v11 = vsel %vm821_vm3, %v917_v18, %v733_v60  ;;  %1717 = vset.pattern.permute.xlu1 %v1793_v39 }
  0xbe   : > { %624 = vrot.lane.b32.xlu1 %v2087_v26, %s1792_s22  ;;  %720 = vrot.lane.b32.xlu0 %v2300_v29, %s1792_s22 }
  0xc0   : > { %v669_v61 = vpop.permute.xlu1 %668  ;;  %v765_v16 = vpop.permute.xlu0 %764 }
  0xc1   : > { %v996_v43 = vsel %vm854_vm4, %v960_v11, %v765_v16  ;;  %v868_v4 = vsel %vm854_vm4, %v831_v19, %v669_v61 }
  0xc2   : > { %656 = vrot.lane.b32.xlu1 %v2280_v15, %s1790_s20  ;;  %752 = vrot.lane.b32.xlu0 %v2080_v12, %s1790_s20  ;;  %v1189_v15 = vsel %vm788_vm2, %v2187_v37, 0 }
  0xc3   : > { %1223 = vmatprep.subr.bf16.mxu1 %v996_v43  ;;  %1638 = vmatpush3.bf16.xpose.msra.mxu0 %v1189_v15 }
  0xc4   : > { %1224 = vmatpush1.bf16.xpose.msra.mxu1 %v868_v4  ;;  %v607_v7 = vpop.permute.xlu1 %606  ;;  %v703_v1 = vpop.permute.xlu0 %702  ;;  %v1047_v4 = vld [vmem:[%s2589_s2] sm:$0xff] }
  0xc5   : > { %v800_v37 = vsel %vm788_vm2, %v1930_v21, %v607_v7  ;;  %v920_v57 = vsel %vm788_vm2, %v2113_v2, %v703_v1  ;;  %v1722_v21 = vld [vmem:[%s2588_s1 + $0x20] ss:$12 sps:$4 sm:$0xff]   ;;  %v1049_v7 = vld [vmem:[%s2589_s2 + $0x10] sm:$0xff]  ;;  %v1050_v1 = vld [vmem:[%s2589_s2 + $0x18] sm:$0xff] }
  0xc6   : > { %688 = vrot.lane.b32.xlu1 %v2052_v22, %s1791_s21  ;;  %784 = vrot.lane.b32.xlu0 %v2117_v13, %s1791_s21 }
  0xc8   : > { %v639_v28 = vpop.permute.xlu1 %638  ;;  %v735_v32 = vpop.permute.xlu0 %734 }
  0xc9   : > { %v833_v55 = vsel %vm821_vm3, %v800_v37, %v639_v28  ;;  %v962_v23 = vsel %vm821_vm3, %v920_v57, %v735_v32 }
  0xca   : > { %626 = vrot.lane.b32.xlu1 %v2099_v45, %s1792_s22  ;;  %722 = vrot.lane.b32.xlu0 %v578_v51, %s1792_s22 }
  0xcb   : > { %1640 = vmatmul.mubr.msk.bf16.vlgmr.msra.gmra.mrb[0].mxu0 %vm788_vm2, %v1718_v6  ;;  %v1051_v6 = vld [vmem:[%s2589_s2 + $0x20] sm:$0xff] }
  0xcc   : > { %v671_v30 = vpop.permute.xlu1 %670  ;;  %v767_v0 = vpop.permute.xlu0 %766  ;;  %1641 = vmatprep.mubr.msk.bf16.mxu0 %vm788_vm2, %v1722_v21 }
  0xcd   : > { %v999_v41 = vsel %vm854_vm4, %v962_v23, %v767_v0  ;;  %v871_v25 = vsel %vm854_vm4, %v833_v55, %v671_v30 }
  0xce   : > { %658 = vrot.lane.b32.xlu1 %v2300_v29, %s1790_s20  ;;  %754 = vrot.lane.b32.xlu0 %v2110_v63, %s1790_s20 }
  0xcf   : > { %1225 = vmatprep.subr.bf16.mxu1 %v999_v41 }
  0xd0   : > { %1226 = vmatpush1.bf16.xpose.msra.mxu1 %v871_v25  ;;  %v609_v2 = vpop.permute.xlu1 %608  ;;  %v705_v38 = vpop.permute.xlu0 %704 }
  0xd1   : > { %v802_v8 = vsel %vm788_vm2, %v2008_v34, %v609_v2  ;;  %v923_v53 = vsel %vm788_vm2, %v2145_v33, %v705_v38  ;;  %v1730_v33 = vld [vmem:[%s2588_s1 + $0x50] ss:$12 sps:$4 sm:$0xff]  }
  0xd2   : > { %690 = vrot.lane.b32.xlu1 %v2080_v12, %s1791_s21  ;;  %786 = vrot.lane.b32.xlu0 %v2138_v58, %s1791_s21 }
  0xd3   : > { %1642 = vmatmul.mubr.msk.bf16.gmra.mrb[4].mxu0 %vm788_vm2, %v1722_v21 }
  0xd4   : > { %v641_v29 = vpop.permute.xlu1 %640  ;;  %v737_v63 = vpop.permute.xlu0 %736  ;;  %1643 = vmatprep.mubr.msk.bf16.mxu0 %vm788_vm2, %v1726_v35 }
  0xd5   : > { %v835_v47 = vsel %vm821_vm3, %v802_v8, %v641_v29  ;;  %v964_v12 = vsel %vm821_vm3, %v923_v53, %v737_v63 }
  0xd6   : > { %1057 = vperm.xlu0 %1716, %v1047_v4  }
  0xd8   : > { %v673_v3 = vpop.permute.xlu1 %672  ;;  %v769_v58 = vpop.permute.xlu0 %768 }
  0xd9   : > { %v1002_v51 = vsel %vm854_vm4, %v964_v12, %v769_v58  ;;  %v874_v20 = vsel %vm854_vm4, %v835_v47, %v673_v3 }
  0xda   : > { %1227 = vmatprep.subr.bf16.mxu1 %v1002_v51  ;;  %1072 = vperm.xlu0 %1716, %v1050_v1  }
  0xdb   : > { %1228 = vmatpush1.bf16.xpose.msra.mxu1 %v874_v20  ;;  %1644 = vmatmul.mubr.msk.bf16.gmra.mrb[8].mxu0 %vm788_vm2, %v1726_v35 }
  0xdc   : > { %v611_v34 = vpop.permute.xlu1 %610  ;;  %v707_v62 = vpop.permute.xlu0 %706  ;;  %1645 = vmatprep.mubr.msk.bf16.mxu0 %vm788_vm2, %v1730_v33 }
  0xdd   : > { %v804_v56 = vsel %vm788_vm2, %v2096_v44, %v611_v34  ;;  %v926_v36 = vsel %vm788_vm2, %v1972_v52, %v707_v62  ;;  %v1048_v44 = vld [vmem:[%s2589_s2 + $0x8] sm:$0xff] }
  0xde   : > { %1062 = vperm.xlu1 %1717, %v1048_v44   ;;  %1082 = vperm.xlu0 %1716, %v1052_v5  }
  0xe0   : > { %v643_v9 = vpop.permute.xlu1 %642  ;;  %v739_v60 = vpop.permute.xlu0 %738 }
  0xe1   : > { %v837_v18 = vsel %vm821_vm3, %v804_v56, %v643_v9  ;;  %v966_v19 = vsel %vm821_vm3, %v926_v36, %v739_v60 }
  0xe2   : > { %1067 = vperm.xlu1 %1717, %v1049_v7  }
  0xe3   : > { %1646 = vmatmul.mubr.msk.bf16.gmra.mrb[12].mxu0 %vm788_vm2, %v1730_v33 }
  0xe4   : > { %v675_v11 = vpop.permute.xlu1 %674  ;;  %v771_v61 = vpop.permute.xlu0 %770 }
  0xe5   : > { %v1005_v16 = vsel %vm854_vm4, %v966_v19, %v771_v61  ;;  %v877_v43 = vsel %vm854_vm4, %v837_v18, %v675_v11 }
  0xe6   : > { %1229 = vmatprep.subr.bf16.mxu1 %v1005_v16  ;;  %1077 = vperm.xlu1 %1717, %v1051_v6  }
  0xe7   : > { %1230 = vmatpush1.bf16.xpose.msra.mxu1 %v877_v43 }
  0xe8   : > { %v613_v52 = vpop.permute.xlu1 %612  ;;  %v709_v54 = vpop.permute.xlu0 %708 }
  0xe9   : > { %v806_v28 = vsel %vm788_vm2, %v1914_v10, %v613_v52  ;;  %v929_v32 = vsel %vm788_vm2, %v1988_v14, %v709_v54  ;;  %v1053_v10 = vld [vmem:[%s2589_s2 + $0x30] sm:$0xff]  ;;  %v1054_v14 = vld [vmem:[%s2589_s2 + $0x38] sm:$0xff] }
  0xea   : > { %1087 = vperm.xlu1 %1717, %v1053_v10   ;;  %1092 = vperm.xlu0 %1716, %v1054_v14  }
  0xec   : > { %v645_v49 = vpop.permute.xlu1 %644  ;;  %v741_v15 = vpop.permute.xlu0 %740 }
  0xed   : > { %v839_v37 = vsel %vm821_vm3, %v806_v28, %v645_v49  ;;  %v968_v57 = vsel %vm821_vm3, %v929_v32, %v741_v15 }
  0xf0   : > { %v677_v55 = vpop.permute.xlu1 %676  ;;  %v773_v23 = vpop.permute.xlu0 %772 }
  0xf1   : > { %v1008_v30 = vsel %vm854_vm4, %v968_v57, %v773_v23  ;;  %v880_v0 = vsel %vm854_vm4, %v839_v37, %v677_v55 }
  0xf2   : > { %1231 = vmatprep.subr.bf16.mxu1 %v1008_v30 }
  0xf3   : > { %1232 = vmatpush1.bf16.xpose.msra.mxu1 %v880_v0 }
  0xf4   : > { %v615_v41 = vpop.permute.xlu1 %614  ;;  %v711_v25 = vpop.permute.xlu0 %710 }
  0xf5   : > { %v808_v38 = vsel %vm788_vm2, %v1936_v27, %v615_v41  ;;  %v932_v29 = vsel %vm788_vm2, %v2016_v42, %v711_v25 }
  0xf8   : > { %v647_v21 = vpop.permute.xlu1 %646  ;;  %v743_v2 = vpop.permute.xlu0 %742 }
  0xf9   : > { %v841_v63 = vsel %vm821_vm3, %v808_v38, %v647_v21  ;;  %v970_v35 = vsel %vm821_vm3, %v932_v29, %v743_v2 }
  0xfc   : > { %v679_v8 = vpop.permute.xlu1 %678  ;;  %v775_v53 = vpop.permute.xlu0 %774 }
  0xfd   : > { %v1011_v47 = vsel %vm854_vm4, %v970_v35, %v775_v53  ;;  %v883_v12 = vsel %vm854_vm4, %v841_v63, %v679_v8 }
  0xfe   : > { %1233 = vmatprep.subr.bf16.mxu1 %v1011_v47 }
  0xff   : > { %1234 = vmatpush1.bf16.xpose.msra.mxu1 %v883_v12 }
 0x100   : > { %v617_v3 = vpop.permute.xlu1 %616  ;;  %v713_v58 = vpop.permute.xlu0 %712 }
 0x101   : > { %v810_v27 = vsel %vm788_vm2, %v1960_v48, %v617_v3  ;;  %v935_v42 = vsel %vm788_vm2, %v2028_v59, %v713_v58 }
 0x104   : > { %v649_v51 = vpop.permute.xlu1 %648  ;;  %v745_v20 = vpop.permute.xlu0 %744 }
 0x105   : > { %v843_v34 = vsel %vm821_vm3, %v810_v27, %v649_v51  ;;  %v972_v62 = vsel %vm821_vm3, %v935_v42, %v745_v20 }
 0x108   : > { %v681_v33 = vpop.permute.xlu1 %680  ;;  %v777_v9 = vpop.permute.xlu0 %776 }
 0x109   : > { %v1014_v60 = vsel %vm854_vm4, %v972_v62, %v777_v9  ;;  %v886_v56 = vsel %vm854_vm4, %v843_v34, %v681_v33 }
 0x10a   : > { %1235 = vmatprep.subr.bf16.mxu1 %v1014_v60  ;;  %v1719_v60 = vld [vmem:[%s2588_s1] ss:$12 sps:$4 sm:$0xff]  }
 0x10b   : > { %1236 = vmatpush1.bf16.xpose.msra.mxu1 %v886_v56  ;;  %v1727_v56 = vld [vmem:[%s2588_s1 + $0x34] ss:$12 sps:$4 sm:$0xff]  }
 0x10c   : > { %v619_v36 = vpop.permute.xlu1 %618  ;;  %v715_v18 = vpop.permute.xlu0 %714 }
 0x10d   : > { %v812_v48 = vsel %vm788_vm2, %v1962_v50, %v619_v36  ;;  %v938_v59 = vsel %vm788_vm2, %v2057_v24, %v715_v18  ;;  %v1729_v36 = vld [vmem:[%s2588_s1 + $0x30] ss:$12 sps:$4 sm:$0xff]   ;;  %v1731_v18 = vld [vmem:[%s2588_s1 + $0x4c] ss:$12 sps:$4 sm:$0xff]  }
 0x110   : > { %v651_v19 = vpop.permute.xlu1 %650  ;;  %v747_v11 = vpop.permute.xlu0 %746 }
 0x111   : > { %v845_v61 = vsel %vm821_vm3, %v812_v48, %v651_v19  ;;  %v974_v16 = vsel %vm821_vm3, %v938_v59, %v747_v11  ;;  %v1733_v19 = vld [vmem:[%s2588_s1 + $0x48] ss:$12 sps:$4 sm:$0xff]  }
 0x114   : > { %v683_v43 = vpop.permute.xlu1 %682  ;;  %v779_v4 = vpop.permute.xlu0 %778 }
 0x115   : > { %v1017_v44 = vsel %vm854_vm4, %v974_v16, %v779_v4  ;;  %v889_v52 = vsel %vm854_vm4, %v845_v61, %v683_v43 }
 0x116   : > { %1237 = vmatprep.subr.bf16.mxu1 %v1017_v44 }
 0x117   : > { %1238 = vmatpush1.bf16.xpose.msra.mxu1 %v889_v52 }
 0x118   : > { %v621_v54 = vpop.permute.xlu1 %620  ;;  %v717_v39 = vpop.permute.xlu0 %716 }
 0x119   : > { %v814_v50 = vsel %vm788_vm2, %v2001_v31, %v621_v54  ;;  %v941_v24 = vsel %vm788_vm2, %v2067_v46, %v717_v39 }
 0x11c   : > { %v653_v7 = vpop.permute.xlu1 %652  ;;  %v749_v1 = vpop.permute.xlu0 %748 }
 0x11d   : > { %v847_v49 = vsel %vm821_vm3, %v814_v50, %v653_v7  ;;  %v976_v15 = vsel %vm821_vm3, %v941_v24, %v749_v1 }
 0x120   : > { %v685_v6 = vpop.permute.xlu1 %684  ;;  %v781_v5 = vpop.permute.xlu0 %780 }
 0x121   : > { %v1020_v28 = vsel %vm854_vm4, %v976_v15, %v781_v5  ;;  %v892_v32 = vsel %vm854_vm4, %v847_v49, %v685_v6 }
 0x122   : > { %1239 = vmatprep.subr.bf16.mxu1 %v1020_v28 }
 0x123   : > { %1240 = vmatpush1.bf16.xpose.msra.mxu1 %v892_v32 }
 0x124   : > { %v623_v37 = vpop.permute.xlu1 %622  ;;  %v719_v57 = vpop.permute.xlu0 %718 }
 0x125   : > { %v816_v31 = vsel %vm788_vm2, %v2012_v40, %v623_v37  ;;  %v944_v46 = vsel %vm788_vm2, %v2087_v26, %v719_v57 }
 0x128   : > { %v655_v55 = vpop.permute.xlu1 %654  ;;  %v751_v23 = vpop.permute.xlu0 %750 }
 0x129   : > { %v849_v30 = vsel %vm821_vm3, %v816_v31, %v655_v55  ;;  %v978_v0 = vsel %vm821_vm3, %v944_v46, %v751_v23 }
 0x12c   : > { %v687_v10 = vpop.permute.xlu1 %686  ;;  %v783_v14 = vpop.permute.xlu0 %782 }
 0x12d   : > { %v1023_v41 = vsel %vm854_vm4, %v978_v0, %v783_v14  ;;  %v895_v25 = vsel %vm854_vm4, %v849_v30, %v687_v10 }
 0x12e   : > { %1241 = vmatprep.subr.bf16.mxu1 %v1023_v41 }
 0x12f   : > { %1242 = vmatpush1.bf16.xpose.msra.mxu1 %v895_v25 }
 0x130   : > { %v625_v21 = vpop.permute.xlu1 %624  ;;  %v721_v2 = vpop.permute.xlu0 %720 }
 0x131   : > { %v818_v40 = vsel %vm788_vm2, %v2041_v17, %v625_v21  ;;  %v947_v26 = vsel %vm788_vm2, %v2099_v45, %v721_v2 }
 0x134   : > { %v657_v38 = vpop.permute.xlu1 %656  ;;  %v753_v29 = vpop.permute.xlu0 %752 }
 0x135   : > { %v851_v63 = vsel %vm821_vm3, %v818_v40, %v657_v38  ;;  %v980_v35 = vsel %vm821_vm3, %v947_v26, %v753_v29 }
 0x138   : > { %v689_v8 = vpop.permute.xlu1 %688  ;;  %v785_v53 = vpop.permute.xlu0 %784 }
 0x139   : > { %v1026_v47 = vsel %vm854_vm4, %v980_v35, %v785_v53  ;;  %v898_v12 = vsel %vm854_vm4, %v851_v63, %v689_v8 }
 0x13a   : > { %1243 = vmatprep.subr.bf16.mxu1 %v1026_v47 }
 0x13b   : > { %1244 = vmatpush1.bf16.xpose.msra.mxu1 %v898_v12 }
 0x13c   : > { %v627_v3 = vpop.permute.xlu1 %626  ;;  %v723_v58 = vpop.permute.xlu0 %722 }
 0x13d   : > { %v820_v17 = vsel %vm788_vm2, %v2052_v22, %v627_v3  ;;  %v950_v45 = vsel %vm788_vm2, %v2117_v13, %v723_v58  ;;  %v1723_v22 = vld [vmem:[%s2588_s1 + $0x1c] ss:$12 sps:$4 sm:$0xff]   ;;  %v1725_v13 = vld [vmem:[%s2588_s1 + $0x18] ss:$12 sps:$4 sm:$0xff]  }
 0x140   : > { %v659_v51 = vpop.permute.xlu1 %658  ;;  %v755_v20 = vpop.permute.xlu0 %754 }
 0x141   : > { %v853_v27 = vsel %vm821_vm3, %v820_v17, %v659_v51  ;;  %v982_v42 = vsel %vm821_vm3, %v950_v45, %v755_v20 }
 0x144   : > { %v691_v34 = vpop.permute.xlu1 %690  ;;  %v787_v62 = vpop.permute.xlu0 %786 }
 0x145   : > { %v1029_v33 = vsel %vm854_vm4, %v982_v42, %v787_v62  ;;  %v901_v9 = vsel %vm854_vm4, %v853_v27, %v691_v34 }
 0x146   : > { %1245 = vmatprep.subr.bf16.mxu1 %v1029_v33 }
 0x147   : > { %1246 = vmatpush1.bf16.xpose.msra.mxu1 %v901_v9 }
 0x14e   : > { %1248 = vmatmul.mubr.bf16.vlgmr.msra.gmra.mrb[0].mxu1 %v1719_v60 }
 0x14f   : > { %1257 = vmatprep.mubr.bf16.mxu1 %v1723_v22 }
 0x155   : > { %v1058_v15 = vpop.permute.xlu0 %1057 }
 0x156   : > { %1258 = vmatmul.mubr.bf16.gmra.mrb[4].mxu1 %v1725_v13 }
 0x157   : > { %1267 = vmatprep.mubr.bf16.mxu1 %v1727_v56 }
 0x159   : > { %v1073_v26 = vpop.permute.xlu0 %1072 }
 0x15d   : > { %v1063_v5 = vpop.permute.xlu1 %1062 }
 0x15e   : > { %1268 = vmatmul.mubr.bf16.gmra.mrb[8].mxu1 %v1729_v36  ;;  %v1083_v36 = vpop.permute.xlu0 %1082 }
 0x15f   : > { %1277 = vmatprep.mubr.bf16.mxu1 %v1731_v18 }
 0x161   : > { %v1068_v25 = vpop.permute.xlu1 %1067 }
 0x165   : > { %v1078_v27 = vpop.permute.xlu1 %1077 }
 0x166   : > { %1278 = vmatmul.mubr.bf16.gmra.mrb[12].mxu1 %v1733_v19 }
 0x19e   : > { %v1322_v11 = vpop.f32.mrb[0].mxu0 }
 0x19f   : > { %v1324_v48 = vpop.f32.mrb[1].mxu0 }
 0x1a0   : > { %v1326_v59 = vpop.f32.mrb[2].mxu0 }
 0x1a1   : > { %v1328_v61 = vpop.f32.mrb[3].mxu0 }
 0x1a6   : > { %v1332_v16 = vpop.f32.mrb[4].mxu0 }
 0x1a7   : > { %v1334_v43 = vpop.f32.mrb[5].mxu0 }
 0x1a8   : > { %v1336_v4 = vpop.f32.mrb[6].mxu0 }
 0x1a9   : > { %v1338_v44 = vpop.f32.mrb[7].mxu0 }
 0x1ae   : > { %v2524_v52 = vpop.f32.mrb[8].mxu0 }
 0x1af   : > { %v2526_v54 = vpop.f32.mrb[9].mxu0 }
 0x1b0   : > { %v2528_v39 = vpop.f32.mrb[10].mxu0 }
 0x1b1   : > { %v2530_v7 = vpop.f32.mrb[11].mxu0 }
 0x1b6   : > { %v2532_v1 = vpop.f32.mrb[12].mxu0 }
 0x1b7   : > { %v2534_v50 = vpop.f32.mrb[13].mxu0 }
 0x1b8   : > { %v2536_v24 = vpop.f32.mrb[14].mxu0 }
 0x1b9   : > { %v2538_v49 = vpop.f32.mrb[15].mxu0 }
 0x221   : > { %v1249_v6 = vpop.f32.mrb[0].mxu1 }
 0x222   : > { %v1250_v28 = vadd.f32 %v1249_v6, %v1058_v15  ;;  %v1251_v32 = vpop.f32.mrb[1].mxu1 }
 0x223   : > { %v1252_v37 = vadd.f32 %v1251_v32, %v1058_v15  ;;  %v1253_v57 = vpop.f32.mrb[2].mxu1 }
 0x224   : > { %v1323_v55 = vadd.f32 %v1322_v11, %v1250_v28  ;;  %v1254_v23 = vadd.f32 %v1253_v57, %v1063_v5  ;;  %v1255_v31 = vpop.f32.mrb[3].mxu1 }
 0x225   : > { %v1325_v46 = vadd.f32 %v1324_v48, %v1252_v37  ;;  %v1256_v30 = vadd.f32 %v1255_v31, %v1063_v5 }
 0x226   : > { %v1377_v0 = vmul.f32 0.70710677, %v1323_v55  ;;  %v1327_v10 = vadd.f32 %v1326_v59, %v1254_v23  ;;  %v1361_v33 = vmul.f32 0.5, %v1323_v55 }
 0x227   : > { %v1378_v14 = vmul.f32 0.70710677, %v1325_v46  ;;  %v1329_v41 = vadd.f32 %v1328_v61, %v1256_v30  ;;  %v1362_v56 = vmul.f32 0.5, %v1325_v46 }
 0x228   : > { %1734 = verf.f32 %v1377_v0  ;;  %v1379_v21 = vmul.f32 0.70710677, %v1327_v10  ;;  %v1363_v59 = vmul.f32 0.5, %v1327_v10  ;;  %v1088_v0 = vpop.permute.xlu1 %1087 }
 0x229   : > { %1736 = verf.f32 %v1378_v14  ;;  %v1380_v2 = vmul.f32 0.70710677, %v1329_v41  ;;  %v1259_v38 = vpop.f32.mrb[4].mxu1  ;;  %v1364_v32 = vmul.f32 0.5, %v1329_v41 }
 0x22a   : > { %1738 = verf.f32 %v1379_v21  ;;  %v1260_v29 = vadd.f32 %v1259_v38, %v1068_v25  ;;  %v1261_v40 = vpop.f32.mrb[5].mxu1 }
 0x22b   : > { %1740 = verf.f32 %v1380_v2  ;;  %v1262_v63 = vadd.f32 %v1261_v40, %v1068_v25  ;;  %v1263_v35 = vpop.f32.mrb[6].mxu1 }
 0x22c   : > { %v1333_v8 = vadd.f32 %v1332_v16, %v1260_v29  ;;  %v1264_v53 = vadd.f32 %v1263_v35, %v1073_v26  ;;  %v1265_v47 = vpop.f32.mrb[7].mxu1 }
 0x22d   : > { %v1335_v12 = vadd.f32 %v1334_v43, %v1262_v63  ;;  %v1266_v3 = vadd.f32 %v1265_v47, %v1073_v26  ;;  %v1093_v63 = vpop.permute.xlu0 %1092 }
 0x22e   : > { %v1381_v58 = vmul.f32 0.70710677, %v1333_v8  ;;  %v1337_v51 = vadd.f32 %v1336_v4, %v1264_v53  ;;  %v1365_v30 = vmul.f32 0.5, %v1333_v8 }
 0x22f   : > { %v1382_v20 = vmul.f32 0.70710677, %v1335_v12  ;;  %v2540_v17 = vadd.f32 %v1338_v44, %v1266_v3  ;;  %v1366_v21 = vmul.f32 0.5, %v1335_v12 }
 0x230   : > { %1742 = verf.f32 %v1381_v58  ;;  %v1383_v45 = vmul.f32 0.70710677, %v1337_v51  ;;  %v1367_v26 = vmul.f32 0.5, %v1337_v51 }
 0x231   : > { %1744 = verf.f32 %v1382_v20  ;;  %v1384_v42 = vmul.f32 0.70710677, %v2540_v17  ;;  %v1269_v34 = vpop.f32.mrb[8].mxu1 }
 0x232   : > { %v1735_v62 = vpop.eup %1734  ;;  %1746 = verf.f32 %v1383_v45  ;;  %v1270_v9 = vadd.f32 %v1269_v34, %v1078_v27  ;;  %v1271_v60 = vpop.f32.mrb[9].mxu1  ;;  %v1368_v34 = vmul.f32 0.5, %v2540_v17 }
 0x233   : > { %v1737_v22 = vpop.eup %1736  ;;  %v1409_v13 = vadd.f32 1.0, %v1735_v62  ;;  %1748 = verf.f32 %v1384_v42  ;;  %v1272_v18 = vadd.f32 %v1271_v60, %v1078_v27  ;;  %v1273_v19 = vpop.f32.mrb[10].mxu1 }
 0x234   : > { %v1739_v11 = vpop.eup %1738  ;;  %v1410_v48 = vadd.f32 1.0, %v1737_v22  ;;  %v2545_v61 = vadd.f32 %v2524_v52, %v1270_v9  ;;  %v1274_v16 = vadd.f32 %v1273_v19, %v1083_v36  ;;  %v1275_v43 = vpop.f32.mrb[11].mxu1 }
 0x235   : > { %v1741_v4 = vpop.eup %1740  ;;  %v1425_v44 = vmul.f32 %v1409_v13, %v1361_v33  ;;  %v1411_v15 = vadd.f32 1.0, %v1739_v11  ;;  %v2548_v6 = vadd.f32 %v2526_v54, %v1272_v18  ;;  %v1276_v5 = vadd.f32 %v1275_v43, %v1083_v36 }
 0x236   : > { %v1426_v28 = vmul.f32 %v1410_v48, %v1362_v56  ;;  %v1412_v37 = vadd.f32 1.0, %v1741_v4  ;;  %v1385_v57 = vmul.f32 0.70710677, %v2545_v61  ;;  %v2558_v23 = vadd.f32 %v2528_v39, %v1274_v16 }
 0x237   : > { %v1427_v52 = vmul.f32 %v1411_v15, %v1363_v59  ;;  %v1386_v55 = vmul.f32 0.70710677, %v2548_v6  ;;  %v1349_v46 = vadd.f32 %v2530_v7, %v1276_v5  ;;  %v1369_v17 = vmul.f32 0.5, %v2545_v61 }
 0x238   : > { %v1615_v54 = vpack.c.bf16 %v1426_v28, %v1425_v44  ;;  %v1428_v31 = vmul.f32 %v1412_v37, %v1364_v32  ;;  %1750 = verf.f32 %v1385_v57  ;;  %v1387_v10 = vmul.f32 0.70710677, %v2558_v23 }
 0x239   : > { %1752 = verf.f32 %v1386_v55  ;;  %v1279_v14 = vpop.f32.mrb[12].mxu1  ;;  %v1388_v2 = vmul.f32 0.70710677, %v1349_v46  ;;  %v1371_v44 = vmul.f32 0.5, %v2558_v23  ;;  %v1372_v5 = vmul.f32 0.5, %v1349_v46 }
 0x23a   : > { %v1743_v41 = vpop.eup %1742  ;;  %1489 = vst [vmem:[%s2554_s19] sm:$0xff] %v1615_v54  ;;  %v1616_v25 = vpack.c.bf16 %v1428_v31, %v1427_v52  ;;  %v1280_v38 = vadd.f32 %v1279_v14, %v1088_v0  ;;  %v1281_v39 = vpop.f32.mrb[13].mxu1  ;;  %1754 = verf.f32 %v1387_v10 }
 0x23b   : > { %v1745_v29 = vpop.eup %1744  ;;  %v1413_v40 = vadd.f32 1.0, %v1743_v41  ;;  %v1282_v7 = vadd.f32 %v1281_v39, %v1088_v0  ;;  %v1283_v35 = vpop.f32.mrb[14].mxu1  ;;  %1756 = verf.f32 %v1388_v2 }
 0x23c   : > { %v1747_v8 = vpop.eup %1746  ;;  %1490 = vst [vmem:[%s2554_s19 + $0x8] sm:$0xff] %v1616_v25  ;;  %v1414_v53 = vadd.f32 1.0, %v1745_v29  ;;  %v1353_v47 = vadd.f32 %v2532_v1, %v1280_v38  ;;  %v1284_v3 = vadd.f32 %v1283_v35, %v1093_v63  ;;  %v1285_v58 = vpop.f32.mrb[15].mxu1 }
 0x23d   : > { %v1749_v20 = vpop.eup %1748  ;;  %v1429_v12 = vmul.f32 %v1413_v40, %v1365_v30  ;;  %v1415_v45 = vadd.f32 1.0, %v1747_v8  ;;  %v1355_v27 = vadd.f32 %v2534_v50, %v1282_v7  ;;  %v1286_v42 = vadd.f32 %v1285_v58, %v1093_v63 }
 0x23e   : > { %v1430_v51 = vmul.f32 %v1414_v53, %v1366_v21  ;;  %v1416_v62 = vadd.f32 1.0, %v1749_v20  ;;  %v1389_v33 = vmul.f32 0.70710677, %v1353_v47  ;;  %v1357_v22 = vadd.f32 %v2536_v24, %v1284_v3 }
 0x23f   : > { %v1431_v9 = vmul.f32 %v1415_v45, %v1367_v26  ;;  %v1390_v60 = vmul.f32 0.70710677, %v1355_v27  ;;  %v1359_v56 = vadd.f32 %v2538_v49, %v1286_v42  ;;  %v1370_v24 = vmul.f32 0.5, %v2548_v6 }
 0x240   : > { %v1617_v1 = vpack.c.bf16 %v1430_v51, %v1429_v12  ;;  %v1432_v13 = vmul.f32 %v1416_v62, %v1368_v34  ;;  %1758 = verf.f32 %v1389_v33  ;;  %v1391_v36 = vmul.f32 0.70710677, %v1357_v22 }
 0x241   : > { %1760 = verf.f32 %v1390_v60  ;;  %v1392_v19 = vmul.f32 0.70710677, %v1359_v56  ;;  %v1373_v6 = vmul.f32 0.5, %v1353_v47  ;;  %v1374_v31 = vmul.f32 0.5, %v1355_v27 }
 0x242   : > { %v1751_v50 = vpop.eup %1750  ;;  %1491 = vst [vmem:[%s2554_s19 + $0x10] sm:$0xff] %v1617_v1  ;;  %v1618_v18 = vpack.c.bf16 %v1432_v13, %v1431_v9  ;;  %1762 = verf.f32 %v1391_v36  ;;  %v1375_v46 = vmul.f32 0.5, %v1357_v22  ;;  %v1376_v25 = vmul.f32 0.5, %v1359_v56 }
 0x243   : > { %v1753_v11 = vpop.eup %1752  ;;  %v1417_v48 = vadd.f32 1.0, %v1751_v50  ;;  %1764 = verf.f32 %v1392_v19 }
 0x244   : > { %1492 = vst [vmem:[%s2554_s19 + $0x18] sm:$0xff] %v1618_v18  ;;  %v1418_v59 = vadd.f32 1.0, %v1753_v11  ;;  %v1755_v16 = vpop.eup %1754 }
 0x245   : > { %v1433_v43 = vmul.f32 %v1417_v48, %v1369_v17  ;;  %v1757_v49 = vpop.eup %1756  ;;  %v1419_v15 = vadd.f32 1.0, %v1755_v16 }
 0x246   : > { %v1434_v4 = vmul.f32 %v1418_v59, %v1370_v24  ;;  %v1420_v28 = vadd.f32 1.0, %v1757_v49 }
 0x247   : > { %v1435_v61 = vmul.f32 %v1419_v15, %v1371_v44 }
 0x248   : > { %v1619_v32 = vpack.c.bf16 %v1434_v4, %v1433_v43  ;;  %v1436_v37 = vmul.f32 %v1420_v28, %v1372_v5 }
 0x24a   : > { %v1759_v57 = vpop.eup %1758  ;;  %1493 = vst [vmem:[%s2554_s19 + $0x20] sm:$0xff] %v1619_v32  ;;  %v1620_v55 = vpack.c.bf16 %v1436_v37, %v1435_v61 }
 0x24b   : > { %v1761_v52 = vpop.eup %1760  ;;  %v1421_v54 = vadd.f32 1.0, %v1759_v57 }
 0x24c   : > { %v1422_v30 = vadd.f32 1.0, %v1761_v52  ;;  %v1763_v0 = vpop.eup %1762  ;;  %1494 = vst [vmem:[%s2554_s19 + $0x28] sm:$0xff] %v1620_v55 }
 0x24d   : > { %v1437_v23 = vmul.f32 %v1421_v54, %v1373_v6  ;;  %v1765_v10 = vpop.eup %1764  ;;  %v1423_v41 = vadd.f32 1.0, %v1763_v0 }
 0x24e   : > { %v1438_v14 = vmul.f32 %v1422_v30, %v1374_v31  ;;  %v1424_v21 = vadd.f32 1.0, %v1765_v10 }
 0x24f   : > { %v1439_v38 = vmul.f32 %v1423_v41, %v1375_v46 }
 0x250   : > { %v1621_v2 = vpack.c.bf16 %v1438_v14, %v1437_v23  ;;  %v1440_v39 = vmul.f32 %v1424_v21, %v1376_v25 }
 0x252   : > { %1495 = vst [vmem:[%s2554_s19 + $0x30] sm:$0xff] %v1621_v2  ;;  %v1622_v29 = vpack.c.bf16 %v1440_v39, %v1439_v38 }
 0x254   : > { %1496 = vst [vmem:[%s2554_s19 + $0x38] sm:$0xff] %v1622_v29 }
 0x255 PF: > { %s13_s14 = sadd.s32 1, %s1788_s14   ;;  %s2591_s12 = smov %s1784_s13 }
 0x256   : > { %p10_p5 = scmp.ge.s32.totalorder %s13_s14, 4   ;;  %s2592_s13 = smov %s2594_s15 }
 0x258   :  { %12 = sbr.rel (!%p10_p5) target bundleno = 2 (0x2), region = 63 }

// kernel: oaa1_forward.3
= control target key start
LH: loop header
LB: loop body
LE: loop exit
PB: predicated region body
PF: predicated region fallthrough
CT: control target
= control target key end

     0   :  { %s6305_s12 = smov 0   ;;  %s6307_s13 = smov 0   ;;  %s10307_s0 = inlined_call_operand.vmem [shape: bf16[2,34,34,16], index: 0, kind: input, shape index: {}]   ;;  %s10308_s1 = inlined_call_operand.vmem [shape: bf16[16,144], index: 1, kind: input, shape index: {}]   ;;  %s10309_s2 = inlined_call_operand.vmem [shape: f32[16,1], index: 2, kind: input, shape index: {}]   ;;  %s10310_s3 = inlined_call_operand.vmem [shape: f32[2,16,1024], index: 3, kind: output, shape index: {}]  }
   0x1   :  { %s6309_s14 = smov 0  }
   0x2 LB: > { %s25_s15 = sadd.s32 1, %s6271_s13  ;;  %p5594_p0 = scmp.ge.s32.totalorder %s6275_s14, 1  ;;  %s6275_s14 = sphi %s6309_s14, %s13_s14   ;;  %s6271_s13 = sphi %s6307_s13, %s11373_s13   ;;  %s6267_s12 = sphi %s6305_s12, %s11372_s12  }
   0x3   : > { %p27_p1 = scmp.ge.s32.totalorder %s25_s15, 2  ;;  %p151_p2 = scmp.lt.s32.totalorder %s6275_s14, 3 }
   0x5   : > { %s11375_s15 = smov (%p27_p1, %s25_s15), 0  ;;  %p152_p3 = pnand %p5594_p0, %p151_p2 }
   0x7   : > { %155 = sbr.rel (%p152_p3) target bundleno = 1420 (0x58c), region = 32 }
   0xe   : > { %p179_p4 = scmp.lt.s32.totalorder %s6267_s12, 1  ;;  %vm368_vm0 = vsmask.f32 3328  ;;  %vm369_vm1 = vsmask.f32 7440  ;;  %v10647_v24 = vmov 0 }
   0xf   : > { %vm6339_vm2 = vmor %vm368_vm0, %vm369_vm1  ;;  %s6277_s20 = smov 16   ;;  %vm1939_vm3 = vcmask 1042432   ;;  %vm1940_vm4 = vcmask 1046532   ;;  %s6278_s21 = smov 32   ;;  %vm3990_vm6 = vcmask 130048   ;;  %vm4183_vm7 = vcmask 261120  }
  0x10   : > { %s11377_s12 = smov (!%p179_p4, %s6267_s12), 1  ;;  %v10648_v24 = vsel %vm6339_vm2, 4294967295, %v10647_v24  ;;  %vm7160_vm5 = vmor %vm1939_vm3, %vm1940_vm4  ;;  %s6279_s22 = smov 48   ;;  %vm4312_vm8 = vcmask 392192   ;;  %vm4441_vm9 = vcmask 523264   ;;  %vm4570_vm10 = vcmask 654336  }
  0x11   : > { %s5909_s16 = smul.u32 680, %s11377_s12  ;;  %10649 = vst [vmem:[#allocation2_spill] sm:$0xff] %v10648_v24  ;;  %s6280_s23 = smov 64   ;;  %vm4699_vm11 = vcmask 785408   ;;  %vm4828_vm12 = vcmask 916480  }
  0x12   : > { %s6281_s24 = smov 80   ;;  %s6282_s25 = smov 96  }
  0x13   : > { %s6329_s19 = scalar_lea.vmem %s10307_s0, %s5909_s16  ;;  %s6283_s26 = smov 112  }
  0x14   : > { %v203_v0 = vld [vmem:[%s6329_s19 + $0x14] sm:$0xf]  ;;  %v204_v1 = vld [vmem:[%s6329_s19 + $0x18] sm:$0xf]  ;;  %v205_v2 = vld [vmem:[%s6329_s19 + $0x1c] sm:$0xf] }
  0x15   : > { %v416_v3 = vshrl.u32 %v203_v0, 16  ;;  %v419_v4 = vshll.u32 %v203_v0, 16  ;;  %v425_v5 = vshll.u32 %v204_v1, 16  ;;  %v429_v6 = vshrl.u32 %v204_v1, 16  ;;  %v198_v7 = vld [vmem:[%s6329_s19] sm:$0xf] }
  0x16   : > { %v435_v8 = vshll.u32 %v205_v2, 16  ;;  %v439_v9 = vshrl.u32 %v205_v2, 16  ;;  %v199_v10 = vld [vmem:[%s6329_s19 + $0x4] sm:$0xf]  ;;  %v200_v15 = vld [vmem:[%s6329_s19 + $0x8] sm:$0xf] }
  0x17   : > { %v418_v11 = vrot.slane %v416_v3, 4  ;;  %v421_v12 = vrot.slane %v419_v4, 5  ;;  %v427_v13 = vrot.slane %v425_v5, 5  ;;  %v431_v14 = vrot.slane %v429_v6, 4  ;;  %v206_v29 = vld [vmem:[%s6329_s19 + $0x20] sm:$0xf] }
  0x18   : > { %v437_v16 = vrot.slane %v435_v8, 5  ;;  %v441_v17 = vrot.slane %v439_v9, 4  ;;  %v372_v18 = vshrl.u32 %v198_v7, 16  ;;  %v375_v19 = vshll.u32 %v198_v7, 16  ;;  %v207_v34 = vld [vmem:[%s6329_s19 + $0x24] sm:$0x1] }
  0x19   : > { %v422_v20 = vor.u32 %v421_v12, %v418_v11  ;;  %v432_v21 = vor.u32 %v431_v14, %v427_v13  ;;  %v381_v22 = vshll.u32 %v199_v10, 16  ;;  %v385_v23 = vshrl.u32 %v199_v10, 16  ;;  %v201_v39 = vld [vmem:[%s6329_s19 + $0xc] sm:$0xf]  ;;  %v202_v51 = vld [vmem:[%s6329_s19 + $0x10] sm:$0x1] }
  0x1a   : > { %v442_v25 = vor.u32 %v441_v17, %v437_v16  ;;  %v374_v26 = vrot.slane %v372_v18, 4  ;;  %v377_v27 = vrot.slane %v375_v19, 5  ;;  %v391_v28 = vshll.u32 %v200_v15, 16  ;;  %v210_v57 = vld [vmem:[%s6329_s19 + $0x30] sm:$0xf]  ;;  %s5908_s10 = sshll.u32 %s11377_s12, 7 }
  0x1b   : > { %v423_v30 = vrot.slane %v422_v20, 4  ;;  %v433_v31 = vrot.slane %v432_v21, 4  ;;  %v383_v32 = vrot.slane %v381_v22, 5  ;;  %v387_v33 = vrot.slane %v385_v23, 4  ;;  %v211_v58 = vld [vmem:[%s6329_s19 + $0x34] sm:$0xf]  ;;  %s10272_s17 = scalar_lea.vmem %s10310_s3, %s5908_s10 }
  0x1c   : > { %v378_v35 = vor.u32 %v377_v27, %v374_v26  ;;  %v393_v36 = vrot.slane %v391_v28, 5  ;;  %v395_v37 = vshrl.u32 %v200_v15, 16  ;;  %v443_v38 = vrot.slane %v442_v25, 4  ;;  %v212_v4 = vld [vmem:[%s6329_s19 + $0x38] sm:$0x1] }
  0x1d   : > { %v428_v40 = vsel %vm6339_vm2, %v423_v30, %v427_v13  ;;  %v438_v41 = vsel %vm6339_vm2, %v433_v31, %v437_v16  ;;  %v388_v42 = vor.u32 %v387_v33, %v383_v32  ;;  %v445_v43 = vshll.u32 %v206_v29, 16  ;;  %v208_v12 = vld [vmem:[%s6329_s19 + $0x28] sm:$0xf]  ;;  %v209_v17 = vld [vmem:[%s6329_s19 + $0x2c] sm:$0xf] }
  0x1e   : > { %v6350_v44 = vcombine.low %v428_v40, %v438_v41  ;;  %v379_v45 = vrot.slane %v378_v35, 4  ;;  %v397_v46 = vrot.slane %v395_v37, 4  ;;  %v449_v47 = vshrl.u32 %v206_v29, 16  ;;  %v215_v27 = vld [vmem:[%s6329_s19 + $0x44] sm:$0xf] }
  0x1f   : > { %v389_v48 = vrot.slane %v388_v42, 4  ;;  %v447_v49 = vrot.slane %v445_v43, 5  ;;  %v455_v50 = vshll.u32 %v207_v34, 16  ;;  %v401_v52 = vshll.u32 %v201_v39, 16  ;;  %v217_v43 = vld [vmem:[%s6329_s19 + $0x4c] sm:$0x1] }
  0x20   : > { %10650 = vst [vmem:[#allocation3_spill] sm:$0xff] %v6350_v44  ;;  %2870 = vrot.lane.b32.xlu1 %v6350_v44, %s6277_s20  ;;  %v384_v53 = vsel %vm6339_vm2, %v379_v45, %v383_v32  ;;  %v398_v54 = vor.u32 %v397_v46, %v393_v36  ;;  %v451_v55 = vrot.slane %v449_v47, 4  ;;  %v405_v56 = vshrl.u32 %v201_v39, 16  ;;  %v216_v32 = vld [vmem:[%s6329_s19 + $0x48] sm:$0xf] }
  0x21   : > { %v394_v59 = vsel %vm6339_vm2, %v389_v48, %v393_v36  ;;  %v448_v60 = vsel %vm6339_vm2, %v443_v38, %v447_v49  ;;  %v457_v61 = vrot.slane %v455_v50, 5  ;;  %v403_v62 = vrot.slane %v401_v52, 5  ;;  %v213_v47 = vld [vmem:[%s6329_s19 + $0x3c] sm:$0xf]  ;;  %v214_v52 = vld [vmem:[%s6329_s19 + $0x40] sm:$0xf] }
  0x22   : > { %v5696_v63 = vcombine.low %v384_v53, %v394_v59  ;;  %v452_v0 = vor.u32 %v451_v55, %v447_v49  ;;  %v399_v1 = vrot.slane %v398_v54, 4  ;;  %v407_v2 = vrot.slane %v405_v56, 4  ;;  %v6054_v24 = vld [vmem:[%s6329_s19 + $0x24] sm:$0x1] }
  0x23   : > { %v411_v3 = vshll.u32 %v202_v51, 16  ;;  %v479_v5 = vshll.u32 %v210_v57, 16  ;;  %v483_v6 = vshrl.u32 %v210_v57, 16  ;;  %v489_v7 = vshll.u32 %v211_v58, 16  ;;  %v7704_v44 = vld [vmem:[%s6329_s19 + $0x144] sm:$0xf] }
  0x24   : > { %2866 = vrot.lane.b32.xlu0 %v5696_v63, %s6277_s20  ;;  %v453_v8 = vrot.slane %v452_v0, 4  ;;  %v404_v9 = vsel %vm6339_vm2, %v399_v1, %v403_v62  ;;  %v408_v10 = vor.u32 %v407_v2, %v403_v62  ;;  %v493_v11 = vshrl.u32 %v211_v58, 16  ;;  %v220_v1 = vld [vmem:[%s6329_s19 + $0x58] sm:$0xf]  ;;  %10800 = vst [vmem:[#allocation151_spill] sm:$0xff] %v7704_v44 }
  0x25   : > { %v413_v13 = vrot.slane %v411_v3, 5  ;;  %v6368_v14 = vrot.slane %v479_v5, 5  ;;  %v485_v15 = vrot.slane %v483_v6, 4  ;;  %v491_v16 = vrot.slane %v489_v7, 5 }
  0x26   : > { %v458_v18 = vsel %vm6339_vm2, %v453_v8, %v457_v61  ;;  %v409_v19 = vrot.slane %v408_v10, 4  ;;  %v495_v20 = vrot.slane %v493_v11, 4  ;;  %v499_v21 = vshll.u32 %v212_v4, 16  ;;  %v221_v10 = vld [vmem:[%s6329_s19 + $0x5c] sm:$0xf] }
  0x27   : > { %v6373_v22 = vcombine.low %v448_v60, %v458_v18  ;;  %v486_v23 = vor.u32 %v485_v15, %v6368_v14  ;;  %v460_v25 = vshrl.u32 %v208_v12, 16  ;;  %v463_v26 = vshll.u32 %v208_v12, 16 }
  0x28   : > { %v414_v28 = vsel %vm6339_vm2, %v409_v19, %v413_v13  ;;  %v496_v29 = vor.u32 %v495_v20, %v491_v16  ;;  %v501_v30 = vrot.slane %v499_v21, 5  ;;  %v469_v31 = vshll.u32 %v209_v17, 16  ;;  %v222_v20 = vld [vmem:[%s6329_s19 + $0x60] sm:$0x1]  ;;  %v218_v21 = vld [vmem:[%s6329_s19 + $0x50] sm:$0xf] }
  0x29   : > { %10651 = vst [vmem:[#allocation4_spill] sm:$0xff] %v6373_v22  ;;  %2872 = vrot.lane.b32.xlu1 %v6373_v22, %s6277_s20  ;;  %v5697_v33 = vcombine.low %v404_v9, %v414_v28  ;;  %v487_v34 = vrot.slane %v486_v23, 4  ;;  %v462_v35 = vrot.slane %v460_v25, 4  ;;  %v465_v36 = vrot.slane %v463_v26, 5 }
  0x2a   : > { %v497_v37 = vrot.slane %v496_v29, 4  ;;  %v471_v38 = vrot.slane %v469_v31, 5  ;;  %v473_v39 = vshrl.u32 %v209_v17, 16  ;;  %v523_v40 = vshll.u32 %v215_v27, 16  ;;  %v219_v31 = vld [vmem:[%s6329_s19 + $0x54] sm:$0xf] }
  0x2b   : > { %2868 = vrot.lane.b32.xlu0 %v5697_v33, %s6277_s20  ;;  %v492_v41 = vsel %vm6339_vm2, %v487_v34, %v491_v16  ;;  %v466_v42 = vor.u32 %v465_v36, %v462_v35  ;;  %v527_v45 = vshrl.u32 %v215_v27, 16  ;;  %v533_v46 = vshll.u32 %v216_v32, 16 }
  0x2c   : > { %v502_v48 = vsel %vm6339_vm2, %v497_v37, %v501_v30  ;;  %v475_v49 = vrot.slane %v473_v39, 4  ;;  %v6389_v50 = vrot.slane %v523_v40, 5  ;;  %v537_v51 = vshrl.u32 %v216_v32, 16  ;;  %v225_v40 = vld [vmem:[%s6329_s19 + $0x6c] sm:$0xf] }
  0x2d   : > { %v6392_v53 = vcombine.low %v492_v41, %v502_v48  ;;  %v467_v54 = vrot.slane %v466_v42, 4  ;;  %v529_v55 = vrot.slane %v527_v45, 4  ;;  %v535_v56 = vrot.slane %v533_v46, 5 }
  0x2e   : > { %v476_v57 = vor.u32 %v475_v49, %v471_v38  ;;  %v539_v58 = vrot.slane %v537_v51, 4  ;;  %v543_v59 = vshll.u32 %v217_v43, 16  ;;  %v504_v60 = vshrl.u32 %v213_v47, 16  ;;  %v226_v51 = vld [vmem:[%s6329_s19 + $0x70] sm:$0xf] }
  0x2f   : > { %10652 = vst [vmem:[#allocation5_spill] sm:$0xff] %v6392_v53  ;;  %2876 = vrot.lane.b32.xlu1 %v6392_v53, %s6277_s20  ;;  %v472_v61 = vsel %vm6339_vm2, %v467_v54, %v471_v38  ;;  %v530_v62 = vor.u32 %v529_v55, %v6389_v50  ;;  %v507_v63 = vshll.u32 %v213_v47, 16  ;;  %v513_v0 = vshll.u32 %v214_v52, 16 }
  0x30   : > { %v477_v2 = vrot.slane %v476_v57, 4  ;;  %v540_v3 = vor.u32 %v539_v58, %v535_v56  ;;  %v545_v4 = vrot.slane %v543_v59, 5  ;;  %v506_v5 = vrot.slane %v504_v60, 4 }
  0x31   : > { %v531_v6 = vrot.slane %v530_v62, 4  ;;  %v509_v7 = vrot.slane %v507_v63, 5  ;;  %v515_v8 = vrot.slane %v513_v0, 5  ;;  %v517_v9 = vshrl.u32 %v214_v52, 16  ;;  %v227_v52 = vld [vmem:[%s6329_s19 + $0x74] sm:$0x1] }
  0x32   : > { %v482_v11 = vsel %vm6339_vm2, %v477_v2, %v6368_v14  ;;  %v541_v12 = vrot.slane %v540_v3, 4  ;;  %v567_v13 = vshll.u32 %v220_v1, 16  ;;  %v571_v15 = vshrl.u32 %v220_v1, 16  ;;  %v223_v1 = vld [vmem:[%s6329_s19 + $0x64] sm:$0xf] }
  0x33   : > { %v6404_v16 = vcombine.low %v472_v61, %v482_v11  ;;  %v536_v17 = vsel %vm6339_vm2, %v531_v6, %v535_v56  ;;  %v510_v18 = vor.u32 %v509_v7, %v506_v5  ;;  %v519_v19 = vrot.slane %v517_v9, 4  ;;  %v224_v6 = vld [vmem:[%s6329_s19 + $0x68] sm:$0xf]  ;;  %v230_v11 = vld [vmem:[%s6329_s19 + $0x80] sm:$0xf] }
  0x34   : > { %v546_v23 = vsel %vm6339_vm2, %v541_v12, %v545_v4  ;;  %v6412_v25 = vrot.slane %v567_v13, 5  ;;  %v573_v26 = vrot.slane %v571_v15, 4  ;;  %v577_v14 = vshll.u32 %v221_v10, 16 }
  0x35   : > { %10653 = vst [vmem:[#allocation6_spill] sm:$0xff] %v6404_v16  ;;  %2874 = vrot.lane.b32.xlu0 %v6404_v16, %s6277_s20  ;;  %v6416_v27 = vcombine.low %v536_v17, %v546_v23  ;;  %v511_v28 = vrot.slane %v510_v18, 4  ;;  %v520_v29 = vor.u32 %v519_v19, %v515_v8  ;;  %v581_v30 = vshrl.u32 %v221_v10, 16 }
  0x36   : > { %v574_v32 = vor.u32 %v573_v26, %v6412_v25  ;;  %v579_v33 = vrot.slane %v577_v14, 5  ;;  %v587_v34 = vshll.u32 %v222_v20, 16  ;;  %v548_v35 = vshrl.u32 %v218_v21, 16 }
  0x37   : > { %10654 = vst [vmem:[#allocation7_spill] sm:$0xff] %v6416_v27  ;;  %2880 = vrot.lane.b32.xlu1 %v6416_v27, %s6277_s20  ;;  %v516_v36 = vsel %vm6339_vm2, %v511_v28, %v515_v8  ;;  %v521_v37 = vrot.slane %v520_v29, 4  ;;  %v583_v38 = vrot.slane %v581_v30, 4  ;;  %v551_v39 = vshll.u32 %v218_v21, 16  ;;  %v231_v28 = vld [vmem:[%s6329_s19 + $0x84] sm:$0xf] }
  0x38   : > { %v575_v41 = vrot.slane %v574_v32, 4  ;;  %v589_v42 = vrot.slane %v587_v34, 5  ;;  %v550_v43 = vrot.slane %v548_v35, 4  ;;  %v557_v45 = vshll.u32 %v219_v31, 16  ;;  %v232_v34 = vld [vmem:[%s6329_s19 + $0x88] sm:$0x1] }
  0x39   : > { %v526_v46 = vsel %vm6339_vm2, %v521_v37, %v6389_v50  ;;  %v584_v47 = vor.u32 %v583_v38, %v579_v33  ;;  %v553_v48 = vrot.slane %v551_v39, 5  ;;  %v561_v49 = vshrl.u32 %v219_v31, 16  ;;  %v228_v39 = vld [vmem:[%s6329_s19 + $0x78] sm:$0xf]  ;;  %v7552_v27 = vld [vmem:[%s6329_s19 + $0xf0] sm:$0xf] }
  0x3a   : > { %v6430_v54 = vcombine.low %v516_v36, %v526_v46  ;;  %v580_v55 = vsel %vm6339_vm2, %v575_v41, %v579_v33  ;;  %v559_v56 = vrot.slane %v557_v45, 5  ;;  %v611_v57 = vshll.u32 %v225_v40, 16 }
  0x3b   : > { %v585_v58 = vrot.slane %v584_v47, 4  ;;  %v554_v59 = vor.u32 %v553_v48, %v550_v43  ;;  %v563_v60 = vrot.slane %v561_v49, 4  ;;  %v615_v61 = vshrl.u32 %v225_v40, 16  ;;  %v229_v48 = vld [vmem:[%s6329_s19 + $0x7c] sm:$0xf] }
  0x3c   : > { %10655 = vst [vmem:[#allocation8_spill] sm:$0xff] %v6430_v54  ;;  %2878 = vrot.lane.b32.xlu0 %v6430_v54, %s6277_s20  ;;  %v6436_v50 = vrot.slane %v611_v57, 5  ;;  %v621_v62 = vshll.u32 %v226_v51, 16  ;;  %v625_v63 = vshrl.u32 %v226_v51, 16  ;;  %v631_v0 = vshll.u32 %v227_v52, 16 }
  0x3d   : > { %v590_v2 = vsel %vm6339_vm2, %v585_v58, %v589_v42  ;;  %v555_v3 = vrot.slane %v554_v59, 4  ;;  %v564_v4 = vor.u32 %v563_v60, %v559_v56  ;;  %v617_v5 = vrot.slane %v615_v61, 4  ;;  %v235_v60 = vld [vmem:[%s6329_s19 + $0x94] sm:$0xf] }
  0x3e   : > { %v6442_v7 = vcombine.low %v580_v55, %v590_v2  ;;  %v623_v8 = vrot.slane %v621_v62, 5  ;;  %v627_v9 = vrot.slane %v625_v63, 4  ;;  %v633_v10 = vrot.slane %v631_v0, 5 }
  0x3f   : > { %v560_v12 = vsel %vm6339_vm2, %v555_v3, %v559_v56  ;;  %v565_v13 = vrot.slane %v564_v4, 4  ;;  %v618_v15 = vor.u32 %v617_v5, %v6436_v50  ;;  %v592_v17 = vshrl.u32 %v223_v1, 16  ;;  %v236_v5 = vld [vmem:[%s6329_s19 + $0x98] sm:$0xf] }
  0x40   : > { %10656 = vst [vmem:[#allocation9_spill] sm:$0xff] %v6442_v7  ;;  %2884 = vrot.lane.b32.xlu1 %v6442_v7, %s6277_s20  ;;  %v628_v18 = vor.u32 %v627_v9, %v623_v8  ;;  %v595_v19 = vshll.u32 %v223_v1, 16  ;;  %v601_v20 = vshll.u32 %v224_v6, 16  ;;  %v605_v21 = vshrl.u32 %v224_v6, 16 }
  0x41   : > { %v570_v23 = vsel %vm6339_vm2, %v565_v13, %v6412_v25  ;;  %v619_v26 = vrot.slane %v618_v15, 4  ;;  %v594_v14 = vrot.slane %v592_v17, 4  ;;  %v655_v29 = vshll.u32 %v230_v11, 16  ;;  %v237_v15 = vld [vmem:[%s6329_s19 + $0x9c] sm:$0x1] }
  0x42   : > { %v6454_v30 = vcombine.low %v560_v12, %v570_v23  ;;  %v629_v31 = vrot.slane %v628_v18, 4  ;;  %v597_v32 = vrot.slane %v595_v19, 5  ;;  %v603_v33 = vrot.slane %v601_v20, 5  ;;  %v233_v18 = vld [vmem:[%s6329_s19 + $0x8c] sm:$0xf] }
  0x43   : > { %v624_v35 = vsel %vm6339_vm2, %v619_v26, %v623_v8  ;;  %v607_v36 = vrot.slane %v605_v21, 4  ;;  %v6459_v37 = vrot.slane %v655_v29, 5  ;;  %v659_v38 = vshrl.u32 %v230_v11, 16  ;;  %v234_v29 = vld [vmem:[%s6329_s19 + $0x90] sm:$0xf] }
  0x44   : > { %10657 = vst [vmem:[#allocation10_spill] sm:$0xff] %v6454_v30  ;;  %2882 = vrot.lane.b32.xlu0 %v6454_v30, %s6277_s20  ;;  %v634_v25 = vsel %vm6339_vm2, %v629_v31, %v633_v10  ;;  %v598_v40 = vor.u32 %v597_v32, %v594_v14  ;;  %v665_v41 = vshll.u32 %v231_v28, 16  ;;  %v669_v42 = vshrl.u32 %v231_v28, 16  ;;  %v6104_v30 = vld [vmem:[%s6329_s19 + $0xec] sm:$0x1] }
  0x45   : > { %v6466_v43 = vcombine.low %v624_v35, %v634_v25  ;;  %v608_v45 = vor.u32 %v607_v36, %v603_v33  ;;  %v661_v46 = vrot.slane %v659_v38, 4  ;;  %v675_v47 = vshll.u32 %v232_v34, 16  ;;  %v240_v25 = vld [vmem:[%s6329_s19 + $0xa8] sm:$0xf] }
  0x46   : > { %v599_v49 = vrot.slane %v598_v40, 4  ;;  %v667_v51 = vrot.slane %v665_v41, 5  ;;  %v671_v52 = vrot.slane %v669_v42, 4  ;;  %v636_v55 = vshrl.u32 %v228_v39, 16 }
  0x47   : > { %10658 = vst [vmem:[#allocation11_spill] sm:$0xff] %v6466_v43  ;;  %2888 = vrot.lane.b32.xlu1 %v6466_v43, %s6277_s20  ;;  %v609_v56 = vrot.slane %v608_v45, 4  ;;  %v662_v57 = vor.u32 %v661_v46, %v6459_v37  ;;  %v677_v58 = vrot.slane %v675_v47, 5  ;;  %v639_v59 = vshll.u32 %v228_v39, 16  ;;  %v6094_v43 = vld [vmem:[%s6329_s19 + $0xc4] sm:$0x1] }
  0x48   : > { %v604_v61 = vsel %vm6339_vm2, %v599_v49, %v603_v33  ;;  %v672_v62 = vor.u32 %v671_v52, %v667_v51  ;;  %v638_v63 = vrot.slane %v636_v55, 4  ;;  %v645_v0 = vshll.u32 %v229_v48, 16 }
  0x49   : > { %v614_v1 = vsel %vm6339_vm2, %v609_v56, %v6436_v50  ;;  %v663_v2 = vrot.slane %v662_v57, 4  ;;  %v641_v3 = vrot.slane %v639_v59, 5  ;;  %v649_v4 = vshrl.u32 %v229_v48, 16 }
  0x4a   : > { %v6479_v6 = vcombine.low %v604_v61, %v614_v1  ;;  %v673_v8 = vrot.slane %v672_v62, 4  ;;  %v647_v9 = vrot.slane %v645_v0, 5  ;;  %v699_v10 = vshll.u32 %v235_v60, 16  ;;  %v242_v61 = vld [vmem:[%s6329_s19 + $0xb0] sm:$0x1] }
  0x4b   : > { %v668_v11 = vsel %vm6339_vm2, %v663_v2, %v667_v51  ;;  %v642_v12 = vor.u32 %v641_v3, %v638_v63  ;;  %v651_v13 = vrot.slane %v649_v4, 4  ;;  %v703_v17 = vshrl.u32 %v235_v60, 16  ;;  %v241_v51 = vld [vmem:[%s6329_s19 + $0xac] sm:$0xf]  ;;  %v238_v63 = vld [vmem:[%s6329_s19 + $0xa0] sm:$0xf] }
  0x4c   : > { %10659 = vst [vmem:[#allocation12_spill] sm:$0xff] %v6479_v6  ;;  %2886 = vrot.lane.b32.xlu0 %v6479_v6, %s6277_s20  ;;  %v678_v50 = vsel %vm6339_vm2, %v673_v8, %v677_v58  ;;  %v6489_v19 = vrot.slane %v699_v10, 5  ;;  %v709_v20 = vshll.u32 %v236_v5, 16  ;;  %v713_v21 = vshrl.u32 %v236_v5, 16  ;;  %v7496_v6 = vld [vmem:[%s6329_s19 + $0xe8] sm:$0xf] }
  0x4d   : > { %v6491_v23 = vcombine.low %v668_v11, %v678_v50  ;;  %v643_v26 = vrot.slane %v642_v12, 4  ;;  %v652_v14 = vor.u32 %v651_v13, %v647_v9  ;;  %v705_v28 = vrot.slane %v703_v17, 4 }
  0x4e   : > { %v711_v31 = vrot.slane %v709_v20, 5  ;;  %v715_v32 = vrot.slane %v713_v21, 4  ;;  %v719_v33 = vshll.u32 %v237_v15, 16  ;;  %v680_v34 = vshrl.u32 %v233_v18, 16  ;;  %v245_v20 = vld [vmem:[%s6329_s19 + $0xbc] sm:$0xf] }
  0x4f   : > { %10660 = vst [vmem:[#allocation13_spill] sm:$0xff] %v6491_v23  ;;  %2892 = vrot.lane.b32.xlu1 %v6491_v23, %s6277_s20  ;;  %v648_v35 = vsel %vm6339_vm2, %v643_v26, %v647_v9  ;;  %v653_v36 = vrot.slane %v652_v14, 4  ;;  %v706_v38 = vor.u32 %v705_v28, %v6489_v19  ;;  %v683_v39 = vshll.u32 %v233_v18, 16  ;;  %v239_v9 = vld [vmem:[%s6329_s19 + $0xa4] sm:$0xf] }
  0x50   : > { %v716_v40 = vor.u32 %v715_v32, %v711_v31  ;;  %v721_v41 = vrot.slane %v719_v33, 5  ;;  %v682_v42 = vrot.slane %v680_v34, 4  ;;  %v689_v45 = vshll.u32 %v234_v29, 16  ;;  %v246_v34 = vld [vmem:[%s6329_s19 + $0xc0] sm:$0xf] }
  0x51   : > { %v658_v46 = vsel %vm6339_vm2, %v653_v36, %v6459_v37  ;;  %v707_v47 = vrot.slane %v706_v38, 4  ;;  %v685_v48 = vrot.slane %v683_v39, 5  ;;  %v693_v49 = vshrl.u32 %v234_v29, 16 }
  0x52   : > { %v6504_v52 = vcombine.low %v648_v35, %v658_v46  ;;  %v717_v55 = vrot.slane %v716_v40, 4  ;;  %v691_v56 = vrot.slane %v689_v45, 5  ;;  %v743_v57 = vshll.u32 %v240_v25, 16  ;;  %v243_v46 = vld [vmem:[%s6329_s19 + $0xb4] sm:$0xf] }
  0x53   : > { %v712_v58 = vsel %vm6339_vm2, %v707_v47, %v711_v31  ;;  %v686_v59 = vor.u32 %v685_v48, %v682_v42  ;;  %v695_v60 = vrot.slane %v693_v49, 4  ;;  %v747_v62 = vshrl.u32 %v240_v25, 16  ;;  %v247_v42 = vld [vmem:[%s6329_s19 + $0xc4] sm:$0x1] }
  0x54   : > { %10661 = vst [vmem:[#allocation14_spill] sm:$0xff] %v6504_v52  ;;  %2890 = vrot.lane.b32.xlu0 %v6504_v52, %s6277_s20  ;;  %v722_v37 = vsel %vm6339_vm2, %v717_v55, %v721_v41  ;;  %v6514_v0 = vrot.slane %v743_v57, 5  ;;  %v753_v1 = vshll.u32 %v241_v51, 16  ;;  %v757_v2 = vshrl.u32 %v241_v51, 16  ;;  %v7414_v52 = vld [vmem:[%s6329_s19 + $0xa4] sm:$0xf] }
  0x55   : > { %v6516_v3 = vcombine.low %v712_v58, %v722_v37  ;;  %v687_v4 = vrot.slane %v686_v59, 4  ;;  %v696_v5 = vor.u32 %v695_v60, %v691_v56  ;;  %v749_v8 = vrot.slane %v747_v62, 4  ;;  %v244_v58 = vld [vmem:[%s6329_s19 + $0xb8] sm:$0xf] }
  0x56   : > { %v755_v10 = vrot.slane %v753_v1, 5  ;;  %v759_v11 = vrot.slane %v757_v2, 4  ;;  %v763_v12 = vshll.u32 %v242_v61, 16  ;;  %v724_v13 = vshrl.u32 %v238_v63, 16 }
  0x57   : > { %10662 = vst [vmem:[#allocation15_spill] sm:$0xff] %v6516_v3  ;;  %2896 = vrot.lane.b32.xlu1 %v6516_v3, %s6277_s20  ;;  %v692_v15 = vsel %vm6339_vm2, %v687_v4, %v691_v56  ;;  %v697_v17 = vrot.slane %v696_v5, 4  ;;  %v750_v18 = vor.u32 %v749_v8, %v6514_v0  ;;  %v727_v50 = vshll.u32 %v238_v63, 16  ;;  %v250_v4 = vld [vmem:[%s6329_s19 + $0xd0] sm:$0xf] }
  0x58   : > { %v760_v21 = vor.u32 %v759_v11, %v755_v10  ;;  %v765_v26 = vrot.slane %v763_v12, 5  ;;  %v726_v14 = vrot.slane %v724_v13, 4  ;;  %v733_v28 = vshll.u32 %v239_v9, 16 }
  0x59   : > { %v702_v29 = vsel %vm6339_vm2, %v697_v17, %v6489_v19  ;;  %v751_v31 = vrot.slane %v750_v18, 4  ;;  %v729_v32 = vrot.slane %v727_v50, 5  ;;  %v737_v33 = vshrl.u32 %v239_v9, 16  ;;  %v251_v17 = vld [vmem:[%s6329_s19 + $0xd4] sm:$0xf] }
  0x5a   : > { %v6529_v35 = vcombine.low %v692_v15, %v702_v29  ;;  %v761_v36 = vrot.slane %v760_v21, 4  ;;  %v735_v38 = vrot.slane %v733_v28, 5  ;;  %v787_v39 = vshll.u32 %v245_v20, 16  ;;  %v252_v29 = vld [vmem:[%s6329_s19 + $0xd8] sm:$0x1] }
  0x5b   : > { %v756_v25 = vsel %vm6339_vm2, %v751_v31, %v755_v10  ;;  %v730_v40 = vor.u32 %v729_v32, %v726_v14  ;;  %v739_v41 = vrot.slane %v737_v33, 4  ;;  %v791_v45 = vshrl.u32 %v245_v20, 16  ;;  %v248_v32 = vld [vmem:[%s6329_s19 + $0xc8] sm:$0xf] }
  0x5c   : > { %10663 = vst [vmem:[#allocation16_spill] sm:$0xff] %v6529_v35  ;;  %2894 = vrot.lane.b32.xlu0 %v6529_v35, %s6277_s20  ;;  %v766_v19 = vsel %vm6339_vm2, %v761_v36, %v765_v26  ;;  %v6539_v47 = vrot.slane %v787_v39, 5  ;;  %v797_v48 = vshll.u32 %v246_v34, 16  ;;  %v801_v49 = vshrl.u32 %v246_v34, 16  ;;  %v7352_v35 = vld [vmem:[%s6329_s19 + $0x98] sm:$0xf] }
  0x5d   : > { %v6541_v51 = vcombine.low %v756_v25, %v766_v19  ;;  %v731_v55 = vrot.slane %v730_v40, 4  ;;  %v740_v56 = vor.u32 %v739_v41, %v735_v38  ;;  %v793_v57 = vrot.slane %v791_v45, 4  ;;  %v249_v41 = vld [vmem:[%s6329_s19 + $0xcc] sm:$0xf] }
  0x5e   : > { %v799_v59 = vrot.slane %v797_v48, 5  ;;  %v803_v60 = vrot.slane %v801_v49, 4  ;;  %v807_v61 = vshll.u32 %v247_v42, 16  ;;  %v768_v62 = vshrl.u32 %v243_v46, 16 }
  0x5f   : > { %10664 = vst [vmem:[#allocation17_spill] sm:$0xff] %v6541_v51  ;;  %2900 = vrot.lane.b32.xlu1 %v6541_v51, %s6277_s20  ;;  %v736_v63 = vsel %vm6339_vm2, %v731_v55, %v735_v38  ;;  %v741_v37 = vrot.slane %v740_v56, 4  ;;  %v794_v1 = vor.u32 %v793_v57, %v6539_v47  ;;  %v771_v2 = vshll.u32 %v243_v46, 16  ;;  %v255_v57 = vld [vmem:[%s6329_s19 + $0xe4] sm:$0xf] }
  0x60   : > { %v804_v5 = vor.u32 %v803_v60, %v799_v59  ;;  %v809_v8 = vrot.slane %v807_v61, 5  ;;  %v770_v9 = vrot.slane %v768_v62, 4  ;;  %v777_v10 = vshll.u32 %v244_v58, 16 }
  0x61   : > { %v746_v11 = vsel %vm6339_vm2, %v741_v37, %v6514_v0  ;;  %v795_v12 = vrot.slane %v794_v1, 4  ;;  %v773_v13 = vrot.slane %v771_v2, 5  ;;  %v781_v15 = vshrl.u32 %v244_v58, 16  ;;  %v256_v2 = vld [vmem:[%s6329_s19 + $0xe8] sm:$0xf] }
  0x62   : > { %v6554_v18 = vcombine.low %v736_v63, %v746_v11  ;;  %v805_v50 = vrot.slane %v804_v5, 4  ;;  %v779_v20 = vrot.slane %v777_v10, 5  ;;  %v831_v21 = vshll.u32 %v250_v4, 16 }
  0x63   : > { %v800_v26 = vsel %vm6339_vm2, %v795_v12, %v799_v59  ;;  %v774_v14 = vor.u32 %v773_v13, %v770_v9  ;;  %v783_v28 = vrot.slane %v781_v15, 4  ;;  %v835_v31 = vshrl.u32 %v250_v4, 16  ;;  %v257_v13 = vld [vmem:[%s6329_s19 + $0xec] sm:$0x1] }
  0x64   : > { %10665 = vst [vmem:[#allocation18_spill] sm:$0xff] %v6554_v18  ;;  %2898 = vrot.lane.b32.xlu0 %v6554_v18, %s6277_s20  ;;  %v810_v0 = vsel %vm6339_vm2, %v805_v50, %v809_v8  ;;  %v6564_v33 = vrot.slane %v831_v21, 5  ;;  %v841_v34 = vshll.u32 %v251_v17, 16  ;;  %v845_v36 = vshrl.u32 %v251_v17, 16  ;;  %v253_v17 = vld [vmem:[%s6329_s19 + $0xdc] sm:$0xf] }
  0x65   : > { %v6566_v38 = vcombine.low %v800_v26, %v810_v0  ;;  %v775_v39 = vrot.slane %v774_v14, 4  ;;  %v784_v25 = vor.u32 %v783_v28, %v779_v20  ;;  %v837_v40 = vrot.slane %v835_v31, 4  ;;  %v254_v31 = vld [vmem:[%s6329_s19 + $0xe0] sm:$0xf]  ;;  %v349_v18 = vld [vmem:[%s6329_s19 + $0x25c] sm:$0xf] }
  0x66   : > { %v843_v42 = vrot.slane %v841_v34, 5  ;;  %v847_v45 = vrot.slane %v845_v36, 4  ;;  %v851_v46 = vshll.u32 %v252_v29, 16  ;;  %v812_v19 = vshrl.u32 %v248_v32, 16 }
  0x67   : > { %10666 = vst [vmem:[#allocation19_spill] sm:$0xff] %v6566_v38  ;;  %2904 = vrot.lane.b32.xlu1 %v6566_v38, %s6277_s20  ;;  %v780_v48 = vsel %vm6339_vm2, %v775_v39, %v779_v20  ;;  %v785_v49 = vrot.slane %v784_v25, 4  ;;  %v838_v55 = vor.u32 %v837_v40, %v6564_v33  ;;  %v815_v56 = vshll.u32 %v248_v32, 16 }
  0x68   : > { %v848_v58 = vor.u32 %v847_v45, %v843_v42  ;;  %v853_v59 = vrot.slane %v851_v46, 5  ;;  %v814_v60 = vrot.slane %v812_v19, 4  ;;  %v821_v61 = vshll.u32 %v249_v41, 16 }
  0x69   : > { %v790_v62 = vsel %vm6339_vm2, %v785_v49, %v6539_v47  ;;  %v839_v63 = vrot.slane %v838_v55, 4  ;;  %v817_v37 = vrot.slane %v815_v56, 5  ;;  %v825_v1 = vshrl.u32 %v249_v41, 16 }
  0x6a   : > { %v6579_v4 = vcombine.low %v780_v48, %v790_v62  ;;  %v849_v5 = vrot.slane %v848_v58, 4  ;;  %v823_v8 = vrot.slane %v821_v61, 5  ;;  %v875_v9 = vshll.u32 %v255_v57, 16  ;;  %v261_v58 = vld [vmem:[%s6329_s19 + $0xfc] sm:$0xf] }
  0x6b   : > { %v844_v10 = vsel %vm6339_vm2, %v839_v63, %v843_v42  ;;  %v818_v11 = vor.u32 %v817_v37, %v814_v60  ;;  %v827_v12 = vrot.slane %v825_v1, 4  ;;  %v879_v15 = vshrl.u32 %v255_v57, 16  ;;  %v260_v42 = vld [vmem:[%s6329_s19 + $0xf8] sm:$0xf] }
  0x6c   : > { %10667 = vst [vmem:[#allocation20_spill] sm:$0xff] %v6579_v4  ;;  %2902 = vrot.lane.b32.xlu0 %v6579_v4, %s6277_s20  ;;  %v854_v47 = vsel %vm6339_vm2, %v849_v5, %v853_v59  ;;  %v6589_v50 = vrot.slane %v875_v9, 5  ;;  %v885_v20 = vshll.u32 %v256_v2, 16  ;;  %v889_v21 = vshrl.u32 %v256_v2, 16  ;;  %v262_v2 = vld [vmem:[%s6329_s19 + $0x100] sm:$0x1] }
  0x6d   : > { %v6591_v26 = vcombine.low %v844_v10, %v854_v47  ;;  %v819_v14 = vrot.slane %v818_v11, 4  ;;  %v828_v28 = vor.u32 %v827_v12, %v823_v8  ;;  %v881_v29 = vrot.slane %v879_v15, 4  ;;  %v259_v47 = vld [vmem:[%s6329_s19 + $0xf4] sm:$0xf]  ;;  %v6124_v4 = vld [vmem:[%s6329_s19 + $0x13c] sm:$0x1] }
  0x6e   : > { %v887_v32 = vrot.slane %v885_v20, 5  ;;  %v891_v0 = vrot.slane %v889_v21, 4  ;;  %v895_v34 = vshll.u32 %v257_v13, 16  ;;  %v856_v36 = vshrl.u32 %v253_v17, 16 }
  0x6f   : > { %10668 = vst [vmem:[#allocation21_spill] sm:$0xff] %v6591_v26  ;;  %2908 = vrot.lane.b32.xlu1 %v6591_v26, %s6277_s20  ;;  %v824_v39 = vsel %vm6339_vm2, %v819_v14, %v823_v8  ;;  %v829_v25 = vrot.slane %v828_v28, 4  ;;  %v882_v40 = vor.u32 %v881_v29, %v6589_v50  ;;  %v859_v41 = vshll.u32 %v253_v17, 16  ;;  %v258_v8 = vld [vmem:[%s6329_s19 + $0xf0] sm:$0xf] }
  0x70   : > { %v892_v45 = vor.u32 %v891_v0, %v887_v32  ;;  %v897_v46 = vrot.slane %v895_v34, 5  ;;  %v858_v19 = vrot.slane %v856_v36, 4  ;;  %v865_v48 = vshll.u32 %v254_v31, 16  ;;  %v265_v34 = vld [vmem:[%s6329_s19 + $0x10c] sm:$0xf] }
  0x71   : > { %v834_v49 = vsel %vm6339_vm2, %v829_v25, %v6564_v33  ;;  %v883_v55 = vrot.slane %v882_v40, 4  ;;  %v861_v56 = vrot.slane %v859_v41, 5  ;;  %v869_v57 = vshrl.u32 %v254_v31, 16  ;;  %v6114_v26 = vld [vmem:[%s6329_s19 + $0x114] sm:$0x1] }
  0x72   : > { %v6604_v59 = vcombine.low %v824_v39, %v834_v49  ;;  %v893_v60 = vrot.slane %v892_v45, 4  ;;  %v867_v61 = vrot.slane %v865_v48, 5  ;;  %v919_v62 = vshll.u32 %v260_v42, 16 }
  0x73   : > { %v888_v63 = vsel %vm6339_vm2, %v883_v55, %v887_v32  ;;  %v862_v37 = vor.u32 %v861_v56, %v858_v19  ;;  %v871_v1 = vrot.slane %v869_v57, 4  ;;  %v923_v5 = vshrl.u32 %v260_v42, 16  ;;  %v266_v19 = vld [vmem:[%s6329_s19 + $0x110] sm:$0xf] }
  0x74   : > { %10669 = vst [vmem:[#allocation22_spill] sm:$0xff] %v6604_v59  ;;  %2906 = vrot.lane.b32.xlu0 %v6604_v59, %s6277_s20  ;;  %v898_v33 = vsel %vm6339_vm2, %v893_v60, %v897_v46  ;;  %v6614_v9 = vrot.slane %v919_v62, 5  ;;  %v929_v10 = vshll.u32 %v261_v58, 16  ;;  %v933_v11 = vshrl.u32 %v261_v58, 16 }
  0x75   : > { %v6616_v12 = vcombine.low %v888_v63, %v898_v33  ;;  %v863_v13 = vrot.slane %v862_v37, 4  ;;  %v872_v15 = vor.u32 %v871_v1, %v867_v61  ;;  %v925_v17 = vrot.slane %v923_v5, 4  ;;  %v263_v63 = vld [vmem:[%s6329_s19 + $0x104] sm:$0xf] }
  0x76   : > { %v931_v20 = vrot.slane %v929_v10, 5  ;;  %v935_v21 = vrot.slane %v933_v11, 4  ;;  %v939_v14 = vshll.u32 %v262_v2, 16  ;;  %v900_v28 = vshrl.u32 %v258_v8, 16  ;;  %v264_v11 = vld [vmem:[%s6329_s19 + $0x108] sm:$0xf] }
  0x77   : > { %10670 = vst [vmem:[#allocation23_spill] sm:$0xff] %v6616_v12  ;;  %2912 = vrot.lane.b32.xlu1 %v6616_v12, %s6277_s20  ;;  %v868_v29 = vsel %vm6339_vm2, %v863_v13, %v867_v61  ;;  %v873_v31 = vrot.slane %v872_v15, 4  ;;  %v926_v32 = vor.u32 %v925_v17, %v6614_v9  ;;  %v903_v0 = vshll.u32 %v258_v8, 16  ;;  %v267_v61 = vld [vmem:[%s6329_s19 + $0x114] sm:$0x1] }
  0x78   : > { %v936_v36 = vor.u32 %v935_v21, %v931_v20  ;;  %v941_v39 = vrot.slane %v939_v14, 5  ;;  %v902_v25 = vrot.slane %v900_v28, 4  ;;  %v909_v40 = vshll.u32 %v259_v47, 16  ;;  %v7515_v12 = vld [vmem:[%s6329_s19 + $0xdc] sm:$0xf] }
  0x79   : > { %v878_v41 = vsel %vm6339_vm2, %v873_v31, %v6589_v50  ;;  %v927_v42 = vrot.slane %v926_v32, 4  ;;  %v905_v45 = vrot.slane %v903_v0, 5  ;;  %v913_v46 = vshrl.u32 %v259_v47, 16 }
  0x7a   : > { %v6629_v48 = vcombine.low %v868_v29, %v878_v41  ;;  %v937_v49 = vrot.slane %v936_v36, 4  ;;  %v911_v55 = vrot.slane %v909_v40, 5  ;;  %v963_v56 = vshll.u32 %v265_v34, 16  ;;  %v270_v29 = vld [vmem:[%s6329_s19 + $0x120] sm:$0xf] }
  0x7b   : > { %v932_v57 = vsel %vm6339_vm2, %v927_v42, %v931_v20  ;;  %v906_v58 = vor.u32 %v905_v45, %v902_v25  ;;  %v915_v60 = vrot.slane %v913_v46, 4  ;;  %v967_v62 = vshrl.u32 %v265_v34, 16  ;;  %v271_v41 = vld [vmem:[%s6329_s19 + $0x124] sm:$0xf] }
  0x7c   : > { %10671 = vst [vmem:[#allocation24_spill] sm:$0xff] %v6629_v48  ;;  %2910 = vrot.lane.b32.xlu0 %v6629_v48, %s6277_s20  ;;  %v942_v50 = vsel %vm6339_vm2, %v937_v49, %v941_v39  ;;  %v6639_v37 = vrot.slane %v963_v56, 5  ;;  %v973_v1 = vshll.u32 %v266_v19, 16  ;;  %v977_v2 = vshrl.u32 %v266_v19, 16 }
  0x7d   : > { %v6641_v5 = vcombine.low %v932_v57, %v942_v50  ;;  %v907_v8 = vrot.slane %v906_v58, 4  ;;  %v916_v33 = vor.u32 %v915_v60, %v911_v55  ;;  %v969_v10 = vrot.slane %v967_v62, 4  ;;  %v272_v57 = vld [vmem:[%s6329_s19 + $0x128] sm:$0x1]  ;;  %v268_v60 = vld [vmem:[%s6329_s19 + $0x118] sm:$0xf] }
  0x7e   : > { %v975_v13 = vrot.slane %v973_v1, 5  ;;  %v979_v15 = vrot.slane %v977_v2, 4  ;;  %v983_v17 = vshll.u32 %v267_v61, 16  ;;  %v944_v47 = vshrl.u32 %v263_v63, 16 }
  0x7f   : > { %10672 = vst [vmem:[#allocation25_spill] sm:$0xff] %v6641_v5  ;;  %2916 = vrot.lane.b32.xlu1 %v6641_v5, %s6277_s20  ;;  %v912_v20 = vsel %vm6339_vm2, %v907_v8, %v911_v55  ;;  %v917_v21 = vrot.slane %v916_v33, 4  ;;  %v970_v14 = vor.u32 %v969_v10, %v6639_v37  ;;  %v947_v28 = vshll.u32 %v263_v63, 16  ;;  %v269_v33 = vld [vmem:[%s6329_s19 + $0x11c] sm:$0xf] }
  0x80   : > { %v980_v31 = vor.u32 %v979_v15, %v975_v13  ;;  %v985_v32 = vrot.slane %v983_v17, 5  ;;  %v946_v0 = vrot.slane %v944_v47, 4  ;;  %v953_v34 = vshll.u32 %v264_v11, 16 }
  0x81   : > { %v922_v36 = vsel %vm6339_vm2, %v917_v21, %v6614_v9  ;;  %v971_v39 = vrot.slane %v970_v14, 4  ;;  %v949_v25 = vrot.slane %v947_v28, 5  ;;  %v957_v40 = vshrl.u32 %v264_v11, 16  ;;  %v275_v14 = vld [vmem:[%s6329_s19 + $0x134] sm:$0xf] }
  0x82   : > { %v6654_v42 = vcombine.low %v912_v20, %v922_v36  ;;  %v981_v45 = vrot.slane %v980_v31, 4  ;;  %v955_v46 = vrot.slane %v953_v34, 5  ;;  %v1007_v19 = vshll.u32 %v270_v29, 16 }
  0x83   : > { %v976_v49 = vsel %vm6339_vm2, %v971_v39, %v975_v13  ;;  %v950_v55 = vor.u32 %v949_v25, %v946_v0  ;;  %v959_v56 = vrot.slane %v957_v40, 4  ;;  %v1011_v58 = vshrl.u32 %v270_v29, 16  ;;  %v276_v25 = vld [vmem:[%s6329_s19 + $0x138] sm:$0xf] }
  0x84   : > { %10673 = vst [vmem:[#allocation26_spill] sm:$0xff] %v6654_v42  ;;  %2914 = vrot.lane.b32.xlu0 %v6654_v42, %s6277_s20  ;;  %v986_v9 = vsel %vm6339_vm2, %v981_v45, %v985_v32  ;;  %v6664_v61 = vrot.slane %v1007_v19, 5  ;;  %v1017_v62 = vshll.u32 %v271_v41, 16  ;;  %v1021_v63 = vshrl.u32 %v271_v41, 16 }
  0x85   : > { %v6666_v50 = vcombine.low %v976_v49, %v986_v9  ;;  %v951_v1 = vrot.slane %v950_v55, 4  ;;  %v960_v2 = vor.u32 %v959_v56, %v955_v46  ;;  %v1013_v8 = vrot.slane %v1011_v58, 4  ;;  %v277_v56 = vld [vmem:[%s6329_s19 + $0x13c] sm:$0x1]  ;;  %v273_v58 = vld [vmem:[%s6329_s19 + $0x12c] sm:$0xf] }
  0x86   : > { %v1019_v10 = vrot.slane %v1017_v62, 5  ;;  %v1023_v11 = vrot.slane %v1021_v63, 4  ;;  %v1027_v13 = vshll.u32 %v272_v57, 16  ;;  %v988_v15 = vshrl.u32 %v268_v60, 16 }
  0x87   : > { %10674 = vst [vmem:[#allocation27_spill] sm:$0xff] %v6666_v50  ;;  %2920 = vrot.lane.b32.xlu1 %v6666_v50, %s6277_s20  ;;  %v956_v17 = vsel %vm6339_vm2, %v951_v1, %v955_v46  ;;  %v961_v47 = vrot.slane %v960_v2, 4  ;;  %v1014_v20 = vor.u32 %v1013_v8, %v6664_v61  ;;  %v991_v21 = vshll.u32 %v268_v60, 16 }
  0x88   : > { %v1024_v28 = vor.u32 %v1023_v11, %v1019_v10  ;;  %v1029_v29 = vrot.slane %v1027_v13, 5  ;;  %v990_v31 = vrot.slane %v988_v15, 4  ;;  %v997_v32 = vshll.u32 %v269_v33, 16 }
  0x89   : > { %v966_v0 = vsel %vm6339_vm2, %v961_v47, %v6639_v37  ;;  %v1015_v34 = vrot.slane %v1014_v20, 4  ;;  %v993_v36 = vrot.slane %v991_v21, 5  ;;  %v1001_v39 = vshrl.u32 %v269_v33, 16  ;;  %v274_v33 = vld [vmem:[%s6329_s19 + $0x130] sm:$0xf] }
  0x8a   : > { %v6679_v40 = vcombine.low %v956_v17, %v966_v0  ;;  %v1025_v41 = vrot.slane %v1024_v28, 4  ;;  %v999_v45 = vrot.slane %v997_v32, 5  ;;  %v1051_v46 = vshll.u32 %v275_v14, 16 }
  0x8b   : > { %v1020_v19 = vsel %vm6339_vm2, %v1015_v34, %v1019_v10  ;;  %v994_v49 = vor.u32 %v993_v36, %v990_v31  ;;  %v1003_v55 = vrot.slane %v1001_v39, 4  ;;  %v1055_v57 = vshrl.u32 %v275_v14, 16  ;;  %v280_v14 = vld [vmem:[%s6329_s19 + $0x148] sm:$0xf] }
  0x8c   : > { %10675 = vst [vmem:[#allocation28_spill] sm:$0xff] %v6679_v40  ;;  %2918 = vrot.lane.b32.xlu0 %v6679_v40, %s6277_s20  ;;  %v1030_v37 = vsel %vm6339_vm2, %v1025_v41, %v1029_v29  ;;  %v6689_v60 = vrot.slane %v1051_v46, 5  ;;  %v1061_v9 = vshll.u32 %v276_v25, 16  ;;  %v1065_v62 = vshrl.u32 %v276_v25, 16  ;;  %v281_v25 = vld [vmem:[%s6329_s19 + $0x14c] sm:$0xf] }
  0x8d   : > { %v6691_v63 = vcombine.low %v1020_v19, %v1030_v37  ;;  %v995_v1 = vrot.slane %v994_v49, 4  ;;  %v1004_v2 = vor.u32 %v1003_v55, %v999_v45  ;;  %v1057_v8 = vrot.slane %v1055_v57, 4  ;;  %v282_v57 = vld [vmem:[%s6329_s19 + $0x150] sm:$0x1]  ;;  %v278_v37 = vld [vmem:[%s6329_s19 + $0x140] sm:$0xf] }
  0x8e   : > { %v1063_v10 = vrot.slane %v1061_v9, 5  ;;  %v1067_v11 = vrot.slane %v1065_v62, 4  ;;  %v1071_v13 = vshll.u32 %v277_v56, 16  ;;  %v1032_v15 = vshrl.u32 %v273_v58, 16 }
  0x8f   : > { %10676 = vst [vmem:[#allocation29_spill] sm:$0xff] %v6691_v63  ;;  %2924 = vrot.lane.b32.xlu1 %v6691_v63, %s6277_s20  ;;  %v1000_v17 = vsel %vm6339_vm2, %v995_v1, %v999_v45  ;;  %v1005_v47 = vrot.slane %v1004_v2, 4  ;;  %v1058_v20 = vor.u32 %v1057_v8, %v6689_v60  ;;  %v1035_v21 = vshll.u32 %v273_v58, 16 }
  0x90   : > { %v1068_v28 = vor.u32 %v1067_v11, %v1063_v10  ;;  %v1073_v29 = vrot.slane %v1071_v13, 5  ;;  %v1034_v31 = vrot.slane %v1032_v15, 4  ;;  %v1041_v32 = vshll.u32 %v274_v33, 16  ;;  %v279_v11 = vld [vmem:[%s6329_s19 + $0x144] sm:$0xf] }
  0x91   : > { %v1010_v0 = vsel %vm6339_vm2, %v1005_v47, %v6664_v61  ;;  %v1059_v34 = vrot.slane %v1058_v20, 4  ;;  %v1037_v36 = vrot.slane %v1035_v21, 5  ;;  %v1045_v39 = vshrl.u32 %v274_v33, 16 }
  0x92   : > { %v6704_v41 = vcombine.low %v1000_v17, %v1010_v0  ;;  %v1069_v45 = vrot.slane %v1068_v28, 4  ;;  %v1043_v46 = vrot.slane %v1041_v32, 5  ;;  %v1095_v19 = vshll.u32 %v280_v14, 16 }
  0x93   : > { %v1064_v49 = vsel %vm6339_vm2, %v1059_v34, %v1063_v10  ;;  %v1038_v55 = vor.u32 %v1037_v36, %v1034_v31  ;;  %v1047_v56 = vrot.slane %v1045_v39, 4  ;;  %v1099_v58 = vshrl.u32 %v280_v14, 16 }
  0x94   : > { %10677 = vst [vmem:[#allocation30_spill] sm:$0xff] %v6704_v41  ;;  %2922 = vrot.lane.b32.xlu0 %v6704_v41, %s6277_s20  ;;  %v1074_v61 = vsel %vm6339_vm2, %v1069_v45, %v1073_v29  ;;  %v6714_v9 = vrot.slane %v1095_v19, 5  ;;  %v1105_v62 = vshll.u32 %v281_v25, 16  ;;  %v1109_v1 = vshrl.u32 %v281_v25, 16  ;;  %v285_v29 = vld [vmem:[%s6329_s19 + $0x15c] sm:$0xf] }
  0x95   : > { %v6716_v2 = vcombine.low %v1064_v49, %v1074_v61  ;;  %v1039_v8 = vrot.slane %v1038_v55, 4  ;;  %v1048_v33 = vor.u32 %v1047_v56, %v1043_v46  ;;  %v1101_v10 = vrot.slane %v1099_v58, 4  ;;  %v286_v19 = vld [vmem:[%s6329_s19 + $0x160] sm:$0xf]  ;;  %v287_v61 = vld [vmem:[%s6329_s19 + $0x164] sm:$0x1] }
  0x96   : > { %v1107_v13 = vrot.slane %v1105_v62, 5  ;;  %v1111_v15 = vrot.slane %v1109_v1, 4  ;;  %v1115_v17 = vshll.u32 %v282_v57, 16  ;;  %v1076_v47 = vshrl.u32 %v278_v37, 16 }
  0x97   : > { %10678 = vst [vmem:[#allocation31_spill] sm:$0xff] %v6716_v2  ;;  %2928 = vrot.lane.b32.xlu1 %v6716_v2, %s6277_s20  ;;  %v1044_v20 = vsel %vm6339_vm2, %v1039_v8, %v1043_v46  ;;  %v1049_v21 = vrot.slane %v1048_v33, 4  ;;  %v1102_v14 = vor.u32 %v1101_v10, %v6714_v9  ;;  %v1079_v28 = vshll.u32 %v278_v37, 16  ;;  %v283_v10 = vld [vmem:[%s6329_s19 + $0x154] sm:$0xf] }
  0x98   : > { %v1112_v31 = vor.u32 %v1111_v15, %v1107_v13  ;;  %v1117_v32 = vrot.slane %v1115_v17, 5  ;;  %v1078_v0 = vrot.slane %v1076_v47, 4  ;;  %v1085_v34 = vshll.u32 %v279_v11, 16  ;;  %v284_v47 = vld [vmem:[%s6329_s19 + $0x158] sm:$0xf] }
  0x99   : > { %v1054_v36 = vsel %vm6339_vm2, %v1049_v21, %v6689_v60  ;;  %v1103_v39 = vrot.slane %v1102_v14, 4  ;;  %v1081_v25 = vrot.slane %v1079_v28, 5  ;;  %v1089_v45 = vshrl.u32 %v279_v11, 16 }
  0x9a   : > { %v6729_v46 = vcombine.low %v1044_v20, %v1054_v36  ;;  %v1113_v49 = vrot.slane %v1112_v31, 4  ;;  %v1087_v55 = vrot.slane %v1085_v34, 5  ;;  %v1139_v56 = vshll.u32 %v285_v29, 16 }
  0x9b   : > { %v1108_v57 = vsel %vm6339_vm2, %v1103_v39, %v1107_v13  ;;  %v1082_v58 = vor.u32 %v1081_v25, %v1078_v0  ;;  %v1091_v37 = vrot.slane %v1089_v45, 4  ;;  %v1143_v62 = vshrl.u32 %v285_v29, 16  ;;  %v290_v25 = vld [vmem:[%s6329_s19 + $0x170] sm:$0xf] }
  0x9c   : > { %10679 = vst [vmem:[#allocation32_spill] sm:$0xff] %v6729_v46  ;;  %2926 = vrot.lane.b32.xlu0 %v6729_v46, %s6277_s20  ;;  %v1118_v60 = vsel %vm6339_vm2, %v1113_v49, %v1117_v32  ;;  %v6738_v1 = vrot.slane %v1139_v56, 5  ;;  %v1149_v8 = vshll.u32 %v286_v19, 16  ;;  %v1153_v33 = vshrl.u32 %v286_v19, 16  ;;  %v7342_v46 = vld [vmem:[%s6329_s19 + $0x7c] sm:$0xf] }
  0x9d   : > { %v6741_v11 = vcombine.low %v1108_v57, %v1118_v60  ;;  %v1083_v15 = vrot.slane %v1082_v58, 4  ;;  %v1092_v13 = vor.u32 %v1091_v37, %v1087_v55  ;;  %v1145_v17 = vrot.slane %v1143_v62, 4  ;;  %v291_v57 = vld [vmem:[%s6329_s19 + $0x174] sm:$0xf] }
  0x9e   : > { %v1151_v20 = vrot.slane %v1149_v8, 5  ;;  %v1155_v21 = vrot.slane %v1153_v33, 4  ;;  %v1159_v14 = vshll.u32 %v287_v61, 16  ;;  %v1120_v32 = vshrl.u32 %v283_v10, 16  ;;  %v292_v8 = vld [vmem:[%s6329_s19 + $0x178] sm:$0x1] }
  0x9f   : > { %10680 = vst [vmem:[#allocation33_spill] sm:$0xff] %v6741_v11  ;;  %2932 = vrot.lane.b32.xlu1 %v6741_v11, %s6277_s20  ;;  %v1088_v28 = vsel %vm6339_vm2, %v1083_v15, %v1087_v55  ;;  %v1093_v29 = vrot.slane %v1092_v13, 4  ;;  %v1146_v31 = vor.u32 %v1145_v17, %v6738_v1  ;;  %v1123_v36 = vshll.u32 %v283_v10, 16 }
  0xa0   : > { %v1156_v0 = vor.u32 %v1155_v21, %v1151_v20  ;;  %v1161_v34 = vrot.slane %v1159_v14, 5  ;;  %v1129_v39 = vshll.u32 %v284_v47, 16  ;;  %v1122_v49 = vrot.slane %v1120_v32, 4 }
  0xa1   : > { %v1098_v45 = vsel %vm6339_vm2, %v1093_v29, %v6714_v9  ;;  %v1147_v19 = vrot.slane %v1146_v31, 4  ;;  %v1133_v56 = vshrl.u32 %v284_v47, 16  ;;  %v1125_v37 = vrot.slane %v1123_v36, 5  ;;  %v288_v47 = vld [vmem:[%s6329_s19 + $0x168] sm:$0xf] }
  0xa2   : > { %v6754_v55 = vcombine.low %v1088_v28, %v1098_v45  ;;  %v1157_v58 = vrot.slane %v1156_v0, 4  ;;  %v1131_v61 = vrot.slane %v1129_v39, 5  ;;  %v1183_v33 = vshll.u32 %v290_v25, 16  ;;  %v289_v36 = vld [vmem:[%s6329_s19 + $0x16c] sm:$0xf] }
  0xa3   : > { %v1152_v62 = vsel %vm6339_vm2, %v1147_v19, %v1151_v20  ;;  %v1135_v60 = vrot.slane %v1133_v56, 4  ;;  %v1187_v10 = vshrl.u32 %v290_v25, 16  ;;  %v1126_v15 = vor.u32 %v1125_v37, %v1122_v49 }
  0xa4   : > { %10681 = vst [vmem:[#allocation34_spill] sm:$0xff] %v6754_v55  ;;  %2930 = vrot.lane.b32.xlu0 %v6754_v55, %s6277_s20  ;;  %v1162_v9 = vsel %vm6339_vm2, %v1157_v58, %v1161_v34  ;;  %v1193_v13 = vshll.u32 %v291_v57, 16  ;;  %v1197_v17 = vshrl.u32 %v291_v57, 16  ;;  %v6766_v20 = vrot.slane %v1183_v33, 5  ;;  %v295_v57 = vld [vmem:[%s6329_s19 + $0x184] sm:$0xf] }
  0xa5   : > { %v6764_v21 = vcombine.low %v1152_v62, %v1162_v9  ;;  %v1136_v14 = vor.u32 %v1135_v60, %v1131_v61  ;;  %v1189_v28 = vrot.slane %v1187_v10, 4  ;;  %v1127_v29 = vrot.slane %v1126_v15, 4 }
  0xa6   : > { %v1195_v31 = vrot.slane %v1193_v13, 5  ;;  %v1199_v32 = vrot.slane %v1197_v17, 4  ;;  %v1203_v0 = vshll.u32 %v292_v8, 16  ;;  %v1164_v25 = vshrl.u32 %v288_v47, 16  ;;  %v296_v8 = vld [vmem:[%s6329_s19 + $0x188] sm:$0xf] }
  0xa7   : > { %10682 = vst [vmem:[#allocation35_spill] sm:$0xff] %v6764_v21  ;;  %2936 = vrot.lane.b32.xlu1 %v6764_v21, %s6277_s20  ;;  %v1137_v34 = vrot.slane %v1136_v14, 4  ;;  %v1190_v39 = vor.u32 %v1189_v28, %v6766_v20  ;;  %v1132_v45 = vsel %vm6339_vm2, %v1127_v29, %v1131_v61  ;;  %v1167_v56 = vshll.u32 %v288_v47, 16  ;;  %v297_v17 = vld [vmem:[%s6329_s19 + $0x18c] sm:$0x1] }
  0xa8   : > { %v1200_v19 = vor.u32 %v1199_v32, %v1195_v31  ;;  %v1205_v49 = vrot.slane %v1203_v0, 5  ;;  %v1166_v62 = vrot.slane %v1164_v25, 4  ;;  %v1173_v60 = vshll.u32 %v289_v36, 16  ;;  %v293_v0 = vld [vmem:[%s6329_s19 + $0x17c] sm:$0xf] }
  0xa9   : > { %v1142_v58 = vsel %vm6339_vm2, %v1137_v34, %v6738_v1  ;;  %v1191_v37 = vrot.slane %v1190_v39, 4  ;;  %v1169_v9 = vrot.slane %v1167_v56, 5  ;;  %v1177_v15 = vshrl.u32 %v289_v36, 16  ;;  %v332_v21 = vld [vmem:[%s6329_s19 + $0x218] sm:$0x1] }
  0xaa   : > { %v6779_v33 = vcombine.low %v1132_v45, %v1142_v58  ;;  %v1201_v10 = vrot.slane %v1200_v19, 4  ;;  %v1175_v13 = vrot.slane %v1173_v60, 5  ;;  %v1227_v47 = vshll.u32 %v295_v57, 16 }
  0xab   : > { %v1196_v61 = vsel %vm6339_vm2, %v1191_v37, %v1195_v31  ;;  %v1231_v14 = vshrl.u32 %v295_v57, 16  ;;  %v1170_v28 = vor.u32 %v1169_v9, %v1166_v62  ;;  %v1179_v29 = vrot.slane %v1177_v15, 4  ;;  %v294_v57 = vld [vmem:[%s6329_s19 + $0x180] sm:$0xf]  ;;  %v300_v62 = vld [vmem:[%s6329_s19 + $0x198] sm:$0xf] }
  0xac   : > { %10683 = vst [vmem:[#allocation36_spill] sm:$0xff] %v6779_v33  ;;  %2934 = vrot.lane.b32.xlu0 %v6779_v33, %s6277_s20  ;;  %v1206_v1 = vsel %vm6339_vm2, %v1201_v10, %v1205_v49  ;;  %v1237_v32 = vshll.u32 %v296_v8, 16  ;;  %v6791_v34 = vrot.slane %v1227_v47, 5  ;;  %v1241_v39 = vshrl.u32 %v296_v8, 16 }
  0xad   : > { %v6789_v36 = vcombine.low %v1196_v61, %v1206_v1  ;;  %v1233_v31 = vrot.slane %v1231_v14, 4  ;;  %v1171_v25 = vrot.slane %v1170_v28, 4  ;;  %v1180_v45 = vor.u32 %v1179_v29, %v1175_v13  ;;  %v301_v14 = vld [vmem:[%s6329_s19 + $0x19c] sm:$0xf] }
  0xae   : > { %v1239_v19 = vrot.slane %v1237_v32, 5  ;;  %v1247_v56 = vshll.u32 %v297_v17, 16  ;;  %v1243_v58 = vrot.slane %v1241_v39, 4  ;;  %v1208_v37 = vshrl.u32 %v293_v0, 16  ;;  %v302_v32 = vld [vmem:[%s6329_s19 + $0x1a0] sm:$0x1] }
  0xaf   : > { %10684 = vst [vmem:[#allocation37_spill] sm:$0xff] %v6789_v36  ;;  %2940 = vrot.lane.b32.xlu1 %v6789_v36, %s6277_s20  ;;  %v1234_v49 = vor.u32 %v1233_v31, %v6791_v34  ;;  %v1176_v60 = vsel %vm6339_vm2, %v1171_v25, %v1175_v13  ;;  %v1181_v10 = vrot.slane %v1180_v45, 4  ;;  %v1211_v9 = vshll.u32 %v293_v0, 16 }
  0xb0   : > { %v1249_v8 = vrot.slane %v1247_v56, 5  ;;  %v1244_v61 = vor.u32 %v1243_v58, %v1239_v19  ;;  %v1210_v47 = vrot.slane %v1208_v37, 4  ;;  %v1217_v17 = vshll.u32 %v294_v57, 16 }
  0xb1   : > { %v1235_v15 = vrot.slane %v1234_v49, 4  ;;  %v1186_v1 = vsel %vm6339_vm2, %v1181_v10, %v6766_v20  ;;  %v1213_v28 = vrot.slane %v1211_v9, 5  ;;  %v1221_v29 = vshrl.u32 %v294_v57, 16  ;;  %v298_v10 = vld [vmem:[%s6329_s19 + $0x190] sm:$0xf] }
  0xb2   : > { %v1271_v31 = vshll.u32 %v300_v62, 16  ;;  %v6805_v39 = vcombine.low %v1176_v60, %v1186_v1  ;;  %v1245_v0 = vrot.slane %v1244_v61, 4  ;;  %v1219_v25 = vrot.slane %v1217_v17, 5 }
  0xb3   : > { %v1240_v13 = vsel %vm6339_vm2, %v1235_v15, %v1239_v19  ;;  %v1214_v45 = vor.u32 %v1213_v28, %v1210_v47  ;;  %v1223_v56 = vrot.slane %v1221_v29, 4  ;;  %v1275_v58 = vshrl.u32 %v300_v62, 16  ;;  %v299_v47 = vld [vmem:[%s6329_s19 + $0x194] sm:$0xf]  ;;  %v305_v28 = vld [vmem:[%s6329_s19 + $0x1ac] sm:$0xf] }
  0xb4   : > { %10685 = vst [vmem:[#allocation38_spill] sm:$0xff] %v6805_v39  ;;  %v6809_v49 = vrot.slane %v1271_v31, 5  ;;  %2938 = vrot.lane.b32.xlu0 %v6805_v39, %s6277_s20  ;;  %v1250_v20 = vsel %vm6339_vm2, %v1245_v0, %v1249_v8  ;;  %v1281_v57 = vshll.u32 %v301_v14, 16  ;;  %v1285_v37 = vshrl.u32 %v301_v14, 16 }
  0xb5   : > { %v1291_v60 = vshll.u32 %v302_v32, 16  ;;  %v6816_v19 = vcombine.low %v1240_v13, %v1250_v20  ;;  %v1215_v9 = vrot.slane %v1214_v45, 4  ;;  %v1224_v15 = vor.u32 %v1223_v56, %v1219_v25 }
  0xb6   : > { %v1277_v61 = vrot.slane %v1275_v58, 4  ;;  %v1283_v17 = vrot.slane %v1281_v57, 5  ;;  %v1287_v1 = vrot.slane %v1285_v37, 4  ;;  %v1252_v32 = vshrl.u32 %v298_v10, 16  ;;  %v306_v57 = vld [vmem:[%s6329_s19 + $0x1b0] sm:$0xf] }
  0xb7   : > { %10686 = vst [vmem:[#allocation39_spill] sm:$0xff] %v6816_v19  ;;  %v1293_v62 = vrot.slane %v1291_v60, 5  ;;  %2944 = vrot.lane.b32.xlu1 %v6816_v19, %s6277_s20  ;;  %v1220_v8 = vsel %vm6339_vm2, %v1215_v9, %v1219_v25  ;;  %v1225_v14 = vrot.slane %v1224_v15, 4  ;;  %v1255_v13 = vshll.u32 %v298_v10, 16 }
  0xb8   : > { %v1278_v29 = vor.u32 %v1277_v61, %v6809_v49  ;;  %v1288_v31 = vor.u32 %v1287_v1, %v1283_v17  ;;  %v1261_v0 = vshll.u32 %v299_v47, 16  ;;  %v1265_v45 = vshrl.u32 %v299_v47, 16  ;;  %v307_v61 = vld [vmem:[%s6329_s19 + $0x1b4] sm:$0x1] }
  0xb9   : > { %v1230_v56 = vsel %vm6339_vm2, %v1225_v14, %v6791_v34  ;;  %v1254_v20 = vrot.slane %v1252_v32, 4  ;;  %v1315_v37 = vshll.u32 %v305_v28, 16  ;;  %v1257_v9 = vrot.slane %v1255_v13, 5  ;;  %v303_v32 = vld [vmem:[%s6329_s19 + $0x1a4] sm:$0xf] }
  0xba   : > { %v1279_v58 = vrot.slane %v1278_v29, 4  ;;  %v6829_v60 = vcombine.low %v1220_v8, %v1230_v56  ;;  %v1289_v25 = vrot.slane %v1288_v31, 4  ;;  %v1263_v15 = vrot.slane %v1261_v0, 5 }
  0xbb   : > { %v1267_v47 = vrot.slane %v1265_v45, 4  ;;  %v6834_v1 = vrot.slane %v1315_v37, 5  ;;  %v1319_v19 = vshrl.u32 %v305_v28, 16  ;;  %v1258_v8 = vor.u32 %v1257_v9, %v1254_v20  ;;  %v304_v45 = vld [vmem:[%s6329_s19 + $0x1a8] sm:$0xf] }
  0xbc   : > { %10687 = vst [vmem:[#allocation40_spill] sm:$0xff] %v6829_v60  ;;  %v1284_v10 = vsel %vm6339_vm2, %v1279_v58, %v1283_v17  ;;  %2942 = vrot.lane.b32.xlu0 %v6829_v60, %s6277_s20  ;;  %v1294_v34 = vsel %vm6339_vm2, %v1289_v25, %v1293_v62  ;;  %v1325_v14 = vshll.u32 %v306_v57, 16  ;;  %v1329_v29 = vshrl.u32 %v306_v57, 16 }
  0xbd   : > { %v6841_v31 = vcombine.low %v1284_v10, %v1294_v34  ;;  %v1268_v13 = vor.u32 %v1267_v47, %v1263_v15  ;;  %v1321_v0 = vrot.slane %v1319_v19, 4  ;;  %v1335_v17 = vshll.u32 %v307_v61, 16  ;;  %v310_v10 = vld [vmem:[%s6329_s19 + $0x1c0] sm:$0xf] }
  0xbe   : > { %v1259_v56 = vrot.slane %v1258_v8, 4  ;;  %v1327_v58 = vrot.slane %v1325_v14, 5  ;;  %v1331_v28 = vrot.slane %v1329_v29, 4  ;;  %v1296_v57 = vshrl.u32 %v303_v32, 16  ;;  %v311_v29 = vld [vmem:[%s6329_s19 + $0x1c4] sm:$0xf] }
  0xbf   : > { %10688 = vst [vmem:[#allocation41_spill] sm:$0xff] %v6841_v31  ;;  %2948 = vrot.lane.b32.xlu1 %v6841_v31, %s6277_s20  ;;  %v1269_v37 = vrot.slane %v1268_v13, 4  ;;  %v1322_v62 = vor.u32 %v1321_v0, %v6834_v1  ;;  %v1337_v20 = vrot.slane %v1335_v17, 5  ;;  %v1299_v19 = vshll.u32 %v303_v32, 16 }
  0xc0   : > { %v1264_v25 = vsel %vm6339_vm2, %v1259_v56, %v1263_v15  ;;  %v1332_v9 = vor.u32 %v1331_v28, %v1327_v58  ;;  %v1305_v61 = vshll.u32 %v304_v45, 16  ;;  %v1298_v8 = vrot.slane %v1296_v57, 4  ;;  %v312_v56 = vld [vmem:[%s6329_s19 + $0x1c8] sm:$0x1]  ;;  %v308_v57 = vld [vmem:[%s6329_s19 + $0x1b8] sm:$0xf] }
  0xc1   : > { %v1274_v47 = vsel %vm6339_vm2, %v1269_v37, %v6809_v49  ;;  %v1323_v34 = vrot.slane %v1322_v62, 4  ;;  %v1309_v14 = vshrl.u32 %v304_v45, 16  ;;  %v1301_v17 = vrot.slane %v1299_v19, 5 }
  0xc2   : > { %v6854_v13 = vcombine.low %v1264_v25, %v1274_v47  ;;  %v1333_v0 = vrot.slane %v1332_v9, 4  ;;  %v1307_v31 = vrot.slane %v1305_v61, 5  ;;  %v1359_v28 = vshll.u32 %v310_v10, 16 }
  0xc3   : > { %v1328_v15 = vsel %vm6339_vm2, %v1323_v34, %v1327_v58  ;;  %v1311_v32 = vrot.slane %v1309_v14, 4  ;;  %v1363_v60 = vshrl.u32 %v310_v10, 16  ;;  %v1302_v45 = vor.u32 %v1301_v17, %v1298_v8  ;;  %v309_v14 = vld [vmem:[%s6329_s19 + $0x1bc] sm:$0xf] }
  0xc4   : > { %10689 = vst [vmem:[#allocation42_spill] sm:$0xff] %v6854_v13  ;;  %2946 = vrot.lane.b32.xlu0 %v6854_v13, %s6277_s20  ;;  %v1338_v49 = vsel %vm6339_vm2, %v1333_v0, %v1337_v20  ;;  %v1369_v37 = vshll.u32 %v311_v29, 16  ;;  %v1373_v62 = vshrl.u32 %v311_v29, 16  ;;  %v6866_v58 = vrot.slane %v1359_v28, 5 }
  0xc5   : > { %v6864_v25 = vcombine.low %v1328_v15, %v1338_v49  ;;  %v1312_v9 = vor.u32 %v1311_v32, %v1307_v31  ;;  %v1365_v19 = vrot.slane %v1363_v60, 4  ;;  %v1303_v61 = vrot.slane %v1302_v45, 4  ;;  %v315_v32 = vld [vmem:[%s6329_s19 + $0x1d4] sm:$0xf] }
  0xc6   : > { %v1371_v47 = vrot.slane %v1369_v37, 5  ;;  %v1375_v10 = vrot.slane %v1373_v62, 4  ;;  %v1379_v34 = vshll.u32 %v312_v56, 16  ;;  %v1340_v29 = vshrl.u32 %v308_v57, 16  ;;  %v316_v37 = vld [vmem:[%s6329_s19 + $0x1d8] sm:$0xf] }
  0xc7   : > { %10690 = vst [vmem:[#allocation43_spill] sm:$0xff] %v6864_v25  ;;  %2952 = vrot.lane.b32.xlu1 %v6864_v25, %s6277_s20  ;;  %v1313_v20 = vrot.slane %v1312_v9, 4  ;;  %v1366_v8 = vor.u32 %v1365_v19, %v6866_v58  ;;  %v1308_v0 = vsel %vm6339_vm2, %v1303_v61, %v1307_v31  ;;  %v1343_v60 = vshll.u32 %v308_v57, 16  ;;  %v317_v57 = vld [vmem:[%s6329_s19 + $0x1dc] sm:$0x1] }
  0xc8   : > { %v1376_v17 = vor.u32 %v1375_v10, %v1371_v47  ;;  %v1381_v15 = vrot.slane %v1379_v34, 5  ;;  %v1342_v49 = vrot.slane %v1340_v29, 4  ;;  %v1349_v45 = vshll.u32 %v309_v14, 16 }
  0xc9   : > { %v1318_v56 = vsel %vm6339_vm2, %v1313_v20, %v6834_v1  ;;  %v1367_v28 = vrot.slane %v1366_v8, 4  ;;  %v1345_v19 = vrot.slane %v1343_v60, 5  ;;  %v1353_v25 = vshrl.u32 %v309_v14, 16 }
  0xca   : > { %v6879_v62 = vcombine.low %v1308_v0, %v1318_v56  ;;  %v1377_v9 = vrot.slane %v1376_v17, 4  ;;  %v1351_v61 = vrot.slane %v1349_v45, 5  ;;  %v1403_v10 = vshll.u32 %v315_v32, 16  ;;  %v313_v0 = vld [vmem:[%s6329_s19 + $0x1cc] sm:$0xf] }
  0xcb   : > { %v1372_v31 = vsel %vm6339_vm2, %v1367_v28, %v1371_v47  ;;  %v1407_v34 = vshrl.u32 %v315_v32, 16  ;;  %v1346_v20 = vor.u32 %v1345_v19, %v1342_v49  ;;  %v1355_v8 = vrot.slane %v1353_v25, 4 }
  0xcc   : > { %10691 = vst [vmem:[#allocation44_spill] sm:$0xff] %v6879_v62  ;;  %2950 = vrot.lane.b32.xlu0 %v6879_v62, %s6277_s20  ;;  %v1382_v1 = vsel %vm6339_vm2, %v1377_v9, %v1381_v15  ;;  %v1413_v29 = vshll.u32 %v316_v37, 16  ;;  %v6891_v17 = vrot.slane %v1403_v10, 5  ;;  %v1417_v60 = vshrl.u32 %v316_v37, 16  ;;  %v314_v62 = vld [vmem:[%s6329_s19 + $0x1d0] sm:$0xf] }
  0xcd   : > { %v6889_v14 = vcombine.low %v1372_v31, %v1382_v1  ;;  %v1409_v47 = vrot.slane %v1407_v34, 4  ;;  %v1347_v56 = vrot.slane %v1346_v20, 4  ;;  %v1356_v28 = vor.u32 %v1355_v8, %v1351_v61  ;;  %v320_v9 = vld [vmem:[%s6329_s19 + $0x1e8] sm:$0xf]  ;;  %v321_v8 = vld [vmem:[%s6329_s19 + $0x1ec] sm:$0xf] }
  0xce   : > { %v1415_v32 = vrot.slane %v1413_v29, 5  ;;  %v1423_v45 = vshll.u32 %v317_v57, 16  ;;  %v1419_v15 = vrot.slane %v1417_v60, 4  ;;  %v1384_v49 = vshrl.u32 %v313_v0, 16  ;;  %v322_v60 = vld [vmem:[%s6329_s19 + $0x1f0] sm:$0x1] }
  0xcf   : > { %10692 = vst [vmem:[#allocation45_spill] sm:$0xff] %v6889_v14  ;;  %2956 = vrot.lane.b32.xlu1 %v6889_v14, %s6277_s20  ;;  %v1410_v25 = vor.u32 %v1409_v47, %v6891_v17  ;;  %v1352_v19 = vsel %vm6339_vm2, %v1347_v56, %v1351_v61  ;;  %v1357_v31 = vrot.slane %v1356_v28, 4  ;;  %v1387_v10 = vshll.u32 %v313_v0, 16 }
  0xd0   : > { %v1425_v37 = vrot.slane %v1423_v45, 5  ;;  %v1420_v1 = vor.u32 %v1419_v15, %v1415_v32  ;;  %v1386_v20 = vrot.slane %v1384_v49, 4  ;;  %v1393_v57 = vshll.u32 %v314_v62, 16 }
  0xd1   : > { %v1411_v34 = vrot.slane %v1410_v25, 4  ;;  %v1362_v29 = vsel %vm6339_vm2, %v1357_v31, %v6866_v58  ;;  %v1389_v47 = vrot.slane %v1387_v10, 5  ;;  %v1397_v14 = vshrl.u32 %v314_v62, 16  ;;  %v318_v31 = vld [vmem:[%s6329_s19 + $0x1e0] sm:$0xf] }
  0xd2   : > { %v1447_v13 = vshll.u32 %v320_v9, 16  ;;  %v6905_v36 = vcombine.low %v1352_v19, %v1362_v29  ;;  %v1421_v0 = vrot.slane %v1420_v1, 4  ;;  %v1395_v56 = vrot.slane %v1393_v57, 5  ;;  %v325_v29 = vld [vmem:[%s6329_s19 + $0x1fc] sm:$0xf] }
  0xd3   : > { %v1416_v61 = vsel %vm6339_vm2, %v1411_v34, %v1415_v32  ;;  %v1390_v28 = vor.u32 %v1389_v47, %v1386_v20  ;;  %v1399_v45 = vrot.slane %v1397_v14, 4  ;;  %v1451_v15 = vshrl.u32 %v320_v9, 16  ;;  %v319_v14 = vld [vmem:[%s6329_s19 + $0x1e4] sm:$0xf] }
  0xd4   : > { %10693 = vst [vmem:[#allocation46_spill] sm:$0xff] %v6905_v36  ;;  %v6909_v25 = vrot.slane %v1447_v13, 5  ;;  %2954 = vrot.lane.b32.xlu0 %v6905_v36, %s6277_s20  ;;  %v1426_v58 = vsel %vm6339_vm2, %v1421_v0, %v1425_v37  ;;  %v1457_v62 = vshll.u32 %v321_v8, 16  ;;  %v1461_v49 = vshrl.u32 %v321_v8, 16  ;;  %v6919_v13 = vpop.permute.xlu1 %2870 }
  0xd5   : > { %v1467_v19 = vshll.u32 %v322_v60, 16  ;;  %v6916_v32 = vcombine.low %v1416_v61, %v1426_v58  ;;  %v1391_v10 = vrot.slane %v1390_v28, 4  ;;  %v1400_v34 = vor.u32 %v1399_v45, %v1395_v56  ;;  %10695 = vst [vmem:[#allocation48_spill] sm:$0xff] %v6919_v13 }
  0xd6   : > { %v1453_v1 = vrot.slane %v1451_v15, 4  ;;  %v1459_v9 = vrot.slane %v1457_v62, 5  ;;  %v1463_v20 = vrot.slane %v1461_v49, 4  ;;  %v1428_v60 = vshrl.u32 %v318_v31, 16  ;;  %v326_v49 = vld [vmem:[%s6329_s19 + $0x200] sm:$0xf] }
  0xd7   : > { %10694 = vst [vmem:[#allocation47_spill] sm:$0xff] %v6916_v32  ;;  %v1469_v57 = vrot.slane %v1467_v19, 5  ;;  %2960 = vrot.lane.b32.xlu1 %v6916_v32, %s6277_s20  ;;  %v1396_v37 = vsel %vm6339_vm2, %v1391_v10, %v1395_v56  ;;  %v1401_v8 = vrot.slane %v1400_v34, 4  ;;  %v1431_v0 = vshll.u32 %v318_v31, 16  ;;  %v6931_v32 = vpop.permute.xlu0 %2866 }
  0xd8   : > { %v1454_v47 = vor.u32 %v1453_v1, %v6909_v25  ;;  %v1464_v61 = vor.u32 %v1463_v20, %v1459_v9  ;;  %v1437_v28 = vshll.u32 %v319_v14, 16  ;;  %v1441_v45 = vshrl.u32 %v319_v14, 16  ;;  %10696 = vst [vmem:[#allocation49_spill] sm:$0xff] %v6931_v32  ;;  %v327_v20 = vld [vmem:[%s6329_s19 + $0x204] sm:$0x1] }
  0xd9   : > { %v1406_v15 = vsel %vm6339_vm2, %v1401_v8, %v6891_v17  ;;  %v1430_v62 = vrot.slane %v1428_v60, 4  ;;  %v1491_v19 = vshll.u32 %v325_v29, 16  ;;  %v1433_v34 = vrot.slane %v1431_v0, 5  ;;  %v6940_v8 = vpop.permute.xlu1 %2872  ;;  %v323_v0 = vld [vmem:[%s6329_s19 + $0x1f4] sm:$0xf] }
  0xda   : > { %v1455_v58 = vrot.slane %v1454_v47, 4  ;;  %v6933_v56 = vcombine.low %v1396_v37, %v1406_v15  ;;  %v1465_v10 = vrot.slane %v1464_v61, 4  ;;  %v1439_v1 = vrot.slane %v1437_v28, 5  ;;  %10698 = vst [vmem:[#allocation51_spill] sm:$0xff] %v6940_v8 }
  0xdb   : > { %v1443_v14 = vrot.slane %v1441_v45, 4  ;;  %v6938_v36 = vrot.slane %v1491_v19, 5  ;;  %v1495_v17 = vshrl.u32 %v325_v29, 16  ;;  %v1434_v47 = vor.u32 %v1433_v34, %v1430_v62 }
  0xdc   : > { %10697 = vst [vmem:[#allocation50_spill] sm:$0xff] %v6933_v56  ;;  %v1460_v31 = vsel %vm6339_vm2, %v1455_v58, %v1459_v9  ;;  %2958 = vrot.lane.b32.xlu0 %v6933_v56, %s6277_s20  ;;  %v1470_v37 = vsel %vm6339_vm2, %v1465_v10, %v1469_v57  ;;  %v1501_v60 = vshll.u32 %v326_v49, 16  ;;  %v1505_v61 = vshrl.u32 %v326_v49, 16  ;;  %v324_v58 = vld [vmem:[%s6329_s19 + $0x1f8] sm:$0xf]  ;;  %v6953_v10 = vpop.permute.xlu0 %2868 }
  0xdd   : > { %v6947_v28 = vcombine.low %v1460_v31, %v1470_v37  ;;  %v1444_v15 = vor.u32 %v1443_v14, %v1439_v1  ;;  %v1497_v9 = vrot.slane %v1495_v17, 4  ;;  %v1511_v45 = vshll.u32 %v327_v20, 16  ;;  %10700 = vst [vmem:[#allocation53_spill] sm:$0xff] %v6953_v10  ;;  %v330_v17 = vld [vmem:[%s6329_s19 + $0x210] sm:$0xf] }
  0xde   : > { %v1435_v29 = vrot.slane %v1434_v47, 4  ;;  %v1503_v19 = vrot.slane %v1501_v60, 5  ;;  %v1507_v39 = vrot.slane %v1505_v61, 4  ;;  %v1472_v49 = vshrl.u32 %v323_v0, 16 }
  0xdf   : > { %10699 = vst [vmem:[#allocation52_spill] sm:$0xff] %v6947_v28  ;;  %2964 = vrot.lane.b32.xlu1 %v6947_v28, %s6277_s20  ;;  %v1445_v56 = vrot.slane %v1444_v15, 4  ;;  %v1498_v57 = vor.u32 %v1497_v9, %v6938_v36  ;;  %v1513_v62 = vrot.slane %v1511_v45, 5  ;;  %v1475_v20 = vshll.u32 %v323_v0, 16  ;;  %v331_v15 = vld [vmem:[%s6329_s19 + $0x214] sm:$0xf]  ;;  %v6962_v9 = vpop.permute.xlu1 %2876 }
  0xe0   : > { %v1440_v34 = vsel %vm6339_vm2, %v1435_v29, %v1439_v1  ;;  %v1508_v31 = vor.u32 %v1507_v39, %v1503_v19  ;;  %v1481_v14 = vshll.u32 %v324_v58, 16  ;;  %v1474_v60 = vrot.slane %v1472_v49, 4  ;;  %10701 = vst [vmem:[#allocation54_spill] sm:$0xff] %v6962_v9  ;;  %v328_v49 = vld [vmem:[%s6329_s19 + $0x208] sm:$0xf] }
  0xe1   : > { %v1450_v37 = vsel %vm6339_vm2, %v1445_v56, %v6909_v25  ;;  %v1499_v47 = vrot.slane %v1498_v57, 4  ;;  %v1485_v61 = vshrl.u32 %v324_v58, 16  ;;  %v1477_v1 = vrot.slane %v1475_v20, 5  ;;  %v6074_v9 = vld [vmem:[%s6329_s19 + $0x74] sm:$0x1] }
  0xe2   : > { %v6964_v45 = vcombine.low %v1440_v34, %v1450_v37  ;;  %v1509_v28 = vrot.slane %v1508_v31, 4  ;;  %v1483_v39 = vrot.slane %v1481_v14, 5  ;;  %v1535_v33 = vshll.u32 %v330_v17, 16  ;;  %v6978_v14 = vpop.permute.xlu0 %2874 }
  0xe3   : > { %v1504_v0 = vsel %vm6339_vm2, %v1499_v47, %v1503_v19  ;;  %v1487_v29 = vrot.slane %v1485_v61, 4  ;;  %v1539_v11 = vshrl.u32 %v330_v17, 16  ;;  %v1478_v56 = vor.u32 %v1477_v1, %v1474_v60  ;;  %10704 = vst [vmem:[#allocation57_spill] sm:$0xff] %v6978_v14 }
  0xe4   : > { %10702 = vst [vmem:[#allocation55_spill] sm:$0xff] %v6964_v45  ;;  %2962 = vrot.lane.b32.xlu0 %v6964_v45, %s6277_s20  ;;  %v1514_v25 = vsel %vm6339_vm2, %v1509_v28, %v1513_v62  ;;  %v1545_v58 = vshll.u32 %v331_v15, 16  ;;  %v1549_v57 = vshrl.u32 %v331_v15, 16  ;;  %v6976_v20 = vrot.slane %v1535_v33, 5  ;;  %v329_v45 = vld [vmem:[%s6329_s19 + $0x20c] sm:$0xf]  ;;  %v6984_v15 = vpop.permute.xlu1 %2880 }
  0xe5   : > { %v6974_v34 = vcombine.low %v1504_v0, %v1514_v25  ;;  %v1488_v31 = vor.u32 %v1487_v29, %v1483_v39  ;;  %v1541_v19 = vrot.slane %v1539_v11, 4  ;;  %v1479_v17 = vrot.slane %v1478_v56, 4  ;;  %10705 = vst [vmem:[#allocation58_spill] sm:$0xff] %v6984_v15  ;;  %v335_v29 = vld [vmem:[%s6329_s19 + $0x224] sm:$0xf] }
  0xe6   : > { %v1547_v37 = vrot.slane %v1545_v58, 5  ;;  %v1551_v47 = vrot.slane %v1549_v57, 4  ;;  %v1555_v61 = vshll.u32 %v332_v21, 16  ;;  %v1516_v60 = vshrl.u32 %v328_v49, 16  ;;  %v336_v57 = vld [vmem:[%s6329_s19 + $0x228] sm:$0xf]  ;;  %v6998_v51 = vpop.permute.xlu0 %2878 }
  0xe7   : > { %10703 = vst [vmem:[#allocation56_spill] sm:$0xff] %v6974_v34  ;;  %2968 = vrot.lane.b32.xlu1 %v6974_v34, %s6277_s20  ;;  %v1489_v28 = vrot.slane %v1488_v31, 4  ;;  %v1542_v62 = vor.u32 %v1541_v19, %v6976_v20  ;;  %v1484_v11 = vsel %vm6339_vm2, %v1479_v17, %v1483_v39  ;;  %v1519_v0 = vshll.u32 %v328_v49, 16  ;;  %v337_v49 = vld [vmem:[%s6329_s19 + $0x22c] sm:$0x1]  ;;  %10707 = vst [vmem:[#allocation60_spill] sm:$0xff] %v6998_v51 }
  0xe8   : > { %v1552_v33 = vor.u32 %v1551_v47, %v1547_v37  ;;  %v1557_v1 = vrot.slane %v1555_v61, 5  ;;  %v1518_v56 = vrot.slane %v1516_v60, 4  ;;  %v1525_v58 = vshll.u32 %v329_v45, 16  ;;  %v334_v51 = vld [vmem:[%s6329_s19 + $0x220] sm:$0xf] }
  0xe9   : > { %v1494_v21 = vsel %vm6339_vm2, %v1489_v28, %v6938_v36  ;;  %v1543_v25 = vrot.slane %v1542_v62, 4  ;;  %v1521_v34 = vrot.slane %v1519_v0, 5  ;;  %v1529_v15 = vshrl.u32 %v329_v45, 16  ;;  %v333_v45 = vld [vmem:[%s6329_s19 + $0x21c] sm:$0xf] }
  0xea   : > { %v6993_v31 = vcombine.low %v1484_v11, %v1494_v21  ;;  %v1553_v19 = vrot.slane %v1552_v33, 4  ;;  %v1527_v17 = vrot.slane %v1525_v58, 5  ;;  %v1579_v47 = vshll.u32 %v335_v29, 16 }
  0xeb   : > { %v1548_v39 = vsel %vm6339_vm2, %v1543_v25, %v1547_v37  ;;  %v1583_v61 = vshrl.u32 %v335_v29, 16  ;;  %v1522_v28 = vor.u32 %v1521_v34, %v1518_v56  ;;  %v1531_v62 = vrot.slane %v1529_v15, 4  ;;  %v7009_v29 = vpop.permute.xlu1 %2884  ;;  %v340_v56 = vld [vmem:[%s6329_s19 + $0x238] sm:$0xf] }
  0xec   : > { %10706 = vst [vmem:[#allocation59_spill] sm:$0xff] %v6993_v31  ;;  %2966 = vrot.lane.b32.xlu0 %v6993_v31, %s6277_s20  ;;  %v1558_v36 = vsel %vm6339_vm2, %v1553_v19, %v1557_v1  ;;  %v1589_v60 = vshll.u32 %v336_v57, 16  ;;  %v7007_v37 = vrot.slane %v1579_v47, 5  ;;  %v1593_v0 = vshrl.u32 %v336_v57, 16  ;;  %10709 = vst [vmem:[#allocation62_spill] sm:$0xff] %v7009_v29 }
  0xed   : > { %v7005_v11 = vcombine.low %v1548_v39, %v1558_v36  ;;  %v1585_v33 = vrot.slane %v1583_v61, 4  ;;  %v1523_v21 = vrot.slane %v1522_v28, 4  ;;  %v1532_v25 = vor.u32 %v1531_v62, %v1527_v17  ;;  %v341_v62 = vld [vmem:[%s6329_s19 + $0x23c] sm:$0xf]  ;;  %v342_v29 = vld [vmem:[%s6329_s19 + $0x240] sm:$0x1] }
  0xee   : > { %v1591_v58 = vrot.slane %v1589_v60, 5  ;;  %v1599_v31 = vshll.u32 %v337_v49, 16  ;;  %v1595_v15 = vrot.slane %v1593_v0, 4  ;;  %v1560_v1 = vshrl.u32 %v333_v45, 16  ;;  %v7019_v60 = vpop.permute.xlu0 %2882 }
  0xef   : > { %10708 = vst [vmem:[#allocation61_spill] sm:$0xff] %v7005_v11  ;;  %2972 = vrot.lane.b32.xlu1 %v7005_v11, %s6277_s20  ;;  %v1586_v34 = vor.u32 %v1585_v33, %v7007_v37  ;;  %v1528_v57 = vsel %vm6339_vm2, %v1523_v21, %v1527_v17  ;;  %v1533_v19 = vrot.slane %v1532_v25, 4  ;;  %v1563_v47 = vshll.u32 %v333_v45, 16  ;;  %10710 = vst [vmem:[#allocation63_spill] sm:$0xff] %v7019_v60  ;;  %v7029_v25 = vpop.permute.xlu1 %2888 }
  0xf0   : > { %v1601_v39 = vrot.slane %v1599_v31, 5  ;;  %v1596_v36 = vor.u32 %v1595_v15, %v1591_v58  ;;  %v1562_v28 = vrot.slane %v1560_v1, 4  ;;  %v1569_v49 = vshll.u32 %v334_v51, 16  ;;  %10712 = vst [vmem:[#allocation65_spill] sm:$0xff] %v7029_v25 }
  0xf1   : > { %v1587_v61 = vrot.slane %v1586_v34, 4  ;;  %v1538_v33 = vsel %vm6339_vm2, %v1533_v19, %v6976_v20  ;;  %v1565_v0 = vrot.slane %v1563_v47, 5  ;;  %v1573_v11 = vshrl.u32 %v334_v51, 16 }
  0xf2   : > { %v1623_v55 = vshll.u32 %v340_v56, 16  ;;  %v7025_v17 = vcombine.low %v1528_v57, %v1538_v33  ;;  %v1597_v45 = vrot.slane %v1596_v36, 4  ;;  %v1571_v21 = vrot.slane %v1569_v49, 5 }
  0xf3   : > { %v1592_v31 = vsel %vm6339_vm2, %v1587_v61, %v1591_v58  ;;  %v1566_v34 = vor.u32 %v1565_v0, %v1562_v28  ;;  %v1575_v15 = vrot.slane %v1573_v11, 4  ;;  %v1627_v20 = vshrl.u32 %v340_v56, 16  ;;  %v338_v58 = vld [vmem:[%s6329_s19 + $0x230] sm:$0xf]  ;;  %v339_v28 = vld [vmem:[%s6329_s19 + $0x234] sm:$0xf]  ;;  %v7041_v0 = vpop.permute.xlu0 %2886 }
  0xf4   : > { %10711 = vst [vmem:[#allocation64_spill] sm:$0xff] %v7025_v17  ;;  %v7031_v1 = vrot.slane %v1623_v55, 5  ;;  %2970 = vrot.lane.b32.xlu0 %v7025_v17, %s6277_s20  ;;  %v1602_v51 = vsel %vm6339_vm2, %v1597_v45, %v1601_v39  ;;  %v1633_v57 = vshll.u32 %v341_v62, 16  ;;  %v1637_v19 = vshrl.u32 %v341_v62, 16  ;;  %10714 = vst [vmem:[#allocation67_spill] sm:$0xff] %v7041_v0 }
  0xf5   : > { %v1643_v47 = vshll.u32 %v342_v29, 16  ;;  %v7038_v61 = vcombine.low %v1592_v31, %v1602_v51  ;;  %v1567_v36 = vrot.slane %v1566_v34, 4  ;;  %v1576_v49 = vor.u32 %v1575_v15, %v1571_v21  ;;  %v7048_v51 = vpop.permute.xlu1 %2892 }
  0xf6   : > { %v1629_v33 = vrot.slane %v1627_v20, 4  ;;  %v1635_v11 = vrot.slane %v1633_v57, 5  ;;  %v1639_v55 = vrot.slane %v1637_v19, 4  ;;  %v1604_v31 = vshrl.u32 %v338_v58, 16  ;;  %10715 = vst [vmem:[#allocation68_spill] sm:$0xff] %v7048_v51 }
  0xf7   : > { %10713 = vst [vmem:[#allocation66_spill] sm:$0xff] %v7038_v61  ;;  %v1645_v56 = vrot.slane %v1643_v47, 5  ;;  %2976 = vrot.lane.b32.xlu1 %v7038_v61, %s6277_s20  ;;  %v1572_v39 = vsel %vm6339_vm2, %v1567_v36, %v1571_v21  ;;  %v1577_v29 = vrot.slane %v1576_v49, 4  ;;  %v1607_v34 = vshll.u32 %v338_v58, 16  ;;  %v345_v61 = vld [vmem:[%s6329_s19 + $0x24c] sm:$0xf] }
  0xf8   : > { %v1630_v62 = vor.u32 %v1629_v33, %v7031_v1  ;;  %v1640_v45 = vor.u32 %v1639_v55, %v1635_v11  ;;  %v1613_v15 = vshll.u32 %v339_v28, 16  ;;  %v1617_v20 = vshrl.u32 %v339_v28, 16  ;;  %v346_v55 = vld [vmem:[%s6329_s19 + $0x250] sm:$0xf] }
  0xf9   : > { %v1582_v57 = vsel %vm6339_vm2, %v1577_v29, %v7007_v37  ;;  %v1606_v47 = vrot.slane %v1604_v31, 4  ;;  %v1609_v49 = vrot.slane %v1607_v34, 5  ;;  %v7064_v31 = vpop.permute.xlu0 %2890  ;;  %v1681_v51 = vshrl.u32 %v346_v55, 16 }
  0xfa   : > { %v1631_v19 = vrot.slane %v1630_v62, 4  ;;  %v7054_v21 = vcombine.low %v1572_v39, %v1582_v57  ;;  %v1641_v36 = vrot.slane %v1640_v45, 4  ;;  %v1615_v33 = vrot.slane %v1613_v15, 5  ;;  %v347_v62 = vld [vmem:[%s6329_s19 + $0x254] sm:$0x1]  ;;  %10717 = vst [vmem:[#allocation70_spill] sm:$0xff] %v7064_v31 }
  0xfb   : > { %v1619_v28 = vrot.slane %v1617_v20, 4  ;;  %v1610_v29 = vor.u32 %v1609_v49, %v1606_v47  ;;  %v1667_v39 = vshll.u32 %v345_v61, 16  ;;  %v1671_v15 = vshrl.u32 %v345_v61, 16  ;;  %v343_v57 = vld [vmem:[%s6329_s19 + $0x244] sm:$0xf] }
  0xfc   : > { %10716 = vst [vmem:[#allocation69_spill] sm:$0xff] %v7054_v21  ;;  %v1636_v58 = vsel %vm6339_vm2, %v1631_v19, %v1635_v11  ;;  %2974 = vrot.lane.b32.xlu0 %v7054_v21, %s6277_s20  ;;  %v1646_v37 = vsel %vm6339_vm2, %v1641_v36, %v1645_v56  ;;  %v1677_v19 = vshll.u32 %v346_v55, 16  ;;  %v7071_v21 = vpop.permute.xlu1 %2896  ;;  %v1687_v36 = vshll.u32 %v347_v62, 16  ;;  %v344_v49 = vld [vmem:[%s6329_s19 + $0x248] sm:$0xf] }
  0xfd   : > { %v7066_v45 = vcombine.low %v1636_v58, %v1646_v37  ;;  %v1620_v34 = vor.u32 %v1619_v28, %v1615_v33  ;;  %v1611_v11 = vrot.slane %v1610_v29, 4  ;;  %v7069_v20 = vrot.slane %v1667_v39, 5  ;;  %10719 = vst [vmem:[#allocation72_spill] sm:$0xff] %v7071_v21 }
  0xfe   : > { %v1673_v47 = vrot.slane %v1671_v15, 4  ;;  %v1679_v61 = vrot.slane %v1677_v19, 5  ;;  %v1683_v28 = vrot.slane %v1681_v51, 4  ;;  %v1648_v37 = vshrl.u32 %v343_v57, 16 }
  0xff   : > { %10718 = vst [vmem:[#allocation71_spill] sm:$0xff] %v7066_v45  ;;  %2980 = vrot.lane.b32.xlu1 %v7066_v45, %s6277_s20  ;;  %v1621_v56 = vrot.slane %v1620_v34, 4  ;;  %v1616_v58 = vsel %vm6339_vm2, %v1611_v11, %v1615_v33  ;;  %v1689_v39 = vrot.slane %v1687_v36, 5  ;;  %v1651_v21 = vshll.u32 %v343_v57, 16  ;;  %v350_v45 = vld [vmem:[%s6329_s19 + $0x260] sm:$0xf]  ;;  %v7085_v33 = vpop.permute.xlu0 %2894 }
 0x100   : > { %v1674_v55 = vor.u32 %v1673_v47, %v7069_v20  ;;  %v1684_v62 = vor.u32 %v1683_v28, %v1679_v61  ;;  %v1650_v15 = vrot.slane %v1648_v37, 4  ;;  %v1657_v31 = vshll.u32 %v344_v49, 16  ;;  %10721 = vst [vmem:[#allocation74_spill] sm:$0xff] %v7085_v33  ;;  %v351_v47 = vld [vmem:[%s6329_s19 + $0x264] sm:$0xf]  ;;  %v7090_v36 = vpop.permute.xlu1 %2900 }
 0x101   : > { %v1626_v29 = vsel %vm6339_vm2, %v1621_v56, %v7031_v1  ;;  %v1653_v11 = vrot.slane %v1651_v21, 5  ;;  %v1661_v19 = vshrl.u32 %v344_v49, 16  ;;  %v1711_v57 = vshll.u32 %v350_v45, 16  ;;  %10722 = vst [vmem:[#allocation75_spill] sm:$0xff] %v7090_v36  ;;  %v7371_v36 = vld [vmem:[%s6329_s19 + $0x8c] sm:$0xf] }
 0x102   : > { %v7083_v34 = vcombine.low %v1616_v58, %v1626_v29  ;;  %v1675_v51 = vrot.slane %v1674_v55, 4  ;;  %v1685_v1 = vrot.slane %v1684_v62, 4  ;;  %v1659_v56 = vrot.slane %v1657_v31, 5  ;;  %v352_v29 = vld [vmem:[%s6329_s19 + $0x268] sm:$0x1] }
 0x103   : > { %v1654_v28 = vor.u32 %v1653_v11, %v1650_v15  ;;  %v1663_v37 = vrot.slane %v1661_v19, 4  ;;  %v7097_v49 = vrot.slane %v1711_v57, 5  ;;  %v1715_v55 = vshrl.u32 %v350_v45, 16 }
 0x104   : > { %10720 = vst [vmem:[#allocation73_spill] sm:$0xff] %v7083_v34  ;;  %2978 = vrot.lane.b32.xlu0 %v7083_v34, %s6277_s20  ;;  %v1680_v58 = vsel %vm6339_vm2, %v1675_v51, %v1679_v61  ;;  %v1690_v21 = vsel %vm6339_vm2, %v1685_v1, %v1689_v39  ;;  %v348_v34 = vld [vmem:[%s6329_s19 + $0x258] sm:$0xf]  ;;  %v1721_v25 = vshll.u32 %v351_v47, 16  ;;  %v1725_v17 = vshrl.u32 %v351_v47, 16  ;;  %v7103_v61 = vpop.permute.xlu0 %2898  ;;  %v7110_v57 = vpop.permute.xlu1 %2904 }
 0x105   : > { %v7100_v62 = vcombine.low %v1680_v58, %v1690_v21  ;;  %v1655_v31 = vrot.slane %v1654_v28, 4  ;;  %v1664_v33 = vor.u32 %v1663_v37, %v1659_v56  ;;  %v1717_v0 = vrot.slane %v1715_v55, 4  ;;  %10724 = vst [vmem:[#allocation77_spill] sm:$0xff] %v7103_v61  ;;  %10725 = vst [vmem:[#allocation78_spill] sm:$0xff] %v7110_v57 }
 0x106   : > { %v1731_v60 = vshll.u32 %v352_v29, 16  ;;  %v1723_v15 = vrot.slane %v1721_v25, 5  ;;  %v1692_v51 = vshrl.u32 %v348_v34, 16  ;;  %v1727_v19 = vrot.slane %v1725_v17, 4  ;;  %v356_v17 = vld [vmem:[%s6329_s19 + $0x278] sm:$0xf] }
 0x107   : > { %10723 = vst [vmem:[#allocation76_spill] sm:$0xff] %v7100_v62  ;;  %2984 = vrot.lane.b32.xlu1 %v7100_v62, %s6277_s20  ;;  %v1660_v39 = vsel %vm6339_vm2, %v1655_v31, %v1659_v56  ;;  %v1665_v45 = vrot.slane %v1664_v33, 4  ;;  %v1718_v11 = vor.u32 %v1717_v0, %v7097_v49  ;;  %v1695_v47 = vshll.u32 %v348_v34, 16  ;;  %v355_v56 = vld [vmem:[%s6329_s19 + $0x274] sm:$0xf] }
 0x108   : > { %v1733_v1 = vrot.slane %v1731_v60, 5  ;;  %v1694_v28 = vrot.slane %v1692_v51, 4  ;;  %v1701_v37 = vshll.u32 %v349_v18, 16  ;;  %v1705_v29 = vshrl.u32 %v349_v18, 16  ;;  %v357_v51 = vld [vmem:[%s6329_s19 + $0x27c] sm:$0x1]  ;;  %v7131_v62 = vpop.permute.xlu1 %2908 }
 0x109   : > { %v1670_v58 = vsel %vm6339_vm2, %v1665_v45, %v7069_v20  ;;  %v1719_v25 = vrot.slane %v1718_v11, 4  ;;  %v1728_v21 = vor.u32 %v1727_v19, %v1723_v15  ;;  %v1697_v0 = vrot.slane %v1695_v47, 5  ;;  %v7123_v45 = vpop.permute.xlu0 %2902  ;;  %10728 = vst [vmem:[#allocation81_spill] sm:$0xff] %v7131_v62 }
 0x10a   : > { %v7116_v33 = vcombine.low %v1660_v39, %v1670_v58  ;;  %v1703_v55 = vrot.slane %v1701_v37, 5  ;;  %v1707_v60 = vrot.slane %v1705_v29, 4  ;;  %v1755_v18 = vshll.u32 %v355_v56, 16  ;;  %10727 = vst [vmem:[#allocation80_spill] sm:$0xff] %v7123_v45  ;;  %v353_v29 = vld [vmem:[%s6329_s19 + $0x26c] sm:$0xf] }
 0x10b   : > { %v1724_v20 = vsel %vm6339_vm2, %v1719_v25, %v1723_v15  ;;  %v1729_v34 = vrot.slane %v1728_v21, 4  ;;  %v1698_v31 = vor.u32 %v1697_v0, %v1694_v28  ;;  %v1759_v11 = vshrl.u32 %v355_v56, 16  ;;  %v354_v0 = vld [vmem:[%s6329_s19 + $0x270] sm:$0xf] }
 0x10c   : > { %10726 = vst [vmem:[#allocation79_spill] sm:$0xff] %v7116_v33  ;;  %2982 = vrot.lane.b32.xlu0 %v7116_v33, %s6277_s20  ;;  %v1708_v39 = vor.u32 %v1707_v60, %v1703_v55  ;;  %v7128_v58 = vrot.slane %v1755_v18, 5  ;;  %v1765_v37 = vshll.u32 %v356_v17, 16  ;;  %v1769_v21 = vshrl.u32 %v356_v17, 16 }
 0x10d   : > { %v1734_v19 = vsel %vm6339_vm2, %v1729_v34, %v1733_v1  ;;  %v1699_v47 = vrot.slane %v1698_v31, 4  ;;  %v1761_v25 = vrot.slane %v1759_v11, 4  ;;  %v1775_v33 = vshll.u32 %v357_v51, 16 }
 0x10e   : > { %v7133_v15 = vcombine.low %v1724_v20, %v1734_v19  ;;  %v1709_v28 = vrot.slane %v1708_v39, 4  ;;  %v1767_v56 = vrot.slane %v1765_v37, 5  ;;  %v1771_v20 = vrot.slane %v1769_v21, 4  ;;  %v7146_v19 = vpop.permute.xlu0 %2906 }
 0x10f   : > { %v1704_v60 = vsel %vm6339_vm2, %v1699_v47, %v1703_v55  ;;  %v1762_v34 = vor.u32 %v1761_v25, %v7128_v58  ;;  %v1736_v31 = vshrl.u32 %v353_v29, 16  ;;  %v1777_v17 = vrot.slane %v1775_v33, 5  ;;  %10731 = vst [vmem:[#allocation84_spill] sm:$0xff] %v7146_v19  ;;  %v7150_v25 = vpop.permute.xlu1 %2912  ;;  %v7297_v19 = vld [vmem:[%s6329_s19 + $0x64] sm:$0xf] }
 0x110   : > { %10729 = vst [vmem:[#allocation82_spill] sm:$0xff] %v7133_v15  ;;  %2988 = vrot.lane.b32.xlu1 %v7133_v15, %s6277_s20  ;;  %v1714_v1 = vsel %vm6339_vm2, %v1709_v28, %v7097_v49  ;;  %v1739_v39 = vshll.u32 %v353_v29, 16  ;;  %v1745_v11 = vshll.u32 %v354_v0, 16  ;;  %v1772_v51 = vor.u32 %v1771_v20, %v1767_v56  ;;  %10732 = vst [vmem:[#allocation85_spill] sm:$0xff] %v7150_v25 }
 0x111   : > { %v7144_v18 = vcombine.low %v1704_v60, %v1714_v1  ;;  %v1763_v55 = vrot.slane %v1762_v34, 4  ;;  %v1738_v47 = vrot.slane %v1736_v31, 4  ;;  %v1749_v37 = vshrl.u32 %v354_v0, 16  ;;  %v6047_v34 = vld [vmem:[%s6329_s19 + $0x8] sm:$0xf] }
 0x112   : > { %v1741_v49 = vrot.slane %v1739_v39, 5  ;;  %v1747_v28 = vrot.slane %v1745_v11, 5  ;;  %v1773_v29 = vrot.slane %v1772_v51, 4  ;;  %v1947_v20 = vrot.slane %v6047_v34, 5  ;;  %v6048_v31 = vld [vmem:[%s6329_s19 + $0xc] sm:$0xf] }
 0x113   : > { %10730 = vst [vmem:[#allocation83_spill] sm:$0xff] %v7144_v18  ;;  %2986 = vrot.lane.b32.xlu0 %v7144_v18, %s6277_s20  ;;  %v1768_v33 = vsel %vm6339_vm2, %v1763_v55, %v1767_v56  ;;  %v1751_v21 = vrot.slane %v1749_v37, 4  ;;  %v1950_v39 = vrot.slane %v6048_v31, 5  ;;  %v10734_v56 = vmov 0  ;;  %v6049_v55 = vld [vmem:[%s6329_s19 + $0x10] sm:$0x1] }
 0x114   : > { %v1742_v60 = vor.u32 %v1741_v49, %v1738_v47  ;;  %v1778_v0 = vsel %vm6339_vm2, %v1773_v29, %v1777_v17  ;;  %v10735_v56 = vsel %vm7160_vm5, 4294967295, %v10734_v56  ;;  %v1953_v51 = vrot.slane %v6049_v55, 5  ;;  %v6050_v47 = vld [vmem:[%s6329_s19] sm:$0xf]  ;;  %v7166_v49 = vpop.permute.xlu0 %2910  ;;  %v6051_v34 = vld [vmem:[%s6329_s19 + $0x4] sm:$0xf]  ;;  %v7174_v55 = vpop.permute.xlu1 %2916 }
 0x115   : > { %v1752_v1 = vor.u32 %v1751_v21, %v1747_v28  ;;  %v7158_v11 = vcombine.low %v1768_v33, %v1778_v0  ;;  %10736 = vst [vmem:[#allocation87_spill] sm:$0xff] %v10735_v56  ;;  %v5598_v37 = vrot.slane %v6050_v47, 9  ;;  %10737 = vst [vmem:[#allocation88_spill] sm:$0xff] %v7166_v49  ;;  %v1949_v29 = vrot.slane %v1947_v20, 4  ;;  %v6217_v56 = vld [vmem:[%s6329_s19 + $0x3c] sm:$0xf] }
 0x116   : > { %v1743_v15 = vrot.slane %v1742_v60, 4  ;;  %v1952_v21 = vrot.slane %v1950_v39, 4  ;;  %v1944_v31 = vrot.slane %v6051_v34, 5  ;;  %v6052_v60 = vld [vmem:[%s6329_s19 + $0x1c] sm:$0xf]  ;;  %10738 = vst [vmem:[#allocation89_spill] sm:$0xff] %v7174_v55 }
 0x117   : > { %10733 = vst [vmem:[#allocation86_spill] sm:$0xff] %v7158_v11  ;;  %v1753_v17 = vrot.slane %v1752_v1, 4  ;;  %2992 = vrot.lane.b32.xlu1 %v7158_v11, %s6277_s20  ;;  %v1960_v0 = vrot.slane %v6052_v60, 5  ;;  %v1951_v47 = vsel %vm7160_vm5, %v1949_v29, %v1950_v39  ;;  %v6053_v55 = vld [vmem:[%s6329_s19 + $0x20] sm:$0xf]  ;;  %v2018_v2 = vrot.slane %v6074_v9, 5 }
 0x118   : > { %v1748_v33 = vsel %vm6339_vm2, %v1743_v15, %v1747_v28  ;;  %v1954_v34 = vsel %vm7160_vm5, %v1952_v21, %v1953_v51  ;;  %v1945_v15 = vsel %vm7160_vm5, %v5598_v37, %v1944_v31  ;;  %v1946_v28 = vrot.slane %v1944_v31, 4  ;;  %v6055_v51 = vld [vmem:[%s6329_s19 + $0x14] sm:$0xf]  ;;  %v7196_v21 = vpop.permute.xlu0 %2914 }
 0x119   : > { %v1758_v1 = vsel %vm6339_vm2, %v1753_v17, %v7128_v58  ;;  %v5761_v18 = vcombine.low %v1951_v47, %v1954_v34  ;;  %v1962_v60 = vrot.slane %v1960_v0, 4  ;;  %v1963_v25 = vrot.slane %v6053_v55, 5  ;;  %v6056_v17 = vld [vmem:[%s6329_s19 + $0x18] sm:$0xf]  ;;  %10740 = vst [vmem:[#allocation91_spill] sm:$0xff] %v7196_v21  ;;  %v7203_v47 = vpop.permute.xlu1 %2920 }
 0x11a   : > { %v7183_v11 = vcombine.low %v1748_v33, %v1758_v1  ;;  %v1966_v58 = vrot.slane %v6054_v24, 5  ;;  %v1948_v39 = vsel %vm7160_vm5, %v1946_v28, %v1947_v20  ;;  %v5599_v37 = vrot.slane %v6055_v51, 9  ;;  %v6057_v1 = vld [vmem:[%s6329_s19 + $0x30] sm:$0xf]  ;;  %10741 = vst [vmem:[#allocation92_spill] sm:$0xff] %v7203_v47 }
 0x11b   : > { %3188 = vrot.lane.b32.xlu1 %v5761_v18, %s6278_s21  ;;  %v1957_v29 = vrot.slane %v6056_v17, 5  ;;  %v5760_v31 = vcombine.low %v1945_v15, %v1948_v39  ;;  %v1964_v24 = vsel %vm7160_vm5, %v1962_v60, %v1963_v25  ;;  %v1965_v33 = vrot.slane %v1963_v25, 4  ;;  %v6058_v28 = vld [vmem:[%s6329_s19 + $0x34] sm:$0xf]  ;;  %v6059_v39 = vld [vmem:[%s6329_s19 + $0x38] sm:$0x1] }
 0x11c   : > { %10739 = vst [vmem:[#allocation90_spill] sm:$0xff] %v7183_v11  ;;  %2990 = vrot.lane.b32.xlu0 %v7183_v11, %s6277_s20  ;;  %v1973_v20 = vrot.slane %v6057_v1, 5  ;;  %v1976_v15 = vrot.slane %v6058_v28, 5  ;;  %v1979_v60 = vrot.slane %v6059_v39, 5  ;;  %v6060_v17 = vld [vmem:[%s6329_s19 + $0x28] sm:$0xf] }
 0x11d   : > { %v1958_v18 = vsel %vm7160_vm5, %v5599_v37, %v1957_v29  ;;  %v1959_v55 = vrot.slane %v1957_v29, 4  ;;  %v1967_v34 = vsel %vm7160_vm5, %v1965_v33, %v1966_v58  ;;  %v5600_v29 = vrot.slane %v6060_v17, 9  ;;  %v6061_v58 = vld [vmem:[%s6329_s19 + $0x2c] sm:$0xf]  ;;  %v6063_v28 = vld [vmem:[%s6329_s19 + $0x48] sm:$0xf] }
 0x11e   : > { %v7210_v25 = vcombine.low %v1964_v24, %v1967_v34  ;;  %v1975_v37 = vrot.slane %v1973_v20, 4  ;;  %v1978_v11 = vrot.slane %v1976_v15, 4  ;;  %v1970_v33 = vrot.slane %v6061_v58, 5  ;;  %v6062_v24 = vld [vmem:[%s6329_s19 + $0x44] sm:$0xf]  ;;  %v7234_v58 = vpop.permute.xlu1 %2924 }
 0x11f   : > { %v1961_v51 = vsel %vm7160_vm5, %v1959_v55, %v1960_v0  ;;  %v1986_v34 = vrot.slane %v6062_v24, 5  ;;  %v1989_v0 = vrot.slane %v6063_v28, 5  ;;  %v7224_v55 = vpop.permute.xlu0 %2918  ;;  %10746 = vst [vmem:[#allocation97_spill] sm:$0xff] %v7234_v58  ;;  %v6064_v28 = vld [vmem:[%s6329_s19 + $0x4c] sm:$0x1]  ;;  %v5603_v3 = vrot.slane %v7297_v19, 9 }
 0x120   : > { %3186 = vrot.lane.b32.xlu0 %v5760_v31, %s6278_s21  ;;  %10742 = vst [vmem:[#allocation93_spill] sm:$0xff] %v7210_v25  ;;  %v7215_v1 = vcombine.low %v1958_v18, %v1961_v51  ;;  %3192 = vrot.lane.b32.xlu1 %v7210_v25, %s6278_s21  ;;  %v1977_v31 = vsel %vm7160_vm5, %v1975_v37, %v1976_v15  ;;  %10744 = vst [vmem:[#allocation95_spill] sm:$0xff] %v7224_v55  ;;  %v1972_v51 = vrot.slane %v1970_v33, 4  ;;  %v7642_v25 = vld [vmem:[%s6329_s19 + $0x138] sm:$0xf] }
 0x121   : > { %v1980_v18 = vsel %vm7160_vm5, %v1978_v11, %v1979_v60  ;;  %v1971_v39 = vsel %vm7160_vm5, %v5600_v29, %v1970_v33  ;;  %v1988_v15 = vrot.slane %v1986_v34, 4  ;;  %v1991_v37 = vrot.slane %v1989_v0, 4  ;;  %v6065_v11 = vld [vmem:[%s6329_s19 + $0x3c] sm:$0xf]  ;;  %v6066_v29 = vld [vmem:[%s6329_s19 + $0x40] sm:$0xf] }
 0x122   : > { %10743 = vst [vmem:[#allocation94_spill] sm:$0xff] %v7215_v1  ;;  %v7232_v17 = vcombine.low %v1977_v31, %v1980_v18  ;;  %v1974_v24 = vsel %vm7160_vm5, %v1972_v51, %v1973_v20  ;;  %v1992_v47 = vrot.slane %v6064_v28, 5  ;;  %v5601_v60 = vrot.slane %v6065_v11, 9  ;;  %v6067_v11 = vld [vmem:[%s6329_s19 + $0x58] sm:$0xf]  ;;  %v7273_v55 = vpop.permute.xlu1 %2928  ;;  %10787 = vst [vmem:[#allocation138_spill] sm:$0xff] %v7642_v25 }
 0x123   : > { %v1983_v33 = vrot.slane %v6066_v29, 5  ;;  %v7243_v31 = vcombine.low %v1971_v39, %v1974_v24  ;;  %v1990_v18 = vsel %vm7160_vm5, %v1988_v15, %v1989_v0  ;;  %v1999_v29 = vrot.slane %v6067_v11, 5  ;;  %v6068_v39 = vld [vmem:[%s6329_s19 + $0x5c] sm:$0xf]  ;;  %v7257_v0 = vpop.permute.xlu0 %2922  ;;  %10751 = vst [vmem:[#allocation102_spill] sm:$0xff] %v7273_v55 }
 0x124   : > { %3190 = vrot.lane.b32.xlu0 %v7215_v1, %s6278_s21  ;;  %10745 = vst [vmem:[#allocation96_spill] sm:$0xff] %v7232_v17  ;;  %3196 = vrot.lane.b32.xlu1 %v7232_v17, %s6278_s21  ;;  %v1993_v20 = vsel %vm7160_vm5, %v1991_v37, %v1992_v47  ;;  %v2002_v24 = vrot.slane %v6068_v39, 5  ;;  %10749 = vst [vmem:[#allocation100_spill] sm:$0xff] %v7257_v0  ;;  %v6069_v37 = vld [vmem:[%s6329_s19 + $0x60] sm:$0x1]  ;;  %v2022_v57 = vrot.slane %v7342_v46, 5 }
 0x125   : > { %10747 = vst [vmem:[#allocation98_spill] sm:$0xff] %v7243_v31  ;;  %v1984_v51 = vsel %vm7160_vm5, %v5601_v60, %v1983_v33  ;;  %v1985_v28 = vrot.slane %v1983_v33, 4  ;;  %v7254_v58 = vcombine.low %v1990_v18, %v1993_v20  ;;  %5838 = vmatprep.subr.msk.bf16.mxu0 %vm3990_vm6, %v7243_v31  ;;  %v2001_v15 = vrot.slane %v1999_v29, 4  ;;  %v6070_v33 = vld [vmem:[%s6329_s19 + $0x50] sm:$0xf] }
 0x126   : > { %v2005_v60 = vrot.slane %v6069_v37, 5  ;;  %v5602_v11 = vrot.slane %v6070_v33, 9  ;;  %v2004_v20 = vrot.slane %v2002_v24, 4  ;;  %v7270_v39 = vld [vmem:[%s6329_s19 + $0x54] sm:$0xf]  ;;  %v7320_v14 = vpop.permute.xlu1 %2932  ;;  %v2070_v32 = vrot.slane %v6094_v43, 5 }
 0x127   : > { %10748 = vst [vmem:[#allocation99_spill] sm:$0xff] %v7254_v58  ;;  %v1987_v47 = vsel %vm7160_vm5, %v1985_v28, %v1986_v34  ;;  %v1996_v0 = vrot.slane %v7270_v39, 5  ;;  %v2003_v34 = vsel %vm7160_vm5, %v2001_v15, %v2002_v24  ;;  %v7278_v28 = vld [vmem:[%s6329_s19 + $0x6c] sm:$0xf]  ;;  %v7282_v33 = vld [vmem:[%s6329_s19 + $0x70] sm:$0xf] }
 0x128   : > { %3194 = vrot.lane.b32.xlu0 %v7243_v31, %s6278_s21  ;;  %3200 = vrot.lane.b32.xlu1 %v7254_v58, %s6278_s21  ;;  %v7267_v18 = vcombine.low %v1984_v51, %v1987_v47  ;;  %v2012_v37 = vrot.slane %v7278_v28, 5  ;;  %v2015_v51 = vrot.slane %v7282_v33, 5  ;;  %v2006_v47 = vsel %vm7160_vm5, %v2004_v20, %v2005_v60  ;;  %v7301_v60 = vld [vmem:[%s6329_s19 + $0x68] sm:$0xf]  ;;  %10755 = vst [vmem:[#allocation106_spill] sm:$0xff] %v7320_v14 }
 0x129   : > { %v1997_v55 = vsel %vm7160_vm5, %v5602_v11, %v1996_v0  ;;  %v1998_v21 = vrot.slane %v1996_v0, 4  ;;  %v7291_v24 = vcombine.low %v2003_v34, %v2006_v47  ;;  %v2009_v11 = vrot.slane %v7301_v60, 5  ;;  %v7304_v0 = vpop.permute.xlu0 %2926  ;;  %v7317_v47 = vld [vmem:[%s6329_s19 + $0x80] sm:$0xf]  ;;  %v7661_v1 = vld [vmem:[%s6329_s19 + $0x12c] sm:$0xf] }
 0x12a   : > { %10750 = vst [vmem:[#allocation101_spill] sm:$0xff] %v7267_v18  ;;  %v2014_v15 = vrot.slane %v2012_v37, 4  ;;  %v2017_v49 = vrot.slane %v2015_v51, 4  ;;  %10753 = vst [vmem:[#allocation104_spill] sm:$0xff] %v7304_v0  ;;  %v2025_v0 = vrot.slane %v7317_v47, 5  ;;  %v7365_v13 = vpop.permute.xlu1 %2936  ;;  %v2122_v53 = vrot.slane %v6114_v26, 5 }
 0x12b   : > { %10752 = vst [vmem:[#allocation103_spill] sm:$0xff] %v7291_v24  ;;  %v2000_v62 = vsel %vm7160_vm5, %v1998_v21, %v1999_v29  ;;  %v2010_v29 = vsel %vm7160_vm5, %v5603_v3, %v2009_v11  ;;  %v2011_v34 = vrot.slane %v2009_v11, 4  ;;  %v7334_v11 = vld [vmem:[%s6329_s19 + $0x78] sm:$0xf]  ;;  %10760 = vst [vmem:[#allocation111_spill] sm:$0xff] %v7365_v13 }
 0x12c   : > { %3198 = vrot.lane.b32.xlu0 %v7267_v18, %s6278_s21  ;;  %3204 = vrot.lane.b32.xlu1 %v7291_v24, %s6278_s21  ;;  %v7308_v20 = vcombine.low %v1997_v55, %v2000_v62  ;;  %v2016_v9 = vsel %vm7160_vm5, %v2014_v15, %v2015_v51  ;;  %v2019_v21 = vsel %vm7160_vm5, %v2017_v49, %v2018_v2  ;;  %v7327_v55 = vld [vmem:[%s6329_s19 + $0x84] sm:$0xf]  ;;  %v2027_v49 = vrot.slane %v2025_v0, 4  ;;  %v6079_v51 = vld [vmem:[%s6329_s19 + $0x88] sm:$0x1] }
 0x12d   : > { %v7324_v62 = vcombine.low %v2016_v9, %v2019_v21  ;;  %v2028_v2 = vrot.slane %v7327_v55, 5  ;;  %v2013_v3 = vsel %vm7160_vm5, %v2011_v34, %v2012_v37  ;;  %v2031_v15 = vrot.slane %v6079_v51, 5  ;;  %v7348_v34 = vld [vmem:[%s6329_s19 + $0x94] sm:$0xf]  ;;  %10791 = vst [vmem:[#allocation142_spill] sm:$0xff] %v7661_v1 }
 0x12e   : > { %10754 = vst [vmem:[#allocation105_spill] sm:$0xff] %v7308_v20  ;;  %v5604_v14 = vrot.slane %v7334_v11, 9  ;;  %v7339_v9 = vcombine.low %v2010_v29, %v2013_v3  ;;  %v2038_v51 = vrot.slane %v7348_v34, 5  ;;  %v2041_v29 = vrot.slane %v7352_v35, 5  ;;  %v7355_v3 = vpop.permute.xlu0 %2930  ;;  %v7417_v10 = vpop.permute.xlu1 %2940  ;;  %v7441_v24 = vld [vmem:[%s6329_s19 + $0xb4] sm:$0xf] }
 0x12f   : > { %10756 = vst [vmem:[#allocation107_spill] sm:$0xff] %v7324_v62  ;;  %v2030_v21 = vrot.slane %v2028_v2, 4  ;;  %v2029_v37 = vsel %vm7160_vm5, %v2027_v49, %v2028_v2  ;;  %10758 = vst [vmem:[#allocation109_spill] sm:$0xff] %v7355_v3  ;;  %v2024_v49 = vrot.slane %v2022_v57, 4  ;;  %v2096_v18 = vrot.slane %v6104_v30, 5 }
 0x130   : > { %3202 = vrot.lane.b32.xlu0 %v7308_v20, %s6278_s21  ;;  %3208 = vrot.lane.b32.xlu1 %v7324_v62, %s6278_s21  ;;  %10757 = vst [vmem:[#allocation108_spill] sm:$0xff] %v7339_v9  ;;  %v2023_v2 = vsel %vm7160_vm5, %v5604_v14, %v2022_v57  ;;  %v2040_v45 = vrot.slane %v2038_v51, 4  ;;  %v2043_v23 = vrot.slane %v2041_v29, 4  ;;  %v6084_v62 = vld [vmem:[%s6329_s19 + $0x9c] sm:$0x1]  ;;  %10765 = vst [vmem:[#allocation116_spill] sm:$0xff] %v7417_v10 }
 0x131   : > { %v2032_v8 = vsel %vm7160_vm5, %v2030_v21, %v2031_v15  ;;  %v2026_v3 = vsel %vm7160_vm5, %v2024_v49, %v2025_v0  ;;  %v2044_v41 = vrot.slane %v6084_v62, 5  ;;  %v5605_v15 = vrot.slane %v7371_v36, 9  ;;  %v7375_v21 = vld [vmem:[%s6329_s19 + $0x90] sm:$0xf]  ;;  %v7389_v49 = vld [vmem:[%s6329_s19 + $0xa8] sm:$0xf] }
 0x132   : > { %v7363_v63 = vcombine.low %v2029_v37, %v2032_v8  ;;  %v2035_v8 = vrot.slane %v7375_v21, 5  ;;  %v7380_v14 = vcombine.low %v2023_v2, %v2026_v3  ;;  %v2042_v57 = vsel %vm7160_vm5, %v2040_v45, %v2041_v29  ;;  %v7397_v2 = vld [vmem:[%s6329_s19 + $0xac] sm:$0xf]  ;;  %v7464_v40 = vpop.permute.xlu1 %2944 }
 0x133   : > { %v2045_v0 = vsel %vm7160_vm5, %v2043_v23, %v2044_v41  ;;  %v2051_v13 = vrot.slane %v7389_v49, 5  ;;  %v2054_v45 = vrot.slane %v7397_v2, 5  ;;  %v7400_v23 = vpop.permute.xlu0 %2934  ;;  %10769 = vst [vmem:[#allocation120_spill] sm:$0xff] %v7464_v40 }
 0x134   : > { %3206 = vrot.lane.b32.xlu0 %v7339_v9, %s6278_s21  ;;  %10759 = vst [vmem:[#allocation110_spill] sm:$0xff] %v7363_v63  ;;  %3212 = vrot.lane.b32.xlu1 %v7363_v63, %s6278_s21  ;;  %10761 = vst [vmem:[#allocation112_spill] sm:$0xff] %v7380_v14  ;;  %v2036_v62 = vsel %vm7160_vm5, %v5605_v15, %v2035_v8  ;;  %v2037_v37 = vrot.slane %v2035_v8, 4  ;;  %v7394_v3 = vcombine.low %v2042_v57, %v2045_v0  ;;  %v6089_v15 = vld [vmem:[%s6329_s19 + $0xb0] sm:$0x1] }
 0x135   : > { %10763 = vst [vmem:[#allocation114_spill] sm:$0xff] %v7400_v23  ;;  %v2053_v29 = vrot.slane %v2051_v13, 4  ;;  %v2057_v8 = vrot.slane %v6089_v15, 5  ;;  %v7406_v63 = vld [vmem:[%s6329_s19 + $0xa0] sm:$0xf]  ;;  %v2056_v0 = vrot.slane %v2054_v45, 4 }
 0x136   : > { %10762 = vst [vmem:[#allocation113_spill] sm:$0xff] %v7394_v3  ;;  %v2039_v41 = vsel %vm7160_vm5, %v2037_v37, %v2038_v51  ;;  %v2048_v23 = vrot.slane %v7414_v52, 5  ;;  %v7422_v37 = vld [vmem:[%s6329_s19 + $0xbc] sm:$0xf]  ;;  %v7509_v42 = vpop.permute.xlu1 %2948 }
 0x137   : > { %v7411_v57 = vcombine.low %v2036_v62, %v2039_v41  ;;  %v2055_v51 = vsel %vm7160_vm5, %v2053_v29, %v2054_v45  ;;  %v2064_v15 = vrot.slane %v7422_v37, 5  ;;  %v2058_v41 = vsel %vm7160_vm5, %v2056_v0, %v2057_v8  ;;  %v7445_v8 = vld [vmem:[%s6329_s19 + $0xb8] sm:$0xf]  ;;  %10774 = vst [vmem:[#allocation125_spill] sm:$0xff] %v7509_v42 }
 0x138   : > { %3210 = vrot.lane.b32.xlu0 %v7380_v14, %s6278_s21  ;;  %v5606_v14 = vrot.slane %v7406_v63, 9  ;;  %3216 = vrot.lane.b32.xlu1 %v7394_v3, %s6278_s21  ;;  %v7426_v3 = vld [vmem:[%s6329_s19 + $0xc0] sm:$0xf]  ;;  %v2050_v9 = vrot.slane %v2048_v23, 4  ;;  %v7435_v45 = vcombine.low %v2055_v51, %v2058_v41  ;;  %v7461_v41 = vld [vmem:[%s6329_s19 + $0xd0] sm:$0xf] }
 0x139   : > { %10764 = vst [vmem:[#allocation115_spill] sm:$0xff] %v7411_v57  ;;  %v2067_v62 = vrot.slane %v7426_v3, 5  ;;  %v2066_v29 = vrot.slane %v2064_v15, 4 }
 0x13a   : > { %v2049_v10 = vsel %vm7160_vm5, %v5606_v14, %v2048_v23  ;;  %10766 = vst [vmem:[#allocation117_spill] sm:$0xff] %v7435_v45  ;;  %v2052_v61 = vsel %vm7160_vm5, %v2050_v9, %v2051_v13  ;;  %v2061_v14 = vrot.slane %v7445_v8, 5  ;;  %v7448_v23 = vpop.permute.xlu0 %2938  ;;  %v7563_v48 = vpop.permute.xlu1 %2952 }
 0x13b   : > { %v2069_v50 = vrot.slane %v2067_v62, 4  ;;  %10767 = vst [vmem:[#allocation118_spill] sm:$0xff] %v7448_v23  ;;  %v7452_v0 = vcombine.low %v2049_v10, %v2052_v61  ;;  %v2068_v43 = vsel %vm7160_vm5, %v2066_v29, %v2067_v62  ;;  %v2077_v23 = vrot.slane %v7461_v41, 5  ;;  %v7471_v61 = vld [vmem:[%s6329_s19 + $0xd4] sm:$0xf]  ;;  %10779 = vst [vmem:[#allocation130_spill] sm:$0xff] %v7563_v48 }
 0x13c   : > { %3214 = vrot.lane.b32.xlu0 %v7411_v57, %s6278_s21  ;;  %v5607_v57 = vrot.slane %v7441_v24, 9  ;;  %3220 = vrot.lane.b32.xlu1 %v7435_v45, %s6278_s21  ;;  %v2063_v51 = vrot.slane %v2061_v14, 4  ;;  %v6099_v62 = vld [vmem:[%s6329_s19 + $0xd8] sm:$0x1]  ;;  %v7486_v45 = vld [vmem:[%s6329_s19 + $0xcc] sm:$0xf] }
 0x13d   : > { %10768 = vst [vmem:[#allocation119_spill] sm:$0xff] %v7452_v0  ;;  %v2071_v13 = vsel %vm7160_vm5, %v2069_v50, %v2070_v32  ;;  %v2080_v50 = vrot.slane %v7471_v61, 5  ;;  %v2083_v29 = vrot.slane %v6099_v62, 5 }
 0x13e   : > { %v2062_v9 = vsel %vm7160_vm5, %v5607_v57, %v2061_v14  ;;  %v7468_v10 = vcombine.low %v2068_v43, %v2071_v13  ;;  %v2065_v32 = vsel %vm7160_vm5, %v2063_v51, %v2064_v15  ;;  %v2079_v57 = vrot.slane %v2077_v23, 4  ;;  %v7478_v14 = vld [vmem:[%s6329_s19 + $0xc8] sm:$0xf]  ;;  %v7492_v51 = vld [vmem:[%s6329_s19 + $0xe4] sm:$0xf] }
 0x13f   : > { %v5608_v40 = vrot.slane %v7478_v14, 9  ;;  %v7483_v43 = vcombine.low %v2062_v9, %v2065_v32  ;;  %v2082_v13 = vrot.slane %v2080_v50, 4  ;;  %v2090_v62 = vrot.slane %v7492_v51, 5  ;;  %v7499_v32 = vpop.permute.xlu0 %2942 }
 0x140   : > { %3218 = vrot.lane.b32.xlu0 %v7452_v0, %s6278_s21  ;;  %10770 = vst [vmem:[#allocation121_spill] sm:$0xff] %v7468_v10  ;;  %3224 = vrot.lane.b32.xlu1 %v7468_v10, %s6278_s21  ;;  %v2074_v0 = vrot.slane %v7486_v45, 5  ;;  %v2081_v15 = vsel %vm7160_vm5, %v2079_v57, %v2080_v50  ;;  %v2093_v9 = vrot.slane %v7496_v6, 5  ;;  %10772 = vst [vmem:[#allocation123_spill] sm:$0xff] %v7499_v32  ;;  %v7587_v10 = vld [vmem:[%s6329_s19 + $0x104] sm:$0xf] }
 0x141   : > { %10771 = vst [vmem:[#allocation122_spill] sm:$0xff] %v7483_v43  ;;  %v2084_v20 = vsel %vm7160_vm5, %v2082_v13, %v2083_v29  ;;  %v2092_v7 = vrot.slane %v2090_v62, 4  ;;  %v5609_v29 = vrot.slane %v7515_v12, 9  ;;  %v7519_v13 = vld [vmem:[%s6329_s19 + $0xe0] sm:$0xf]  ;;  %v7610_v38 = vpop.permute.xlu1 %2956 }
 0x142   : > { %v2075_v50 = vsel %vm7160_vm5, %v5608_v40, %v2074_v0  ;;  %v2076_v57 = vrot.slane %v2074_v0, 4  ;;  %v7507_v5 = vcombine.low %v2081_v15, %v2084_v20  ;;  %v2095_v58 = vrot.slane %v2093_v9, 4  ;;  %10783 = vst [vmem:[#allocation134_spill] sm:$0xff] %v7610_v38 }
 0x143   : > { %v2087_v40 = vrot.slane %v7519_v13, 5 }
 0x144   : > { %3222 = vrot.lane.b32.xlu0 %v7483_v43, %s6278_s21  ;;  %10773 = vst [vmem:[#allocation124_spill] sm:$0xff] %v7507_v5  ;;  %v2078_v32 = vsel %vm7160_vm5, %v2076_v57, %v2077_v23  ;;  %3228 = vrot.lane.b32.xlu1 %v7507_v5, %s6278_s21  ;;  %v2094_v23 = vsel %vm7160_vm5, %v2092_v7, %v2093_v9  ;;  %v7533_v57 = vld [vmem:[%s6329_s19 + $0xf8] sm:$0xf]  ;;  %v7560_v5 = vld [vmem:[%s6329_s19 + $0xf4] sm:$0xf] }
 0x145   : > { %v7524_v20 = vcombine.low %v2075_v50, %v2078_v32  ;;  %v2097_v30 = vsel %vm7160_vm5, %v2095_v58, %v2096_v18  ;;  %v2088_v0 = vsel %vm7160_vm5, %v5609_v29, %v2087_v40  ;;  %v2089_v15 = vrot.slane %v2087_v40, 4  ;;  %v7541_v50 = vld [vmem:[%s6329_s19 + $0xfc] sm:$0xf]  ;;  %v7544_v58 = vpop.permute.xlu0 %2946  ;;  %v6109_v29 = vld [vmem:[%s6329_s19 + $0x100] sm:$0x1] }
 0x146   : > { %v2103_v42 = vrot.slane %v7533_v57, 5  ;;  %v7538_v32 = vcombine.low %v2094_v23, %v2097_v30  ;;  %v2106_v7 = vrot.slane %v7541_v50, 5  ;;  %10777 = vst [vmem:[#allocation128_spill] sm:$0xff] %v7544_v58  ;;  %v2109_v40 = vrot.slane %v6109_v29, 5 }
 0x147   : > { %10775 = vst [vmem:[#allocation126_spill] sm:$0xff] %v7524_v20  ;;  %5855 = vmatprep.subr.msk.bf16.mxu1 %vm3990_vm6, %v7524_v20  ;;  %v2091_v18 = vsel %vm7160_vm5, %v2089_v15, %v2090_v62  ;;  %v5610_v23 = vrot.slane %v7552_v27, 9  ;;  %v2100_v17 = vrot.slane %v7560_v5, 5  ;;  %v7568_v15 = vld [vmem:[%s6329_s19 + $0x10c] sm:$0xf] }
 0x148   : > { %3226 = vrot.lane.b32.xlu0 %v7524_v20, %s6278_s21  ;;  %10776 = vst [vmem:[#allocation127_spill] sm:$0xff] %v7538_v32  ;;  %v2105_v9 = vrot.slane %v2103_v42, 4  ;;  %3232 = vrot.lane.b32.xlu1 %v7538_v32, %s6278_s21  ;;  %v7557_v30 = vcombine.low %v2088_v0, %v2091_v18  ;;  %v2108_v58 = vrot.slane %v2106_v7, 4  ;;  %v2116_v29 = vrot.slane %v7568_v15, 5  ;;  %v7572_v32 = vld [vmem:[%s6329_s19 + $0x110] sm:$0xf] }
 0x149   : > { %v2119_v0 = vrot.slane %v7572_v32, 5  ;;  %v2101_v48 = vsel %vm7160_vm5, %v5610_v23, %v2100_v17  ;;  %v2102_v54 = vrot.slane %v2100_v17, 4  ;;  %v7594_v17 = vpop.permute.xlu0 %2950  ;;  %v7655_v43 = vpop.permute.xlu1 %2960 }
 0x14a   : > { %10778 = vst [vmem:[#allocation129_spill] sm:$0xff] %v7557_v30  ;;  %v2107_v62 = vsel %vm7160_vm5, %v2105_v9, %v2106_v7  ;;  %v2110_v18 = vsel %vm7160_vm5, %v2108_v58, %v2109_v40  ;;  %v2118_v9 = vrot.slane %v2116_v29, 4  ;;  %v7591_v58 = vld [vmem:[%s6329_s19 + $0x108] sm:$0xf]  ;;  %10781 = vst [vmem:[#allocation132_spill] sm:$0xff] %v7594_v17 }
 0x14b   : > { %v7581_v7 = vcombine.low %v2107_v62, %v2110_v18  ;;  %v2121_v20 = vrot.slane %v2119_v0, 4  ;;  %v2104_v31 = vsel %vm7160_vm5, %v2102_v54, %v2103_v42  ;;  %v2113_v40 = vrot.slane %v7591_v58, 5  ;;  %v7607_v18 = vld [vmem:[%s6329_s19 + $0x120] sm:$0xf]  ;;  %10790 = vst [vmem:[#allocation141_spill] sm:$0xff] %v7655_v43 }
 0x14c   : > { %3230 = vrot.lane.b32.xlu0 %v7557_v30, %s6278_s21  ;;  %v5611_v30 = vrot.slane %v7587_v10, 9  ;;  %v7598_v23 = vcombine.low %v2101_v48, %v2104_v31  ;;  %v2120_v54 = vsel %vm7160_vm5, %v2118_v9, %v2119_v0  ;;  %v2129_v17 = vrot.slane %v7607_v18, 5  ;;  %v7617_v31 = vld [vmem:[%s6329_s19 + $0x124] sm:$0xf]  ;;  %v6119_v0 = vld [vmem:[%s6329_s19 + $0x128] sm:$0x1] }
 0x14d   : > { %10780 = vst [vmem:[#allocation131_spill] sm:$0xff] %v7581_v7  ;;  %3236 = vrot.lane.b32.xlu1 %v7581_v7, %s6278_s21  ;;  %v2123_v26 = vsel %vm7160_vm5, %v2121_v20, %v2122_v53  ;;  %v2115_v62 = vrot.slane %v2113_v40, 4  ;;  %v2132_v53 = vrot.slane %v7617_v31, 5  ;;  %v2135_v9 = vrot.slane %v6119_v0, 5  ;;  %v7632_v7 = vld [vmem:[%s6329_s19 + $0x11c] sm:$0xf] }
 0x14e   : > { %10782 = vst [vmem:[#allocation133_spill] sm:$0xff] %v7598_v23  ;;  %v2114_v42 = vsel %vm7160_vm5, %v5611_v30, %v2113_v40  ;;  %v7614_v48 = vcombine.low %v2120_v54, %v2123_v26  ;;  %v2131_v30 = vrot.slane %v2129_v17, 4  ;;  %v7624_v40 = vld [vmem:[%s6329_s19 + $0x118] sm:$0xf] }
 0x14f   : > { %v2117_v20 = vsel %vm7160_vm5, %v2115_v62, %v2116_v29  ;;  %v5612_v38 = vrot.slane %v7624_v40, 9  ;;  %v2134_v26 = vrot.slane %v2132_v53, 4  ;;  %v7638_v62 = vld [vmem:[%s6329_s19 + $0x134] sm:$0xf] }
 0x150   : > { %3234 = vrot.lane.b32.xlu0 %v7598_v23, %s6278_s21  ;;  %10784 = vst [vmem:[#allocation135_spill] sm:$0xff] %v7614_v48  ;;  %v7629_v54 = vcombine.low %v2114_v42, %v2117_v20  ;;  %v2126_v23 = vrot.slane %v7632_v7, 5  ;;  %v2133_v29 = vsel %vm7160_vm5, %v2131_v30, %v2132_v53  ;;  %10786 = vst [vmem:[#allocation137_spill] sm:$0xff] %v7638_v62  ;;  %v2142_v0 = vrot.slane %v7638_v62, 5  ;;  %v7645_v20 = vpop.permute.xlu0 %2954 }
 0x151   : > { %3240 = vrot.lane.b32.xlu1 %v7614_v48, %s6278_s21  ;;  %v2145_v42 = vrot.slane %v7642_v25, 5  ;;  %10788 = vst [vmem:[#allocation139_spill] sm:$0xff] %v7645_v20  ;;  %v2136_v48 = vsel %vm7160_vm5, %v2134_v26, %v2135_v9  ;;  %v5613_v9 = vrot.slane %v7661_v1, 9  ;;  %v7665_v26 = vld [vmem:[%s6329_s19 + $0x130] sm:$0xf] }
 0x152   : > { %10785 = vst [vmem:[#allocation136_spill] sm:$0xff] %v7629_v54  ;;  %v2127_v53 = vsel %vm7160_vm5, %v5612_v38, %v2126_v23  ;;  %v2128_v30 = vrot.slane %v2126_v23, 4  ;;  %v7653_v59 = vcombine.low %v2133_v29, %v2136_v48  ;;  %v2144_v22 = vrot.slane %v2142_v0, 4  ;;  %10792 = vst [vmem:[#allocation143_spill] sm:$0xff] %v7665_v26  ;;  %v7731_v1 = vld [vmem:[%s6329_s19 + $0x154] sm:$0xf] }
 0x153   : > { %v2147_v16 = vrot.slane %v2145_v42, 4  ;;  %v2139_v38 = vrot.slane %v7665_v26, 5  ;;  %10805 = vst [vmem:[#allocation156_spill] sm:$0xff] %v7731_v1  ;;  %v6206_v25 = vld [vmem:[%s6329_s19 + $0x270] sm:$0xf] }
 0x154   : > { %3238 = vrot.lane.b32.xlu0 %v7629_v54, %s6278_s21  ;;  %10789 = vst [vmem:[#allocation140_spill] sm:$0xff] %v7653_v59  ;;  %v2130_v20 = vsel %vm7160_vm5, %v2128_v30, %v2129_v17  ;;  %v2148_v54 = vrot.slane %v6124_v4, 5  ;;  %v2146_v17 = vsel %vm7160_vm5, %v2144_v22, %v2145_v42  ;;  %v7679_v30 = vld [vmem:[%s6329_s19 + $0x148] sm:$0xf] }
 0x155   : > { %3244 = vrot.lane.b32.xlu1 %v7653_v59, %s6278_s21  ;;  %v7670_v23 = vcombine.low %v2127_v53, %v2130_v20  ;;  %v2140_v48 = vsel %vm7160_vm5, %v5613_v9, %v2139_v38  ;;  %v2141_v29 = vrot.slane %v2139_v38, 4  ;;  %10794 = vst [vmem:[#allocation145_spill] sm:$0xff] %v7679_v30  ;;  %v2155_v43 = vrot.slane %v7679_v30, 5  ;;  %v7687_v53 = vld [vmem:[%s6329_s19 + $0x14c] sm:$0xf]  ;;  %v7707_v30 = vpop.permute.xlu1 %2964 }
 0x156   : > { %v2149_v4 = vsel %vm7160_vm5, %v2147_v16, %v2148_v54  ;;  %10796 = vst [vmem:[#allocation147_spill] sm:$0xff] %v7687_v53  ;;  %v2158_v22 = vrot.slane %v7687_v53, 5  ;;  %v7690_v16 = vpop.permute.xlu0 %2958  ;;  %v6129_v9 = vld [vmem:[%s6329_s19 + $0x150] sm:$0x1]  ;;  %v7696_v59 = vld [vmem:[%s6329_s19 + $0x140] sm:$0xf] }
 0x157   : > { %10793 = vst [vmem:[#allocation144_spill] sm:$0xff] %v7670_v23  ;;  %v7684_v20 = vcombine.low %v2146_v17, %v2149_v4  ;;  %10797 = vst [vmem:[#allocation148_spill] sm:$0xff] %v7690_v16  ;;  %v2143_v54 = vsel %vm7160_vm5, %v2141_v29, %v2142_v0  ;;  %v2157_v42 = vrot.slane %v2155_v43, 4  ;;  %v2161_v38 = vrot.slane %v6129_v9, 5  ;;  %v6132_v0 = vld [vmem:[%s6329_s19 + $0x164] sm:$0x1] }
 0x158   : > { %3242 = vrot.lane.b32.xlu0 %v7670_v23, %s6278_s21  ;;  %10798 = vst [vmem:[#allocation149_spill] sm:$0xff] %v7696_v59  ;;  %v5614_v17 = vrot.slane %v7696_v59, 9  ;;  %v7701_v4 = vcombine.low %v2140_v48, %v2143_v54  ;;  %v2160_v23 = vrot.slane %v2158_v22, 4  ;;  %v2152_v16 = vrot.slane %v7704_v44, 5  ;;  %10801 = vst [vmem:[#allocation152_spill] sm:$0xff] %v7707_v30 }
 0x159   : > { %10795 = vst [vmem:[#allocation146_spill] sm:$0xff] %v7684_v20  ;;  %3248 = vrot.lane.b32.xlu1 %v7684_v20, %s6278_s21  ;;  %v2174_v29 = vrot.slane %v6132_v0, 5  ;;  %v2159_v9 = vsel %vm7160_vm5, %v2157_v42, %v2158_v22  ;;  %v7713_v59 = vld [vmem:[%s6329_s19 + $0x15c] sm:$0xf]  ;;  %v7717_v48 = vld [vmem:[%s6329_s19 + $0x160] sm:$0xf] }
 0x15a   : > { %10799 = vst [vmem:[#allocation150_spill] sm:$0xff] %v7701_v4  ;;  %10802 = vst [vmem:[#allocation153_spill] sm:$0xff] %v7713_v59  ;;  %v2168_v20 = vrot.slane %v7713_v59, 5  ;;  %v2171_v54 = vrot.slane %v7717_v48, 5  ;;  %v2162_v30 = vsel %vm7160_vm5, %v2160_v23, %v2161_v38  ;;  %v2153_v0 = vsel %vm7160_vm5, %v5614_v17, %v2152_v16  ;;  %v7738_v38 = vpop.permute.xlu0 %2962 }
 0x15b   : > { %10803 = vst [vmem:[#allocation154_spill] sm:$0xff] %v7717_v48  ;;  %v2154_v44 = vrot.slane %v2152_v16, 4  ;;  %v7726_v53 = vcombine.low %v2159_v9, %v2162_v30  ;;  %v7735_v48 = vld [vmem:[%s6329_s19 + $0x158] sm:$0xf]  ;;  %10807 = vst [vmem:[#allocation158_spill] sm:$0xff] %v7738_v38  ;;  %v7752_v38 = vpop.permute.xlu1 %2968 }
 0x15c   : > { %3246 = vrot.lane.b32.xlu0 %v7701_v4, %s6278_s21  ;;  %v2170_v22 = vrot.slane %v2168_v20, 4  ;;  %v2173_v42 = vrot.slane %v2171_v54, 4  ;;  %v5615_v4 = vrot.slane %v7731_v1, 9  ;;  %10806 = vst [vmem:[#allocation157_spill] sm:$0xff] %v7735_v48  ;;  %v2165_v23 = vrot.slane %v7735_v48, 5  ;;  %10810 = vst [vmem:[#allocation161_spill] sm:$0xff] %v7752_v38 }
 0x15d   : > { %10804 = vst [vmem:[#allocation155_spill] sm:$0xff] %v7726_v53  ;;  %v2156_v59 = vsel %vm7160_vm5, %v2154_v44, %v2155_v43  ;;  %3252 = vrot.lane.b32.xlu1 %v7726_v53, %s6278_s21  ;;  %v6137_v1 = vld [vmem:[%s6329_s19 + $0x178] sm:$0x1]  ;;  %v6152_v48 = vld [vmem:[%s6329_s19 + $0x1b4] sm:$0x1] }
 0x15e   : > { %v7742_v30 = vcombine.low %v2153_v0, %v2156_v59  ;;  %v2172_v44 = vsel %vm7160_vm5, %v2170_v22, %v2171_v54  ;;  %v2175_v43 = vsel %vm7160_vm5, %v2173_v42, %v2174_v29  ;;  %v2166_v17 = vsel %vm7160_vm5, %v5615_v4, %v2165_v23  ;;  %v7758_v59 = vld [vmem:[%s6329_s19 + $0x170] sm:$0xf]  ;;  %v7762_v29 = vld [vmem:[%s6329_s19 + $0x174] sm:$0xf]  ;;  %v7766_v22 = vld [vmem:[%s6329_s19 + $0x168] sm:$0xf] }
 0x15f   : > { %v7748_v16 = vcombine.low %v2172_v44, %v2175_v43  ;;  %v2167_v9 = vrot.slane %v2165_v23, 4  ;;  %v2187_v53 = vrot.slane %v6137_v1, 5  ;;  %10811 = vst [vmem:[#allocation162_spill] sm:$0xff] %v7758_v59  ;;  %v2181_v54 = vrot.slane %v7758_v59, 5  ;;  %10812 = vst [vmem:[#allocation163_spill] sm:$0xff] %v7762_v29 }
 0x160   : > { %10808 = vst [vmem:[#allocation159_spill] sm:$0xff] %v7742_v30  ;;  %3250 = vrot.lane.b32.xlu0 %v7742_v30, %s6278_s21  ;;  %v2184_v0 = vrot.slane %v7762_v29, 5  ;;  %10813 = vst [vmem:[#allocation164_spill] sm:$0xff] %v7766_v22  ;;  %v5616_v4 = vrot.slane %v7766_v22, 9  ;;  %v7772_v1 = vld [vmem:[%s6329_s19 + $0x16c] sm:$0xf]  ;;  %v7786_v29 = vpop.permute.xlu0 %2966 }
 0x161   : > { %10809 = vst [vmem:[#allocation160_spill] sm:$0xff] %v7748_v16  ;;  %v2169_v42 = vsel %vm7160_vm5, %v2167_v9, %v2168_v20  ;;  %10814 = vst [vmem:[#allocation165_spill] sm:$0xff] %v7772_v1  ;;  %v2178_v23 = vrot.slane %v7772_v1, 5  ;;  %3256 = vrot.lane.b32.xlu1 %v7748_v16, %s6278_s21  ;;  %v2183_v43 = vrot.slane %v2181_v54, 4  ;;  %v7780_v30 = vld [vmem:[%s6329_s19 + $0x184] sm:$0xf] }
 0x162   : > { %v7777_v44 = vcombine.low %v2166_v17, %v2169_v42  ;;  %v2186_v38 = vrot.slane %v2184_v0, 4  ;;  %10816 = vst [vmem:[#allocation167_spill] sm:$0xff] %v7780_v30  ;;  %v2194_v22 = vrot.slane %v7780_v30, 5  ;;  %v6143_v59 = vld [vmem:[%s6329_s19 + $0x18c] sm:$0x1]  ;;  %10817 = vst [vmem:[#allocation168_spill] sm:$0xff] %v7786_v29 }
 0x163   : > { %v2200_v20 = vrot.slane %v6143_v59, 5  ;;  %v2179_v9 = vsel %vm7160_vm5, %v5616_v4, %v2178_v23  ;;  %v2180_v1 = vrot.slane %v2178_v23, 4  ;;  %v2185_v17 = vsel %vm7160_vm5, %v2183_v43, %v2184_v0  ;;  %v7795_v30 = vld [vmem:[%s6329_s19 + $0x188] sm:$0xf]  ;;  %v7803_v29 = vld [vmem:[%s6329_s19 + $0x17c] sm:$0xf] }
 0x164   : > { %10815 = vst [vmem:[#allocation166_spill] sm:$0xff] %v7777_v44  ;;  %3254 = vrot.lane.b32.xlu0 %v7777_v44, %s6278_s21  ;;  %v2188_v42 = vsel %vm7160_vm5, %v2186_v38, %v2187_v53  ;;  %v2196_v16 = vrot.slane %v2194_v22, 4  ;;  %10818 = vst [vmem:[#allocation169_spill] sm:$0xff] %v7795_v30  ;;  %v2197_v59 = vrot.slane %v7795_v30, 5  ;;  %v5617_v44 = vrot.slane %v7803_v29, 9  ;;  %v7810_v38 = vpop.permute.xlu1 %2972 }
 0x165   : > { %v7798_v4 = vcombine.low %v2185_v17, %v2188_v42  ;;  %v2182_v23 = vsel %vm7160_vm5, %v2180_v1, %v2181_v54  ;;  %10820 = vst [vmem:[#allocation171_spill] sm:$0xff] %v7803_v29  ;;  %v7807_v0 = vld [vmem:[%s6329_s19 + $0x180] sm:$0xf]  ;;  %10822 = vst [vmem:[#allocation173_spill] sm:$0xff] %v7810_v38  ;;  %v7821_v29 = vld [vmem:[%s6329_s19 + $0x198] sm:$0xf] }
 0x166   : > { %10821 = vst [vmem:[#allocation172_spill] sm:$0xff] %v7807_v0  ;;  %v2191_v53 = vrot.slane %v7807_v0, 5  ;;  %v7812_v43 = vcombine.low %v2179_v9, %v2182_v23  ;;  %v2198_v17 = vsel %vm7160_vm5, %v2196_v16, %v2197_v59  ;;  %v2199_v42 = vrot.slane %v2197_v59, 4  ;;  %10824 = vst [vmem:[#allocation175_spill] sm:$0xff] %v7821_v29  ;;  %v6148_v30 = vld [vmem:[%s6329_s19 + $0x1a0] sm:$0x1] }
 0x167   : > { %10819 = vst [vmem:[#allocation170_spill] sm:$0xff] %v7798_v4  ;;  %3260 = vrot.lane.b32.xlu1 %v7798_v4, %s6278_s21  ;;  %v2207_v0 = vrot.slane %v7821_v29, 5  ;;  %v2213_v9 = vrot.slane %v6148_v30, 5  ;;  %v7830_v59 = vld [vmem:[%s6329_s19 + $0x19c] sm:$0xf]  ;;  %v2226_v26 = vrot.slane %v6152_v48, 5 }
 0x168   : > { %10823 = vst [vmem:[#allocation174_spill] sm:$0xff] %v7812_v43  ;;  %v2192_v54 = vsel %vm7160_vm5, %v5617_v44, %v2191_v53  ;;  %v2193_v1 = vrot.slane %v2191_v53, 4  ;;  %3258 = vrot.lane.b32.xlu0 %v7812_v43, %s6278_s21  ;;  %v2201_v16 = vsel %vm7160_vm5, %v2199_v42, %v2200_v20  ;;  %10825 = vst [vmem:[#allocation176_spill] sm:$0xff] %v7830_v59  ;;  %v2210_v44 = vrot.slane %v7830_v59, 5  ;;  %v7834_v23 = vld [vmem:[%s6329_s19 + $0x190] sm:$0xf]  ;;  %v7841_v43 = vpop.permute.xlu0 %2970 }
 0x169   : > { %10826 = vst [vmem:[#allocation177_spill] sm:$0xff] %v7834_v23  ;;  %v5618_v53 = vrot.slane %v7834_v23, 9  ;;  %v7837_v38 = vcombine.low %v2198_v17, %v2201_v16  ;;  %v2209_v4 = vrot.slane %v2207_v0, 4  ;;  %10828 = vst [vmem:[#allocation179_spill] sm:$0xff] %v7841_v43  ;;  %v7846_v42 = vld [vmem:[%s6329_s19 + $0x194] sm:$0xf] }
 0x16a   : > { %v2195_v30 = vsel %vm7160_vm5, %v2193_v1, %v2194_v22  ;;  %v2212_v20 = vrot.slane %v2210_v44, 4  ;;  %10830 = vst [vmem:[#allocation181_spill] sm:$0xff] %v7846_v42  ;;  %v2204_v59 = vrot.slane %v7846_v42, 5  ;;  %v7855_v22 = vld [vmem:[%s6329_s19 + $0x1ac] sm:$0xf] }
 0x16b   : > { %10827 = vst [vmem:[#allocation178_spill] sm:$0xff] %v7837_v38  ;;  %v7843_v29 = vcombine.low %v2192_v54, %v2195_v30  ;;  %3264 = vrot.lane.b32.xlu1 %v7837_v38, %s6278_s21  ;;  %v2211_v17 = vsel %vm7160_vm5, %v2209_v4, %v2210_v44  ;;  %10831 = vst [vmem:[#allocation182_spill] sm:$0xff] %v7855_v22  ;;  %v2220_v54 = vrot.slane %v7855_v22, 5  ;;  %v7859_v1 = vld [vmem:[%s6329_s19 + $0x1b0] sm:$0xf]  ;;  %v7862_v30 = vpop.permute.xlu1 %2976 }
 0x16c   : > { %10832 = vst [vmem:[#allocation183_spill] sm:$0xff] %v7859_v1  ;;  %v2223_v16 = vrot.slane %v7859_v1, 5  ;;  %10833 = vst [vmem:[#allocation184_spill] sm:$0xff] %v7862_v30  ;;  %v2214_v48 = vsel %vm7160_vm5, %v2212_v20, %v2213_v9  ;;  %v2205_v4 = vsel %vm7160_vm5, %v5618_v53, %v2204_v59  ;;  %v2206_v44 = vrot.slane %v2204_v59, 4  ;;  %v7875_v30 = vld [vmem:[%s6329_s19 + $0x1a4] sm:$0xf] }
 0x16d   : > { %10829 = vst [vmem:[#allocation180_spill] sm:$0xff] %v7843_v29  ;;  %3262 = vrot.lane.b32.xlu0 %v7843_v29, %s6278_s21  ;;  %v7870_v43 = vcombine.low %v2211_v17, %v2214_v48  ;;  %v2222_v38 = vrot.slane %v2220_v54, 4  ;;  %10835 = vst [vmem:[#allocation186_spill] sm:$0xff] %v7875_v30  ;;  %v5619_v29 = vrot.slane %v7875_v30, 9  ;;  %v7879_v23 = vld [vmem:[%s6329_s19 + $0x1a8] sm:$0xf] }
 0x16e   : > { %v2225_v22 = vrot.slane %v2223_v16, 4  ;;  %v2208_v1 = vsel %vm7160_vm5, %v2206_v44, %v2207_v0  ;;  %10836 = vst [vmem:[#allocation187_spill] sm:$0xff] %v7879_v23  ;;  %v2217_v9 = vrot.slane %v7879_v23, 5  ;;  %v7890_v20 = vpop.permute.xlu0 %2974  ;;  %v6157_v30 = vld [vmem:[%s6329_s19 + $0x1c8] sm:$0x1] }
 0x16f   : > { %10834 = vst [vmem:[#allocation185_spill] sm:$0xff] %v7870_v43  ;;  %3268 = vrot.lane.b32.xlu1 %v7870_v43, %s6278_s21  ;;  %v7884_v59 = vcombine.low %v2205_v4, %v2208_v1  ;;  %v2224_v53 = vsel %vm7160_vm5, %v2222_v38, %v2223_v16  ;;  %10838 = vst [vmem:[#allocation189_spill] sm:$0xff] %v7890_v20  ;;  %v2239_v23 = vrot.slane %v6157_v30, 5  ;;  %v7900_v1 = vld [vmem:[%s6329_s19 + $0x1c0] sm:$0xf] }
 0x170   : > { %v2227_v0 = vsel %vm7160_vm5, %v2225_v22, %v2226_v26  ;;  %v2218_v48 = vsel %vm7160_vm5, %v5619_v29, %v2217_v9  ;;  %v2219_v44 = vrot.slane %v2217_v9, 4  ;;  %10840 = vst [vmem:[#allocation191_spill] sm:$0xff] %v7900_v1  ;;  %v2233_v26 = vrot.slane %v7900_v1, 5  ;;  %v7904_v38 = vld [vmem:[%s6329_s19 + $0x1c4] sm:$0xf] }
 0x171   : > { %10837 = vst [vmem:[#allocation188_spill] sm:$0xff] %v7884_v59  ;;  %v7892_v17 = vcombine.low %v2224_v53, %v2227_v0  ;;  %3266 = vrot.lane.b32.xlu0 %v7884_v59, %s6278_s21  ;;  %10841 = vst [vmem:[#allocation192_spill] sm:$0xff] %v7904_v38  ;;  %v2236_v22 = vrot.slane %v7904_v38, 5  ;;  %v7908_v16 = vld [vmem:[%s6329_s19 + $0x1b8] sm:$0xf]  ;;  %v7911_v4 = vpop.permute.xlu1 %2980 }
 0x172   : > { %10842 = vst [vmem:[#allocation193_spill] sm:$0xff] %v7908_v16  ;;  %v5620_v29 = vrot.slane %v7908_v16, 9  ;;  %10843 = vst [vmem:[#allocation194_spill] sm:$0xff] %v7911_v4  ;;  %v2221_v30 = vsel %vm7160_vm5, %v2219_v44, %v2220_v54  ;;  %v7916_v9 = vld [vmem:[%s6329_s19 + $0x1bc] sm:$0xf]  ;;  %v2235_v20 = vrot.slane %v2233_v26, 4 }
 0x173   : > { %10839 = vst [vmem:[#allocation190_spill] sm:$0xff] %v7892_v17  ;;  %10844 = vst [vmem:[#allocation195_spill] sm:$0xff] %v7916_v9  ;;  %v2230_v53 = vrot.slane %v7916_v9, 5  ;;  %3272 = vrot.lane.b32.xlu1 %v7892_v17, %s6278_s21  ;;  %v7921_v0 = vcombine.low %v2218_v48, %v2221_v30  ;;  %v2238_v43 = vrot.slane %v2236_v22, 4  ;;  %v7924_v59 = vld [vmem:[%s6329_s19 + $0x1d4] sm:$0xf] }
 0x174   : > { %10846 = vst [vmem:[#allocation197_spill] sm:$0xff] %v7924_v59  ;;  %v2246_v4 = vrot.slane %v7924_v59, 5  ;;  %v6163_v16 = vld [vmem:[%s6329_s19 + $0x1dc] sm:$0x1]  ;;  %v2237_v48 = vsel %vm7160_vm5, %v2235_v20, %v2236_v22  ;;  %v7937_v9 = vld [vmem:[%s6329_s19 + $0x1d8] sm:$0xf] }
 0x175   : > { %10845 = vst [vmem:[#allocation196_spill] sm:$0xff] %v7921_v0  ;;  %v2252_v54 = vrot.slane %v6163_v16, 5  ;;  %v2231_v44 = vsel %vm7160_vm5, %v5620_v29, %v2230_v53  ;;  %v2232_v1 = vrot.slane %v2230_v53, 4  ;;  %3270 = vrot.lane.b32.xlu0 %v7921_v0, %s6278_s21  ;;  %v2240_v30 = vsel %vm7160_vm5, %v2238_v43, %v2239_v23  ;;  %10847 = vst [vmem:[#allocation198_spill] sm:$0xff] %v7937_v9  ;;  %v7947_v0 = vld [vmem:[%s6329_s19 + $0x1cc] sm:$0xf] }
 0x176   : > { %v2248_v17 = vrot.slane %v2246_v4, 4  ;;  %v2249_v59 = vrot.slane %v7937_v9, 5  ;;  %v7940_v16 = vpop.permute.xlu0 %2978  ;;  %v7942_v29 = vcombine.low %v2237_v48, %v2240_v30  ;;  %10850 = vst [vmem:[#allocation201_spill] sm:$0xff] %v7947_v0  ;;  %v5621_v20 = vrot.slane %v7947_v0, 9  ;;  %v7951_v43 = vld [vmem:[%s6329_s19 + $0x1d0] sm:$0xf] }
 0x177   : > { %10848 = vst [vmem:[#allocation199_spill] sm:$0xff] %v7940_v16  ;;  %v2234_v53 = vsel %vm7160_vm5, %v2232_v1, %v2233_v26  ;;  %10851 = vst [vmem:[#allocation202_spill] sm:$0xff] %v7951_v43  ;;  %v2243_v23 = vrot.slane %v7951_v43, 5  ;;  %v7965_v0 = vld [vmem:[%s6329_s19 + $0x1e8] sm:$0xf] }
 0x178   : > { %10849 = vst [vmem:[#allocation200_spill] sm:$0xff] %v7942_v29  ;;  %v7954_v22 = vcombine.low %v2231_v44, %v2234_v53  ;;  %v2250_v16 = vsel %vm7160_vm5, %v2248_v17, %v2249_v59  ;;  %v2251_v48 = vrot.slane %v2249_v59, 4  ;;  %3276 = vrot.lane.b32.xlu1 %v7942_v29, %s6278_s21  ;;  %10854 = vst [vmem:[#allocation205_spill] sm:$0xff] %v7965_v0  ;;  %v2259_v43 = vrot.slane %v7965_v0, 5  ;;  %v6168_v44 = vld [vmem:[%s6329_s19 + $0x1f0] sm:$0x1] }
 0x179   : > { %v7958_v30 = vpop.permute.xlu1 %2984  ;;  %v2244_v1 = vsel %vm7160_vm5, %v5621_v20, %v2243_v23  ;;  %v2245_v26 = vrot.slane %v2243_v23, 4  ;;  %v2265_v53 = vrot.slane %v6168_v44, 5  ;;  %v7974_v17 = vld [vmem:[%s6329_s19 + $0x1ec] sm:$0xf]  ;;  %v7978_v23 = vld [vmem:[%s6329_s19 + $0x1e0] sm:$0xf] }
 0x17a   : > { %10852 = vst [vmem:[#allocation203_spill] sm:$0xff] %v7954_v22  ;;  %10853 = vst [vmem:[#allocation204_spill] sm:$0xff] %v7958_v30  ;;  %3274 = vrot.lane.b32.xlu0 %v7954_v22, %s6278_s21  ;;  %v2253_v59 = vsel %vm7160_vm5, %v2251_v48, %v2252_v54  ;;  %v2262_v20 = vrot.slane %v7974_v17, 5  ;;  %v5622_v30 = vrot.slane %v7978_v23, 9  ;;  %v2261_v0 = vrot.slane %v2259_v43, 4 }
 0x17b   : > { %10855 = vst [vmem:[#allocation206_spill] sm:$0xff] %v7974_v17  ;;  %10856 = vst [vmem:[#allocation207_spill] sm:$0xff] %v7978_v23  ;;  %v7981_v29 = vcombine.low %v2250_v16, %v2253_v59  ;;  %v2247_v44 = vsel %vm7160_vm5, %v2245_v26, %v2246_v4  ;;  %v7988_v54 = vld [vmem:[%s6329_s19 + $0x1e4] sm:$0xf]  ;;  %v6173_v4 = vld [vmem:[%s6329_s19 + $0x1fc] sm:$0xf] }
 0x17c   : > { %v7985_v22 = vcombine.low %v2244_v1, %v2247_v44  ;;  %v2264_v9 = vrot.slane %v2262_v20, 4  ;;  %10859 = vst [vmem:[#allocation210_spill] sm:$0xff] %v7988_v54  ;;  %v2256_v48 = vrot.slane %v7988_v54, 5  ;;  %v6172_v17 = vld [vmem:[%s6329_s19 + $0x204] sm:$0x1]  ;;  %v2263_v16 = vsel %vm7160_vm5, %v2261_v0, %v2262_v20 }
 0x17d   : > { %10857 = vst [vmem:[#allocation208_spill] sm:$0xff] %v7981_v29  ;;  %v2278_v42 = vrot.slane %v6172_v17, 5  ;;  %3280 = vrot.lane.b32.xlu1 %v7981_v29, %s6278_s21  ;;  %v2272_v1 = vrot.slane %v6173_v4, 5  ;;  %v6174_v26 = vld [vmem:[%s6329_s19 + $0x200] sm:$0xf] }
 0x17e   : > { %10858 = vst [vmem:[#allocation209_spill] sm:$0xff] %v7985_v22  ;;  %v7991_v38 = vpop.permute.xlu0 %2982  ;;  %v2275_v59 = vrot.slane %v6174_v26, 5  ;;  %3278 = vrot.lane.b32.xlu0 %v7985_v22, %s6278_s21  ;;  %v2266_v44 = vsel %vm7160_vm5, %v2264_v9, %v2265_v53  ;;  %v2257_v17 = vsel %vm7160_vm5, %v5622_v30, %v2256_v48  ;;  %v8013_v26 = vld [vmem:[%s6329_s19 + $0x1f4] sm:$0xf]  ;;  %v8017_v9 = vld [vmem:[%s6329_s19 + $0x1f8] sm:$0xf] }
 0x17f   : > { %10860 = vst [vmem:[#allocation211_spill] sm:$0xff] %v7991_v38  ;;  %v2258_v38 = vrot.slane %v2256_v48, 4  ;;  %v8008_v29 = vcombine.low %v2263_v16, %v2266_v44  ;;  %v2274_v0 = vrot.slane %v2272_v1, 4  ;;  %10863 = vst [vmem:[#allocation214_spill] sm:$0xff] %v8013_v26  ;;  %v5623_v22 = vrot.slane %v8013_v26, 9 }
 0x180   : > { %v2277_v20 = vrot.slane %v2275_v59, 4  ;;  %10864 = vst [vmem:[#allocation215_spill] sm:$0xff] %v8017_v9  ;;  %v2269_v30 = vrot.slane %v8017_v9, 5  ;;  %v6177_v26 = vld [vmem:[%s6329_s19 + $0x218] sm:$0x1] }
 0x181   : > { %10862 = vst [vmem:[#allocation213_spill] sm:$0xff] %v8008_v29  ;;  %v2260_v4 = vsel %vm7160_vm5, %v2258_v38, %v2259_v43  ;;  %3284 = vrot.lane.b32.xlu1 %v8008_v29, %s6278_s21  ;;  %v2276_v48 = vsel %vm7160_vm5, %v2274_v0, %v2275_v59  ;;  %v2291_v9 = vrot.slane %v6177_v26, 5  ;;  %v6179_v0 = vld [vmem:[%s6329_s19 + $0x214] sm:$0xf]  ;;  %v6182_v29 = vld [vmem:[%s6329_s19 + $0x224] sm:$0xf] }
 0x182   : > { %v8006_v23 = vpop.permute.xlu1 %2988  ;;  %v8022_v53 = vcombine.low %v2257_v17, %v2260_v4  ;;  %v2279_v38 = vsel %vm7160_vm5, %v2277_v20, %v2278_v42  ;;  %v2270_v16 = vsel %vm7160_vm5, %v5623_v22, %v2269_v30  ;;  %v2271_v44 = vrot.slane %v2269_v30, 4  ;;  %v6178_v17 = vld [vmem:[%s6329_s19 + $0x210] sm:$0xf]  ;;  %v6180_v42 = vld [vmem:[%s6329_s19 + $0x208] sm:$0xf] }
 0x183   : > { %10861 = vst [vmem:[#allocation212_spill] sm:$0xff] %v8006_v23  ;;  %v8028_v43 = vcombine.low %v2276_v48, %v2279_v38  ;;  %v2285_v59 = vrot.slane %v6178_v17, 5  ;;  %v2288_v4 = vrot.slane %v6179_v0, 5  ;;  %v5624_v20 = vrot.slane %v6180_v42, 9  ;;  %v6181_v22 = vld [vmem:[%s6329_s19 + $0x20c] sm:$0xf] }
 0x184   : > { %10865 = vst [vmem:[#allocation216_spill] sm:$0xff] %v8022_v53  ;;  %3282 = vrot.lane.b32.xlu0 %v8022_v53, %s6278_s21  ;;  %v2273_v48 = vsel %vm7160_vm5, %v2271_v44, %v2272_v1  ;;  %v2282_v30 = vrot.slane %v6181_v22, 5  ;;  %v2298_v0 = vrot.slane %v6182_v29, 5  ;;  %v6183_v42 = vld [vmem:[%s6329_s19 + $0x22c] sm:$0x1] }
 0x185   : > { %10866 = vst [vmem:[#allocation217_spill] sm:$0xff] %v8028_v43  ;;  %v8032_v23 = vpop.permute.xlu0 %2986  ;;  %3288 = vrot.lane.b32.xlu1 %v8028_v43, %s6278_s21  ;;  %v8047_v26 = vcombine.low %v2270_v16, %v2273_v48  ;;  %v2290_v17 = vrot.slane %v2288_v4, 4  ;;  %v2304_v53 = vrot.slane %v6183_v42, 5  ;;  %v6186_v54 = vld [vmem:[%s6329_s19 + $0x220] sm:$0xf] }
 0x186   : > { %10867 = vst [vmem:[#allocation218_spill] sm:$0xff] %v8032_v23  ;;  %v2287_v23 = vrot.slane %v2285_v59, 4  ;;  %v2283_v1 = vsel %vm7160_vm5, %v5624_v20, %v2282_v30  ;;  %v2284_v44 = vrot.slane %v2282_v30, 4  ;;  %v2300_v48 = vrot.slane %v2298_v0, 4  ;;  %v6185_v30 = vld [vmem:[%s6329_s19 + $0x21c] sm:$0xf] }
 0x187   : > { %10869 = vst [vmem:[#allocation220_spill] sm:$0xff] %v8047_v26  ;;  %v2292_v16 = vsel %vm7160_vm5, %v2290_v17, %v2291_v9  ;;  %v5625_v42 = vrot.slane %v6185_v30, 9 }
 0x188   : > { %3286 = vrot.lane.b32.xlu0 %v8047_v26, %s6278_s21  ;;  %v2289_v22 = vsel %vm7160_vm5, %v2287_v23, %v2288_v4  ;;  %v2286_v20 = vsel %vm7160_vm5, %v2284_v44, %v2285_v59  ;;  %v2295_v26 = vrot.slane %v6186_v54, 5  ;;  %v6187_v44 = vld [vmem:[%s6329_s19 + $0x238] sm:$0xf] }
 0x189   : > { %v8043_v38 = vpop.permute.xlu1 %2992  ;;  %v8060_v29 = vcombine.low %v2289_v22, %v2292_v16  ;;  %v8070_v9 = vcombine.low %v2283_v1, %v2286_v20  ;;  %v2311_v54 = vrot.slane %v6187_v44, 5  ;;  %v6188_v22 = vld [vmem:[%s6329_s19 + $0x240] sm:$0x1]  ;;  %v6190_v20 = vld [vmem:[%s6329_s19 + $0x230] sm:$0xf] }
 0x18a   : > { %10868 = vst [vmem:[#allocation219_spill] sm:$0xff] %v8043_v38  ;;  %v6184_v38 = vld [vmem:[%s6329_s19 + $0x228] sm:$0xf]  ;;  %v2296_v59 = vsel %vm7160_vm5, %v5625_v42, %v2295_v26  ;;  %v2297_v17 = vrot.slane %v2295_v26, 4  ;;  %v2317_v16 = vrot.slane %v6188_v22, 5  ;;  %v5626_v30 = vrot.slane %v6190_v20, 9 }
 0x18b   : > { %v2301_v43 = vrot.slane %v6184_v38, 5  ;;  %10870 = vst [vmem:[#allocation221_spill] sm:$0xff] %v8060_v29  ;;  %10873 = vst [vmem:[#allocation224_spill] sm:$0xff] %v8070_v9  ;;  %3292 = vrot.lane.b32.xlu1 %v8060_v29, %s6278_s21  ;;  %v2313_v42 = vrot.slane %v2311_v54, 4  ;;  %v6194_v20 = vld [vmem:[%s6329_s19 + $0x250] sm:$0xf] }
 0x18c   : > { %3290 = vrot.lane.b32.xlu0 %v8070_v9, %s6278_s21  ;;  %v2299_v26 = vsel %vm7160_vm5, %v2297_v17, %v2298_v0  ;;  %v6191_v9 = vld [vmem:[%s6329_s19 + $0x234] sm:$0xf]  ;;  %v6193_v0 = vld [vmem:[%s6329_s19 + $0x24c] sm:$0xf] }
 0x18d   : > { %v8068_v23 = vpop.permute.xlu1 %3188  ;;  %v2302_v4 = vsel %vm7160_vm5, %v2300_v48, %v2301_v43  ;;  %v2303_v38 = vrot.slane %v2301_v43, 4  ;;  %v6189_v43 = vld [vmem:[%s6329_s19 + $0x23c] sm:$0xf]  ;;  %v8092_v22 = vcombine.low %v2296_v59, %v2299_v26  ;;  %v2324_v17 = vrot.slane %v6193_v0, 5 }
 0x18e   : > { %v8066_v62 = vpop.permute.xlu0 %2990  ;;  %10872 = vst [vmem:[#allocation223_spill] sm:$0xff] %v8068_v23  ;;  %v2314_v48 = vrot.slane %v6189_v43, 5  ;;  %v2308_v23 = vrot.slane %v6191_v9, 5  ;;  %v2327_v26 = vrot.slane %v6194_v20, 5 }
 0x18f   : > { %10871 = vst [vmem:[#allocation222_spill] sm:$0xff] %v8066_v62  ;;  %v2305_v1 = vsel %vm7160_vm5, %v2303_v38, %v2304_v53  ;;  %10876 = vst [vmem:[#allocation227_spill] sm:$0xff] %v8092_v22  ;;  %v6192_v53 = vld [vmem:[%s6329_s19 + $0x254] sm:$0x1] }
 0x190   : > { %v8086_v62 = vcombine.low %v2302_v4, %v2305_v1  ;;  %v2316_v29 = vrot.slane %v2314_v48, 4  ;;  %v2330_v38 = vrot.slane %v6192_v53, 5  ;;  %v2315_v4 = vsel %vm7160_vm5, %v2313_v42, %v2314_v48  ;;  %3294 = vrot.lane.b32.xlu0 %v8092_v22, %s6278_s21  ;;  %v6195_v42 = vld [vmem:[%s6329_s19 + $0x244] sm:$0xf]  ;;  %v6197_v22 = vld [vmem:[%s6329_s19 + $0x268] sm:$0x1] }
 0x191   : > { %v2309_v59 = vsel %vm7160_vm5, %v5626_v30, %v2308_v23  ;;  %v2310_v43 = vrot.slane %v2308_v23, 4  ;;  %v2326_v48 = vrot.slane %v2324_v17, 4  ;;  %v5627_v0 = vrot.slane %v6195_v42, 9  ;;  %v6199_v42 = vld [vmem:[%s6329_s19 + $0x264] sm:$0xf] }
 0x192   : > { %10874 = vst [vmem:[#allocation225_spill] sm:$0xff] %v8086_v62  ;;  %v8090_v44 = vpop.permute.xlu0 %3186  ;;  %3296 = vrot.lane.b32.xlu1 %v8086_v62, %s6278_s21  ;;  %v8101_v1 = vpop.permute.xlu1 %3192  ;;  %v2318_v9 = vsel %vm7160_vm5, %v2316_v29, %v2317_v16  ;;  %v6196_v62 = vld [vmem:[%s6329_s19 + $0x248] sm:$0xf]  ;;  %v2343_v29 = vrot.slane %v6197_v22, 5  ;;  %v2329_v23 = vrot.slane %v2327_v26, 4 }
 0x193   : > { %10875 = vst [vmem:[#allocation226_spill] sm:$0xff] %v8090_v44  ;;  %10877 = vst [vmem:[#allocation228_spill] sm:$0xff] %v8101_v1  ;;  %v8110_v53 = vcombine.low %v2315_v4, %v2318_v9  ;;  %v2321_v1 = vrot.slane %v6196_v62, 5  ;;  %v2312_v16 = vsel %vm7160_vm5, %v2310_v43, %v2311_v54  ;;  %v2328_v4 = vsel %vm7160_vm5, %v2326_v48, %v2327_v26  ;;  %v6198_v22 = vld [vmem:[%s6329_s19 + $0x260] sm:$0xf] }
 0x194   : > { %v8121_v30 = vcombine.low %v2309_v59, %v2312_v16  ;;  %v2331_v54 = vsel %vm7160_vm5, %v2329_v23, %v2330_v38  ;;  %v2337_v43 = vrot.slane %v6198_v22, 5  ;;  %v6201_v48 = vld [vmem:[%s6329_s19 + $0x25c] sm:$0xf] }
 0x195   : > { %10878 = vst [vmem:[#allocation229_spill] sm:$0xff] %v8110_v53  ;;  %v2322_v62 = vsel %vm7160_vm5, %v5627_v0, %v2321_v1  ;;  %v2323_v9 = vrot.slane %v2321_v1, 4  ;;  %v8136_v26 = vcombine.low %v2328_v4, %v2331_v54  ;;  %v2334_v0 = vrot.slane %v6201_v48, 5  ;;  %v6202_v38 = vld [vmem:[%s6329_s19 + $0x27c] sm:$0x1] }
 0x196   : > { %v8114_v44 = vpop.permute.xlu0 %3190  ;;  %3300 = vrot.lane.b32.xlu1 %v8110_v53, %s6278_s21  ;;  %10880 = vst [vmem:[#allocation231_spill] sm:$0xff] %v8121_v30  ;;  %v8127_v20 = vpop.permute.xlu1 %3196  ;;  %v2340_v53 = vrot.slane %v6199_v42, 5  ;;  %3298 = vrot.lane.b32.xlu0 %v8121_v30, %s6278_s21  ;;  %v2356_v23 = vrot.slane %v6202_v38, 5  ;;  %v6204_v48 = vld [vmem:[%s6329_s19 + $0x278] sm:$0xf] }
 0x197   : > { %10879 = vst [vmem:[#allocation230_spill] sm:$0xff] %v8114_v44  ;;  %10881 = vst [vmem:[#allocation232_spill] sm:$0xff] %v8127_v20  ;;  %v6200_v44 = vld [vmem:[%s6329_s19 + $0x258] sm:$0xf]  ;;  %v2325_v1 = vsel %vm7160_vm5, %v2323_v9, %v2324_v17  ;;  %v2336_v54 = vrot.slane %v2334_v0, 4  ;;  %v2353_v30 = vrot.slane %v6204_v48, 5 }
 0x198   : > { %v5628_v59 = vrot.slane %v6200_v44, 9  ;;  %10882 = vst [vmem:[#allocation233_spill] sm:$0xff] %v8136_v26  ;;  %v8144_v22 = vcombine.low %v2322_v62, %v2325_v1  ;;  %v2339_v44 = vrot.slane %v2337_v43, 4  ;;  %v2342_v42 = vrot.slane %v2340_v53, 4  ;;  %v6203_v17 = vld [vmem:[%s6329_s19 + $0x274] sm:$0xf] }
 0x199   : > { %v2350_v9 = vrot.slane %v6203_v17, 5  ;;  %v6205_v1 = vld [vmem:[%s6329_s19 + $0x26c] sm:$0xf]  ;;  %v2355_v48 = vrot.slane %v2353_v30, 4 }
 0x19a   : > { %v8141_v16 = vpop.permute.xlu0 %3194  ;;  %10884 = vst [vmem:[#allocation235_spill] sm:$0xff] %v8144_v22  ;;  %3304 = vrot.lane.b32.xlu1 %v8136_v26, %s6278_s21  ;;  %v2335_v4 = vsel %vm7160_vm5, %v5628_v59, %v2334_v0  ;;  %v8152_v20 = vpop.permute.xlu1 %3200  ;;  %v2341_v38 = vsel %vm7160_vm5, %v2339_v44, %v2340_v53  ;;  %v2344_v62 = vsel %vm7160_vm5, %v2342_v42, %v2343_v29  ;;  %v2347_v26 = vrot.slane %v6206_v25, 5 }
 0x19b   : > { %10883 = vst [vmem:[#allocation234_spill] sm:$0xff] %v8141_v16  ;;  %10885 = vst [vmem:[#allocation236_spill] sm:$0xff] %v8152_v20  ;;  %v5629_v16 = vrot.slane %v6205_v1, 9  ;;  %3302 = vrot.lane.b32.xlu0 %v8144_v22, %s6278_s21  ;;  %v8162_v59 = vcombine.low %v2341_v38, %v2344_v62  ;;  %v2338_v0 = vsel %vm7160_vm5, %v2336_v54, %v2337_v43  ;;  %v2352_v17 = vrot.slane %v2350_v9, 4  ;;  %v6209_v1 = vld [vmem:[%s6329_s19 + $0x14] sm:$0xf] }
 0x19c   : > { %v8168_v53 = vcombine.low %v2335_v4, %v2338_v0  ;;  %v2349_v25 = vrot.slane %v2347_v26, 4  ;;  %v2357_v43 = vsel %vm7160_vm5, %v2355_v48, %v2356_v23  ;;  %v6207_v23 = vld [vmem:[%s6329_s19 + $0x1c] sm:$0xf]  ;;  %v6210_v0 = vld [vmem:[%s6329_s19 + $0x18] sm:$0xf] }
 0x19d   : > { %10886 = vst [vmem:[#allocation237_spill] sm:$0xff] %v8162_v59  ;;  %v2348_v29 = vsel %vm7160_vm5, %v5629_v16, %v2347_v26  ;;  %v2354_v44 = vsel %vm7160_vm5, %v2352_v17, %v2353_v30  ;;  %v8204_v17 = vcombine.low %v6209_v1, %v6210_v0  ;;  %v6211_v48 = vld [vmem:[%s6329_s19 + $0x30] sm:$0xf]  ;;  %v6215_v1 = vld [vmem:[%s6329_s19 + $0x44] sm:$0xf] }
 0x19e   : > { %v8166_v20 = vpop.permute.xlu0 %3198  ;;  %10888 = vst [vmem:[#allocation239_spill] sm:$0xff] %v8168_v53  ;;  %3308 = vrot.lane.b32.xlu1 %v8162_v59, %s6278_s21  ;;  %v8178_v42 = vcombine.low %v2354_v44, %v2357_v43  ;;  %v2351_v4 = vsel %vm7160_vm5, %v2349_v25, %v2350_v9  ;;  %v8182_v54 = vpop.permute.xlu1 %3204  ;;  %v6208_v9 = vld [vmem:[%s6329_s19 + $0x20] sm:$0xf]  ;;  %v6213_v43 = vld [vmem:[%s6329_s19 + $0x28] sm:$0xf] }
 0x19f   : > { %10887 = vst [vmem:[#allocation238_spill] sm:$0xff] %v8166_v20  ;;  %10890 = vst [vmem:[#allocation241_spill] sm:$0xff] %v8182_v54  ;;  %3306 = vrot.lane.b32.xlu0 %v8168_v53, %s6278_s21  ;;  %v8186_v26 = vcombine.low %v2348_v29, %v2351_v4  ;;  %v8196_v38 = vcombine.low %v6207_v23, %v6208_v9  ;;  %v6212_v29 = vld [vmem:[%s6329_s19 + $0x34] sm:$0xf]  ;;  %v6214_v4 = vld [vmem:[%s6329_s19 + $0x2c] sm:$0xf] }
 0x1a0   : > { %10889 = vst [vmem:[#allocation240_spill] sm:$0xff] %v8178_v42  ;;  %v8210_v25 = vcombine.low %v6211_v48, %v6212_v29  ;;  %v8218_v23 = vcombine.low %v6213_v43, %v6214_v4  ;;  %v6216_v0 = vld [vmem:[%s6329_s19 + $0x48] sm:$0xf]  ;;  %v6219_v4 = vld [vmem:[%s6329_s19 + $0x58] sm:$0xf] }
 0x1a1   : > { %10891 = vst [vmem:[#allocation242_spill] sm:$0xff] %v8186_v26  ;;  %v8226_v48 = vcombine.low %v6215_v1, %v6216_v0  ;;  %v6220_v59 = vld [vmem:[%s6329_s19 + $0x5c] sm:$0xf]  ;;  %v6221_v0 = vld [vmem:[%s6329_s19 + $0x50] sm:$0xf] }
 0x1a2   : > { %v8188_v16 = vpop.permute.xlu0 %3202  ;;  %3312 = vrot.lane.b32.xlu1 %v8178_v42, %s6278_s21  ;;  %v8192_v30 = vpop.permute.xlu1 %3208  ;;  %v6218_v42 = vld [vmem:[%s6329_s19 + $0x40] sm:$0xf]  ;;  %v8242_v53 = vcombine.low %v6219_v4, %v6220_v59  ;;  %v8250_v22 = vcombine.low %v6221_v0, %v7270_v39  ;;  %v8266_v4 = vcombine.low %v7297_v19, %v7301_v60  ;;  %v8274_v0 = vcombine.low %v7317_v47, %v7327_v55 }
 0x1a3   : > { %10892 = vst [vmem:[#allocation243_spill] sm:$0xff] %v8188_v16  ;;  %10893 = vst [vmem:[#allocation244_spill] sm:$0xff] %v8192_v30  ;;  %3310 = vrot.lane.b32.xlu0 %v8186_v26, %s6278_s21  ;;  %v8234_v26 = vcombine.low %v6217_v56, %v6218_v42  ;;  %v8258_v42 = vcombine.low %v7278_v28, %v7282_v33  ;;  %v8280_v28 = vcombine.low %v7334_v11, %v7342_v46  ;;  %v11021_v30 = vld [vmem:[#allocation5_spill] sm:$0xff] }
 0x1a4   : > { %10897 = vst [vmem:[#allocation248_spill] sm:$0xff] %v8226_v48  ;;  %10900 = vst [vmem:[#allocation251_spill] sm:$0xff] %v8242_v53  ;;  %v8288_v33 = vcombine.low %v7348_v34, %v7352_v35  ;;  %v8296_v47 = vcombine.low %v7371_v36, %v7375_v21  ;;  %v8304_v55 = vcombine.low %v7389_v49, %v7397_v2 }
 0x1a5   : > { %10901 = vst [vmem:[#allocation252_spill] sm:$0xff] %v8250_v22  ;;  %10902 = vst [vmem:[#allocation253_spill] sm:$0xff] %v8258_v42  ;;  %v8312_v11 = vcombine.low %v7406_v63, %v7414_v52  ;;  %v8320_v34 = vcombine.low %v7422_v37, %v7426_v3  ;;  %v8328_v49 = vcombine.low %v7441_v24, %v7445_v8 }
 0x1a6   : > { %v8200_v62 = vpop.permute.xlu0 %3206  ;;  %3322 = vrot.lane.b32.xlu1 %v8196_v38, %s6279_s22  ;;  %v8214_v44 = vpop.permute.xlu1 %3212  ;;  %10903 = vst [vmem:[#allocation254_spill] sm:$0xff] %v8266_v4  ;;  %v8336_v63 = vcombine.low %v7461_v41, %v7471_v61  ;;  %v8344_v2 = vcombine.low %v7478_v14, %v7486_v45  ;;  %v8350_v24 = vcombine.low %v7492_v51, %v7496_v6 }
 0x1a7   : > { %10894 = vst [vmem:[#allocation245_spill] sm:$0xff] %v8200_v62  ;;  %3320 = vrot.lane.b32.xlu0 %v8204_v17, %s6279_s22  ;;  %10895 = vst [vmem:[#allocation246_spill] sm:$0xff] %v8214_v44  ;;  %v8358_v8 = vcombine.low %v7515_v12, %v7519_v13  ;;  %v8366_v41 = vcombine.low %v7533_v57, %v7541_v50  ;;  %v8374_v61 = vcombine.low %v7552_v27, %v7560_v5  ;;  %v10923_v50 = vld [vmem:[#allocation138_spill] sm:$0xff] }
 0x1a8   : > { %10910 = vst [vmem:[#allocation261_spill] sm:$0xff] %v8350_v24  ;;  %v8382_v14 = vcombine.low %v7568_v15, %v7572_v32  ;;  %v8390_v13 = vcombine.low %v7587_v10, %v7591_v58  ;;  %v8398_v5 = vcombine.low %v7607_v18, %v7617_v31  ;;  %v8406_v32 = vcombine.low %v7624_v40, %v7632_v7  ;;  %v10924_v15 = vld [vmem:[#allocation137_spill] sm:$0xff]  ;;  %v10925_v18 = vld [vmem:[#allocation143_spill] sm:$0xff]  ;;  %v10926_v31 = vld [vmem:[#allocation142_spill] sm:$0xff] }
 0x1a9   : > { %10912 = vst [vmem:[#allocation263_spill] sm:$0xff] %v8358_v8  ;;  %10914 = vst [vmem:[#allocation265_spill] sm:$0xff] %v8366_v41  ;;  %v8414_v58 = vcombine.low %v10924_v15, %v10923_v50  ;;  %v10932_v50 = vld [vmem:[#allocation151_spill] sm:$0xff]  ;;  %v10933_v15 = vld [vmem:[#allocation149_spill] sm:$0xff] }
 0x1aa   : > { %3326 = vrot.lane.b32.xlu1 %v8210_v25, %s6279_s22  ;;  %v8222_v9 = vpop.permute.xlu0 %3210  ;;  %v8230_v29 = vpop.permute.xlu1 %3216  ;;  %10916 = vst [vmem:[#allocation267_spill] sm:$0xff] %v8374_v61  ;;  %10919 = vst [vmem:[#allocation270_spill] sm:$0xff] %v8390_v13 }
 0x1ab   : > { %10896 = vst [vmem:[#allocation247_spill] sm:$0xff] %v8222_v9  ;;  %3324 = vrot.lane.b32.xlu0 %v8218_v23, %s6279_s22  ;;  %10898 = vst [vmem:[#allocation249_spill] sm:$0xff] %v8230_v29 }
 0x1ae   : > { %3330 = vrot.lane.b32.xlu1 %v8226_v48, %s6279_s22  ;;  %v8238_v43 = vpop.permute.xlu0 %3214  ;;  %v8246_v1 = vpop.permute.xlu1 %3220 }
 0x1af   : > { %10899 = vst [vmem:[#allocation250_spill] sm:$0xff] %v8238_v43  ;;  %3328 = vrot.lane.b32.xlu0 %v8234_v26, %s6279_s22 }
 0x1b2   : > { %3334 = vrot.lane.b32.xlu1 %v8242_v53, %s6279_s22  ;;  %v8254_v56 = vpop.permute.xlu0 %3218  ;;  %v8262_v59 = vpop.permute.xlu1 %3224 }
 0x1b3   : > { %3332 = vrot.lane.b32.xlu0 %v8250_v22, %s6279_s22 }
 0x1b6   : > { %3338 = vrot.lane.b32.xlu1 %v8258_v42, %s6279_s22  ;;  %v8270_v39 = vpop.permute.xlu0 %3222  ;;  %v8284_v19 = vpop.permute.xlu1 %3228 }
 0x1b7   : > { %3336 = vrot.lane.b32.xlu0 %v8266_v4, %s6279_s22 }
 0x1ba   : > { %3342 = vrot.lane.b32.xlu1 %v8274_v0, %s6279_s22  ;;  %v8292_v60 = vpop.permute.xlu0 %3226  ;;  %v8300_v46 = vpop.permute.xlu1 %3232 }
 0x1bb   : > { %3340 = vrot.lane.b32.xlu0 %v8280_v28, %s6279_s22  ;;  %10904 = vst [vmem:[#allocation255_spill] sm:$0xff] %v8300_v46  ;;  %v11042_v46 = vld [vmem:[#allocation23_spill] sm:$0xff] }
 0x1be   : > { %3346 = vrot.lane.b32.xlu1 %v8288_v33, %s6279_s22  ;;  %v8308_v35 = vpop.permute.xlu0 %3230 }
 0x1bf   : > { %3344 = vrot.lane.b32.xlu0 %v8296_v47, %s6279_s22  ;;  %10905 = vst [vmem:[#allocation256_spill] sm:$0xff] %v8308_v35  ;;  %v8316_v36 = vpop.permute.xlu1 %3236  ;;  %v6223_v35 = vld [vmem:[%s6329_s19 + $0x4] sm:$0xf] }
 0x1c0   : > { %10906 = vst [vmem:[#allocation257_spill] sm:$0xff] %v8316_v36  ;;  %v11027_v36 = vld [vmem:[#allocation98_spill] sm:$0xff] }
 0x1c2   : > { %3350 = vrot.lane.b32.xlu1 %v8304_v55, %s6279_s22  ;;  %v8324_v21 = vpop.permute.xlu0 %3234 }
 0x1c3   : > { %3348 = vrot.lane.b32.xlu0 %v8312_v11, %s6279_s22  ;;  %10907 = vst [vmem:[#allocation258_spill] sm:$0xff] %v8324_v21  ;;  %v8332_v52 = vpop.permute.xlu1 %3240 }
 0x1c4   : > { %10908 = vst [vmem:[#allocation259_spill] sm:$0xff] %v8332_v52 }
 0x1c6   : > { %3354 = vrot.lane.b32.xlu1 %v8320_v34, %s6279_s22  ;;  %v8340_v3 = vpop.permute.xlu0 %3238 }
 0x1c7   : > { %3352 = vrot.lane.b32.xlu0 %v8328_v49, %s6279_s22  ;;  %10909 = vst [vmem:[#allocation260_spill] sm:$0xff] %v8340_v3  ;;  %v8354_v37 = vpop.permute.xlu1 %3244 }
 0x1c8   : > { %10911 = vst [vmem:[#allocation262_spill] sm:$0xff] %v8354_v37 }
 0x1ca   : > { %3358 = vrot.lane.b32.xlu1 %v8336_v63, %s6279_s22  ;;  %v8362_v45 = vpop.permute.xlu0 %3242 }
 0x1cb   : > { %3356 = vrot.lane.b32.xlu0 %v8344_v2, %s6279_s22  ;;  %10913 = vst [vmem:[#allocation264_spill] sm:$0xff] %v8362_v45  ;;  %v8370_v6 = vpop.permute.xlu1 %3248 }
 0x1cc   : > { %10915 = vst [vmem:[#allocation266_spill] sm:$0xff] %v8370_v6  ;;  %v8436_v6 = vcombine.low %v10933_v15, %v10932_v50  ;;  %v10943_v15 = vld [vmem:[#allocation163_spill] sm:$0xff] }
 0x1ce   : > { %3362 = vrot.lane.b32.xlu1 %v8350_v24, %s6279_s22  ;;  %v8378_v12 = vpop.permute.xlu0 %3246 }
 0x1cf   : > { %3360 = vrot.lane.b32.xlu0 %v8358_v8, %s6279_s22  ;;  %10917 = vst [vmem:[#allocation268_spill] sm:$0xff] %v8378_v12  ;;  %v8386_v51 = vpop.permute.xlu1 %3252 }
 0x1d0   : > { %10918 = vst [vmem:[#allocation269_spill] sm:$0xff] %v8386_v51  ;;  %v8420_v51 = vcombine.low %v10926_v31, %v10925_v18 }
 0x1d2   : > { %3366 = vrot.lane.b32.xlu1 %v8366_v41, %s6279_s22  ;;  %v8394_v27 = vpop.permute.xlu0 %3250 }
 0x1d3   : > { %3364 = vrot.lane.b32.xlu0 %v8374_v61, %s6279_s22  ;;  %10920 = vst [vmem:[#allocation271_spill] sm:$0xff] %v8394_v27  ;;  %v8402_v57 = vpop.permute.xlu1 %3256 }
 0x1d4   : > { %10921 = vst [vmem:[#allocation272_spill] sm:$0xff] %v8402_v57  ;;  %v10929_v57 = vld [vmem:[#allocation147_spill] sm:$0xff] }
 0x1d6   : > { %3370 = vrot.lane.b32.xlu1 %v8382_v14, %s6279_s22  ;;  %v8410_v10 = vpop.permute.xlu0 %3254 }
 0x1d7   : > { %3368 = vrot.lane.b32.xlu0 %v8390_v13, %s6279_s22  ;;  %10922 = vst [vmem:[#allocation273_spill] sm:$0xff] %v8410_v10  ;;  %v10930_v10 = vld [vmem:[#allocation145_spill] sm:$0xff] }
 0x1d8   : > { %v8430_v27 = vcombine.low %v10930_v10, %v10929_v57  ;;  %v10939_v57 = vld [vmem:[#allocation157_spill] sm:$0xff]  ;;  %v10940_v10 = vld [vmem:[#allocation156_spill] sm:$0xff] }
 0x1d9   : > { %v8424_v7 = vpop.permute.xlu1 %3260  ;;  %v8452_v12 = vcombine.low %v10940_v10, %v10939_v57  ;;  %v10951_v10 = vld [vmem:[#allocation169_spill] sm:$0xff] }
 0x1da   : > { %3374 = vrot.lane.b32.xlu1 %v8398_v5, %s6279_s22  ;;  %10927 = vst [vmem:[#allocation138_spill] sm:$0xff] %v8424_v7  ;;  %v8426_v40 = vpop.permute.xlu0 %3258  ;;  %10931 = vst [vmem:[#allocation143_spill] sm:$0xff] %v8430_v27  ;;  %v10936_v7 = vld [vmem:[#allocation154_spill] sm:$0xff] }
 0x1db   : > { %3372 = vrot.lane.b32.xlu0 %v8406_v32, %s6279_s22  ;;  %10928 = vst [vmem:[#allocation137_spill] sm:$0xff] %v8426_v40  ;;  %v10937_v40 = vld [vmem:[#allocation153_spill] sm:$0xff]  ;;  %10941 = vst [vmem:[#allocation151_spill] sm:$0xff] %v8452_v12 }
 0x1dc   : > { %v8446_v29 = vcombine.low %v10937_v40, %v10936_v7  ;;  %v10947_v40 = vld [vmem:[#allocation165_spill] sm:$0xff] }
 0x1dd   : > { %v8440_v18 = vpop.permute.xlu1 %3264 }
 0x1de   : > { %3378 = vrot.lane.b32.xlu1 %v8414_v58, %s6279_s22  ;;  %10934 = vst [vmem:[#allocation142_spill] sm:$0xff] %v8440_v18  ;;  %10938 = vst [vmem:[#allocation145_spill] sm:$0xff] %v8446_v29  ;;  %v10944_v18 = vld [vmem:[#allocation162_spill] sm:$0xff] }
 0x1df   : > { %3376 = vrot.lane.b32.xlu0 %v8420_v51, %s6279_s22  ;;  %v8442_v31 = vpop.permute.xlu0 %3262  ;;  %v8460_v43 = vcombine.low %v10944_v18, %v10943_v15  ;;  %v10955_v15 = vld [vmem:[#allocation172_spill] sm:$0xff] }
 0x1e0   : > { %10935 = vst [vmem:[#allocation147_spill] sm:$0xff] %v8442_v31  ;;  %v10948_v31 = vld [vmem:[#allocation164_spill] sm:$0xff] }
 0x1e1   : > { %v8456_v50 = vpop.permute.xlu1 %3268  ;;  %10945 = vst [vmem:[#allocation154_spill] sm:$0xff] %v8460_v43  ;;  %v8468_v37 = vcombine.low %v10948_v31, %v10947_v40  ;;  %v10959_v40 = vld [vmem:[#allocation176_spill] sm:$0xff] }
 0x1e2   : > { %3382 = vrot.lane.b32.xlu1 %v8430_v27, %s6279_s22  ;;  %10942 = vst [vmem:[#allocation149_spill] sm:$0xff] %v8456_v50  ;;  %v10952_v50 = vld [vmem:[#allocation167_spill] sm:$0xff] }
 0x1e3   : > { %3380 = vrot.lane.b32.xlu0 %v8436_v6, %s6279_s22  ;;  %v8464_v7 = vpop.permute.xlu0 %3266  ;;  %10949 = vst [vmem:[#allocation157_spill] sm:$0xff] %v8468_v37  ;;  %v8476_v44 = vcombine.low %v10952_v50, %v10951_v10  ;;  %v10963_v10 = vld [vmem:[#allocation181_spill] sm:$0xff] }
 0x1e4   : > { %10946 = vst [vmem:[#allocation153_spill] sm:$0xff] %v8464_v7  ;;  %v10956_v7 = vld [vmem:[#allocation171_spill] sm:$0xff] }
 0x1e5   : > { %v8472_v57 = vpop.permute.xlu1 %3272  ;;  %10953 = vst [vmem:[#allocation163_spill] sm:$0xff] %v8476_v44  ;;  %v8484_v45 = vcombine.low %v10956_v7, %v10955_v15  ;;  %v10967_v15 = vld [vmem:[#allocation183_spill] sm:$0xff] }
 0x1e6   : > { %3386 = vrot.lane.b32.xlu1 %v8446_v29, %s6279_s22  ;;  %10950 = vst [vmem:[#allocation156_spill] sm:$0xff] %v8472_v57  ;;  %v10960_v57 = vld [vmem:[#allocation175_spill] sm:$0xff]  ;;  %v11033_v29 = vld [vmem:[#allocation8_spill] sm:$0xff] }
 0x1e7   : > { %3384 = vrot.lane.b32.xlu0 %v8452_v12, %s6279_s22  ;;  %v8480_v18 = vpop.permute.xlu0 %3270  ;;  %10957 = vst [vmem:[#allocation165_spill] sm:$0xff] %v8484_v45  ;;  %v8492_v9 = vcombine.low %v10960_v57, %v10959_v40  ;;  %v10971_v40 = vld [vmem:[#allocation187_spill] sm:$0xff] }
 0x1e8   : > { %10954 = vst [vmem:[#allocation162_spill] sm:$0xff] %v8480_v18  ;;  %v10964_v18 = vld [vmem:[#allocation177_spill] sm:$0xff] }
 0x1e9   : > { %10961 = vst [vmem:[#allocation169_spill] sm:$0xff] %v8492_v9  ;;  %v8500_v52 = vcombine.low %v10964_v18, %v10963_v10  ;;  %v10975_v10 = vld [vmem:[#allocation192_spill] sm:$0xff] }
 0x1ea   : > { %3390 = vrot.lane.b32.xlu1 %v8460_v43, %s6279_s22  ;;  %v8488_v31 = vpop.permute.xlu1 %3276  ;;  %v11024_v43 = vld [vmem:[#allocation21_spill] sm:$0xff] }
 0x1eb   : > { %3388 = vrot.lane.b32.xlu0 %v8468_v37, %s6279_s22  ;;  %10958 = vst [vmem:[#allocation164_spill] sm:$0xff] %v8488_v31  ;;  %10965 = vst [vmem:[#allocation172_spill] sm:$0xff] %v8500_v52  ;;  %v10968_v31 = vld [vmem:[#allocation182_spill] sm:$0xff] }
 0x1ec   : > { %v8496_v50 = vpop.permute.xlu0 %3274 }
 0x1ed   : > { %10962 = vst [vmem:[#allocation167_spill] sm:$0xff] %v8496_v50  ;;  %v10972_v50 = vld [vmem:[#allocation186_spill] sm:$0xff] }
 0x1ee   : > { %3394 = vrot.lane.b32.xlu1 %v8476_v44, %s6279_s22  ;;  %v8508_v44 = vcombine.low %v10968_v31, %v10967_v15  ;;  %v10979_v15 = vld [vmem:[#allocation195_spill] sm:$0xff] }
 0x1ef   : > { %3392 = vrot.lane.b32.xlu0 %v8484_v45, %s6279_s22  ;;  %v8504_v7 = vpop.permute.xlu1 %3280  ;;  %v8516_v45 = vcombine.low %v10972_v50, %v10971_v40  ;;  %v10983_v40 = vld [vmem:[#allocation198_spill] sm:$0xff] }
 0x1f0   : > { %10966 = vst [vmem:[#allocation171_spill] sm:$0xff] %v8504_v7  ;;  %10969 = vst [vmem:[#allocation176_spill] sm:$0xff] %v8508_v44  ;;  %v8512_v57 = vpop.permute.xlu0 %3278  ;;  %v10976_v7 = vld [vmem:[#allocation191_spill] sm:$0xff] }
 0x1f1   : > { %10970 = vst [vmem:[#allocation175_spill] sm:$0xff] %v8512_v57  ;;  %10973 = vst [vmem:[#allocation181_spill] sm:$0xff] %v8516_v45  ;;  %v10980_v57 = vld [vmem:[#allocation193_spill] sm:$0xff] }
 0x1f2   : > { %3398 = vrot.lane.b32.xlu1 %v8492_v9, %s6279_s22  ;;  %v8524_v9 = vcombine.low %v10976_v7, %v10975_v10  ;;  %v10987_v10 = vld [vmem:[#allocation202_spill] sm:$0xff] }
 0x1f3   : > { %3396 = vrot.lane.b32.xlu0 %v8500_v52, %s6279_s22  ;;  %v8520_v18 = vpop.permute.xlu1 %3284  ;;  %v8532_v52 = vcombine.low %v10980_v57, %v10979_v15  ;;  %v10990_v57 = vld [vmem:[#allocation206_spill] sm:$0xff]  ;;  %v10991_v15 = vld [vmem:[#allocation205_spill] sm:$0xff] }
 0x1f4   : > { %10974 = vst [vmem:[#allocation177_spill] sm:$0xff] %v8520_v18  ;;  %10977 = vst [vmem:[#allocation183_spill] sm:$0xff] %v8524_v9  ;;  %v10984_v18 = vld [vmem:[#allocation197_spill] sm:$0xff] }
 0x1f5   : > { %10981 = vst [vmem:[#allocation187_spill] sm:$0xff] %v8532_v52 }
 0x1f6   : > { %3402 = vrot.lane.b32.xlu1 %v8508_v44, %s6279_s22  ;;  %v8528_v31 = vpop.permute.xlu0 %3282  ;;  %v8540_v44 = vcombine.low %v10984_v18, %v10983_v40 }
 0x1f7   : > { %3400 = vrot.lane.b32.xlu0 %v8516_v45, %s6279_s22  ;;  %10978 = vst [vmem:[#allocation182_spill] sm:$0xff] %v8528_v31  ;;  %v8536_v50 = vpop.permute.xlu1 %3288  ;;  %v10988_v31 = vld [vmem:[#allocation201_spill] sm:$0xff] }
 0x1f8   : > { %10982 = vst [vmem:[#allocation186_spill] sm:$0xff] %v8536_v50  ;;  %10985 = vst [vmem:[#allocation192_spill] sm:$0xff] %v8540_v44  ;;  %v8548_v45 = vcombine.low %v10988_v31, %v10987_v10  ;;  %v10995_v50 = vld [vmem:[#allocation210_spill] sm:$0xff] }
 0x1fa   : > { %3406 = vrot.lane.b32.xlu1 %v8524_v9, %s6279_s22  ;;  %v8544_v7 = vpop.permute.xlu0 %3286  ;;  %10989 = vst [vmem:[#allocation195_spill] sm:$0xff] %v8548_v45  ;;  %v8554_v9 = vcombine.low %v10991_v15, %v10990_v57  ;;  %v11000_v57 = vld [vmem:[#allocation215_spill] sm:$0xff]  ;;  %v11001_v15 = vld [vmem:[#allocation214_spill] sm:$0xff] }
 0x1fb   : > { %3404 = vrot.lane.b32.xlu0 %v8532_v52, %s6279_s22  ;;  %10986 = vst [vmem:[#allocation191_spill] sm:$0xff] %v8544_v7  ;;  %v10996_v7 = vld [vmem:[#allocation207_spill] sm:$0xff] }
 0x1fc   : > { %10992 = vst [vmem:[#allocation193_spill] sm:$0xff] %v8554_v9  ;;  %v8564_v52 = vcombine.low %v10996_v7, %v10995_v50 }
 0x1fd   : > { %v8558_v18 = vpop.permute.xlu1 %3292 }
 0x1fe   : > { %3410 = vrot.lane.b32.xlu1 %v8540_v44, %s6279_s22  ;;  %10993 = vst [vmem:[#allocation198_spill] sm:$0xff] %v8558_v18  ;;  %v8560_v40 = vpop.permute.xlu0 %3290  ;;  %10997 = vst [vmem:[#allocation202_spill] sm:$0xff] %v8564_v52  ;;  %v8576_v44 = vcombine.low %v11001_v15, %v11000_v57  ;;  %v11003_v18 = vld [vmem:[#allocation3_spill] sm:$0xff] }
 0x1ff   : > { %3408 = vrot.lane.b32.xlu0 %v8548_v45, %s6279_s22  ;;  %10994 = vst [vmem:[#allocation197_spill] sm:$0xff] %v8560_v40  ;;  %v11016_v40 = vld [vmem:[#allocation4_spill] sm:$0xff]  ;;  %v11017_v45 = vld [vmem:[#allocation22_spill] sm:$0xff] }
 0x200   : > { %11002 = vst [vmem:[#allocation205_spill] sm:$0xff] %v8576_v44 }
 0x202   : > { %3414 = vrot.lane.b32.xlu1 %v8554_v9, %s6279_s22  ;;  %v8572_v10 = vpop.permute.xlu0 %3294  ;;  %v11019_v9 = vld [vmem:[#allocation19_spill] sm:$0xff] }
 0x203   : > { %3412 = vrot.lane.b32.xlu0 %v8564_v52, %s6279_s22  ;;  %10999 = vst [vmem:[#allocation206_spill] sm:$0xff] %v8572_v10  ;;  %v11007_v10 = vld [vmem:[#allocation20_spill] sm:$0xff] }
 0x204   : > { %v8570_v31 = vpop.permute.xlu1 %3296 }
 0x205   : > { %10998 = vst [vmem:[#allocation201_spill] sm:$0xff] %v8570_v31  ;;  %v11006_v31 = vld [vmem:[#allocation94_spill] sm:$0xff] }
 0x206   : > { %3454 = vrot.lane.b32.xlu1 %v11003_v18, %s6280_s23  ;;  %v11010_v18 = vld [vmem:[#allocation122_spill] sm:$0xff] }
 0x207   : > { %3416 = vrot.lane.b32.xlu0 %v8576_v44, %s6279_s22  ;;  %v11018_v44 = vld [vmem:[#allocation93_spill] sm:$0xff] }
 0x208   : > { %v8582_v50 = vpop.permute.xlu1 %3300  ;;  %v8584_v7 = vpop.permute.xlu0 %3298 }
 0x209   : > { %11004 = vst [vmem:[#allocation210_spill] sm:$0xff] %v8582_v50  ;;  %11005 = vst [vmem:[#allocation207_spill] sm:$0xff] %v8584_v7 }
 0x20a   : > { %3588 = vrot.lane.b32.xlu1 %v11006_v31, %s6281_s24  ;;  %v11013_v31 = vld [vmem:[#allocation6_spill] sm:$0xff] }
 0x20b   : > { %3486 = vrot.lane.b32.xlu0 %v11007_v10, %s6280_s23 }
 0x20c   : > { %v8590_v57 = vpop.permute.xlu1 %3304 }
 0x20d   : > { %11008 = vst [vmem:[#allocation215_spill] sm:$0xff] %v8590_v57  ;;  %v8592_v15 = vpop.permute.xlu0 %3302 }
 0x20e   : > { %11009 = vst [vmem:[#allocation214_spill] sm:$0xff] %v8592_v15  ;;  %3722 = vrot.lane.b32.xlu1 %v8218_v23, %s6282_s25 }
 0x20f   : > { %3620 = vrot.lane.b32.xlu0 %v11010_v18, %s6281_s24 }
 0x210   : > { %v8598_v50 = vpop.permute.xlu1 %3308 }
 0x211   : > { %11011 = vst [vmem:[#allocation3_spill] sm:$0xff] %v8598_v50  ;;  %v8600_v7 = vpop.permute.xlu0 %3306 }
 0x212   : > { %11012 = vst [vmem:[#allocation94_spill] sm:$0xff] %v8600_v7  ;;  %3856 = vrot.lane.b32.xlu1 %v11013_v31, %s6283_s26 }
 0x213   : > { %3754 = vrot.lane.b32.xlu0 %v8344_v2, %s6282_s25 }
 0x214   : > { %v8606_v57 = vpop.permute.xlu1 %3312 }
 0x215   : > { %11014 = vst [vmem:[#allocation6_spill] sm:$0xff] %v8606_v57  ;;  %v8608_v15 = vpop.permute.xlu0 %3310 }
 0x216   : > { %11015 = vst [vmem:[#allocation274_spill] sm:$0xff] %v8608_v15  ;;  %3456 = vrot.lane.b32.xlu1 %v11016_v40, %s6280_s23  ;;  %v11020_v40 = vld [vmem:[#allocation121_spill] sm:$0xff] }
 0x217   : > { %3888 = vrot.lane.b32.xlu0 %v11017_v45, %s6283_s26 }
 0x218   : > { %v8614_v50 = vpop.permute.xlu1 %3322 }
 0x219   : > { %v8616_v7 = vpop.permute.xlu0 %3320 }
 0x21a   : > { %3590 = vrot.lane.b32.xlu1 %v11018_v44, %s6281_s24 }
 0x21b   : > { %3488 = vrot.lane.b32.xlu0 %v11019_v9, %s6280_s23 }
 0x21c   : > { %v8622_v52 = vpop.permute.xlu1 %3326 }
 0x21d   : > { %v8624_v57 = vpop.permute.xlu0 %3324 }
 0x21e   : > { %3724 = vrot.lane.b32.xlu1 %v8210_v25, %s6282_s25 }
 0x21f   : > { %3622 = vrot.lane.b32.xlu0 %v11020_v40, %s6281_s24 }
 0x220   : > { %v8630_v15 = vpop.permute.xlu1 %3330 }
 0x221   : > { %v8632_v18 = vpop.permute.xlu0 %3328 }
 0x222   : > { %3858 = vrot.lane.b32.xlu1 %v11021_v30, %s6283_s26 }
 0x223   : > { %3756 = vrot.lane.b32.xlu0 %v8336_v63, %s6282_s25 }
 0x224   : > { %v8638_v44 = vpop.permute.xlu1 %3334 }
 0x225   : > { %11022 = vst [vmem:[#allocation4_spill] sm:$0xff] %v8638_v44  ;;  %v8640_v3 = vpop.permute.xlu0 %3332  ;;  %v11045_v44 = vld [vmem:[#allocation101_spill] sm:$0xff] }
 0x226   : > { %11023 = vst [vmem:[#allocation22_spill] sm:$0xff] %v8640_v3  ;;  %3458 = vrot.lane.b32.xlu1 %v11013_v31, %s6280_s23  ;;  %v11030_v31 = vld [vmem:[#allocation126_spill] sm:$0xff] }
 0x227   : > { %3890 = vrot.lane.b32.xlu0 %v11024_v43, %s6283_s26 }
 0x228   : > { %v8646_v40 = vpop.permute.xlu1 %3338 }
 0x229   : > { %11025 = vst [vmem:[#allocation93_spill] sm:$0xff] %v8646_v40  ;;  %v8648_v62 = vpop.permute.xlu0 %3336 }
 0x22a   : > { %11026 = vst [vmem:[#allocation5_spill] sm:$0xff] %v8648_v62  ;;  %3592 = vrot.lane.b32.xlu1 %v11027_v36, %s6281_s24  ;;  %v11039_v62 = vld [vmem:[#allocation7_spill] sm:$0xff] }
 0x22b   : > { %3490 = vrot.lane.b32.xlu0 %v11017_v45, %s6280_s23 }
 0x22c   : > { %v8654_v54 = vpop.permute.xlu1 %3342 }
 0x22d   : > { %11028 = vst [vmem:[#allocation21_spill] sm:$0xff] %v8654_v54  ;;  %v8656_v37 = vpop.permute.xlu0 %3340  ;;  %v11036_v54 = vld [vmem:[#allocation24_spill] sm:$0xff] }
 0x22e   : > { %11029 = vst [vmem:[#allocation98_spill] sm:$0xff] %v8656_v37  ;;  %3726 = vrot.lane.b32.xlu1 %v8234_v26, %s6282_s25 }
 0x22f   : > { %3624 = vrot.lane.b32.xlu0 %v11030_v31, %s6281_s24 }
 0x230   : > { %v8662_v21 = vpop.permute.xlu1 %3346 }
 0x231   : > { %11031 = vst [vmem:[#allocation126_spill] sm:$0xff] %v8662_v21  ;;  %v8664_v40 = vpop.permute.xlu0 %3344 }
 0x232   : > { %11032 = vst [vmem:[#allocation275_spill] sm:$0xff] %v8664_v40  ;;  %3860 = vrot.lane.b32.xlu1 %v11033_v29, %s6283_s26  ;;  %v11037_v40 = vld [vmem:[#allocation96_spill] sm:$0xff] }
 0x233   : > { %3758 = vrot.lane.b32.xlu0 %v8358_v8, %s6282_s25 }
 0x234   : > { %v8670_v36 = vpop.permute.xlu1 %3350 }
 0x235   : > { %11034 = vst [vmem:[#allocation8_spill] sm:$0xff] %v8670_v36  ;;  %v8672_v45 = vpop.permute.xlu0 %3348 }
 0x236   : > { %11035 = vst [vmem:[#allocation276_spill] sm:$0xff] %v8672_v45  ;;  %3460 = vrot.lane.b32.xlu1 %v11021_v30, %s6280_s23  ;;  %v11038_v30 = vld [vmem:[#allocation124_spill] sm:$0xff] }
 0x237   : > { %3892 = vrot.lane.b32.xlu0 %v11036_v54, %s6283_s26 }
 0x238   : > { %v8678_v31 = vpop.permute.xlu1 %3354 }
 0x239   : > { %v8680_v21 = vpop.permute.xlu0 %3352 }
 0x23a   : > { %3594 = vrot.lane.b32.xlu1 %v11037_v40, %s6281_s24 }
 0x23b   : > { %3492 = vrot.lane.b32.xlu0 %v11024_v43, %s6280_s23 }
 0x23c   : > { %v8686_v37 = vpop.permute.xlu1 %3358 }
 0x23d   : > { %v8688_v36 = vpop.permute.xlu0 %3356 }
 0x23e   : > { %3728 = vrot.lane.b32.xlu1 %v8226_v48, %s6282_s25 }
 0x23f   : > { %3626 = vrot.lane.b32.xlu0 %v11038_v30, %s6281_s24 }
 0x240   : > { %v8694_v45 = vpop.permute.xlu1 %3362 }
 0x241   : > { %v8696_v9 = vpop.permute.xlu0 %3360 }
 0x242   : > { %3862 = vrot.lane.b32.xlu1 %v11039_v62, %s6283_s26 }
 0x243   : > { %3760 = vrot.lane.b32.xlu0 %v8350_v24, %s6282_s25 }
 0x244   : > { %v8702_v43 = vpop.permute.xlu1 %3366 }
 0x245   : > { %11040 = vst [vmem:[#allocation24_spill] sm:$0xff] %v8702_v43  ;;  %v8704_v16 = vpop.permute.xlu0 %3364 }
 0x246   : > { %11041 = vst [vmem:[#allocation96_spill] sm:$0xff] %v8704_v16  ;;  %3462 = vrot.lane.b32.xlu1 %v11033_v29, %s6280_s23  ;;  %v11048_v29 = vld [vmem:[#allocation129_spill] sm:$0xff]  ;;  %v6222_v16 = vld [vmem:[%s6329_s19] sm:$0xf] }
 0x247   : > { %3894 = vrot.lane.b32.xlu0 %v11042_v46, %s6283_s26  ;;  %v5632_v8 = vcombine.low %v6222_v16, %v6223_v35  ;;  %v11083_v16 = vld [vmem:[#allocation131_spill] sm:$0xff] }
 0x248   : > { %v8710_v12 = vpop.permute.xlu1 %3370 }
 0x249   : > { %11043 = vst [vmem:[#allocation124_spill] sm:$0xff] %v8710_v12  ;;  %v8712_v10 = vpop.permute.xlu0 %3368 }
 0x24a   : > { %11044 = vst [vmem:[#allocation7_spill] sm:$0xff] %v8712_v10  ;;  %3596 = vrot.lane.b32.xlu1 %v11045_v44, %s6281_s24  ;;  %v11051_v10 = vld [vmem:[#allocation10_spill] sm:$0xff] }
 0x24b   : > { %3494 = vrot.lane.b32.xlu0 %v11036_v54, %s6280_s23 }
 0x24c   : > { %v8718_v24 = vpop.permute.xlu1 %3374 }
 0x24d   : > { %11046 = vst [vmem:[#allocation23_spill] sm:$0xff] %v8718_v24  ;;  %v8720_v43 = vpop.permute.xlu0 %3372 }
 0x24e   : > { %11047 = vst [vmem:[#allocation101_spill] sm:$0xff] %v8720_v43  ;;  %3730 = vrot.lane.b32.xlu1 %v8250_v22, %s6282_s25  ;;  %v11054_v43 = vld [vmem:[#allocation26_spill] sm:$0xff] }
 0x24f   : > { %3628 = vrot.lane.b32.xlu0 %v11048_v29, %s6281_s24 }
 0x250   : > { %v8726_v48 = vpop.permute.xlu1 %3378 }
 0x251   : > { %11049 = vst [vmem:[#allocation129_spill] sm:$0xff] %v8726_v48  ;;  %v8728_v12 = vpop.permute.xlu0 %3376 }
 0x252   : > { %11050 = vst [vmem:[#allocation277_spill] sm:$0xff] %v8728_v12  ;;  %3864 = vrot.lane.b32.xlu1 %v11051_v10, %s6283_s26  ;;  %v11057_v12 = vld [vmem:[#allocation99_spill] sm:$0xff] }
 0x253   : > { %3762 = vrot.lane.b32.xlu0 %v8374_v61, %s6282_s25 }
 0x254   : > { %v8734_v54 = vpop.permute.xlu1 %3382 }
 0x255   : > { %11052 = vst [vmem:[#allocation10_spill] sm:$0xff] %v8734_v54  ;;  %v8736_v24 = vpop.permute.xlu0 %3380 }
 0x256   : > { %11053 = vst [vmem:[#allocation278_spill] sm:$0xff] %v8736_v24  ;;  %3464 = vrot.lane.b32.xlu1 %v11039_v62, %s6280_s23  ;;  %v11060_v62 = vld [vmem:[#allocation127_spill] sm:$0xff] }
 0x257   : > { %3896 = vrot.lane.b32.xlu0 %v11054_v43, %s6283_s26 }
 0x258   : > { %v8742_v22 = vpop.permute.xlu1 %3386 }
 0x259   : > { %11055 = vst [vmem:[#allocation26_spill] sm:$0xff] %v8742_v22  ;;  %v8744_v48 = vpop.permute.xlu0 %3384 }
 0x25a   : > { %11056 = vst [vmem:[#allocation279_spill] sm:$0xff] %v8744_v48  ;;  %3598 = vrot.lane.b32.xlu1 %v11057_v12, %s6281_s24  ;;  %v11063_v48 = vld [vmem:[#allocation9_spill] sm:$0xff] }
 0x25b   : > { %3496 = vrot.lane.b32.xlu0 %v11042_v46, %s6280_s23 }
 0x25c   : > { %v8750_v61 = vpop.permute.xlu1 %3390 }
 0x25d   : > { %11058 = vst [vmem:[#allocation99_spill] sm:$0xff] %v8750_v61  ;;  %v8752_v54 = vpop.permute.xlu0 %3388 }
 0x25e   : > { %11059 = vst [vmem:[#allocation280_spill] sm:$0xff] %v8752_v54  ;;  %3732 = vrot.lane.b32.xlu1 %v8242_v53, %s6282_s25  ;;  %v11066_v54 = vld [vmem:[#allocation25_spill] sm:$0xff] }
 0x25f   : > { %3630 = vrot.lane.b32.xlu0 %v11060_v62, %s6281_s24 }
 0x260   : > { %v8758_v24 = vpop.permute.xlu1 %3394 }
 0x261   : > { %11061 = vst [vmem:[#allocation127_spill] sm:$0xff] %v8758_v24  ;;  %v8760_v22 = vpop.permute.xlu0 %3392 }
 0x262   : > { %11062 = vst [vmem:[#allocation281_spill] sm:$0xff] %v8760_v22  ;;  %3866 = vrot.lane.b32.xlu1 %v11063_v48, %s6283_s26  ;;  %v11069_v22 = vld [vmem:[#allocation105_spill] sm:$0xff] }
 0x263   : > { %3764 = vrot.lane.b32.xlu0 %v8366_v41, %s6282_s25  ;;  %v11075_v41 = vld [vmem:[#allocation12_spill] sm:$0xff] }
 0x264   : > { %v8766_v46 = vpop.permute.xlu1 %3398 }
 0x265   : > { %11064 = vst [vmem:[#allocation9_spill] sm:$0xff] %v8766_v46  ;;  %v8768_v61 = vpop.permute.xlu0 %3396 }
 0x266   : > { %11065 = vst [vmem:[#allocation282_spill] sm:$0xff] %v8768_v61  ;;  %3466 = vrot.lane.b32.xlu1 %v11051_v10, %s6280_s23  ;;  %v11072_v10 = vld [vmem:[#allocation133_spill] sm:$0xff] }
 0x267   : > { %3898 = vrot.lane.b32.xlu0 %v11066_v54, %s6283_s26 }
 0x268   : > { %v8774_v53 = vpop.permute.xlu1 %3402 }
 0x269   : > { %11067 = vst [vmem:[#allocation25_spill] sm:$0xff] %v8774_v53  ;;  %v8776_v24 = vpop.permute.xlu0 %3400 }
 0x26a   : > { %11068 = vst [vmem:[#allocation283_spill] sm:$0xff] %v8776_v24  ;;  %3600 = vrot.lane.b32.xlu1 %v11069_v22, %s6281_s24 }
 0x26b   : > { %3498 = vrot.lane.b32.xlu0 %v11054_v43, %s6280_s23 }
 0x26c   : > { %v8782_v46 = vpop.permute.xlu1 %3406 }
 0x26d   : > { %11070 = vst [vmem:[#allocation105_spill] sm:$0xff] %v8782_v46  ;;  %v8784_v61 = vpop.permute.xlu0 %3404 }
 0x26e   : > { %11071 = vst [vmem:[#allocation284_spill] sm:$0xff] %v8784_v61  ;;  %3734 = vrot.lane.b32.xlu1 %v8266_v4, %s6282_s25  ;;  %v11078_v61 = vld [vmem:[#allocation28_spill] sm:$0xff] }
 0x26f   : > { %3632 = vrot.lane.b32.xlu0 %v11072_v10, %s6281_s24 }
 0x270   : > { %v8790_v53 = vpop.permute.xlu1 %3410 }
 0x271   : > { %11073 = vst [vmem:[#allocation133_spill] sm:$0xff] %v8790_v53  ;;  %v8792_v24 = vpop.permute.xlu0 %3408 }
 0x272   : > { %11074 = vst [vmem:[#allocation285_spill] sm:$0xff] %v8792_v24  ;;  %3868 = vrot.lane.b32.xlu1 %v11075_v41, %s6283_s26  ;;  %v11080_v24 = vld [vmem:[#allocation103_spill] sm:$0xff] }
 0x273   : > { %3766 = vrot.lane.b32.xlu0 %v8390_v13, %s6282_s25 }
 0x274   : > { %v8798_v43 = vpop.permute.xlu1 %3414 }
 0x275   : > { %11076 = vst [vmem:[#allocation12_spill] sm:$0xff] %v8798_v43  ;;  %v8800_v46 = vpop.permute.xlu0 %3412 }
 0x276   : > { %11077 = vst [vmem:[#allocation286_spill] sm:$0xff] %v8800_v46  ;;  %3468 = vrot.lane.b32.xlu1 %v11063_v48, %s6280_s23  ;;  %v11081_v48 = vld [vmem:[#allocation49_spill] sm:$0xff] }
 0x277   : > { %3900 = vrot.lane.b32.xlu0 %v11078_v61, %s6283_s26  ;;  %v3993_v13 = vsel %vm3990_vm6, %v5632_v8, %v11081_v48  ;;  %v11085_v48 = vld [vmem:[#allocation77_spill] sm:$0xff] }
 0x278   : > { %v3455_v4 = vpop.permute.xlu1 %3454 }
 0x279   : > { %v8806_v53 = vpop.permute.xlu0 %3416 }
 0x27a   : > { %11079 = vst [vmem:[#allocation28_spill] sm:$0xff] %v8806_v53  ;;  %3602 = vrot.lane.b32.xlu1 %v11080_v24, %s6281_s24  ;;  %v11082_v53 = vld [vmem:[#allocation226_spill] sm:$0xff] }
 0x27b   : > { %3500 = vrot.lane.b32.xlu0 %v11066_v54, %s6280_s23  ;;  %v4185_v27 = vsel %vm4183_vm7, %v3993_v13, %v11082_v53 }
 0x27c   : > { %v3589_v43 = vpop.permute.xlu1 %3588  ;;  %v4314_v54 = vsel %vm4312_vm8, %v4185_v27, %v8616_v7  ;;  %v4041_v27 = vsel %vm3990_vm6, %v8312_v11, %v11085_v48  ;;  %v6224_v48 = vld [vmem:[%s6329_s19 + $0x8] sm:$0xf] }
 0x27d   : > { %v3487_v46 = vpop.permute.xlu0 %3486  ;;  %v4443_v3 = vsel %vm4441_vm9, %v4314_v54, %v3455_v4  ;;  %v4217_v7 = vsel %vm4183_vm7, %v4041_v27, %v8254_v56  ;;  %v6225_v27 = vld [vmem:[%s6329_s19 + $0xc] sm:$0xf] }
 0x27e   : > { %3736 = vrot.lane.b32.xlu1 %v8258_v42, %s6282_s25  ;;  %v11084_v42 = vld [vmem:[#allocation11_spill] sm:$0xff]  ;;  %v4572_v8 = vsel %vm4570_vm10, %v4443_v3, %v3589_v43  ;;  %v4346_v3 = vsel %vm4312_vm8, %v4217_v7, %v8680_v21  ;;  %v5633_v21 = vcombine.low %v6224_v48, %v6225_v27 }
 0x27f   : > { %3634 = vrot.lane.b32.xlu0 %v11083_v16, %s6281_s24  ;;  %v4475_v43 = vsel %vm4441_vm9, %v4346_v3, %v3487_v46  ;;  %v11088_v46 = vld [vmem:[#allocation53_spill] sm:$0xff] }
 0x280   : > { %v3723_v35 = vpop.permute.xlu1 %3722  ;;  %v3996_v7 = vsel %vm3990_vm6, %v5633_v21, %v11088_v46 }
 0x281   : > { %v3621_v20 = vpop.permute.xlu0 %3620  ;;  %v4701_v53 = vsel %vm4699_vm11, %v4572_v8, %v3723_v35  ;;  %v11086_v35 = vld [vmem:[#allocation27_spill] sm:$0xff] }
 0x282   : > { %3870 = vrot.lane.b32.xlu1 %v11084_v42, %s6283_s26 }
 0x283   : > { %3768 = vrot.lane.b32.xlu0 %v8382_v14, %s6282_s25 }
 0x284   : > { %v3857_v13 = vpop.permute.xlu1 %3856 }
 0x285   : > { %v4830_v4 = vsel %vm4828_vm12, %v4701_v53, %v3857_v13  ;;  %v3755_v54 = vpop.permute.xlu0 %3754  ;;  %v4604_v53 = vsel %vm4570_vm10, %v4475_v43, %v3621_v20  ;;  %v11090_v43 = vld [vmem:[#allocation136_spill] sm:$0xff] }
 0x286   : > { %3470 = vrot.lane.b32.xlu1 %v11075_v41, %s6280_s23  ;;  %5240 = vmatpush1.bf16.xpose.msra.mxu0 %v4830_v4  ;;  %v4733_v56 = vsel %vm4699_vm11, %v4604_v53, %v3755_v54  ;;  %v11087_v41 = vld [vmem:[#allocation108_spill] sm:$0xff]  ;;  %v11089_v54 = vld [vmem:[#allocation223_spill] sm:$0xff] }
 0x287   : > { %5839 = vmatprep.subr.msk.bf16.mxu0 %vm3990_vm6, %v11037_v40  ;;  %3902 = vrot.lane.b32.xlu0 %v11086_v35, %s6283_s26  ;;  %v4187_v3 = vsel %vm4183_vm7, %v3996_v7, %v11089_v54 }
 0x288   : > { %v3457_v8 = vpop.permute.xlu1 %3456 }
 0x289   : > { %v3889_v13 = vpop.permute.xlu0 %3888 }
 0x28a   : > { %3604 = vrot.lane.b32.xlu1 %v11087_v41, %s6281_s24  ;;  %v4878_v4 = vsel %vm4828_vm12, %v4733_v56, %v3889_v13  ;;  %v11091_v13 = vld [vmem:[#allocation14_spill] sm:$0xff] }
 0x28b   : > { %3502 = vrot.lane.b32.xlu0 %v11078_v61, %s6280_s23  ;;  %5283 = vmatpush1.bf16.xpose.msra.mxu1 %v4878_v4  ;;  %v4316_v61 = vsel %vm4312_vm8, %v4187_v3, %v8614_v50  ;;  %v11092_v4 = vld [vmem:[#allocation75_spill] sm:$0xff]  ;;  %v11093_v3 = vld [vmem:[#allocation30_spill] sm:$0xff] }
 0x28c   : > { %v3591_v40 = vpop.permute.xlu1 %3590  ;;  %5856 = vmatprep.subr.msk.bf16.mxu1 %vm3990_vm6, %v11038_v30  ;;  %v4445_v56 = vsel %vm4441_vm9, %v4316_v61, %v3457_v8  ;;  %v4044_v46 = vsel %vm3990_vm6, %v8304_v55, %v11092_v4  ;;  %v11097_v4 = vld [vmem:[#allocation135_spill] sm:$0xff] }
 0x28d   : > { %v3489_v20 = vpop.permute.xlu0 %3488  ;;  %v4574_v48 = vsel %vm4570_vm10, %v4445_v56, %v3591_v40  ;;  %v4219_v8 = vsel %vm4183_vm7, %v4044_v46, %v8246_v1 }
 0x28e   : > { %3738 = vrot.lane.b32.xlu1 %v8280_v28, %s6282_s25  ;;  %v4348_v40 = vsel %vm4312_vm8, %v4219_v8, %v8678_v31  ;;  %v11098_v8 = vld [vmem:[#allocation13_spill] sm:$0xff] }
 0x28f   : > { %3636 = vrot.lane.b32.xlu0 %v11090_v43, %s6281_s24  ;;  %v4477_v54 = vsel %vm4441_vm9, %v4348_v40, %v3489_v20  ;;  %v11095_v20 = vld [vmem:[#allocation48_spill] sm:$0xff] }
 0x290   : > { %v3725_v53 = vpop.permute.xlu1 %3724 }
 0x291   : > { %v3623_v30 = vpop.permute.xlu0 %3622  ;;  %v4703_v27 = vsel %vm4699_vm11, %v4574_v48, %v3725_v53 }
 0x292   : > { %3872 = vrot.lane.b32.xlu1 %v11091_v13, %s6283_s26  ;;  %v4606_v61 = vsel %vm4570_vm10, %v4477_v54, %v3623_v30  ;;  %v3999_v30 = vsel %vm3990_vm6, %v8204_v17, %v11095_v20  ;;  %v11099_v54 = vld [vmem:[#allocation80_spill] sm:$0xff] }
 0x293   : > { %3770 = vrot.lane.b32.xlu0 %v8406_v32, %s6282_s25 }
 0x294   : > { %v3859_v21 = vpop.permute.xlu1 %3858 }
 0x295   : > { %v4833_v50 = vsel %vm4828_vm12, %v4703_v27, %v3859_v21  ;;  %v3757_v7 = vpop.permute.xlu0 %3756  ;;  %v11096_v27 = vld [vmem:[#allocation230_spill] sm:$0xff] }
 0x296   : > { %3472 = vrot.lane.b32.xlu1 %v11084_v42, %s6280_s23  ;;  %5242 = vmatpush1.bf16.xpose.msra.mxu0 %v4833_v50  ;;  %v4735_v1 = vsel %vm4699_vm11, %v4606_v61, %v3757_v7  ;;  %v11094_v42 = vld [vmem:[#allocation107_spill] sm:$0xff]  ;;  %v4189_v21 = vsel %vm4183_vm7, %v3999_v30, %v11096_v27  ;;  %v4047_v61 = vsel %vm3990_vm6, %v8328_v49, %v11099_v54 }
 0x297   : > { %5840 = vmatprep.subr.msk.bf16.mxu0 %vm3990_vm6, %v11045_v44  ;;  %3904 = vrot.lane.b32.xlu0 %v11093_v3, %s6283_s26  ;;  %v4318_v46 = vsel %vm4312_vm8, %v4189_v21, %v8624_v57 }
 0x298   : > { %v3459_v53 = vpop.permute.xlu1 %3458 }
 0x299   : > { %v3891_v56 = vpop.permute.xlu0 %3890 }
 0x29a   : > { %3606 = vrot.lane.b32.xlu1 %v11094_v42, %s6281_s24  ;;  %v4881_v48 = vsel %vm4828_vm12, %v4735_v1, %v3891_v56 }
 0x29b   : > { %3504 = vrot.lane.b32.xlu0 %v11086_v35, %s6280_s23  ;;  %5285 = vmatpush1.bf16.xpose.msra.mxu1 %v4881_v48 }
 0x29c   : > { %v3593_v44 = vpop.permute.xlu1 %3592  ;;  %5857 = vmatprep.subr.msk.bf16.mxu1 %vm3990_vm6, %v11048_v29  ;;  %v4447_v29 = vsel %vm4441_vm9, %v4318_v46, %v3459_v53  ;;  %v4221_v53 = vsel %vm4183_vm7, %v4047_v61, %v8270_v39  ;;  %v11103_v46 = vld [vmem:[#allocation228_spill] sm:$0xff] }
 0x29d   : > { %v3491_v31 = vpop.permute.xlu0 %3490  ;;  %v4576_v7 = vsel %vm4570_vm10, %v4447_v29, %v3593_v44  ;;  %v4350_v56 = vsel %vm4312_vm8, %v4221_v53, %v8688_v36  ;;  %v11100_v44 = vld [vmem:[#allocation29_spill] sm:$0xff] }
 0x29e   : > { %3740 = vrot.lane.b32.xlu1 %v8274_v0, %s6282_s25  ;;  %v4479_v48 = vsel %vm4441_vm9, %v4350_v56, %v3491_v31  ;;  %v11102_v31 = vld [vmem:[#allocation51_spill] sm:$0xff] }
 0x29f   : > { %3638 = vrot.lane.b32.xlu0 %v11097_v4, %s6281_s24 }
 0x2a0   : > { %v3727_v35 = vpop.permute.xlu1 %3726 }
 0x2a1   : > { %v3625_v50 = vpop.permute.xlu0 %3624  ;;  %v4705_v17 = vsel %vm4699_vm11, %v4576_v7, %v3727_v35  ;;  %v4002_v35 = vsel %vm3990_vm6, %v8196_v38, %v11102_v31 }
 0x2a2   : > { %3874 = vrot.lane.b32.xlu1 %v11098_v8, %s6283_s26  ;;  %v4608_v30 = vsel %vm4570_vm10, %v4479_v48, %v3625_v50  ;;  %v4191_v29 = vsel %vm4183_vm7, %v4002_v35, %v11103_v46  ;;  %v11104_v50 = vld [vmem:[#allocation144_spill] sm:$0xff]  ;;  %v11110_v35 = vld [vmem:[#allocation234_spill] sm:$0xff] }
 0x2a3   : > { %3772 = vrot.lane.b32.xlu0 %v8398_v5, %s6282_s25  ;;  %v4320_v7 = vsel %vm4312_vm8, %v4191_v29, %v8622_v52  ;;  %v11111_v29 = vld [vmem:[#allocation140_spill] sm:$0xff] }
 0x2a4   : > { %v3861_v40 = vpop.permute.xlu1 %3860 }
 0x2a5   : > { %v4836_v57 = vsel %vm4828_vm12, %v4705_v17, %v3861_v40  ;;  %v3759_v1 = vpop.permute.xlu0 %3758  ;;  %v11105_v40 = vld [vmem:[#allocation16_spill] sm:$0xff] }
 0x2a6   : > { %3474 = vrot.lane.b32.xlu1 %v11091_v13, %s6280_s23  ;;  %5244 = vmatpush1.bf16.xpose.msra.mxu0 %v4836_v57  ;;  %v4737_v39 = vsel %vm4699_vm11, %v4608_v30, %v3759_v1  ;;  %v11101_v13 = vld [vmem:[#allocation112_spill] sm:$0xff]  ;;  %v11106_v57 = vld [vmem:[#allocation78_spill] sm:$0xff] }
 0x2a7   : > { %5841 = vmatprep.subr.msk.bf16.mxu0 %vm3990_vm6, %v11057_v12  ;;  %3906 = vrot.lane.b32.xlu0 %v11100_v44, %s6283_s26  ;;  %v4050_v53 = vsel %vm3990_vm6, %v8320_v34, %v11106_v57  ;;  %v11107_v30 = vld [vmem:[#allocation32_spill] sm:$0xff] }
 0x2a8   : > { %v3461_v20 = vpop.permute.xlu1 %3460  ;;  %v4223_v1 = vsel %vm4183_vm7, %v4050_v53, %v8262_v59 }
 0x2a9   : > { %v3893_v27 = vpop.permute.xlu0 %3892  ;;  %v4352_v48 = vsel %vm4312_vm8, %v4223_v1, %v8686_v37 }
 0x2aa   : > { %3608 = vrot.lane.b32.xlu1 %v11101_v13, %s6281_s24  ;;  %v4884_v21 = vsel %vm4828_vm12, %v4737_v39, %v3893_v27 }
 0x2ab   : > { %3506 = vrot.lane.b32.xlu0 %v11093_v3, %s6280_s23  ;;  %5287 = vmatpush1.bf16.xpose.msra.mxu1 %v4884_v21 }
 0x2ac   : > { %v3595_v12 = vpop.permute.xlu1 %3594  ;;  %5858 = vmatprep.subr.msk.bf16.mxu1 %vm3990_vm6, %v11060_v62  ;;  %v4449_v62 = vsel %vm4441_vm9, %v4320_v7, %v3461_v20 }
 0x2ad   : > { %v3493_v36 = vpop.permute.xlu0 %3492  ;;  %v4578_v54 = vsel %vm4570_vm10, %v4449_v62, %v3595_v12  ;;  %v11112_v62 = vld [vmem:[#allocation15_spill] sm:$0xff] }
 0x2ae   : > { %3742 = vrot.lane.b32.xlu1 %v8296_v47, %s6282_s25  ;;  %v4481_v20 = vsel %vm4441_vm9, %v4352_v48, %v3493_v36  ;;  %v11109_v36 = vld [vmem:[#allocation57_spill] sm:$0xff] }
 0x2af   : > { %3640 = vrot.lane.b32.xlu0 %v11104_v50, %s6281_s24  ;;  %v4005_v31 = vsel %vm3990_vm6, %v8218_v23, %v11109_v36 }
 0x2b0   : > { %v3729_v3 = vpop.permute.xlu1 %3728  ;;  %v4193_v46 = vsel %vm4183_vm7, %v4005_v31, %v11110_v35  ;;  %v11119_v31 = vld [vmem:[#allocation18_spill] sm:$0xff] }
 0x2b1   : > { %v3627_v17 = vpop.permute.xlu0 %3626  ;;  %v4707_v38 = vsel %vm4699_vm11, %v4578_v54, %v3729_v3  ;;  %v4322_v3 = vsel %vm4312_vm8, %v4193_v46, %v8632_v18  ;;  %v11120_v46 = vld [vmem:[#allocation81_spill] sm:$0xff] }
 0x2b2   : > { %3876 = vrot.lane.b32.xlu1 %v11105_v40, %s6283_s26  ;;  %v4610_v27 = vsel %vm4570_vm10, %v4481_v20, %v3627_v17 }
 0x2b3   : > { %3774 = vrot.lane.b32.xlu0 %v8420_v51, %s6282_s25 }
 0x2b4   : > { %v3863_v61 = vpop.permute.xlu1 %3862 }
 0x2b5   : > { %v4839_v52 = vsel %vm4828_vm12, %v4707_v38, %v3863_v61  ;;  %v3761_v56 = vpop.permute.xlu0 %3760  ;;  %v11113_v38 = vld [vmem:[#allocation84_spill] sm:$0xff] }
 0x2b6   : > { %3476 = vrot.lane.b32.xlu1 %v11098_v8, %s6280_s23  ;;  %5246 = vmatpush1.bf16.xpose.msra.mxu0 %v4839_v52  ;;  %v4739_v59 = vsel %vm4699_vm11, %v4610_v27, %v3761_v56  ;;  %v11108_v8 = vld [vmem:[#allocation110_spill] sm:$0xff]  ;;  %v4053_v61 = vsel %vm3990_vm6, %v8344_v2, %v11113_v38  ;;  %v11114_v2 = vld [vmem:[#allocation31_spill] sm:$0xff] }
 0x2b7   : > { %5842 = vmatprep.subr.msk.bf16.mxu0 %vm3990_vm6, %v11069_v22  ;;  %3908 = vrot.lane.b32.xlu0 %v11107_v30, %s6283_s26  ;;  %v4225_v57 = vsel %vm4183_vm7, %v4053_v61, %v8292_v60  ;;  %v11116_v27 = vld [vmem:[#allocation54_spill] sm:$0xff] }
 0x2b8   : > { %v3463_v39 = vpop.permute.xlu1 %3462  ;;  %v4354_v52 = vsel %vm4312_vm8, %v4225_v57, %v8696_v9 }
 0x2b9   : > { %v3895_v21 = vpop.permute.xlu0 %3894 }
 0x2ba   : > { %3610 = vrot.lane.b32.xlu1 %v11108_v8, %s6281_s24  ;;  %v4887_v12 = vsel %vm4828_vm12, %v4739_v59, %v3895_v21  ;;  %v4008_v59 = vsel %vm3990_vm6, %v8210_v25, %v11116_v27  ;;  %v11117_v21 = vld [vmem:[#allocation232_spill] sm:$0xff]  ;;  %v11130_v27 = vld [vmem:[#allocation263_spill] sm:$0xff] }
 0x2bb   : > { %3508 = vrot.lane.b32.xlu0 %v11100_v44, %s6280_s23  ;;  %5289 = vmatpush1.bf16.xpose.msra.mxu1 %v4887_v12  ;;  %v4195_v12 = vsel %vm4183_vm7, %v4008_v59, %v11117_v21 }
 0x2bc   : > { %v3597_v22 = vpop.permute.xlu1 %3596  ;;  %5859 = vmatprep.subr.msk.bf16.mxu1 %vm3990_vm6, %v11072_v10  ;;  %v4451_v10 = vsel %vm4441_vm9, %v4322_v3, %v3463_v39 }
 0x2bd   : > { %v3495_v37 = vpop.permute.xlu0 %3494  ;;  %v4580_v17 = vsel %vm4570_vm10, %v4451_v10, %v3597_v22  ;;  %v11118_v22 = vld [vmem:[#allocation150_spill] sm:$0xff] }
 0x2be   : > { %3744 = vrot.lane.b32.xlu1 %v8288_v33, %s6282_s25  ;;  %v4483_v1 = vsel %vm4441_vm9, %v4354_v52, %v3495_v37  ;;  %v4324_v37 = vsel %vm4312_vm8, %v4195_v12, %v8630_v15  ;;  %v11131_v12 = vld [vmem:[#allocation256_spill] sm:$0xff] }
 0x2bf   : > { %3642 = vrot.lane.b32.xlu0 %v11111_v29, %s6281_s24 }
 0x2c0   : > { %v3731_v44 = vpop.permute.xlu1 %3730 }
 0x2c1   : > { %v3629_v7 = vpop.permute.xlu0 %3628  ;;  %v4709_v23 = vsel %vm4699_vm11, %v4580_v17, %v3731_v44  ;;  %v4056_v44 = vsel %vm3990_vm6, %v8336_v63, %v11120_v46  ;;  %v11121_v63 = vld [vmem:[#allocation34_spill] sm:$0xff] }
 0x2c2   : > { %3878 = vrot.lane.b32.xlu1 %v11112_v62, %s6283_s26  ;;  %v4612_v48 = vsel %vm4570_vm10, %v4483_v1, %v3629_v7  ;;  %v4227_v3 = vsel %vm4183_vm7, %v4056_v44, %v8284_v19  ;;  %v11125_v1 = vld [vmem:[#allocation146_spill] sm:$0xff] }
 0x2c3   : > { %3776 = vrot.lane.b32.xlu0 %v8414_v58, %s6282_s25  ;;  %v4356_v7 = vsel %vm4312_vm8, %v4227_v3, %v8694_v45 }
 0x2c4   : > { %v3865_v54 = vpop.permute.xlu1 %3864 }
 0x2c5   : > { %v4842_v18 = vsel %vm4828_vm12, %v4709_v23, %v3865_v54  ;;  %v3763_v53 = vpop.permute.xlu0 %3762 }
 0x2c6   : > { %3478 = vrot.lane.b32.xlu1 %v11105_v40, %s6280_s23  ;;  %5248 = vmatpush1.bf16.xpose.msra.mxu0 %v4842_v18  ;;  %v4741_v60 = vsel %vm4699_vm11, %v4612_v48, %v3763_v53  ;;  %v11115_v40 = vld [vmem:[#allocation115_spill] sm:$0xff]  ;;  %v11123_v18 = vld [vmem:[#allocation60_spill] sm:$0xff]  ;;  %v11124_v53 = vld [vmem:[#allocation238_spill] sm:$0xff] }
 0x2c7   : > { %5843 = vmatprep.subr.msk.bf16.mxu0 %vm3990_vm6, %v11080_v24  ;;  %3910 = vrot.lane.b32.xlu0 %v11114_v2, %s6283_s26  ;;  %v4011_v57 = vsel %vm3990_vm6, %v8234_v26, %v11123_v18  ;;  %v11140_v18 = vld [vmem:[#allocation20_spill] sm:$0xff] }
 0x2c8   : > { %v3465_v56 = vpop.permute.xlu1 %3464  ;;  %v4197_v52 = vsel %vm4183_vm7, %v4011_v57, %v11124_v53  ;;  %v11141_v53 = vld [vmem:[#allocation151_spill] sm:$0xff] }
 0x2c9   : > { %v3897_v20 = vpop.permute.xlu0 %3896 }
 0x2ca   : > { %3612 = vrot.lane.b32.xlu1 %v11115_v40, %s6281_s24  ;;  %v4890_v39 = vsel %vm4828_vm12, %v4741_v60, %v3897_v20  ;;  %v11127_v20 = vld [vmem:[#allocation17_spill] sm:$0xff] }
 0x2cb   : > { %3510 = vrot.lane.b32.xlu0 %v11107_v30, %s6280_s23  ;;  %5291 = vmatpush1.bf16.xpose.msra.mxu1 %v4890_v39  ;;  %v11128_v39 = vld [vmem:[#allocation143_spill] sm:$0xff] }
 0x2cc   : > { %v3599_v9 = vpop.permute.xlu1 %3598  ;;  %5860 = vmatprep.subr.msk.bf16.mxu1 %vm3990_vm6, %v11083_v16  ;;  %v4453_v16 = vsel %vm4441_vm9, %v4324_v37, %v3465_v56  ;;  %v11126_v56 = vld [vmem:[#allocation22_spill] sm:$0xff] }
 0x2cd   : > { %v3497_v24 = vpop.permute.xlu0 %3496  ;;  %v4326_v48 = vsel %vm4312_vm8, %v4197_v52, %v11126_v56  ;;  %v11143_v56 = vld [vmem:[#allocation261_spill] sm:$0xff] }
 0x2ce   : > { %3746 = vrot.lane.b32.xlu1 %v8312_v11, %s6282_s25  ;;  %v4582_v11 = vsel %vm4570_vm10, %v4453_v16, %v3599_v9  ;;  %v4485_v17 = vsel %vm4441_vm9, %v4356_v7, %v3497_v24  ;;  %v11129_v24 = vld [vmem:[#allocation88_spill] sm:$0xff]  ;;  %v11135_v7 = vld [vmem:[#allocation58_spill] sm:$0xff] }
 0x2cf   : > { %3644 = vrot.lane.b32.xlu0 %v11118_v22, %s6281_s24  ;;  %v4059_v59 = vsel %vm3990_vm6, %v11130_v27, %v11129_v24  ;;  %v11132_v16 = vld [vmem:[#allocation96_spill] sm:$0xff] }
 0x2d0   : > { %v3733_v30 = vpop.permute.xlu1 %3732 }
 0x2d1   : > { %v3631_v36 = vpop.permute.xlu0 %3630  ;;  %v4711_v25 = vsel %vm4699_vm11, %v4582_v11, %v3733_v30  ;;  %v4229_v30 = vsel %vm4183_vm7, %v4059_v59, %v11131_v12  ;;  %v11146_v59 = vld [vmem:[#allocation36_spill] sm:$0xff] }
 0x2d2   : > { %3880 = vrot.lane.b32.xlu1 %v11119_v31, %s6283_s26  ;;  %v4614_v54 = vsel %vm4570_vm10, %v4485_v17, %v3631_v36  ;;  %v4358_v36 = vsel %vm4312_vm8, %v4229_v30, %v11132_v16  ;;  %v11136_v17 = vld [vmem:[#allocation248_spill] sm:$0xff] }
 0x2d3   : > { %3778 = vrot.lane.b32.xlu0 %v8436_v6, %s6282_s25 }
 0x2d4   : > { %v3867_v35 = vpop.permute.xlu1 %3866 }
 0x2d5   : > { %v4845_v15 = vsel %vm4828_vm12, %v4711_v25, %v3867_v35  ;;  %v3765_v10 = vpop.permute.xlu0 %3764  ;;  %v11133_v25 = vld [vmem:[#allocation33_spill] sm:$0xff] }
 0x2d6   : > { %3480 = vrot.lane.b32.xlu1 %v11112_v62, %s6280_s23  ;;  %5250 = vmatpush1.bf16.xpose.msra.mxu0 %v4845_v15  ;;  %v4743_v19 = vsel %vm4699_vm11, %v4614_v54, %v3765_v10  ;;  %v11122_v62 = vld [vmem:[#allocation113_spill] sm:$0xff]  ;;  %v11137_v54 = vld [vmem:[#allocation236_spill] sm:$0xff] }
 0x2d7   : > { %5844 = vmatprep.subr.msk.bf16.mxu0 %vm3990_vm6, %v11087_v41  ;;  %3912 = vrot.lane.b32.xlu0 %v11121_v63, %s6283_s26 }
 0x2d8   : > { %v3467_v23 = vpop.permute.xlu1 %3466 }
 0x2d9   : > { %v3899_v38 = vpop.permute.xlu0 %3898 }
 0x2da   : > { %3614 = vrot.lane.b32.xlu1 %v11122_v62, %s6281_s24  ;;  %v4893_v61 = vsel %vm4828_vm12, %v4743_v19, %v3899_v38  ;;  %v11138_v38 = vld [vmem:[#allocation159_spill] sm:$0xff] }
 0x2db   : > { %3512 = vrot.lane.b32.xlu0 %v11114_v2, %s6280_s23  ;;  %5293 = vmatpush1.bf16.xpose.msra.mxu1 %v4893_v61  ;;  %v11139_v61 = vld [vmem:[#allocation4_spill] sm:$0xff] }
 0x2dc   : > { %v3601_v45 = vpop.permute.xlu1 %3600  ;;  %5861 = vmatprep.subr.msk.bf16.mxu1 %vm3990_vm6, %v11090_v43  ;;  %v4455_v43 = vsel %vm4441_vm9, %v4326_v48, %v3467_v23  ;;  %v4014_v23 = vsel %vm3990_vm6, %v11136_v17, %v11135_v7  ;;  %v11153_v17 = vld [vmem:[#allocation19_spill] sm:$0xff] }
 0x2dd   : > { %v3499_v41 = vpop.permute.xlu0 %3498  ;;  %v4199_v19 = vsel %vm4183_vm7, %v4014_v23, %v11137_v54  ;;  %v11154_v54 = vld [vmem:[#allocation145_spill] sm:$0xff] }
 0x2de   : > { %3748 = vrot.lane.b32.xlu1 %v8304_v55, %s6282_s25  ;;  %v4584_v55 = vsel %vm4570_vm10, %v4455_v43, %v3601_v45  ;;  %v4487_v11 = vsel %vm4441_vm9, %v4358_v36, %v3499_v41  ;;  %v4328_v45 = vsel %vm4312_vm8, %v4199_v19, %v11139_v61  ;;  %v11156_v61 = vld [vmem:[#allocation267_spill] sm:$0xff] }
 0x2df   : > { %3646 = vrot.lane.b32.xlu0 %v11125_v1, %s6281_s24 }
 0x2e0   : > { %v3735_v2 = vpop.permute.xlu1 %3734 }
 0x2e1   : > { %v3633_v60 = vpop.permute.xlu0 %3632  ;;  %v4713_v26 = vsel %vm4699_vm11, %v4584_v55, %v3735_v2  ;;  %v11142_v2 = vld [vmem:[#allocation85_spill] sm:$0xff] }
 0x2e2   : > { %3882 = vrot.lane.b32.xlu1 %v11127_v20, %s6283_s26  ;;  %v4616_v46 = vsel %vm4570_vm10, %v4487_v11, %v3633_v60  ;;  %v4062_v48 = vsel %vm3990_vm6, %v11143_v56, %v11142_v2  ;;  %v11144_v60 = vld [vmem:[#allocation255_spill] sm:$0xff] }
 0x2e3   : > { %3780 = vrot.lane.b32.xlu0 %v11128_v39, %s6282_s25  ;;  %v4231_v55 = vsel %vm4183_vm7, %v4062_v48, %v11144_v60  ;;  %v11148_v11 = vld [vmem:[#allocation63_spill] sm:$0xff] }
 0x2e4   : > { %v3869_v9 = vpop.permute.xlu1 %3868  ;;  %v11159_v48 = vld [vmem:[#allocation35_spill] sm:$0xff] }
 0x2e5   : > { %v4848_v21 = vsel %vm4828_vm12, %v4713_v26, %v3869_v9  ;;  %v3767_v37 = vpop.permute.xlu0 %3766  ;;  %v11145_v9 = vld [vmem:[#allocation24_spill] sm:$0xff] }
 0x2e6   : > { %3482 = vrot.lane.b32.xlu1 %v11119_v31, %s6280_s23  ;;  %5252 = vmatpush1.bf16.xpose.msra.mxu0 %v4848_v21  ;;  %v4745_v44 = vsel %vm4699_vm11, %v4616_v46, %v3767_v37  ;;  %v11134_v31 = vld [vmem:[#allocation119_spill] sm:$0xff]  ;;  %v4360_v24 = vsel %vm4312_vm8, %v4231_v55, %v11145_v9 }
 0x2e7   : > { %5845 = vmatprep.subr.msk.bf16.mxu0 %vm3990_vm6, %v11094_v42  ;;  %3914 = vrot.lane.b32.xlu0 %v11133_v25, %s6283_s26 }
 0x2e8   : > { %v3469_v35 = vpop.permute.xlu1 %3468 }
 0x2e9   : > { %v3901_v15 = vpop.permute.xlu0 %3900 }
 0x2ea   : > { %3616 = vrot.lane.b32.xlu1 %v11134_v31, %s6281_s24  ;;  %v4896_v3 = vsel %vm4828_vm12, %v4745_v44, %v3901_v15  ;;  %v11150_v44 = vld [vmem:[#allocation243_spill] sm:$0xff] }
 0x2eb   : > { %3514 = vrot.lane.b32.xlu0 %v11121_v63, %s6280_s23  ;;  %5295 = vmatpush1.bf16.xpose.msra.mxu1 %v4896_v3  ;;  %v11151_v3 = vld [vmem:[#allocation155_spill] sm:$0xff] }
 0x2ec   : > { %v3603_v42 = vpop.permute.xlu1 %3602  ;;  %5862 = vmatprep.subr.msk.bf16.mxu1 %vm3990_vm6, %v11097_v4  ;;  %v4457_v4 = vsel %vm4441_vm9, %v4328_v45, %v3469_v35  ;;  %v11149_v35 = vld [vmem:[#allocation252_spill] sm:$0xff] }
 0x2ed   : > { %v3501_v10 = vpop.permute.xlu0 %3500  ;;  %v4017_v46 = vsel %vm3990_vm6, %v11149_v35, %v11148_v11  ;;  %v11167_v35 = vld [vmem:[#allocation93_spill] sm:$0xff] }
 0x2ee   : > { %3750 = vrot.lane.b32.xlu1 %v8328_v49, %s6282_s25  ;;  %v4586_v49 = vsel %vm4570_vm10, %v4457_v4, %v3603_v42  ;;  %v4489_v27 = vsel %vm4441_vm9, %v4360_v24, %v3501_v10  ;;  %v4201_v15 = vsel %vm4183_vm7, %v4017_v46, %v11150_v44  ;;  %v11152_v42 = vld [vmem:[#allocation5_spill] sm:$0xff]  ;;  %v11161_v24 = vld [vmem:[#allocation59_spill] sm:$0xff] }
 0x2ef   : > { %3648 = vrot.lane.b32.xlu0 %v11138_v38, %s6281_s24  ;;  %v4330_v10 = vsel %vm4312_vm8, %v4201_v15, %v11152_v42  ;;  %v6227_v44 = vld [vmem:[%s6329_s19 + $0x20c] sm:$0xf] }
 0x2f0   : > { %v3737_v63 = vpop.permute.xlu1 %3736 }
 0x2f1   : > { %v3635_v41 = vpop.permute.xlu0 %3634  ;;  %v4715_v57 = vsel %vm4699_vm11, %v4586_v49, %v3737_v63  ;;  %v11155_v63 = vld [vmem:[#allocation91_spill] sm:$0xff] }
 0x2f2   : > { %3884 = vrot.lane.b32.xlu1 %v11140_v18, %s6283_s26  ;;  %v4618_v12 = vsel %vm4570_vm10, %v4489_v27, %v3635_v41  ;;  %v4065_v45 = vsel %vm3990_vm6, %v11156_v61, %v11155_v63  ;;  %v9175_v41 = vld [vmem:[%s10308_s1 + $0x4] ss:$8 sps:$4 sm:$0xff]   ;;  %v11169_v63 = vld [vmem:[#allocation89_spill] sm:$0xff] }
 0x2f3   : > { %3782 = vrot.lane.b32.xlu0 %v11141_v53, %s6282_s25  ;;  %v11157_v18 = vld [vmem:[#allocation258_spill] sm:$0xff]  ;;  %5854 = vmatprep.mubr.msk.bf16.mxu0 %vm3990_vm6, %v9175_v41  ;;  %v11170_v61 = vld [vmem:[#allocation265_spill] sm:$0xff] }
 0x2f4   : > { %v3871_v52 = vpop.permute.xlu1 %3870  ;;  %v4233_v49 = vsel %vm4183_vm7, %v4065_v45, %v11157_v18  ;;  %5871 = vmatprep.mubr.msk.bf16.mxu1 %vm3990_vm6, %v9175_v41  ;;  %v4068_v45 = vsel %vm3990_vm6, %v11170_v61, %v11169_v63  ;;  %v11171_v18 = vld [vmem:[#allocation257_spill] sm:$0xff]  ;;  %v11182_v61 = vld [vmem:[#allocation95_spill] sm:$0xff] }
 0x2f5   : > { %v4851_v43 = vsel %vm4828_vm12, %v4715_v57, %v3871_v52  ;;  %v3769_v26 = vpop.permute.xlu0 %3768  ;;  %v11158_v52 = vld [vmem:[#allocation7_spill] sm:$0xff] }
 0x2f6   : > { %3484 = vrot.lane.b32.xlu1 %v11127_v20, %s6280_s23  ;;  %5254 = vmatpush1.bf16.xpose.msra.mxu0 %v4851_v43  ;;  %v4747_v30 = vsel %vm4699_vm11, %v4618_v12, %v3769_v26  ;;  %v11147_v20 = vld [vmem:[#allocation117_spill] sm:$0xff]  ;;  %v4362_v2 = vsel %vm4312_vm8, %v4233_v49, %v11158_v52  ;;  %v11163_v12 = vld [vmem:[#allocation62_spill] sm:$0xff]  ;;  %v4235_v49 = vsel %vm4183_vm7, %v4068_v45, %v11171_v18  ;;  %v11172_v52 = vld [vmem:[#allocation124_spill] sm:$0xff] }
 0x2f7   : > { %5846 = vmatprep.subr.msk.bf16.mxu0 %vm3990_vm6, %v11101_v13  ;;  %3916 = vrot.lane.b32.xlu0 %v11146_v59, %s6283_s26  ;;  %v11183_v45 = vld [vmem:[#allocation270_spill] sm:$0xff] }
 0x2f8   : > { %v3471_v21 = vpop.permute.xlu1 %3470 }
 0x2f9   : > { %v3903_v37 = vpop.permute.xlu0 %3902 }
 0x2fa   : > { %3618 = vrot.lane.b32.xlu1 %v11147_v20, %s6281_s24  ;;  %v4899_v16 = vsel %vm4828_vm12, %v4747_v30, %v3903_v37  ;;  %v11164_v30 = vld [vmem:[#allocation251_spill] sm:$0xff] }
 0x2fb   : > { %3516 = vrot.lane.b32.xlu0 %v11133_v25, %s6280_s23  ;;  %5297 = vmatpush1.bf16.xpose.msra.mxu1 %v4899_v16  ;;  %v4020_v37 = vsel %vm3990_vm6, %v11164_v30, %v11163_v12  ;;  %v11165_v16 = vld [vmem:[#allocation241_spill] sm:$0xff] }
 0x2fc   : > { %v3605_v13 = vpop.permute.xlu1 %3604  ;;  %5863 = vmatprep.subr.msk.bf16.mxu1 %vm3990_vm6, %v11104_v50  ;;  %v4459_v50 = vsel %vm4441_vm9, %v4330_v10, %v3471_v21  ;;  %v11162_v21 = vld [vmem:[#allocation157_spill] sm:$0xff]  ;;  %v11168_v10 = vld [vmem:[#allocation38_spill] sm:$0xff] }
 0x2fd   : > { %v3503_v36 = vpop.permute.xlu0 %3502  ;;  %v11175_v30 = vld [vmem:[#allocation217_spill] sm:$0xff] }
 0x2fe   : > { %3752 = vrot.lane.b32.xlu1 %v8320_v34, %s6282_s25  ;;  %v4588_v34 = vsel %vm4570_vm10, %v4459_v50, %v3605_v13  ;;  %v4491_v56 = vsel %vm4441_vm9, %v4362_v2, %v3503_v36  ;;  %v4203_v13 = vsel %vm4183_vm7, %v4020_v37, %v11165_v16  ;;  %v11166_v36 = vld [vmem:[#allocation220_spill] sm:$0xff]  ;;  %v4364_v2 = vsel %vm4312_vm8, %v4235_v49, %v11172_v52  ;;  %v11176_v37 = vld [vmem:[#allocation67_spill] sm:$0xff]  ;;  %v11177_v16 = vld [vmem:[#allocation254_spill] sm:$0xff] }
 0x2ff   : > { %3650 = vrot.lane.b32.xlu0 %v11151_v3, %s6281_s24  ;;  %v4332_v46 = vsel %vm4312_vm8, %v4203_v13, %v11167_v35  ;;  %v4023_v13 = vsel %vm3990_vm6, %v11177_v16, %v11176_v37  ;;  %v6231_v35 = vld [vmem:[%s6329_s19 + $0x214] sm:$0xf] }
 0x300   : > { %v3739_v25 = vpop.permute.xlu1 %3738  ;;  %v11184_v49 = vld [vmem:[#allocation260_spill] sm:$0xff] }
 0x301   : > { %v3637_v7 = vpop.permute.xlu0 %3636  ;;  %v4717_v23 = vsel %vm4699_vm11, %v4588_v34, %v3739_v25 }
 0x302   : > { %3886 = vrot.lane.b32.xlu1 %v11153_v17, %s6283_s26  ;;  %v4620_v60 = vsel %vm4570_vm10, %v4491_v56, %v3637_v7  ;;  %v6228_v7 = vld [vmem:[%s6329_s19 + $0x1fc] sm:$0xf]  ;;  %v6229_v17 = vld [vmem:[%s6329_s19 + $0x200] sm:$0xf] }
 0x303   : > { %3784 = vrot.lane.b32.xlu0 %v11154_v54, %s6282_s25  ;;  %v9222_v34 = vcombine.low %v6228_v7, %v6229_v17 }
 0x304   : > { %v3873_v19 = vpop.permute.xlu1 %3872 }
 0x305   : > { %v4854_v4 = vsel %vm4828_vm12, %v4717_v23, %v3873_v19  ;;  %v3771_v57 = vpop.permute.xlu0 %3770 }
 0x306   : > { %3518 = vrot.lane.b32.xlu1 %v11146_v59, %s6280_s23  ;;  %5256 = vmatpush1.bf16.xpose.msra.mxu0 %v4854_v4  ;;  %v4749_v55 = vsel %vm4699_vm11, %v4620_v60, %v3771_v57 }
 0x307   : > { %5847 = vmatprep.subr.msk.bf16.mxu0 %vm3990_vm6, %v11108_v8  ;;  %3918 = vrot.lane.b32.xlu0 %v11159_v48, %s6283_s26  ;;  %v11160_v8 = vld [vmem:[#allocation166_spill] sm:$0xff] }
 0x308   : > { %v3473_v43 = vpop.permute.xlu1 %3472 }
 0x309   : > { %v3905_v26 = vpop.permute.xlu0 %3904  ;;  %v4461_v25 = vsel %vm4441_vm9, %v4332_v46, %v3473_v43  ;;  %v11173_v43 = vld [vmem:[#allocation64_spill] sm:$0xff] }
 0x30a   : > { %3652 = vrot.lane.b32.xlu1 %v11160_v8, %s6281_s24  ;;  %v4902_v9 = vsel %vm4828_vm12, %v4749_v55, %v3905_v26 }
 0x30b   : > { %3550 = vrot.lane.b32.xlu0 %v11161_v24, %s6280_s23  ;;  %5299 = vmatpush1.bf16.xpose.msra.mxu1 %v4902_v9 }
 0x30c   : > { %v3607_v27 = vpop.permute.xlu1 %3606  ;;  %5864 = vmatprep.subr.msk.bf16.mxu1 %vm3990_vm6, %v11111_v29  ;;  %v6226_v29 = vld [vmem:[%s6329_s19 + $0x208] sm:$0xf] }
 0x30d   : > { %v3505_v59 = vpop.permute.xlu0 %3504  ;;  %v9214_v15 = vcombine.low %v6226_v29, %v6227_v44  ;;  %v4590_v50 = vsel %vm4570_vm10, %v4461_v25, %v3607_v27  ;;  %v11174_v27 = vld [vmem:[#allocation56_spill] sm:$0xff]  ;;  %v11178_v29 = vld [vmem:[#allocation245_spill] sm:$0xff] }
 0x30e   : > { %3786 = vrot.lane.b32.xlu1 %v11162_v21, %s6282_s25  ;;  %v4493_v56 = vsel %vm4441_vm9, %v4364_v2, %v3505_v59  ;;  %v11179_v44 = vld [vmem:[#allocation160_spill] sm:$0xff]  ;;  %v11185_v2 = vld [vmem:[#allocation61_spill] sm:$0xff] }
 0x30f   : > { %3684 = vrot.lane.b32.xlu0 %v11166_v36, %s6281_s24 }
 0x310   : > { %v3741_v11 = vpop.permute.xlu1 %3740 }
 0x311   : > { %v3639_v42 = vpop.permute.xlu0 %3638  ;;  %v4719_v23 = vsel %vm4699_vm11, %v4590_v50, %v3741_v11  ;;  %v6230_v11 = vld [vmem:[%s6329_s19 + $0x210] sm:$0xf] }
 0x312   : > { %3920 = vrot.lane.b32.xlu1 %v11168_v10, %s6283_s26  ;;  %v4622_v55 = vsel %vm4570_vm10, %v4493_v56, %v3639_v42  ;;  %v9258_v46 = vcombine.low %v6230_v11, %v6231_v35  ;;  %v11186_v56 = vld [vmem:[#allocation101_spill] sm:$0xff] }
 0x313   : > { %3818 = vrot.lane.b32.xlu0 %v9214_v15, %s6282_s25  ;;  %v11189_v11 = vld [vmem:[#allocation65_spill] sm:$0xff] }
 0x314   : > { %v3875_v19 = vpop.permute.xlu1 %3874  ;;  %v11190_v35 = vld [vmem:[#allocation253_spill] sm:$0xff] }
 0x315   : > { %v4857_v4 = vsel %vm4828_vm12, %v4719_v23, %v3875_v19  ;;  %v3773_v57 = vpop.permute.xlu0 %3772  ;;  %v11181_v19 = vld [vmem:[#allocation154_spill] sm:$0xff] }
 0x316   : > { %3418 = vrot.lane.b32.xlu1 %v9222_v34, %s6279_s22  ;;  %5258 = vmatpush1.bf16.xpose.msra.mxu0 %v4857_v4  ;;  %v4751_v26 = vsel %vm4699_vm11, %v4622_v55, %v3773_v57  ;;  %v4071_v4 = vsel %vm3990_vm6, %v11183_v45, %v11182_v61  ;;  %v11195_v45 = vld [vmem:[#allocation92_spill] sm:$0xff] }
 0x317   : > { %5848 = vmatprep.subr.msk.bf16.mxu0 %vm3990_vm6, %v11115_v40  ;;  %3952 = vrot.lane.b32.xlu0 %v11173_v43, %s6283_s26  ;;  %v4237_v57 = vsel %vm4183_vm7, %v4071_v4, %v11184_v49  ;;  %v6233_v49 = vld [vmem:[%s6329_s19 + $0x220] sm:$0xf] }
 0x318   : > { %v3475_v60 = vpop.permute.xlu1 %3474 }
 0x319   : > { %v3907_v9 = vpop.permute.xlu0 %3906 }
 0x31a   : > { %3552 = vrot.lane.b32.xlu1 %v11174_v27, %s6280_s23  ;;  %v4905_v12 = vsel %vm4828_vm12, %v4751_v26, %v3907_v9  ;;  %v11187_v26 = vld [vmem:[#allocation37_spill] sm:$0xff] }
 0x31b   : > { %3520 = vrot.lane.b32.xlu0 %v11159_v48, %s6280_s23  ;;  %5301 = vmatpush1.bf16.xpose.msra.mxu1 %v4905_v12  ;;  %v4205_v48 = vsel %vm4183_vm7, %v4023_v13, %v11178_v29  ;;  %v11188_v13 = vld [vmem:[#allocation174_spill] sm:$0xff]  ;;  %v11191_v29 = vld [vmem:[#allocation244_spill] sm:$0xff] }
 0x31c   : > { %v3609_v40 = vpop.permute.xlu1 %3608  ;;  %5865 = vmatprep.subr.msk.bf16.mxu1 %vm3990_vm6, %v11118_v22  ;;  %v11180_v22 = vld [vmem:[#allocation98_spill] sm:$0xff] }
 0x31d   : > { %v3507_v59 = vpop.permute.xlu0 %3506  ;;  %v4334_v42 = vsel %vm4312_vm8, %v4205_v48, %v11180_v22  ;;  %v11192_v22 = vld [vmem:[#allocation21_spill] sm:$0xff] }
 0x31e   : > { %3686 = vrot.lane.b32.xlu1 %v11175_v30, %s6281_s24  ;;  %v4463_v50 = vsel %vm4441_vm9, %v4334_v42, %v3475_v60  ;;  %v4366_v60 = vsel %vm4312_vm8, %v4237_v57, %v11186_v56  ;;  %v11305_v30 = vld [vmem:[#allocation138_spill] sm:$0xff] }
 0x31f   : > { %3654 = vrot.lane.b32.xlu0 %v11179_v44, %s6281_s24  ;;  %v4592_v17 = vsel %vm4570_vm10, %v4463_v50, %v3609_v40  ;;  %v4495_v55 = vsel %vm4441_vm9, %v4366_v60, %v3507_v59 }
 0x320   : > { %v3743_v25 = vpop.permute.xlu1 %3742 }
 0x321   : > { %v3641_v7 = vpop.permute.xlu0 %3640  ;;  %v4721_v23 = vsel %vm4699_vm11, %v4592_v17, %v3743_v25 }
 0x322   : > { %3820 = vrot.lane.b32.xlu1 %v9258_v46, %s6282_s25  ;;  %v4624_v12 = vsel %vm4570_vm10, %v4495_v55, %v3641_v7  ;;  %v11193_v7 = vld [vmem:[#allocation165_spill] sm:$0xff]  ;;  %v11197_v55 = vld [vmem:[#allocation40_spill] sm:$0xff] }
 0x323   : > { %3788 = vrot.lane.b32.xlu0 %v11181_v19, %s6282_s25 }
 0x324   : > { %v3877_v63 = vpop.permute.xlu1 %3876 }
 0x325   : > { %v4860_v18 = vsel %vm4828_vm12, %v4721_v23, %v3877_v63  ;;  %v3775_v52 = vpop.permute.xlu0 %3774  ;;  %v11194_v63 = vld [vmem:[#allocation224_spill] sm:$0xff] }
 0x326   : > { %3954 = vrot.lane.b32.xlu1 %v11185_v2, %s6283_s26  ;;  %5260 = vmatpush1.bf16.xpose.msra.mxu0 %v4860_v18  ;;  %v4753_v40 = vsel %vm4699_vm11, %v4624_v12, %v3775_v52  ;;  %v6232_v18 = vld [vmem:[%s6329_s19 + $0x21c] sm:$0xf]  ;;  %v11196_v52 = vld [vmem:[#allocation259_spill] sm:$0xff] }
 0x327   : > { %5849 = vmatprep.subr.msk.bf16.mxu0 %vm3990_vm6, %v11122_v62  ;;  %3922 = vrot.lane.b32.xlu0 %v11187_v26, %s6283_s26  ;;  %v9321_v57 = vcombine.low %v6232_v18, %v6233_v49 }
 0x328   : > { %v3477_v9 = vpop.permute.xlu1 %3476 }
 0x329   : > { %v3909_v37 = vpop.permute.xlu0 %3908 }
 0x32a   : > { %3522 = vrot.lane.b32.xlu1 %v11168_v10, %s6280_s23  ;;  %v4908_v16 = vsel %vm4828_vm12, %v4753_v40, %v3909_v37  ;;  %v4026_v10 = vsel %vm3990_vm6, %v11190_v35, %v11189_v11  ;;  %v11199_v35 = vld [vmem:[#allocation69_spill] sm:$0xff] }
 0x32b   : > { %3420 = vrot.lane.b32.xlu0 %v9214_v15, %s6279_s22  ;;  %5303 = vmatpush1.bf16.xpose.msra.mxu1 %v4908_v16  ;;  %v4207_v48 = vsel %vm4183_vm7, %v4026_v10, %v11191_v29  ;;  %v11200_v10 = vld [vmem:[#allocation70_spill] sm:$0xff] }
 0x32c   : > { %v3611_v62 = vpop.permute.xlu1 %3610  ;;  %5866 = vmatprep.subr.msk.bf16.mxu1 %vm3990_vm6, %v11125_v1  ;;  %v4336_v1 = vsel %vm4312_vm8, %v4207_v48, %v11192_v22  ;;  %v4029_v29 = vsel %vm3990_vm6, %v8280_v28, %v11200_v10  ;;  %v11201_v48 = vld [vmem:[#allocation247_spill] sm:$0xff] }
 0x32d   : > { %v3509_v59 = vpop.permute.xlu0 %3508  ;;  %v4465_v42 = vsel %vm4441_vm9, %v4336_v1, %v3477_v9  ;;  %v11198_v9 = vld [vmem:[#allocation23_spill] sm:$0xff] }
 0x32e   : > { %3656 = vrot.lane.b32.xlu1 %v11188_v13, %s6281_s24  ;;  %v4594_v17 = vsel %vm4570_vm10, %v4465_v42, %v3611_v62  ;;  %v11202_v1 = vld [vmem:[#allocation275_spill] sm:$0xff] }
 0x32f   : > { %3554 = vrot.lane.b32.xlu0 %v11173_v43, %s6280_s23  ;;  %v4074_v43 = vsel %vm3990_vm6, %v8382_v14, %v11195_v45  ;;  %v6235_v28 = vld [vmem:[%s6329_s19 + $0x228] sm:$0xf] }
 0x330   : > { %v3745_v25 = vpop.permute.xlu1 %3744  ;;  %v4239_v56 = vsel %vm4183_vm7, %v4074_v43, %v11196_v52  ;;  %v11206_v52 = vld [vmem:[#allocation264_spill] sm:$0xff]  ;;  %v11210_v10 = vld [vmem:[#allocation39_spill] sm:$0xff] }
 0x331   : > { %v3643_v50 = vpop.permute.xlu0 %3642  ;;  %v4723_v23 = vsel %vm4699_vm11, %v4594_v17, %v3745_v25  ;;  %v4368_v12 = vsel %vm4312_vm8, %v4239_v56, %v11198_v9  ;;  %v4209_v25 = vsel %vm4183_vm7, %v4029_v29, %v11201_v48  ;;  %v11203_v17 = vld [vmem:[#allocation221_spill] sm:$0xff]  ;;  %v11211_v29 = vld [vmem:[#allocation68_spill] sm:$0xff] }
 0x332   : > { %3790 = vrot.lane.b32.xlu1 %v11193_v7, %s6282_s25  ;;  %v4497_v14 = vsel %vm4441_vm9, %v4368_v12, %v3509_v59  ;;  %v4338_v42 = vsel %vm4312_vm8, %v4209_v25, %v11202_v1  ;;  %v11207_v9 = vld [vmem:[#allocation277_spill] sm:$0xff]  ;;  %v4032_v48 = vsel %vm3990_vm6, %v8274_v0, %v11211_v29  ;;  %v11212_v25 = vld [vmem:[#allocation246_spill] sm:$0xff] }
 0x333   : > { %3688 = vrot.lane.b32.xlu0 %v11194_v63, %s6281_s24  ;;  %v4626_v37 = vsel %vm4570_vm10, %v4497_v14, %v3643_v50 }
 0x334   : > { %v3879_v61 = vpop.permute.xlu1 %3878 }
 0x335   : > { %v4863_v4 = vsel %vm4828_vm12, %v4723_v23, %v3879_v61  ;;  %v3777_v60 = vpop.permute.xlu0 %3776  ;;  %v6234_v23 = vld [vmem:[%s6329_s19 + $0x224] sm:$0xf] }
 0x336   : > { %3924 = vrot.lane.b32.xlu1 %v11197_v55, %s6283_s26  ;;  %5262 = vmatpush1.bf16.xpose.msra.mxu0 %v4863_v4  ;;  %v4755_v16 = vsel %vm4699_vm11, %v4626_v37, %v3777_v60  ;;  %v9360_v61 = vcombine.low %v6234_v23, %v6235_v28  ;;  %v11205_v4 = vld [vmem:[#allocation100_spill] sm:$0xff]  ;;  %v11215_v28 = vld [vmem:[#allocation97_spill] sm:$0xff] }
 0x337   : > { %5850 = vmatprep.subr.msk.bf16.mxu0 %vm3990_vm6, %v11134_v31  ;;  %3822 = vrot.lane.b32.xlu0 %v9321_v57, %s6282_s25  ;;  %v4077_v18 = vsel %vm3990_vm6, %v8406_v32, %v11205_v4  ;;  %v11208_v32 = vld [vmem:[#allocation163_spill] sm:$0xff]  ;;  %v11216_v4 = vld [vmem:[#allocation262_spill] sm:$0xff] }
 0x338   : > { %v3479_v40 = vpop.permute.xlu1 %3478  ;;  %v4241_v56 = vsel %vm4183_vm7, %v4077_v18, %v11206_v52  ;;  %v11217_v52 = vld [vmem:[#allocation172_spill] sm:$0xff] }
 0x339   : > { %v3911_v62 = vpop.permute.xlu0 %3910  ;;  %v4370_v12 = vsel %vm4312_vm8, %v4241_v56, %v11207_v9  ;;  %v11218_v56 = vld [vmem:[#allocation129_spill] sm:$0xff]  ;;  %v11219_v9 = vld [vmem:[#allocation122_spill] sm:$0xff] }
 0x33a   : > { %3422 = vrot.lane.b32.xlu1 %v9258_v46, %s6279_s22  ;;  %v4911_v11 = vsel %vm4828_vm12, %v4755_v16, %v3911_v62 }
 0x33b   : > { %3956 = vrot.lane.b32.xlu0 %v11199_v35, %s6283_s26  ;;  %5305 = vmatpush1.bf16.xpose.msra.mxu1 %v4911_v11  ;;  %v11209_v11 = vld [vmem:[#allocation66_spill] sm:$0xff] }
 0x33c   : > { %v3613_v31 = vpop.permute.xlu1 %3612  ;;  %5867 = vmatprep.subr.msk.bf16.mxu1 %vm3990_vm6, %v11138_v38  ;;  %v4467_v38 = vsel %vm4441_vm9, %v4338_v42, %v3479_v40  ;;  %v11213_v42 = vld [vmem:[#allocation126_spill] sm:$0xff] }
 0x33d   : > { %v3511_v59 = vpop.permute.xlu0 %3510 }
 0x33e   : > { %3556 = vrot.lane.b32.xlu1 %v11185_v2, %s6280_s23  ;;  %v4596_v2 = vsel %vm4570_vm10, %v4467_v38, %v3613_v31  ;;  %v4499_v14 = vsel %vm4441_vm9, %v4370_v12, %v3511_v59 }
 0x33f   : > { %3524 = vrot.lane.b32.xlu0 %v11187_v26, %s6280_s23  ;;  %v11204_v26 = vld [vmem:[#allocation170_spill] sm:$0xff] }
 0x340   : > { %v3747_v22 = vpop.permute.xlu1 %3746 }
 0x341   : > { %v3645_v50 = vpop.permute.xlu0 %3644  ;;  %v4725_v45 = vsel %vm4699_vm11, %v4596_v2, %v3747_v22  ;;  %v4211_v22 = vsel %vm4183_vm7, %v4032_v48, %v11212_v25  ;;  %v11214_v2 = vld [vmem:[#allocation180_spill] sm:$0xff]  ;;  %v11222_v25 = vld [vmem:[#allocation74_spill] sm:$0xff] }
 0x342   : > { %3690 = vrot.lane.b32.xlu1 %v11203_v17, %s6281_s24  ;;  %v4628_v37 = vsel %vm4570_vm10, %v4499_v14, %v3645_v50  ;;  %v4340_v38 = vsel %vm4312_vm8, %v4211_v22, %v11213_v42  ;;  %v4035_v22 = vsel %vm3990_vm6, %v8296_v47, %v11222_v25  ;;  %v11232_v25 = vld [vmem:[#allocation169_spill] sm:$0xff] }
 0x343   : > { %3658 = vrot.lane.b32.xlu0 %v11204_v26, %s6281_s24 }
 0x344   : > { %v3881_v43 = vpop.permute.xlu1 %3880 }
 0x345   : > { %v4866_v49 = vsel %vm4828_vm12, %v4725_v45, %v3881_v43  ;;  %v3779_v60 = vpop.permute.xlu0 %3778  ;;  %v4080_v45 = vsel %vm3990_vm6, %v8398_v5, %v11215_v28  ;;  %v11220_v5 = vld [vmem:[#allocation227_spill] sm:$0xff] }
 0x346   : > { %3824 = vrot.lane.b32.xlu1 %v9360_v61, %s6282_s25  ;;  %5264 = vmatpush1.bf16.xpose.msra.mxu0 %v4866_v49  ;;  %v4757_v16 = vsel %vm4699_vm11, %v4628_v37, %v3779_v60  ;;  %v4243_v18 = vsel %vm4183_vm7, %v4080_v45, %v11216_v4  ;;  %v6237_v37 = vld [vmem:[%s6329_s19 + $0x234] sm:$0xf] }
 0x347   : > { %5851 = vmatprep.subr.msk.bf16.mxu0 %vm3990_vm6, %v11147_v20  ;;  %3792 = vrot.lane.b32.xlu0 %v11208_v32, %s6282_s25  ;;  %v4372_v60 = vsel %vm4312_vm8, %v4243_v18, %v11218_v56  ;;  %v11226_v45 = vld [vmem:[#allocation104_spill] sm:$0xff] }
 0x348   : > { %v3481_v40 = vpop.permute.xlu1 %3480  ;;  %v11227_v18 = vld [vmem:[#allocation268_spill] sm:$0xff] }
 0x349   : > { %v3913_v62 = vpop.permute.xlu0 %3912 }
 0x34a   : > { %3958 = vrot.lane.b32.xlu1 %v11209_v11, %s6283_s26  ;;  %v4914_v31 = vsel %vm4828_vm12, %v4757_v16, %v3913_v62 }
 0x34b   : > { %3926 = vrot.lane.b32.xlu0 %v11210_v10, %s6283_s26  ;;  %5307 = vmatpush1.bf16.xpose.msra.mxu1 %v4914_v31 }
 0x34c   : > { %v3615_v20 = vpop.permute.xlu1 %3614  ;;  %5868 = vmatprep.subr.msk.bf16.mxu1 %vm3990_vm6, %v11151_v3  ;;  %v4469_v3 = vsel %vm4441_vm9, %v4340_v38, %v3481_v40  ;;  %v6236_v40 = vld [vmem:[%s6329_s19 + $0x230] sm:$0xf]  ;;  %v11224_v38 = vld [vmem:[#allocation73_spill] sm:$0xff] }
 0x34d   : > { %v3513_v59 = vpop.permute.xlu0 %3512  ;;  %v9425_v16 = vcombine.low %v6236_v40, %v6237_v37  ;;  %v11231_v40 = vld [vmem:[#allocation178_spill] sm:$0xff] }
 0x34e   : > { %3526 = vrot.lane.b32.xlu1 %v11197_v55, %s6280_s23  ;;  %v4598_v55 = vsel %vm4570_vm10, %v4469_v3, %v3615_v20  ;;  %v11221_v20 = vld [vmem:[#allocation42_spill] sm:$0xff] }
 0x34f   : > { %3424 = vrot.lane.b32.xlu0 %v9321_v57, %s6279_s22 }
 0x350   : > { %v3749_v1 = vpop.permute.xlu1 %3748 }
 0x351   : > { %v3647_v50 = vpop.permute.xlu0 %3646  ;;  %v4727_v0 = vsel %vm4699_vm11, %v4598_v55, %v3749_v1  ;;  %v11223_v1 = vld [vmem:[#allocation250_spill] sm:$0xff] }
 0x352   : > { %3660 = vrot.lane.b32.xlu1 %v11214_v2, %s6281_s24  ;;  %v4213_v42 = vsel %vm4183_vm7, %v4035_v22, %v11223_v1  ;;  %v11233_v1 = vld [vmem:[#allocation71_spill] sm:$0xff] }
 0x353   : > { %3558 = vrot.lane.b32.xlu0 %v11199_v35, %s6280_s23  ;;  %v4501_v35 = vsel %vm4441_vm9, %v4372_v60, %v3513_v59  ;;  %v11229_v60 = vld [vmem:[#allocation278_spill] sm:$0xff] }
 0x354   : > { %v3883_v23 = vpop.permute.xlu1 %3882  ;;  %v4630_v14 = vsel %vm4570_vm10, %v4501_v35, %v3647_v50  ;;  %v11225_v50 = vld [vmem:[#allocation276_spill] sm:$0xff]  ;;  %v11230_v35 = vld [vmem:[#allocation121_spill] sm:$0xff] }
 0x355   : > { %v4869_v43 = vsel %vm4828_vm12, %v4727_v0, %v3883_v23  ;;  %v3781_v49 = vpop.permute.xlu0 %3780  ;;  %v4342_v55 = vsel %vm4312_vm8, %v4213_v42, %v11225_v50  ;;  %v11234_v42 = vld [vmem:[#allocation72_spill] sm:$0xff]  ;;  %v11235_v50 = vld [vmem:[#allocation249_spill] sm:$0xff] }
 0x356   : > { %3794 = vrot.lane.b32.xlu1 %v11217_v52, %s6282_s25  ;;  %5266 = vmatpush1.bf16.xpose.msra.mxu0 %v4869_v43  ;;  %v4759_v62 = vsel %vm4699_vm11, %v4630_v14, %v3781_v49  ;;  %v4083_v43 = vsel %vm3990_vm6, %v8420_v51, %v11226_v45 }
 0x357   : > { %5852 = vmatprep.subr.msk.bf16.mxu0 %vm3990_vm6, %v11219_v9  ;;  %3692 = vrot.lane.b32.xlu0 %v11220_v5, %s6281_s24  ;;  %v4245_v49 = vsel %vm4183_vm7, %v4083_v43, %v11227_v18 }
 0x358   : > { %v3483_v12 = vpop.permute.xlu1 %3482  ;;  %v4374_v9 = vsel %vm4312_vm8, %v4245_v49, %v11229_v60 }
 0x359   : > { %v3915_v31 = vpop.permute.xlu0 %3914 }
 0x35a   : > { %3928 = vrot.lane.b32.xlu1 %v11221_v20, %s6283_s26  ;;  %v4917_v29 = vsel %vm4828_vm12, %v4759_v62, %v3915_v31 }
 0x35b   : > { %3826 = vrot.lane.b32.xlu0 %v9425_v16, %s6282_s25  ;;  %5309 = vmatpush1.bf16.xpose.msra.mxu1 %v4917_v29 }
 0x35c   : > { %v3617_v59 = vpop.permute.xlu1 %3616  ;;  %5869 = vmatprep.subr.msk.bf16.mxu1 %vm3990_vm6, %v11160_v8  ;;  %v4471_v8 = vsel %vm4441_vm9, %v4342_v55, %v3483_v12  ;;  %v6239_v12 = vld [vmem:[%s6329_s19 + $0x23c] sm:$0xf] }
 0x35d   : > { %v3515_v48 = vpop.permute.xlu0 %3514  ;;  %v4600_v47 = vsel %vm4570_vm10, %v4471_v8, %v3617_v59  ;;  %v11236_v8 = vld [vmem:[#allocation41_spill] sm:$0xff] }
 0x35e   : > { %3426 = vrot.lane.b32.xlu1 %v9360_v61, %s6279_s22  ;;  %v4503_v51 = vsel %vm4441_vm9, %v4374_v9, %v3515_v48 }
 0x35f   : > { %3960 = vrot.lane.b32.xlu0 %v11224_v38, %s6283_s26 }
 0x360   : > { %v3751_v3 = vpop.permute.xlu1 %3750 }
 0x361   : > { %v3649_v0 = vpop.permute.xlu0 %3648  ;;  %v4729_v23 = vsel %vm4699_vm11, %v4600_v47, %v3751_v3  ;;  %v4038_v3 = vsel %vm3990_vm6, %v8288_v33, %v11234_v42  ;;  %v11237_v47 = vld [vmem:[#allocation8_spill] sm:$0xff] }
 0x362   : > { %3560 = vrot.lane.b32.xlu1 %v11209_v11, %s6280_s23  ;;  %v11228_v11 = vld [vmem:[#allocation225_spill] sm:$0xff]  ;;  %v4632_v62 = vsel %vm4570_vm10, %v4503_v51, %v3649_v0  ;;  %v4215_v55 = vsel %vm4183_vm7, %v4038_v3, %v11235_v50  ;;  %v11244_v50 = vld [vmem:[#allocation44_spill] sm:$0xff] }
 0x363   : > { %3528 = vrot.lane.b32.xlu0 %v11210_v10, %s6280_s23  ;;  %v6238_v10 = vld [vmem:[%s6329_s19 + $0x238] sm:$0xf] }
 0x364   : > { %v3885_v28 = vpop.permute.xlu1 %3884  ;;  %v9467_v14 = vcombine.low %v6238_v10, %v6239_v12 }
 0x365   : > { %v4872_v4 = vsel %vm4828_vm12, %v4729_v23, %v3885_v28  ;;  %v3783_v56 = vpop.permute.xlu0 %3782  ;;  %v4344_v23 = vsel %vm4312_vm8, %v4215_v55, %v11237_v47  ;;  %v11245_v55 = vld [vmem:[#allocation109_spill] sm:$0xff]  ;;  %v11246_v47 = vld [vmem:[#allocation271_spill] sm:$0xff] }
 0x366   : > { %3694 = vrot.lane.b32.xlu1 %v11228_v11, %s6281_s24  ;;  %5268 = vmatpush1.bf16.xpose.msra.mxu0 %v4872_v4  ;;  %v4761_v31 = vsel %vm4699_vm11, %v4632_v62, %v3783_v56  ;;  %v11238_v4 = vld [vmem:[#allocation102_spill] sm:$0xff] }
 0x367   : > { %5853 = vmatprep.subr.msk.bf16.mxu0 %vm3990_vm6, %v11230_v35  ;;  %3662 = vrot.lane.b32.xlu0 %v11231_v40, %s6281_s24  ;;  %v4086_v18 = vsel %vm3990_vm6, %v8414_v58, %v11238_v4  ;;  %v11239_v56 = vld [vmem:[#allocation266_spill] sm:$0xff]  ;;  %v11248_v4 = vld [vmem:[#allocation79_spill] sm:$0xff] }
 0x368   : > { %v3485_v37 = vpop.permute.xlu1 %3484  ;;  %v4247_v60 = vsel %vm4183_vm7, %v4086_v18, %v11239_v56  ;;  %v11241_v35 = vld [vmem:[#allocation10_spill] sm:$0xff] }
 0x369   : > { %v3917_v29 = vpop.permute.xlu0 %3916  ;;  %v4376_v10 = vsel %vm4312_vm8, %v4247_v60, %v11241_v35  ;;  %v11250_v56 = vld [vmem:[#allocation202_spill] sm:$0xff] }
 0x36a   : > { %3828 = vrot.lane.b32.xlu1 %v9467_v14, %s6282_s25  ;;  %v4920_v59 = vsel %vm4828_vm12, %v4761_v31, %v3917_v29  ;;  %v11242_v29 = vld [vmem:[#allocation181_spill] sm:$0xff]  ;;  %v11251_v35 = vld [vmem:[#allocation182_spill] sm:$0xff] }
 0x36b   : > { %3796 = vrot.lane.b32.xlu0 %v11232_v25, %s6282_s25  ;;  %5311 = vmatpush1.bf16.xpose.msra.mxu1 %v4920_v59  ;;  %v11243_v59 = vld [vmem:[#allocation231_spill] sm:$0xff] }
 0x36c   : > { %v3619_v22 = vpop.permute.xlu1 %3618  ;;  %5870 = vmatprep.subr.msk.bf16.mxu1 %vm3990_vm6, %v11179_v44  ;;  %v4473_v44 = vsel %vm4441_vm9, %v4344_v23, %v3485_v37  ;;  %v6010_v37 = vld [vmem:[%s10308_s1] ss:$8 sps:$4 sm:$0xff]  }
 0x36d   : > { %v3517_v48 = vpop.permute.xlu0 %3516  ;;  %v4602_v45 = vsel %vm4570_vm10, %v4473_v44, %v3619_v22  ;;  %v6240_v22 = vld [vmem:[%s6329_s19 + $0x244] sm:$0xf]  ;;  %v11247_v44 = vld [vmem:[#allocation279_spill] sm:$0xff] }
 0x36e   : > { %3962 = vrot.lane.b32.xlu1 %v11233_v1, %s6283_s26  ;;  %v4505_v58 = vsel %vm4441_vm9, %v4376_v10, %v3517_v48  ;;  %v6241_v48 = vld [vmem:[%s6329_s19 + $0x248] sm:$0xf] }
 0x36f   : > { %3930 = vrot.lane.b32.xlu0 %v11236_v8, %s6283_s26  ;;  %v9528_v42 = vcombine.low %v6240_v22, %v6241_v48  ;;  %v6242_v22 = vld [vmem:[%s6329_s19 + $0x24c] sm:$0xf]  ;;  %v6243_v48 = vld [vmem:[%s6329_s19 + $0x250] sm:$0xf] }
 0x370   : > { %v3753_v0 = vpop.permute.xlu1 %3752 }
 0x371   : > { %v3651_v28 = vpop.permute.xlu0 %3650  ;;  %v4731_v33 = vsel %vm4699_vm11, %v4602_v45, %v3753_v0  ;;  %v4089_v0 = vsel %vm3990_vm6, %v8436_v6, %v11245_v55  ;;  %v9574_v55 = vcombine.low %v6242_v22, %v6243_v48  ;;  %v11264_v22 = vld [vmem:[#allocation196_spill] sm:$0xff] }
 0x372   : > { %3530 = vrot.lane.b32.xlu1 %v11221_v20, %s6280_s23  ;;  %v11240_v20 = vld [vmem:[#allocation188_spill] sm:$0xff]  ;;  %v4634_v51 = vsel %vm4570_vm10, %v4505_v58, %v3651_v28  ;;  %v4249_v23 = vsel %vm4183_vm7, %v4089_v0, %v11246_v47 }
 0x373   : > { %3428 = vrot.lane.b32.xlu0 %v9425_v16, %s6279_s22  ;;  %v4378_v28 = vsel %vm4312_vm8, %v4249_v23, %v11247_v44  ;;  %v11255_v0 = vld [vmem:[#allocation176_spill] sm:$0xff] }
 0x374   : > { %v3887_v43 = vpop.permute.xlu1 %3886  ;;  %v11257_v44 = vld [vmem:[#allocation152_spill] sm:$0xff] }
 0x375   : > { %v4875_v49 = vsel %vm4828_vm12, %v4731_v33, %v3887_v43  ;;  %v3785_v9 = vpop.permute.xlu0 %3784 }
 0x376   : > { %3664 = vrot.lane.b32.xlu1 %v11240_v20, %s6281_s24  ;;  %5270 = vmatpush1.bf16.xpose.msra.mxu0 %v4875_v49  ;;  %v4763_v62 = vsel %vm4699_vm11, %v4634_v51, %v3785_v9  ;;  %v11249_v49 = vld [vmem:[#allocation158_spill] sm:$0xff] }
 0x377   : > { %5872 = vmatprep.subr.msk.bf16.mxu0 %vm3990_vm6, %v11188_v13  ;;  %3562 = vrot.lane.b32.xlu0 %v11224_v38, %s6280_s23  ;;  %v4137_v60 = vsel %vm3990_vm6, %v11250_v56, %v11249_v49 }
 0x378   : > { %v3519_v12 = vpop.permute.xlu1 %3518  ;;  %v4281_v10 = vsel %vm4183_vm7, %v4137_v60, %v11251_v35 }
 0x379   : > { %v3919_v31 = vpop.permute.xlu0 %3918  ;;  %v4507_v45 = vsel %vm4441_vm9, %v4378_v28, %v3519_v12  ;;  %v11252_v12 = vld [vmem:[#allocation28_spill] sm:$0xff]  ;;  %v11258_v28 = vld [vmem:[#allocation193_spill] sm:$0xff] }
 0x37a   : > { %3798 = vrot.lane.b32.xlu1 %v11242_v29, %s6282_s25  ;;  %v4923_v13 = vsel %vm4828_vm12, %v4763_v62, %v3919_v31  ;;  %v4410_v51 = vsel %vm4312_vm8, %v4281_v10, %v11252_v12  ;;  %v11263_v12 = vld [vmem:[#allocation26_spill] sm:$0xff] }
 0x37b   : > { %3696 = vrot.lane.b32.xlu0 %v11243_v59, %s6281_s24  ;;  %5313 = vmatpush1.bf16.xpose.msra.mxu1 %v4923_v13 }
 0x37c   : > { %v3653_v38 = vpop.permute.xlu1 %3652  ;;  %5889 = vmatprep.subr.msk.bf16.mxu1 %vm3990_vm6, %v11194_v63 }
 0x37d   : > { %5272 = vmatmul.mubr.bf16.vlgmr.msra.gmra.mrb[0].mxu0 %v6010_v37  ;;  %v3551_v3 = vpop.permute.xlu0 %3550  ;;  %v4636_v43 = vsel %vm4570_vm10, %v4507_v45, %v3653_v38  ;;  %v4140_v45 = vsel %vm3990_vm6, %v11258_v28, %v11257_v44 }
 0x37e   : > { %3932 = vrot.lane.b32.xlu1 %v11244_v50, %s6283_s26  ;;  %5888 = vmatprep.mubr.msk.bf16.mxu0 %vm3990_vm6, %v9175_v41 }
 0x37f   : > { %3830 = vrot.lane.b32.xlu0 %v9528_v42, %s6282_s25 }
 0x380   : > { %v3787_v63 = vpop.permute.xlu1 %3786 }
 0x381   : > { %v3685_v33 = vpop.permute.xlu0 %3684  ;;  %v4765_v6 = vsel %vm4699_vm11, %v4636_v43, %v3787_v63  ;;  %v11256_v63 = vld [vmem:[#allocation76_spill] sm:$0xff] }
 0x382   : > { %3430 = vrot.lane.b32.xlu1 %v9467_v14, %s6279_s22  ;;  %5315 = vmatmul.mubr.bf16.vlgmr.msra.gmra.mrb[0].mxu1 %v6010_v37 }
 0x383   : > { %3964 = vrot.lane.b32.xlu0 %v11248_v4, %s6283_s26  ;;  %5905 = vmatprep.mubr.msk.bf16.mxu1 %vm3990_vm6, %v9175_v41  ;;  %v4539_v41 = vsel %vm4441_vm9, %v4410_v51, %v3551_v3 }
 0x384   : > { %v3921_v18 = vpop.permute.xlu1 %3920  ;;  %v4668_v62 = vsel %vm4570_vm10, %v4539_v41, %v3685_v33  ;;  %v11259_v33 = vld [vmem:[#allocation177_spill] sm:$0xff] }
 0x385   : > { %v4926_v9 = vsel %vm4828_vm12, %v4765_v6, %v3921_v18  ;;  %v3819_v58 = vpop.permute.xlu0 %3818  ;;  %v4283_v43 = vsel %vm4183_vm7, %v4140_v45, %v11259_v33  ;;  %v11261_v18 = vld [vmem:[#allocation106_spill] sm:$0xff]  ;;  %v6244_v45 = vld [vmem:[%s6329_s19 + $0x258] sm:$0xf]  ;;  %v6245_v33 = vld [vmem:[%s6329_s19 + $0x25c] sm:$0xf] }
 0x386   : > { %3564 = vrot.lane.b32.xlu1 %v11233_v1, %s6280_s23  ;;  %5326 = vmatpush1.bf16.xpose.msra.mxu0 %v4926_v9  ;;  %v4797_v31 = vsel %vm4699_vm11, %v4668_v62, %v3819_v58  ;;  %v11253_v1 = vld [vmem:[#allocation229_spill] sm:$0xff]  ;;  %v4092_v49 = vsel %vm3990_vm6, %v11128_v39, %v11261_v18 }
 0x387   : > { %5873 = vmatprep.subr.msk.bf16.mxu0 %vm3990_vm6, %v11204_v26  ;;  %3532 = vrot.lane.b32.xlu0 %v11236_v8, %s6280_s23  ;;  %v11254_v26 = vld [vmem:[#allocation185_spill] sm:$0xff] }
 0x388   : > { %v3419_v37 = vpop.permute.xlu1 %3418  ;;  %v11262_v9 = vld [vmem:[#allocation269_spill] sm:$0xff] }
 0x389   : > { %v3953_v13 = vpop.permute.xlu0 %3952  ;;  %v4412_v60 = vsel %vm4312_vm8, %v4283_v43, %v3419_v37  ;;  %v4251_v35 = vsel %vm4183_vm7, %v4092_v49, %v11262_v9  ;;  %v9627_v43 = vcombine.low %v6244_v45, %v6245_v33  ;;  %v11269_v18 = vld [vmem:[#allocation273_spill] sm:$0xff]  ;;  %v11270_v9 = vld [vmem:[#allocation280_spill] sm:$0xff] }
 0x38a   : > { %3698 = vrot.lane.b32.xlu1 %v11253_v1, %s6281_s24  ;;  %v4974_v38 = vsel %vm4828_vm12, %v4797_v31, %v3953_v13  ;;  %v4380_v51 = vsel %vm4312_vm8, %v4251_v35, %v11263_v12 }
 0x38b   : > { %3666 = vrot.lane.b32.xlu0 %v11254_v26, %s6281_s24  ;;  %5369 = vmatpush1.bf16.xpose.msra.mxu1 %v4974_v38 }
 0x38c   : > { %v3553_v8 = vpop.permute.xlu1 %3552  ;;  %5890 = vmatprep.subr.msk.bf16.mxu1 %vm3990_vm6, %v11203_v17  ;;  %v11260_v17 = vld [vmem:[#allocation43_spill] sm:$0xff] }
 0x38d   : > { %v3521_v3 = vpop.permute.xlu0 %3520  ;;  %v4541_v10 = vsel %vm4441_vm9, %v4412_v60, %v3553_v8 }
 0x38e   : > { %3832 = vrot.lane.b32.xlu1 %v9574_v55, %s6282_s25  ;;  %v4509_v62 = vsel %vm4441_vm9, %v4380_v51, %v3521_v3  ;;  %v11271_v51 = vld [vmem:[#allocation83_spill] sm:$0xff] }
 0x38f   : > { %3800 = vrot.lane.b32.xlu0 %v11255_v0, %s6282_s25 }
 0x390   : > { %v3687_v47 = vpop.permute.xlu1 %3686 }
 0x391   : > { %v3655_v23 = vpop.permute.xlu0 %3654  ;;  %v4670_v41 = vsel %vm4570_vm10, %v4541_v10, %v3687_v47  ;;  %v11265_v47 = vld [vmem:[#allocation187_spill] sm:$0xff] }
 0x392   : > { %3966 = vrot.lane.b32.xlu1 %v11256_v63, %s6283_s26  ;;  %v4638_v31 = vsel %vm4570_vm10, %v4509_v62, %v3655_v23  ;;  %v11266_v23 = vld [vmem:[#allocation235_spill] sm:$0xff]  ;;  %v11272_v62 = vld [vmem:[#allocation168_spill] sm:$0xff] }
 0x393   : > { %3934 = vrot.lane.b32.xlu0 %v11260_v17, %s6283_s26 }
 0x394   : > { %v3821_v6 = vpop.permute.xlu1 %3820 }
 0x395   : > { %v3789_v58 = vpop.permute.xlu0 %3788  ;;  %v4799_v39 = vsel %vm4699_vm11, %v4670_v41, %v3821_v6  ;;  %v11268_v6 = vld [vmem:[#allocation114_spill] sm:$0xff] }
 0x396   : > { %3534 = vrot.lane.b32.xlu1 %v11244_v50, %s6280_s23  ;;  %v4767_v50 = vsel %vm4699_vm11, %v4638_v31, %v3789_v58 }
 0x397   : > { %3432 = vrot.lane.b32.xlu0 %v9528_v42, %s6279_s22 }
 0x398   : > { %v3955_v37 = vpop.permute.xlu1 %3954 }
 0x399   : > { %v4977_v13 = vsel %vm4828_vm12, %v4799_v39, %v3955_v37  ;;  %v3923_v38 = vpop.permute.xlu0 %3922  ;;  %v11273_v39 = vld [vmem:[#allocation205_spill] sm:$0xff] }
 0x39a   : > { %3668 = vrot.lane.b32.xlu1 %v11264_v22, %s6281_s24  ;;  %5371 = vmatpush1.bf16.xpose.msra.mxu1 %v4977_v13  ;;  %v4929_v48 = vsel %vm4828_vm12, %v4767_v50, %v3923_v38  ;;  %v4143_v37 = vsel %vm3990_vm6, %v11273_v39, %v11272_v62  ;;  %v11274_v13 = vld [vmem:[#allocation191_spill] sm:$0xff] }
 0x39b   : > { %5891 = vmatprep.subr.msk.bf16.mxu1 %vm3990_vm6, %v11220_v5  ;;  %3566 = vrot.lane.b32.xlu0 %v11248_v4, %s6280_s23  ;;  %v11267_v4 = vld [vmem:[#allocation46_spill] sm:$0xff]  ;;  %v4285_v50 = vsel %vm4183_vm7, %v4143_v37, %v11274_v13  ;;  %v11282_v37 = vld [vmem:[#allocation111_spill] sm:$0xff] }
 0x39c   : > { %5328 = vmatpush1.bf16.xpose.msra.mxu0 %v4929_v48  ;;  %v3523_v8 = vpop.permute.xlu1 %3522 }
 0x39d   : > { %5874 = vmatprep.subr.msk.bf16.mxu0 %vm3990_vm6, %v11214_v2  ;;  %v3421_v3 = vpop.permute.xlu0 %3420  ;;  %v4095_v2 = vsel %vm3990_vm6, %v11141_v53, %v11268_v6 }
 0x39e   : > { %3802 = vrot.lane.b32.xlu1 %v11265_v47, %s6282_s25  ;;  %v4253_v49 = vsel %vm4183_vm7, %v4095_v2, %v11269_v18  ;;  %v4414_v48 = vsel %vm4312_vm8, %v4285_v50, %v3421_v3  ;;  %v11275_v2 = vld [vmem:[#allocation233_spill] sm:$0xff]  ;;  %v6246_v3 = vld [vmem:[%s6329_s19 + $0x260] sm:$0xf]  ;;  %v6247_v18 = vld [vmem:[%s6329_s19 + $0x264] sm:$0xf] }
 0x39f   : > { %3700 = vrot.lane.b32.xlu0 %v11266_v23, %s6281_s24  ;;  %v4382_v35 = vsel %vm4312_vm8, %v4253_v49, %v11270_v9  ;;  %v9668_v49 = vcombine.low %v6246_v3, %v6247_v18  ;;  %v11283_v50 = vld [vmem:[#allocation272_spill] sm:$0xff] }
 0x3a0   : > { %v3657_v44 = vpop.permute.xlu1 %3656  ;;  %v4511_v10 = vsel %vm4441_vm9, %v4382_v35, %v3523_v8 }
 0x3a1   : > { %v3555_v5 = vpop.permute.xlu0 %3554  ;;  %v4640_v12 = vsel %vm4570_vm10, %v4511_v10, %v3657_v44  ;;  %v11278_v10 = vld [vmem:[#allocation82_spill] sm:$0xff] }
 0x3a2   : > { %3936 = vrot.lane.b32.xlu1 %v11267_v4, %s6283_s26  ;;  %v4543_v8 = vsel %vm4441_vm9, %v4414_v48, %v3555_v5 }
 0x3a3   : > { %3834 = vrot.lane.b32.xlu0 %v9627_v43, %s6282_s25 }
 0x3a4   : > { %v3791_v60 = vpop.permute.xlu1 %3790 }
 0x3a5   : > { %v3689_v58 = vpop.permute.xlu0 %3688  ;;  %v4769_v53 = vsel %vm4699_vm11, %v4640_v12, %v3791_v60  ;;  %v11277_v60 = vld [vmem:[#allocation183_spill] sm:$0xff] }
 0x3a6   : > { %3434 = vrot.lane.b32.xlu1 %v9574_v55, %s6279_s22  ;;  %v4672_v45 = vsel %vm4570_vm10, %v4543_v8, %v3689_v58  ;;  %v11279_v58 = vld [vmem:[#allocation161_spill] sm:$0xff] }
 0x3a7   : > { %3968 = vrot.lane.b32.xlu0 %v11271_v51, %s6283_s26  ;;  %v4146_v12 = vsel %vm3990_vm6, %v9222_v34, %v11279_v58  ;;  %v11285_v58 = vld [vmem:[#allocation203_spill] sm:$0xff] }
 0x3a8   : > { %v3925_v41 = vpop.permute.xlu1 %3924 }
 0x3a9   : > { %v4932_v31 = vsel %vm4828_vm12, %v4769_v53, %v3925_v41  ;;  %v3823_v38 = vpop.permute.xlu0 %3822  ;;  %v11280_v53 = vld [vmem:[#allocation186_spill] sm:$0xff] }
 0x3aa   : > { %3568 = vrot.lane.b32.xlu1 %v11256_v63, %s6280_s23  ;;  %5330 = vmatpush1.bf16.xpose.msra.mxu0 %v4932_v31  ;;  %v4801_v33 = vsel %vm4699_vm11, %v4672_v45, %v3823_v38  ;;  %v4287_v41 = vsel %vm4183_vm7, %v4146_v12, %v11280_v53  ;;  %v4098_v31 = vsel %vm3990_vm6, %v11154_v54, %v11282_v37  ;;  %v11284_v45 = vld [vmem:[#allocation99_spill] sm:$0xff]  ;;  %v6249_v37 = vld [vmem:[%s6329_s19 + $0x270] sm:$0xf] }
 0x3ab   : > { %5875 = vmatprep.subr.msk.bf16.mxu0 %vm3990_vm6, %v11231_v40  ;;  %3536 = vrot.lane.b32.xlu0 %v11260_v17, %s6280_s23  ;;  %v11276_v40 = vld [vmem:[#allocation190_spill] sm:$0xff]  ;;  %v4255_v38 = vsel %vm4183_vm7, %v4098_v31, %v11283_v50  ;;  %v11286_v12 = vld [vmem:[#allocation195_spill] sm:$0xff]  ;;  %v11291_v50 = vld [vmem:[#allocation137_spill] sm:$0xff] }
 0x3ac   : > { %v3423_v44 = vpop.permute.xlu1 %3422  ;;  %v11287_v53 = vld [vmem:[#allocation239_spill] sm:$0xff] }
 0x3ad   : > { %v3957_v6 = vpop.permute.xlu0 %3956  ;;  %v4416_v13 = vsel %vm4312_vm8, %v4287_v41, %v3423_v44 }
 0x3ae   : > { %3702 = vrot.lane.b32.xlu1 %v11275_v2, %s6281_s24  ;;  %v4980_v63 = vsel %vm4828_vm12, %v4801_v33, %v3957_v6  ;;  %v4384_v33 = vsel %vm4312_vm8, %v4255_v38, %v11284_v45 }
 0x3af   : > { %3670 = vrot.lane.b32.xlu0 %v11276_v40, %s6281_s24  ;;  %5373 = vmatpush1.bf16.xpose.msra.mxu1 %v4980_v63 }
 0x3b0   : > { %v3557_v17 = vpop.permute.xlu1 %3556  ;;  %5892 = vmatprep.subr.msk.bf16.mxu1 %vm3990_vm6, %v11228_v11  ;;  %v11281_v11 = vld [vmem:[#allocation45_spill] sm:$0xff] }
 0x3b1   : > { %v3525_v5 = vpop.permute.xlu0 %3524  ;;  %v4545_v48 = vsel %vm4441_vm9, %v4416_v13, %v3557_v17  ;;  %v11290_v13 = vld [vmem:[#allocation118_spill] sm:$0xff] }
 0x3b2   : > { %3836 = vrot.lane.b32.xlu1 %v9668_v49, %s6282_s25  ;;  %v4513_v63 = vsel %vm4441_vm9, %v4384_v33, %v3525_v5 }
 0x3b3   : > { %3804 = vrot.lane.b32.xlu0 %v11277_v60, %s6282_s25 }
 0x3b4   : > { %v3691_v9 = vpop.permute.xlu1 %3690 }
 0x3b5   : > { %v3659_v35 = vpop.permute.xlu0 %3658  ;;  %v4674_v6 = vsel %vm4570_vm10, %v4545_v48, %v3691_v9 }
 0x3b6   : > { %3970 = vrot.lane.b32.xlu1 %v11278_v10, %s6283_s26  ;;  %v4642_v3 = vsel %vm4570_vm10, %v4513_v63, %v3659_v35 }
 0x3b7   : > { %3938 = vrot.lane.b32.xlu0 %v11281_v11, %s6283_s26 }
 0x3b8   : > { %v3825_v62 = vpop.permute.xlu1 %3824 }
 0x3b9   : > { %v3793_v8 = vpop.permute.xlu0 %3792  ;;  %v4803_v54 = vsel %vm4699_vm11, %v4674_v6, %v3825_v62  ;;  %v6248_v62 = vld [vmem:[%s6329_s19 + $0x26c] sm:$0xf] }
 0x3ba   : > { %3538 = vrot.lane.b32.xlu1 %v11267_v4, %s6280_s23  ;;  %v4771_v4 = vsel %vm4699_vm11, %v4642_v3, %v3793_v8  ;;  %v9721_v31 = vcombine.low %v6248_v62, %v6249_v37  ;;  %v11292_v8 = vld [vmem:[#allocation281_spill] sm:$0xff]  ;;  %v11294_v3 = vld [vmem:[#allocation179_spill] sm:$0xff] }
 0x3bb   : > { %3436 = vrot.lane.b32.xlu0 %v9627_v43, %s6279_s22 }
 0x3bc   : > { %v3959_v44 = vpop.permute.xlu1 %3958  ;;  %11288 = vst [vmem:[#allocation103_spill] sm:$0xff] %v9721_v31 }
 0x3bd   : > { %v4983_v18 = vsel %vm4828_vm12, %v4803_v54, %v3959_v44  ;;  %v3927_v17 = vpop.permute.xlu0 %3926  ;;  %v11293_v54 = vld [vmem:[#allocation90_spill] sm:$0xff] }
 0x3be   : > { %3672 = vrot.lane.b32.xlu1 %v11285_v58, %s6281_s24  ;;  %5375 = vmatpush1.bf16.xpose.msra.mxu1 %v4983_v18  ;;  %v4935_v5 = vsel %vm4828_vm12, %v4771_v4, %v3927_v17  ;;  %v4149_v18 = vsel %vm3990_vm6, %v9214_v15, %v11294_v3  ;;  %v11295_v17 = vld [vmem:[#allocation197_spill] sm:$0xff] }
 0x3bf   : > { %5893 = vmatprep.subr.msk.bf16.mxu1 %vm3990_vm6, %v11243_v59  ;;  %3570 = vrot.lane.b32.xlu0 %v11271_v51, %s6280_s23  ;;  %v11289_v51 = vld [vmem:[#allocation50_spill] sm:$0xff] }
 0x3c0   : > { %5332 = vmatpush1.bf16.xpose.msra.mxu0 %v4935_v5  ;;  %v3527_v9 = vpop.permute.xlu1 %3526  ;;  %v4289_v5 = vsel %vm4183_vm7, %v4149_v18, %v11295_v17  ;;  %v11300_v18 = vld [vmem:[#allocation86_spill] sm:$0xff] }
 0x3c1   : > { %5876 = vmatprep.subr.msk.bf16.mxu0 %vm3990_vm6, %v11240_v20  ;;  %v3425_v35 = vpop.permute.xlu0 %3424  ;;  %v4101_v20 = vsel %vm3990_vm6, %v11162_v21, %v11290_v13 }
 0x3c2   : > { %3806 = vrot.lane.b32.xlu1 %v11286_v12, %s6282_s25  ;;  %v4257_v38 = vsel %vm4183_vm7, %v4101_v20, %v11291_v50  ;;  %v6250_v50 = vld [vmem:[%s6329_s19 + $0x274] sm:$0xf]  ;;  %v11323_v12 = vld [vmem:[#allocation9_spill] sm:$0xff] }
 0x3c3   : > { %3704 = vrot.lane.b32.xlu0 %v11287_v53, %s6281_s24  ;;  %v4386_v45 = vsel %vm4312_vm8, %v4257_v38, %v11292_v8 }
 0x3c4   : > { %v3661_v41 = vpop.permute.xlu1 %3660  ;;  %v4515_v33 = vsel %vm4441_vm9, %v4386_v45, %v3527_v9  ;;  %v9774_v45 = vld [vmem:[%s6329_s19 + $0x284] sm:$0xf] }
 0x3c5   : > { %v3559_v59 = vpop.permute.xlu0 %3558  ;;  %v4644_v63 = vsel %vm4570_vm10, %v4515_v33, %v3661_v41  ;;  %v4418_v41 = vsel %vm4312_vm8, %v4289_v5, %v3425_v35  ;;  %v11299_v33 = vld [vmem:[#allocation192_spill] sm:$0xff]  ;;  %v11302_v5 = vld [vmem:[#allocation198_spill] sm:$0xff] }
 0x3c6   : > { %3940 = vrot.lane.b32.xlu1 %v11289_v51, %s6283_s26  ;;  %v4547_v15 = vsel %vm4441_vm9, %v4418_v41, %v3559_v59  ;;  %v11298_v59 = vld [vmem:[#allocation200_spill] sm:$0xff]  ;;  %v11303_v41 = vld [vmem:[#allocation47_spill] sm:$0xff] }
 0x3c7   : > { %3838 = vrot.lane.b32.xlu0 %v9721_v31, %s6282_s25 }
 0x3c8   : > { %v3795_v48 = vpop.permute.xlu1 %3794 }
 0x3c9   : > { %v3693_v6 = vpop.permute.xlu0 %3692  ;;  %v4773_v21 = vsel %vm4699_vm11, %v4644_v63, %v3795_v48  ;;  %v9769_v48 = vld [vmem:[%s6329_s19 + $0x280] sm:$0xf] }
 0x3ca   : > { %3438 = vrot.lane.b32.xlu1 %v9668_v49, %s6279_s22  ;;  %v4676_v37 = vsel %vm4570_vm10, %v4547_v15, %v3693_v6  ;;  %v2359_v63 = vshrl.u32 %v9769_v48, 16 }
 0x3cb   : > { %3972 = vrot.lane.b32.xlu0 %v11293_v54, %s6283_s26 }
 0x3cc   : > { %v3929_v44 = vpop.permute.xlu1 %3928 }
 0x3cd   : > { %v4938_v4 = vsel %vm4828_vm12, %v4773_v21, %v3929_v44  ;;  %v3827_v9 = vpop.permute.xlu0 %3826  ;;  %v2362_v21 = vshll.u32 %v9769_v48, 16  ;;  %v2372_v44 = vshrl.u32 %v9774_v45, 16 }
 0x3ce   : > { %3572 = vrot.lane.b32.xlu1 %v11278_v10, %s6280_s23  ;;  %5334 = vmatpush1.bf16.xpose.msra.mxu0 %v4938_v4  ;;  %v4805_v13 = vsel %vm4699_vm11, %v4676_v37, %v3827_v9  ;;  %v11296_v10 = vld [vmem:[#allocation237_spill] sm:$0xff]  ;;  %v2361_v37 = vrot.slane %v2359_v63, 4  ;;  %v11306_v63 = vld [vmem:[#allocation127_spill] sm:$0xff] }
 0x3cf   : > { %5877 = vmatprep.subr.msk.bf16.mxu0 %vm3990_vm6, %v11254_v26  ;;  %3540 = vrot.lane.b32.xlu0 %v11281_v11, %s6280_s23  ;;  %v6251_v26 = vld [vmem:[%s6329_s19 + $0x278] sm:$0xf] }
 0x3d0   : > { %v3427_v62 = vpop.permute.xlu1 %3426  ;;  %v9762_v38 = vcombine.low %v6250_v50, %v6251_v26  ;;  %v11301_v4 = vld [vmem:[#allocation173_spill] sm:$0xff] }
 0x3d1   : > { %v3961_v20 = vpop.permute.xlu0 %3960  ;;  %v4152_v17 = vsel %vm3990_vm6, %v9258_v46, %v11301_v4 }
 0x3d2   : > { %3706 = vrot.lane.b32.xlu1 %v11296_v10, %s6281_s24  ;;  %v4986_v35 = vsel %vm4828_vm12, %v4805_v13, %v3961_v20  ;;  %11297 = vst [vmem:[#allocation49_spill] sm:$0xff] %v9762_v38  ;;  %v4291_v9 = vsel %vm4183_vm7, %v4152_v17, %v11302_v5  ;;  %v2364_v13 = vrot.slane %v2362_v21, 5  ;;  %v11304_v20 = vld [vmem:[#allocation116_spill] sm:$0xff]  ;;  %v9801_v5 = vld [vmem:[%s6329_s19 + $0x288] sm:$0xf] }
 0x3d3   : > { %3674 = vrot.lane.b32.xlu0 %v11298_v59, %s6281_s24  ;;  %5377 = vmatpush1.bf16.xpose.msra.mxu1 %v4986_v35  ;;  %v4104_v35 = vsel %vm3990_vm6, %v11181_v19, %v11304_v20  ;;  %v4420_v50 = vsel %vm4312_vm8, %v4291_v9, %v3427_v62  ;;  %v2378_v20 = vshll.u32 %v9801_v5, 16 }
 0x3d4   : > { %v3561_v11 = vpop.permute.xlu1 %3560  ;;  %5894 = vmatprep.subr.msk.bf16.mxu1 %vm3990_vm6, %v11253_v1  ;;  %v2368_v1 = vshll.u32 %v9774_v45, 16  ;;  %v4259_v46 = vsel %vm4183_vm7, %v4104_v35, %v11305_v30 }
 0x3d5   : > { %v3529_v8 = vpop.permute.xlu0 %3528  ;;  %v4549_v4 = vsel %vm4441_vm9, %v4420_v50, %v3561_v11  ;;  %v4388_v21 = vsel %vm4312_vm8, %v4259_v46, %v11306_v63  ;;  %v2365_v11 = vor.u32 %v2364_v13, %v2361_v37  ;;  %v2380_v50 = vrot.slane %v2378_v20, 5  ;;  %v11308_v63 = vld [vmem:[#allocation242_spill] sm:$0xff] }
 0x3d6   : > { %3840 = vrot.lane.b32.xlu1 %v9762_v38, %s6282_s25  ;;  %v2370_v26 = vrot.slane %v2368_v1, 5  ;;  %v4517_v62 = vsel %vm4441_vm9, %v4388_v21, %v3529_v8  ;;  %v11307_v8 = vld [vmem:[#allocation209_spill] sm:$0xff]  ;;  %v6284_v46 = vmov 0  }
 0x3d7   : > { %3808 = vrot.lane.b32.xlu0 %v11299_v33, %s6282_s25  ;;  %v2374_v33 = vrot.slane %v2372_v44, 4  ;;  %v2366_v37 = vrot.slane %v2365_v11, 4  ;;  %5943 = vset.pattern.permute.xlu1 %v6284_v46  ;;  %v11311_v11 = vld [vmem:[#allocation123_spill] sm:$0xff] }
 0x3d8   : > { %v3695_v6 = vpop.permute.xlu1 %3694  ;;  %5942 = vset.pattern.permute.xlu0 %v6284_v46 }
 0x3d9   : > { %v3663_v3 = vpop.permute.xlu0 %3662  ;;  %v4678_v19 = vsel %vm4570_vm10, %v4549_v4, %v3695_v6  ;;  %v2375_v9 = vor.u32 %v2374_v33, %v2370_v26  ;;  %v9822_v33 = vld [vmem:[%s6329_s19 + $0x28c] sm:$0xf] }
 0x3da   : > { %3974 = vrot.lane.b32.xlu1 %v11300_v18, %s6283_s26  ;;  %v4646_v1 = vsel %vm4570_vm10, %v4517_v62, %v3663_v3  ;;  %v2371_v62 = vsel %vm6339_vm2, %v2366_v37, %v2370_v26  ;;  %v9853_v37 = vld [vmem:[%s6329_s19 + $0x290] sm:$0x1] }
 0x3db   : > { %3942 = vrot.lane.b32.xlu0 %v11303_v41, %s6283_s26  ;;  %v2376_v13 = vrot.slane %v2375_v9, 4 }
 0x3dc   : > { %v3829_v15 = vpop.permute.xlu1 %3828 }
 0x3dd   : > { %v3797_v17 = vpop.permute.xlu0 %3796  ;;  %v4807_v44 = vsel %vm4699_vm11, %v4678_v19, %v3829_v15  ;;  %v11332_v19 = vld [vmem:[#allocation194_spill] sm:$0xff] }
 0x3de   : > { %3542 = vrot.lane.b32.xlu1 %v11289_v51, %s6280_s23  ;;  %v4775_v35 = vsel %vm4699_vm11, %v4646_v1, %v3797_v17  ;;  %v2388_v17 = vshll.u32 %v9822_v33, 16  ;;  %v4107_v1 = vsel %vm3990_vm6, %v11193_v7, %v11311_v11  ;;  %v2398_v11 = vshll.u32 %v9853_v37, 16 }
 0x3df   : > { %3440 = vrot.lane.b32.xlu0 %v9721_v31, %s6279_s22 }
 0x3e0   : > { %v3963_v30 = vpop.permute.xlu1 %3962  ;;  %v2390_v9 = vrot.slane %v2388_v17, 5 }
 0x3e1   : > { %v4989_v51 = vsel %vm4828_vm12, %v4807_v44, %v3963_v30  ;;  %v3931_v6 = vpop.permute.xlu0 %3930  ;;  %v11310_v30 = vld [vmem:[#allocation55_spill] sm:$0xff] }
 0x3e2   : > { %3676 = vrot.lane.b32.xlu1 %v11307_v8, %s6281_s24  ;;  %5379 = vmatpush1.bf16.xpose.msra.mxu1 %v4989_v51  ;;  %v4941_v15 = vsel %vm4828_vm12, %v4775_v35, %v3931_v6  ;;  %v11312_v35 = vld [vmem:[#allocation147_spill] sm:$0xff] }
 0x3e3   : > { %5895 = vmatprep.subr.msk.bf16.mxu1 %vm3990_vm6, %v11266_v23  ;;  %3574 = vrot.lane.b32.xlu0 %v11293_v54, %s6280_s23  ;;  %v2392_v23 = vshrl.u32 %v9822_v33, 16  ;;  %v2382_v54 = vshrl.u32 %v9801_v5, 16  ;;  %v4261_v6 = vsel %vm4183_vm7, %v4107_v1, %v11312_v35  ;;  %v11314_v1 = vld [vmem:[#allocation189_spill] sm:$0xff] }
 0x3e4   : > { %5336 = vmatpush1.bf16.xpose.msra.mxu0 %v4941_v15  ;;  %v3531_v3 = vpop.permute.xlu1 %3530 }
 0x3e5   : > { %5878 = vmatprep.subr.msk.bf16.mxu0 %vm3990_vm6, %v11264_v22  ;;  %v3429_v4 = vpop.permute.xlu0 %3428  ;;  %v9835_v22 = vcombine.low %v9769_v48, %v9774_v45  ;;  %v2384_v51 = vrot.slane %v2382_v54, 4  ;;  %v2394_v20 = vrot.slane %v2392_v23, 4 }
 0x3e6   : > { %3810 = vrot.lane.b32.xlu1 %v11250_v56, %s6282_s25  ;;  %v2381_v56 = vsel %vm6339_vm2, %v2376_v13, %v2380_v50  ;;  %v11313_v13 = vld [vmem:[#allocation282_spill] sm:$0xff] }
 0x3e7   : > { %3708 = vrot.lane.b32.xlu0 %v11308_v63, %s6281_s24  ;;  %v9850_v15 = vcombine.low %v2371_v62, %v2381_v56  ;;  %v4390_v46 = vsel %vm4312_vm8, %v4261_v6, %v11313_v13  ;;  %v2385_v54 = vor.u32 %v2384_v51, %v2380_v50  ;;  %v2395_v17 = vor.u32 %v2394_v20, %v2390_v9  ;;  %v11315_v6 = vld [vmem:[#allocation206_spill] sm:$0xff] }
 0x3e8   : > { %v3665_v21 = vpop.permute.xlu1 %3664  ;;  %v4519_v31 = vsel %vm4441_vm9, %v4390_v46, %v3531_v3  ;;  %v4155_v3 = vsel %vm3990_vm6, %v9321_v57, %v11314_v1  ;;  %v2400_v20 = vrot.slane %v2398_v11, 5  ;;  %v9897_v11 = vld [vmem:[%s6329_s19 + $0x294] sm:$0xf] }
 0x3e9   : > { %v3563_v44 = vpop.permute.xlu0 %3562  ;;  %v4648_v23 = vsel %vm4570_vm10, %v4519_v31, %v3665_v21  ;;  %v4293_v13 = vsel %vm4183_vm7, %v4155_v3, %v11315_v6  ;;  %v2386_v21 = vrot.slane %v2385_v54, 4  ;;  %v2396_v51 = vrot.slane %v2395_v17, 4 }
 0x3ea   : > { %3944 = vrot.lane.b32.xlu1 %v11310_v30, %s6283_s26  ;;  %v4422_v50 = vsel %vm4312_vm8, %v4293_v13, %v3429_v4  ;;  %v11316_v4 = vld [vmem:[#allocation240_spill] sm:$0xff]  ;;  %v9885_v54 = vcombine.low %v9801_v5, %v9822_v33  ;;  %v2409_v3 = vrot.slane %v9774_v45, 5 }
 0x3eb   : > { %3842 = vrot.lane.b32.xlu0 %v9835_v22, %s6282_s25  ;;  %v4551_v57 = vsel %vm4441_vm9, %v4422_v50, %v3563_v44  ;;  %v2391_v44 = vsel %vm6339_vm2, %v2386_v21, %v2390_v9  ;;  %v9904_v9 = vld [vmem:[%s6329_s19 + $0x298] sm:$0xf]  ;;  %v11318_v50 = vld [vmem:[#allocation120_spill] sm:$0xff] }
 0x3ec   : > { %v3799_v26 = vpop.permute.xlu1 %3798  ;;  %v2434_v6 = vshrl.u32 %v9904_v9, 16  ;;  %v2430_v13 = vshll.u32 %v9904_v9, 16  ;;  %v11319_v21 = vld [vmem:[#allocation184_spill] sm:$0xff] }
 0x3ed   : > { %v3697_v7 = vpop.permute.xlu0 %3696  ;;  %v4777_v62 = vsel %vm4699_vm11, %v4648_v23, %v3799_v26  ;;  %v4158_v45 = vsel %vm3990_vm6, %v9360_v61, %v11319_v21  ;;  %v11322_v21 = vld [vmem:[#allocation142_spill] sm:$0xff] }
 0x3ee   : > { %3442 = vrot.lane.b32.xlu1 %v9762_v38, %s6279_s22  ;;  %v4680_v46 = vsel %vm4570_vm10, %v4551_v57, %v3697_v7  ;;  %v11317_v7 = vld [vmem:[#allocation208_spill] sm:$0xff]  ;;  %v2432_v38 = vrot.slane %v2430_v13, 5  ;;  %v2436_v61 = vrot.slane %v2434_v6, 4 }
 0x3ef   : > { %3976 = vrot.lane.b32.xlu0 %v9850_v15, %s6283_s26 }
 0x3f0   : > { %v3933_v56 = vpop.permute.xlu1 %3932 }
 0x3f1   : > { %v4944_v35 = vsel %vm4828_vm12, %v4777_v62, %v3933_v56  ;;  %v3831_v31 = vpop.permute.xlu0 %3830 }
 0x3f2   : > { %3576 = vrot.lane.b32.xlu1 %v11300_v18, %s6280_s23  ;;  %5338 = vmatpush1.bf16.xpose.msra.mxu0 %v4944_v35  ;;  %v4809_v18 = vsel %vm4699_vm11, %v4680_v46, %v3831_v31  ;;  %v2421_v35 = vshrl.u32 %v9897_v11, 16  ;;  %v11321_v46 = vld [vmem:[#allocation52_spill] sm:$0xff] }
 0x3f3   : > { %5879 = vmatprep.subr.msk.bf16.mxu0 %vm3990_vm6, %v11276_v40  ;;  %3544 = vrot.lane.b32.xlu0 %v11303_v41, %s6280_s23  ;;  %v2401_v41 = vsel %vm6339_vm2, %v2396_v51, %v2400_v20  ;;  %v5630_v51 = vrot.slane %v9769_v48, 9  ;;  %v11320_v20 = vld [vmem:[#allocation201_spill] sm:$0xff] }
 0x3f4   : > { %v3431_v26 = vpop.permute.xlu1 %3430  ;;  %v9901_v56 = vcombine.low %v2391_v44, %v2401_v41  ;;  %v4295_v57 = vsel %vm4183_vm7, %v4158_v45, %v11320_v20  ;;  %v2423_v44 = vrot.slane %v2421_v35, 4 }
 0x3f5   : > { %v3965_v23 = vpop.permute.xlu0 %3964  ;;  %v4424_v41 = vsel %vm4312_vm8, %v4295_v57, %v3431_v26  ;;  %v2410_v57 = vsel %vm7160_vm5, %v5630_v51, %v2409_v3 }
 0x3f6   : > { %3710 = vrot.lane.b32.xlu1 %v11316_v4, %s6281_s24  ;;  %v4992_v40 = vsel %vm4828_vm12, %v4809_v18, %v3965_v23  ;;  %v2411_v23 = vrot.slane %v2409_v3, 4  ;;  %v2437_v3 = vor.u32 %v2436_v61, %v2432_v38 }
 0x3f7   : > { %3678 = vrot.lane.b32.xlu0 %v11317_v7, %s6281_s24  ;;  %5381 = vmatpush1.bf16.xpose.msra.mxu1 %v4992_v40  ;;  %v2412_v40 = vrot.slane %v9801_v5, 5 }
 0x3f8   : > { %v3565_v17 = vpop.permute.xlu1 %3564  ;;  %5896 = vmatprep.subr.msk.bf16.mxu1 %vm3990_vm6, %v11275_v2  ;;  %v2424_v2 = vshll.u32 %v9897_v11, 16 }
 0x3f9   : > { %v3533_v62 = vpop.permute.xlu0 %3532  ;;  %v4553_v45 = vsel %vm4441_vm9, %v4424_v41, %v3565_v17  ;;  %v2413_v13 = vsel %vm7160_vm5, %v2411_v23, %v2412_v40 }
 0x3fa   : > { %3844 = vrot.lane.b32.xlu1 %v9885_v54, %s6282_s25  ;;  %v9958_v23 = vcombine.low %v2410_v57, %v2413_v13 }
 0x3fb   : > { %3812 = vrot.lane.b32.xlu0 %v11258_v28, %s6282_s25  ;;  %v4110_v28 = vsel %vm3990_vm6, %v11208_v32, %v11318_v50  ;;  %v9929_v32 = vld [vmem:[%s6329_s19 + $0x29c] sm:$0xf]  ;;  %v2426_v50 = vrot.slane %v2424_v2, 5 }
 0x3fc   : > { %v3699_v1 = vpop.permute.xlu1 %3698  ;;  %v4263_v48 = vsel %vm4183_vm7, %v4110_v28, %v11322_v21 }
 0x3fd   : > { %v3667_v31 = vpop.permute.xlu0 %3666  ;;  %v4392_v5 = vsel %vm4312_vm8, %v4263_v48, %v11323_v12  ;;  %v4682_v35 = vsel %vm4570_vm10, %v4553_v45, %v3699_v1  ;;  %v2427_v28 = vor.u32 %v2426_v50, %v2423_v44  ;;  %v9961_v44 = vld [vmem:[%s6329_s19 + $0x2a0] sm:$0xf]  ;;  %v2438_v50 = vrot.slane %v2437_v3, 4 }
 0x3fe   : > { %3978 = vrot.lane.b32.xlu1 %v9901_v56, %s6283_s26  ;;  %v4521_v2 = vsel %vm4441_vm9, %v4392_v5, %v3533_v62  ;;  %v2444_v48 = vshrl.u32 %v9929_v32, 16  ;;  %v2450_v45 = vshll.u32 %v9961_v44, 16  ;;  %v5830_v5 = vcombine.low %v9897_v11, %v9904_v9 }
 0x3ff   : > { %3946 = vrot.lane.b32.xlu0 %v11321_v46, %s6283_s26  ;;  %v4650_v12 = vsel %vm4570_vm10, %v4521_v2, %v3667_v31  ;;  %v2428_v41 = vrot.slane %v2427_v28, 4  ;;  %v2418_v2 = vrot.slane %v9853_v37, 5 }
 0x400   : > { %v3833_v18 = vpop.permute.xlu1 %3832  ;;  %v2446_v13 = vrot.slane %v2444_v48, 4 }
 0x401   : > { %v3801_v20 = vpop.permute.xlu0 %3800  ;;  %v4811_v6 = vsel %vm4699_vm11, %v4682_v35, %v3833_v18  ;;  %v11325_v18 = vld [vmem:[#allocation216_spill] sm:$0xff]  ;;  %v2414_v35 = vrot.slane %v2412_v40, 4 }
 0x402   : > { %3546 = vrot.lane.b32.xlu1 %v11310_v30, %s6280_s23  ;;  %v2440_v30 = vshll.u32 %v9929_v32, 16  ;;  %v4779_v62 = vsel %vm4699_vm11, %v4650_v12, %v3801_v20 }
 0x403   : > { %3444 = vrot.lane.b32.xlu0 %v9835_v22, %s6279_s22 }
 0x404   : > { %v3967_v17 = vpop.permute.xlu1 %3966  ;;  %v2442_v61 = vrot.slane %v2440_v30, 5  ;;  %v2452_v30 = vrot.slane %v2450_v45, 5 }
 0x405   : > { %v4995_v1 = vsel %vm4828_vm12, %v4811_v6, %v3967_v17  ;;  %v3935_v51 = vpop.permute.xlu0 %3934  ;;  %v11326_v6 = vld [vmem:[#allocation128_spill] sm:$0xff] }
 0x406   : > { %3680 = vrot.lane.b32.xlu1 %v11325_v18, %s6281_s24  ;;  %5383 = vmatpush1.bf16.xpose.msra.mxu1 %v4995_v1  ;;  %v4947_v22 = vsel %vm4828_vm12, %v4779_v62, %v3935_v51  ;;  %v4113_v17 = vsel %vm3990_vm6, %v11217_v52, %v11326_v6  ;;  %v11327_v1 = vld [vmem:[#allocation153_spill] sm:$0xff]  ;;  %v9989_v62 = vld [vmem:[%s6329_s19 + $0x2a4] sm:$0x1] }
 0x407   : > { %5897 = vmatprep.subr.msk.bf16.mxu1 %vm3990_vm6, %v11287_v53  ;;  %3578 = vrot.lane.b32.xlu0 %v9850_v15, %s6280_s23  ;;  %v2415_v53 = vrot.slane %v9822_v33, 5  ;;  %v2454_v15 = vshrl.u32 %v9961_v44, 16  ;;  %v2460_v48 = vshll.u32 %v9989_v62, 16 }
 0x408   : > { %5340 = vmatpush1.bf16.xpose.msra.mxu0 %v4947_v22  ;;  %v3535_v31 = vpop.permute.xlu1 %3534 }
 0x409   : > { %5880 = vmatprep.subr.msk.bf16.mxu0 %vm3990_vm6, %v11285_v58  ;;  %v3433_v21 = vpop.permute.xlu0 %3432  ;;  %v2433_v58 = vsel %vm6339_vm2, %v2428_v41, %v2432_v38  ;;  %v2417_v57 = vrot.slane %v2415_v53, 4  ;;  %v2456_v12 = vrot.slane %v2454_v15, 4  ;;  %v4265_v38 = vsel %vm4183_vm7, %v4113_v17, %v11327_v1 }
 0x40a   : > { %3814 = vrot.lane.b32.xlu1 %v11273_v39, %s6282_s25  ;;  %v2443_v39 = vsel %vm6339_vm2, %v2438_v50, %v2442_v61  ;;  %v2416_v52 = vsel %vm7160_vm5, %v2414_v35, %v2415_v53  ;;  %v2447_v50 = vor.u32 %v2446_v13, %v2442_v61  ;;  %v2462_v6 = vrot.slane %v2460_v48, 5 }
 0x40b   : > { %3712 = vrot.lane.b32.xlu0 %v9958_v23, %s6281_s24  ;;  %v5832_v3 = vcombine.low %v2433_v58, %v2443_v39  ;;  %v2419_v22 = vsel %vm7160_vm5, %v2417_v57, %v2418_v2  ;;  %v2457_v15 = vor.u32 %v2456_v12, %v2452_v30  ;;  %v11330_v58 = vld [vmem:[#allocation207_spill] sm:$0xff] }
 0x40c   : > { %v3669_v20 = vpop.permute.xlu1 %3668  ;;  %v10012_v61 = vcombine.low %v2416_v52, %v2419_v22  ;;  %v2448_v57 = vrot.slane %v2447_v50, 4  ;;  %v11335_v50 = vld [vmem:[#allocation149_spill] sm:$0xff] }
 0x40d   : > { %v3567_v33 = vpop.permute.xlu0 %3566  ;;  %v2458_v2 = vrot.slane %v2457_v15, 4 }
 0x40e   : > { %3948 = vrot.lane.b32.xlu1 %v11161_v24, %s6283_s26  ;;  %v11328_v24 = vld [vmem:[#allocation283_spill] sm:$0xff] }
 0x40f   : > { %3846 = vrot.lane.b32.xlu0 %v5830_v5, %s6282_s25  ;;  %v4394_v40 = vsel %vm4312_vm8, %v4265_v38, %v11328_v24  ;;  %v11329_v5 = vld [vmem:[#allocation199_spill] sm:$0xff] }
 0x410   : > { %v3803_v28 = vpop.permute.xlu1 %3802  ;;  %v4523_v37 = vsel %vm4441_vm9, %v4394_v40, %v3535_v31  ;;  %v4164_v40 = vsel %vm3990_vm6, %v9467_v14, %v11332_v19  ;;  %v5023_v14 = vld [vmem:[%s10309_s2] sm:$0xff] }
 0x411   : > { %v3701_v51 = vpop.permute.xlu0 %3700  ;;  %v4652_v41 = vsel %vm4570_vm10, %v4523_v37, %v3669_v20  ;;  %v5024_v37 = vld [vmem:[%s10309_s2 + $0x8] sm:$0xff]  ;;  %v11341_v19 = vld [vmem:[#allocation214_spill] sm:$0xff] }
 0x412   : > { %3446 = vrot.lane.b32.xlu1 %v9885_v54, %s6279_s22  ;;  %v4781_v45 = vsel %vm4699_vm11, %v4652_v41, %v3803_v28  ;;  %v4161_v54 = vsel %vm3990_vm6, %v9425_v16, %v11329_v5 }
 0x413   : > { %3980 = vrot.lane.b32.xlu0 %v5832_v3, %s6283_s26  ;;  %v4297_v39 = vsel %vm4183_vm7, %v4161_v54, %v11330_v58 }
 0x414   : > { %v3937_v31 = vpop.permute.xlu1 %3936  ;;  %v4426_v20 = vsel %vm4312_vm8, %v4297_v39, %v3433_v21  ;;  %v5831_v21 = vcombine.low %v9929_v32, %v9961_v44 }
 0x415   : > { %v4950_v53 = vsel %vm4828_vm12, %v4781_v45, %v3937_v31  ;;  %v3835_v35 = vpop.permute.xlu0 %3834  ;;  %v4555_v16 = vsel %vm4441_vm9, %v4426_v20, %v3567_v33  ;;  %v11331_v33 = vld [vmem:[#allocation213_spill] sm:$0xff] }
 0x416   : > { %3580 = vrot.lane.b32.xlu1 %v9901_v56, %s6280_s23  ;;  %5342 = vmatpush1.bf16.xpose.msra.mxu0 %v4950_v53  ;;  %v4684_v13 = vsel %vm4570_vm10, %v4555_v16, %v3701_v51  ;;  %v11336_v31 = vld [vmem:[#allocation25_spill] sm:$0xff] }
 0x417   : > { %5881 = vmatprep.subr.msk.bf16.mxu0 %vm3990_vm6, %v11298_v59  ;;  %3548 = vrot.lane.b32.xlu0 %v11321_v46, %s6280_s23  ;;  %v4813_v56 = vsel %vm4699_vm11, %v4684_v13, %v3835_v35  ;;  %v2453_v59 = vsel %vm6339_vm2, %v2448_v57, %v2452_v30  ;;  %v2463_v46 = vsel %vm6339_vm2, %v2458_v2, %v2462_v6  ;;  %v11337_v13 = vld [vmem:[#allocation132_spill] sm:$0xff] }
 0x418   : > { %v3435_v17 = vpop.permute.xlu1 %3434  ;;  %v5833_v3 = vcombine.low %v2453_v59, %v2463_v46  ;;  %v11339_v59 = vld [vmem:[#allocation284_spill] sm:$0xff] }
 0x419   : > { %v3969_v12 = vpop.permute.xlu0 %3968 }
 0x41a   : > { %3714 = vrot.lane.b32.xlu1 %v10012_v61, %s6281_s24  ;;  %v4998_v1 = vsel %vm4828_vm12, %v4813_v56, %v3969_v12  ;;  %v4119_v56 = vsel %vm3990_vm6, %v11242_v29, %v11337_v13  ;;  %v11338_v12 = vld [vmem:[#allocation162_spill] sm:$0xff] }
 0x41b   : > { %3682 = vrot.lane.b32.xlu0 %v11331_v33, %s6281_s24  ;;  %5385 = vmatpush1.bf16.xpose.msra.mxu1 %v4998_v1 }
 0x41c   : > { %v3569_v38 = vpop.permute.xlu1 %3568  ;;  %5898 = vmatprep.subr.msk.bf16.mxu1 %vm3990_vm6, %v11296_v10  ;;  %v11333_v10 = vld [vmem:[#allocation210_spill] sm:$0xff] }
 0x41d   : > { %v3537_v28 = vpop.permute.xlu0 %3536  ;;  %v4299_v51 = vsel %vm4183_vm7, %v4164_v40, %v11333_v10 }
 0x41e   : > { %3848 = vrot.lane.b32.xlu1 %v5831_v21, %s6282_s25  ;;  %v4428_v41 = vsel %vm4312_vm8, %v4299_v51, %v3435_v17  ;;  %v4269_v21 = vsel %vm4183_vm7, %v4119_v56, %v11338_v12 }
 0x41f   : > { %3816 = vrot.lane.b32.xlu0 %v9222_v34, %s6282_s25  ;;  %v11334_v34 = vld [vmem:[#allocation125_spill] sm:$0xff]  ;;  %v4557_v48 = vsel %vm4441_vm9, %v4428_v41, %v3569_v38  ;;  %v4398_v46 = vsel %vm4312_vm8, %v4269_v21, %v11339_v59 }
 0x420   : > { %v3703_v24 = vpop.permute.xlu1 %3702  ;;  %v4116_v22 = vsel %vm3990_vm6, %v11232_v25, %v11334_v34 }
 0x421   : > { %v3671_v30 = vpop.permute.xlu0 %3670  ;;  %v4267_v15 = vsel %vm4183_vm7, %v4116_v22, %v11335_v50  ;;  %v4686_v5 = vsel %vm4570_vm10, %v4557_v48, %v3703_v24  ;;  %v11340_v24 = vld [vmem:[#allocation211_spill] sm:$0xff] }
 0x422   : > { %3982 = vrot.lane.b32.xlu1 %v5833_v3, %s6283_s26 }
 0x423   : > { %3950 = vrot.lane.b32.xlu0 %v11174_v27, %s6283_s26  ;;  %v4396_v27 = vsel %vm4312_vm8, %v4267_v15, %v11336_v31  ;;  %v11343_v31 = vld [vmem:[#allocation215_spill] sm:$0xff] }
 0x424   : > { %v3837_v52 = vpop.permute.xlu1 %3836  ;;  %v4525_v25 = vsel %vm4441_vm9, %v4396_v27, %v3537_v28 }
 0x425   : > { %v3805_v45 = vpop.permute.xlu0 %3804  ;;  %v4815_v54 = vsel %vm4699_vm11, %v4686_v5, %v3837_v52  ;;  %v4654_v58 = vsel %vm4570_vm10, %v4525_v25, %v3671_v30  ;;  %v4167_v30 = vsel %vm3990_vm6, %v9528_v42, %v11340_v24  ;;  %v11344_v25 = vld [vmem:[#allocation130_spill] sm:$0xff]  ;;  %v11347_v24 = vld [vmem:[#allocation139_spill] sm:$0xff] }
 0x426   : > { %5032 = vperm.xlu1 %5943, %v5024_v37   ;;  %v4783_v35 = vsel %vm4699_vm11, %v4654_v58, %v3805_v45  ;;  %v4301_v40 = vsel %vm4183_vm7, %v4167_v30, %v11341_v19  ;;  %v11342_v45 = vld [vmem:[#allocation204_spill] sm:$0xff] }
 0x427   : > { %5027 = vperm.xlu0 %5942, %v5023_v14   ;;  %v11345_v58 = vld [vmem:[#allocation156_spill] sm:$0xff] }
 0x428   : > { %v3971_v53 = vpop.permute.xlu1 %3970 }
 0x429   : > { %v5001_v39 = vsel %vm4828_vm12, %v4815_v54, %v3971_v53  ;;  %v3939_v20 = vpop.permute.xlu0 %3938  ;;  %v4122_v54 = vsel %vm3990_vm6, %v11255_v0, %v11344_v25 }
 0x42a   : > { %5387 = vmatpush1.bf16.xpose.msra.mxu1 %v5001_v39  ;;  %v4953_v57 = vsel %vm4828_vm12, %v4783_v35, %v3939_v20  ;;  %v11346_v20 = vld [vmem:[#allocation105_spill] sm:$0xff] }
 0x42b   : > { %5899 = vmatprep.subr.msk.bf16.mxu1 %vm3990_vm6, %v11308_v63  ;;  %5344 = vmatpush1.bf16.xpose.msra.mxu0 %v4953_v57 }
 0x42c   : > { %v3539_v2 = vpop.permute.xlu1 %3538  ;;  %5882 = vmatprep.subr.msk.bf16.mxu0 %vm3990_vm6, %v11307_v8 }
 0x42d   : > { %v3437_v6 = vpop.permute.xlu0 %3436  ;;  %v4527_v63 = vsel %vm4441_vm9, %v4398_v46, %v3539_v2 }
 0x42e   : > { %v4430_v10 = vsel %vm4312_vm8, %v4301_v40, %v3437_v6 }
 0x430   : > { %v3673_v16 = vpop.permute.xlu1 %3672 }
 0x431   : > { %v3571_v17 = vpop.permute.xlu0 %3570  ;;  %v4656_v28 = vsel %vm4570_vm10, %v4527_v63, %v3673_v16 }
 0x432   : > { %v4559_v51 = vsel %vm4441_vm9, %v4430_v10, %v3571_v17 }
 0x434   : > { %v3807_v1 = vpop.permute.xlu1 %3806 }
 0x435   : > { %v3705_v38 = vpop.permute.xlu0 %3704  ;;  %v4785_v8 = vsel %vm4699_vm11, %v4656_v28, %v3807_v1 }
 0x436   : > { %v4688_v34 = vsel %vm4570_vm10, %v4559_v51, %v3705_v38 }
 0x438   : > { %v3941_v3 = vpop.permute.xlu1 %3940 }
 0x439   : > { %v4956_v29 = vsel %vm4828_vm12, %v4785_v8, %v3941_v3  ;;  %v3839_v37 = vpop.permute.xlu0 %3838 }
 0x43a   : > { %5346 = vmatpush1.bf16.xpose.msra.mxu0 %v4956_v29  ;;  %v4817_v22 = vsel %vm4699_vm11, %v4688_v34, %v3839_v37  ;;  %v11348_v29 = vld [vmem:[#allocation167_spill] sm:$0xff]  ;;  %v11349_v37 = vld [vmem:[#allocation285_spill] sm:$0xff] }
 0x43b   : > { %5883 = vmatprep.subr.msk.bf16.mxu0 %vm3990_vm6, %v11317_v7  ;;  %v4170_v7 = vsel %vm3990_vm6, %v9574_v55, %v11342_v45 }
 0x43c   : > { %v3439_v52 = vpop.permute.xlu1 %3438  ;;  %v4303_v27 = vsel %vm4183_vm7, %v4170_v7, %v11343_v31 }
 0x43d   : > { %v3973_v42 = vpop.permute.xlu0 %3972  ;;  %v4432_v53 = vsel %vm4312_vm8, %v4303_v27, %v3439_v52 }
 0x43e   : > { %v5004_v41 = vsel %vm4828_vm12, %v4817_v22, %v3973_v42 }
 0x43f   : > { %5389 = vmatpush1.bf16.xpose.msra.mxu1 %v5004_v41  ;;  %v11350_v41 = vld [vmem:[#allocation218_spill] sm:$0xff] }
 0x440   : > { %v3573_v14 = vpop.permute.xlu1 %3572  ;;  %5900 = vmatprep.subr.msk.bf16.mxu1 %vm3990_vm6, %v11316_v4  ;;  %v4271_v4 = vsel %vm4183_vm7, %v4122_v54, %v11345_v58  ;;  %v2471_v58 = vrot.slane %v9904_v9, 5 }
 0x441   : > { %v3541_v50 = vpop.permute.xlu0 %3540  ;;  %v4561_v39 = vsel %vm4441_vm9, %v4432_v53, %v3573_v14  ;;  %v4400_v57 = vsel %vm4312_vm8, %v4271_v4, %v11346_v20  ;;  %v4173_v14 = vsel %vm3990_vm6, %v9627_v43, %v11350_v41  ;;  %v2474_v20 = vrot.slane %v9929_v32, 5  ;;  %v11357_v41 = vld [vmem:[#allocation148_spill] sm:$0xff] }
 0x442   : > { %v4529_v2 = vsel %vm4441_vm9, %v4400_v57, %v3541_v50 }
 0x444   : > { %v3707_v15 = vpop.permute.xlu1 %3706 }
 0x445   : > { %v3675_v48 = vpop.permute.xlu0 %3674  ;;  %v4690_v55 = vsel %vm4570_vm10, %v4561_v39, %v3707_v15  ;;  %v11351_v15 = vld [vmem:[#allocation94_spill] sm:$0xff] }
 0x446   : > { %v4658_v0 = vsel %vm4570_vm10, %v4529_v2, %v3675_v48  ;;  %v4305_v48 = vsel %vm4183_vm7, %v4173_v14, %v11351_v15  ;;  %v11358_v14 = vld [vmem:[#allocation195_spill] sm:$0xff] }
 0x447   : > { %v11359_v15 = vld [vmem:[#allocation175_spill] sm:$0xff] }
 0x448   : > { %v3841_v5 = vpop.permute.xlu1 %3840 }
 0x449   : > { %v3809_v35 = vpop.permute.xlu0 %3808  ;;  %v4819_v6 = vsel %vm4699_vm11, %v4690_v55, %v3841_v5  ;;  %v11352_v55 = vld [vmem:[#allocation212_spill] sm:$0xff] }
 0x44a   : > { %v4787_v13 = vsel %vm4699_vm11, %v4658_v0, %v3809_v35  ;;  %v2473_v35 = vrot.slane %v2471_v58, 4  ;;  %v4176_v2 = vsel %vm3990_vm6, %v9668_v49, %v11352_v55 }
 0x44c   : > { %v3975_v16 = vpop.permute.xlu1 %3974 }
 0x44d   : > { %v5007_v17 = vsel %vm4828_vm12, %v4819_v6, %v3975_v16  ;;  %v3943_v56 = vpop.permute.xlu0 %3942  ;;  %v11353_v6 = vld [vmem:[#allocation3_spill] sm:$0xff] }
 0x44e   : > { %5391 = vmatpush1.bf16.xpose.msra.mxu1 %v5007_v17  ;;  %v4959_v12 = vsel %vm4828_vm12, %v4787_v13, %v3943_v56  ;;  %v4307_v16 = vsel %vm4183_vm7, %v4176_v2, %v11353_v6  ;;  %v11354_v17 = vld [vmem:[#allocation134_spill] sm:$0xff]  ;;  %v11355_v13 = vld [vmem:[#allocation164_spill] sm:$0xff]  ;;  %v11364_v6 = vld [vmem:[#allocation217_spill] sm:$0xff] }
 0x44f   : > { %5901 = vmatprep.subr.msk.bf16.mxu1 %vm3990_vm6, %v9958_v23  ;;  %5348 = vmatpush1.bf16.xpose.msra.mxu0 %v4959_v12  ;;  %v4125_v23 = vsel %vm3990_vm6, %v11265_v47, %v11347_v24 }
 0x450   : > { %v3543_v21 = vpop.permute.xlu1 %3542  ;;  %v10120_v1 = vpop.f32.mrb[0].mxu0  ;;  %5884 = vmatprep.subr.msk.bf16.mxu0 %vm3990_vm6, %v11325_v18  ;;  %v4273_v18 = vsel %vm4183_vm7, %v4125_v23, %v11348_v29 }
 0x451   : > { %v10124_v59 = vpop.f32.mrb[1].mxu0  ;;  %v3441_v46 = vpop.permute.xlu0 %3440  ;;  %v4402_v10 = vsel %vm4312_vm8, %v4273_v18, %v11349_v37 }
 0x452   : > { %v10126_v63 = vpop.f32.mrb[2].mxu0  ;;  %v4531_v52 = vsel %vm4441_vm9, %v4402_v10, %v3543_v21  ;;  %v4434_v7 = vsel %vm4312_vm8, %v4305_v48, %v3441_v46  ;;  %v11356_v21 = vld [vmem:[#allocation133_spill] sm:$0xff] }
 0x453   : > { %v10128_v38 = vpop.f32.mrb[3].mxu0 }
 0x454   : > { %v3677_v28 = vpop.permute.xlu1 %3676 }
 0x455   : > { %v3575_v8 = vpop.permute.xlu0 %3574  ;;  %v10130_v3 = vpop.f32.mrb[0].mxu1  ;;  %v4660_v22 = vsel %vm4570_vm10, %v4531_v52, %v3677_v28 }
 0x456   : > { %v10135_v30 = vpop.f32.mrb[1].mxu1  ;;  %v4563_v31 = vsel %vm4441_vm9, %v4434_v7, %v3575_v8  ;;  %v11360_v7 = vld [vmem:[#allocation286_spill] sm:$0xff] }
 0x457   : > { %v10139_v40 = vpop.f32.mrb[2].mxu1 }
 0x458   : > { %v3811_v19 = vpop.permute.xlu1 %3810  ;;  %v10143_v51 = vpop.f32.mrb[3].mxu1 }
 0x459   : > { %v3709_v34 = vpop.permute.xlu0 %3708  ;;  %v4789_v47 = vsel %vm4699_vm11, %v4660_v22, %v3811_v19 }
 0x45a   : > { %v4692_v5 = vsel %vm4570_vm10, %v4563_v31, %v3709_v34 }
 0x45c   : > { %v3945_v42 = vpop.permute.xlu1 %3944 }
 0x45d   : > { %v4962_v50 = vsel %vm4828_vm12, %v4789_v47, %v3945_v42  ;;  %v3843_v45 = vpop.permute.xlu0 %3842  ;;  %v2477_v42 = vrot.slane %v9961_v44, 5 }
 0x45e   : > { %5350 = vmatpush1.bf16.xpose.msra.mxu0 %v4962_v50  ;;  %v4821_v25 = vsel %vm4699_vm11, %v4692_v5, %v3843_v45  ;;  %v4131_v50 = vsel %vm3990_vm6, %v11358_v14, %v11357_v41 }
 0x45f   : > { %5885 = vmatprep.subr.msk.bf16.mxu0 %vm3990_vm6, %v11331_v33  ;;  %v5631_v33 = vrot.slane %v9897_v11, 9  ;;  %v4128_v11 = vsel %vm3990_vm6, %v11277_v60, %v11354_v17  ;;  %v4277_v48 = vsel %vm4183_vm7, %v4131_v50, %v11359_v15 }
 0x460   : > { %v3443_v27 = vpop.permute.xlu1 %3442  ;;  %v4275_v56 = vsel %vm4183_vm7, %v4128_v11, %v11355_v13  ;;  %v4406_v31 = vsel %vm4312_vm8, %v4277_v48, %v11360_v7 }
 0x461   : > { %v3977_v43 = vpop.permute.xlu0 %3976  ;;  %v2472_v9 = vsel %vm7160_vm5, %v5631_v33, %v2471_v58  ;;  %v4436_v32 = vsel %vm4312_vm8, %v4307_v16, %v3443_v27  ;;  %v4404_v46 = vsel %vm4312_vm8, %v4275_v56, %v11356_v21  ;;  %v11361_v58 = vld [vmem:[#allocation222_spill] sm:$0xff]  ;;  %v11366_v21 = vld [vmem:[#allocation49_spill] sm:$0xff] }
 0x462   : > { %v5010_v54 = vsel %vm4828_vm12, %v4821_v25, %v3977_v43  ;;  %v2479_v25 = vrot.slane %v2477_v42, 4  ;;  %v2480_v43 = vrot.slane %v9989_v62, 5 }
 0x463   : > { %5393 = vmatpush1.bf16.xpose.msra.mxu1 %v5010_v54 }
 0x464   : > { %v3577_v53 = vpop.permute.xlu1 %3576  ;;  %5902 = vmatprep.subr.msk.bf16.mxu1 %vm3990_vm6, %v10012_v61  ;;  %v2475_v61 = vsel %vm7160_vm5, %v2473_v35, %v2474_v20  ;;  %v11363_v35 = vld [vmem:[#allocation274_spill] sm:$0xff]  ;;  %v2481_v62 = vsel %vm7160_vm5, %v2479_v25, %v2480_v43 }
 0x465   : > { %v3545_v4 = vpop.permute.xlu0 %3544  ;;  %v4565_v49 = vsel %vm4441_vm9, %v4436_v32, %v3577_v53  ;;  %v5834_v8 = vcombine.low %v2472_v9, %v2475_v61 }
 0x466   : > { %v4533_v24 = vsel %vm4441_vm9, %v4404_v46, %v3545_v4  ;;  %v11362_v4 = vld [vmem:[#allocation103_spill] sm:$0xff] }
 0x468   : > { %v3711_v39 = vpop.permute.xlu1 %3710 }
 0x469   : > { %v3679_v57 = vpop.permute.xlu0 %3678  ;;  %v4694_v28 = vsel %vm4570_vm10, %v4565_v49, %v3711_v39  ;;  %v4179_v39 = vsel %vm3990_vm6, %v11362_v4, %v11361_v58 }
 0x46a   : > { %v4662_v60 = vsel %vm4570_vm10, %v4533_v24, %v3679_v57  ;;  %v4309_v57 = vsel %vm4183_vm7, %v4179_v39, %v11363_v35 }
 0x46c   : > { %v3845_v0 = vpop.permute.xlu1 %3844 }
 0x46d   : > { %v3813_v12 = vpop.permute.xlu0 %3812  ;;  %v4823_v23 = vsel %vm4699_vm11, %v4694_v28, %v3845_v0  ;;  %v11367_v28 = vld [vmem:[#allocation6_spill] sm:$0xff] }
 0x46e   : > { %v4791_v19 = vsel %vm4699_vm11, %v4662_v60, %v3813_v12  ;;  %v11365_v12 = vld [vmem:[#allocation219_spill] sm:$0xff] }
 0x46f   : > { %v4182_v46 = vsel %vm3990_vm6, %v11366_v21, %v11365_v12 }
 0x470   : > { %v3979_v29 = vpop.permute.xlu1 %3978 }
 0x471   : > { %v5013_v18 = vsel %vm4828_vm12, %v4823_v23, %v3979_v29  ;;  %v3947_v37 = vpop.permute.xlu0 %3946  ;;  %v11368_v23 = vld [vmem:[#allocation141_spill] sm:$0xff]  ;;  %v11369_v29 = vld [vmem:[#allocation192_spill] sm:$0xff] }
 0x472   : > { %5395 = vmatpush1.bf16.xpose.msra.mxu1 %v5013_v18  ;;  %v4965_v10 = vsel %vm4828_vm12, %v4791_v19, %v3947_v37  ;;  %v4134_v60 = vsel %vm3990_vm6, %v11369_v29, %v11368_v23  ;;  %v11370_v19 = vld [vmem:[#allocation171_spill] sm:$0xff] }
 0x473   : > { %5903 = vmatprep.subr.msk.bf16.mxu1 %vm3990_vm6, %v5834_v8  ;;  %5352 = vmatpush1.bf16.xpose.msra.mxu0 %v4965_v10  ;;  %v4311_v8 = vsel %vm4183_vm7, %v4182_v46, %v11367_v28  ;;  %v4279_v37 = vsel %vm4183_vm7, %v4134_v60, %v11370_v19 }
 0x474   : > { %v3547_v52 = vpop.permute.xlu1 %3546  ;;  %5886 = vmatprep.subr.msk.bf16.mxu0 %vm3990_vm6, %v11166_v36  ;;  %v2476_v36 = vrot.slane %v2474_v20, 4 }
 0x475   : > { %v3445_v34 = vpop.permute.xlu0 %3444  ;;  %v4535_v27 = vsel %vm4441_vm9, %v4406_v31, %v3547_v52  ;;  %v6252_v31 = vld [vmem:[%s10308_s1] ss:$8 sps:$4 sm:$0xff]  }
 0x476   : > { %v2478_v20 = vsel %vm7160_vm5, %v2476_v36, %v2477_v42  ;;  %v4438_v2 = vsel %vm4312_vm8, %v4309_v57, %v3445_v34  ;;  %v11371_v34 = vld [vmem:[#allocation12_spill] sm:$0xff] }
 0x477   : > { %v5835_v61 = vcombine.low %v2478_v20, %v2481_v62 }
 0x478   : > { %v3681_v22 = vpop.permute.xlu1 %3680 }
 0x479   : > { %v3579_v47 = vpop.permute.xlu0 %3578  ;;  %v4664_v44 = vsel %vm4570_vm10, %v4535_v27, %v3681_v22  ;;  %v4408_v22 = vsel %vm4312_vm8, %v4279_v37, %v11371_v34 }
 0x47a   : > { %v4567_v16 = vsel %vm4441_vm9, %v4438_v2, %v3579_v47 }
 0x47c   : > { %v3815_v45 = vpop.permute.xlu1 %3814 }
 0x47d   : > { %v3713_v5 = vpop.permute.xlu0 %3712  ;;  %v4793_v54 = vsel %vm4699_vm11, %v4664_v44, %v3815_v45 }
 0x47e   : > { %v4696_v9 = vsel %vm4570_vm10, %v4567_v16, %v3713_v5 }
 0x480   : > { %v3949_v53 = vpop.permute.xlu1 %3948 }
 0x481   : > { %v4968_v33 = vsel %vm4828_vm12, %v4793_v54, %v3949_v53  ;;  %v3847_v55 = vpop.permute.xlu0 %3846 }
 0x482   : > { %5354 = vmatpush1.bf16.xpose.msra.mxu0 %v4968_v33  ;;  %v4825_v17 = vsel %vm4699_vm11, %v4696_v9, %v3847_v55 }
 0x483   : > { %5887 = vmatprep.subr.msk.bf16.mxu0 %vm3990_vm6, %v11364_v6 }
 0x484   : > { %v3447_v0 = vpop.permute.xlu1 %3446 }
 0x485   : > { %v3981_v11 = vpop.permute.xlu0 %3980  ;;  %v4440_v18 = vsel %vm4312_vm8, %v4311_v8, %v3447_v0 }
 0x486   : > { %v5016_v32 = vsel %vm4828_vm12, %v4825_v17, %v3981_v11 }
 0x487   : > { %5397 = vmatpush1.bf16.xpose.msra.mxu1 %v5016_v32 }
 0x488   : > { %v3581_v13 = vpop.permute.xlu1 %3580  ;;  %5904 = vmatprep.subr.msk.bf16.mxu1 %vm3990_vm6, %v5835_v61 }
 0x489   : > { %v3549_v26 = vpop.permute.xlu0 %3548  ;;  %v4569_v10 = vsel %vm4441_vm9, %v4440_v18, %v3581_v13 }
 0x48a   : > { %v4537_v42 = vsel %vm4441_vm9, %v4408_v22, %v3549_v26 }
 0x48c   : > { %v3715_v56 = vpop.permute.xlu1 %3714 }
 0x48d   : > { %v3683_v49 = vpop.permute.xlu0 %3682  ;;  %v4698_v47 = vsel %vm4570_vm10, %v4569_v10, %v3715_v56 }
 0x48e   : > { %v4666_v50 = vsel %vm4570_vm10, %v4537_v42, %v3683_v49 }
 0x490   : > { %v3849_v24 = vpop.permute.xlu1 %3848 }
 0x491   : > { %v3817_v52 = vpop.permute.xlu0 %3816  ;;  %v4827_v41 = vsel %vm4699_vm11, %v4698_v47, %v3849_v24 }
 0x492   : > { %v4795_v48 = vsel %vm4699_vm11, %v4666_v50, %v3817_v52 }
 0x494   : > { %v3983_v14 = vpop.permute.xlu1 %3982 }
 0x495   : > { %v5019_v15 = vsel %vm4828_vm12, %v4827_v41, %v3983_v14  ;;  %v3951_v45 = vpop.permute.xlu0 %3950 }
 0x496   : > { %5399 = vmatpush1.bf16.xpose.msra.mxu1 %v5019_v15  ;;  %v4971_v7 = vsel %vm4828_vm12, %v4795_v48, %v3951_v45 }
 0x497   : > { %5356 = vmatpush1.bf16.xpose.msra.mxu0 %v4971_v7 }
 0x49d   : > { %5401 = vmatmul.mubr.bf16.vlgmr.msra.gmra.mrb[4].mxu1 %v6252_v31 }
 0x49e   : > { %5358 = vmatmul.mubr.bf16.vlgmr.msra.gmra.mrb[4].mxu0 %v6252_v31 }
 0x4a5   : > { %v10248_v27 = vpop.permute.xlu1 %5032 }
 0x4a6   : > { %v5278_v5 = vadd.f32 %v10126_v63, %v10248_v27  ;;  %v5321_v36 = vadd.f32 %v10139_v40, %v10248_v27  ;;  %v5280_v25 = vadd.f32 %v10128_v38, %v10248_v27  ;;  %v5323_v43 = vadd.f32 %v10143_v51, %v10248_v27  ;;  %v10258_v44 = vpop.permute.xlu0 %5027 }
 0x4a7   : > { %v5274_v63 = vadd.f32 %v10120_v1, %v10258_v44  ;;  %v5276_v40 = vadd.f32 %v10124_v59, %v10258_v44  ;;  %v5317_v38 = vadd.f32 %v10130_v3, %v10258_v44  ;;  %v5319_v51 = vadd.f32 %v10135_v30, %v10258_v44 }
 0x4a8   : > { %v5435_v54 = vmul.f32 0.70710677, %v5278_v5  ;;  %v5437_v53 = vmul.f32 0.70710677, %v5321_v36  ;;  %v5436_v58 = vmul.f32 0.70710677, %v5280_v25 }
 0x4a9   : > { %v5438_v4 = vmul.f32 0.70710677, %v5323_v43  ;;  %v5427_v39 = vmul.f32 0.70710677, %v5274_v63  ;;  %v5428_v33 = vmul.f32 0.70710677, %v5276_v40 }
 0x4aa   : > { %6015 = verf.f32 %v5435_v54  ;;  %v5429_v35 = vmul.f32 0.70710677, %v5317_v38  ;;  %v5430_v57 = vmul.f32 0.70710677, %v5319_v51  ;;  %v5419_v1 = vmul.f32 0.5, %v5278_v5 }
 0x4ab   : > { %6017 = verf.f32 %v5437_v53  ;;  %v5421_v55 = vmul.f32 0.5, %v5321_v36  ;;  %v5420_v62 = vmul.f32 0.5, %v5280_v25  ;;  %v5422_v6 = vmul.f32 0.5, %v5323_v43 }
 0x4ac   : > { %6019 = verf.f32 %v5436_v58  ;;  %v5411_v11 = vmul.f32 0.5, %v5274_v63  ;;  %v5412_v26 = vmul.f32 0.5, %v5276_v40  ;;  %v5413_v12 = vmul.f32 0.5, %v5317_v38 }
 0x4ad   : > { %6021 = verf.f32 %v5438_v4  ;;  %v5414_v28 = vmul.f32 0.5, %v5319_v51 }
 0x4ae   : > { %6023 = verf.f32 %v5427_v39 }
 0x4af   : > { %6025 = verf.f32 %v5428_v33 }
 0x4b0   : > { %6027 = verf.f32 %v5429_v35 }
 0x4b1   : > { %6029 = verf.f32 %v5430_v57 }
 0x4b4   : > { %v6016_v59 = vpop.eup %6015 }
 0x4b5   : > { %v6018_v20 = vpop.eup %6017  ;;  %v5467_v3 = vadd.f32 1.0, %v6016_v59 }
 0x4b6   : > { %v6020_v2 = vpop.eup %6019  ;;  %v5469_v30 = vadd.f32 1.0, %v6018_v20 }
 0x4b7   : > { %v6022_v16 = vpop.eup %6021  ;;  %v5483_v0 = vmul.f32 %v5467_v3, %v5419_v1  ;;  %v5468_v9 = vadd.f32 1.0, %v6020_v2 }
 0x4b8   : > { %v5485_v61 = vmul.f32 %v5469_v30, %v5421_v55  ;;  %v5470_v17 = vadd.f32 1.0, %v6022_v16  ;;  %v6024_v32 = vpop.eup %6023 }
 0x4b9   : > { %5499 = vst [vmem:[%s10272_s17 + $0x40] sm:$0xff] %v5483_v0  ;;  %v5484_v13 = vmul.f32 %v5468_v9, %v5420_v62  ;;  %v6026_v56 = vpop.eup %6025  ;;  %v5459_v21 = vadd.f32 1.0, %v6024_v32 }
 0x4ba   : > { %5501 = vst [vmem:[%s10272_s17 + $0x50] sm:$0xff] %v5485_v61  ;;  %v5486_v49 = vmul.f32 %v5470_v17, %v5422_v6  ;;  %v6028_v46 = vpop.eup %6027  ;;  %v5460_v8 = vadd.f32 1.0, %v6026_v56 }
 0x4bb   : > { %5500 = vst [vmem:[%s10272_s17 + $0x48] sm:$0xff] %v5484_v13  ;;  %v6030_v24 = vpop.eup %6029  ;;  %v5461_v23 = vadd.f32 1.0, %v6028_v46  ;;  %v5475_v29 = vmul.f32 %v5459_v21, %v5411_v11 }
 0x4bc   : > { %5502 = vst [vmem:[%s10272_s17 + $0x58] sm:$0xff] %v5486_v49  ;;  %v5462_v60 = vadd.f32 1.0, %v6030_v24  ;;  %v5476_v18 = vmul.f32 %v5460_v8, %v5412_v26 }
 0x4bd   : > { %v5477_v19 = vmul.f32 %v5461_v23, %v5413_v12  ;;  %5491 = vst [vmem:[%s10272_s17] sm:$0xff] %v5475_v29 }
 0x4be   : > { %v5478_v37 = vmul.f32 %v5462_v60, %v5414_v28  ;;  %5492 = vst [vmem:[%s10272_s17 + $0x8] sm:$0xff] %v5476_v18 }
 0x4bf   : > { %5493 = vst [vmem:[%s10272_s17 + $0x10] sm:$0xff] %v5477_v19 }
 0x4c0   : > { %5494 = vst [vmem:[%s10272_s17 + $0x18] sm:$0xff] %v5478_v37 }
 0x570   : > { %v5402_v10 = vpop.f32.mrb[4].mxu1 }
 0x571   : > { %v5403_v52 = vadd.f32 %v5402_v10, %v10258_v44  ;;  %v5404_v34 = vpop.f32.mrb[5].mxu1  ;;  %v5359_v22 = vpop.f32.mrb[4].mxu0 }
 0x572   : > { %v5405_v47 = vadd.f32 %v5404_v34, %v10258_v44  ;;  %v5406_v42 = vpop.f32.mrb[6].mxu1  ;;  %v5360_v41 = vadd.f32 %v5359_v22, %v10258_v44  ;;  %v5361_v50 = vpop.f32.mrb[5].mxu0 }
 0x573   : > { %v5433_v14 = vmul.f32 0.70710677, %v5403_v52  ;;  %v5407_v15 = vadd.f32 %v5406_v42, %v10248_v27  ;;  %v5408_v48 = vpop.f32.mrb[7].mxu1  ;;  %v5362_v45 = vadd.f32 %v5361_v50, %v10258_v44  ;;  %v5363_v31 = vpop.f32.mrb[6].mxu0  ;;  %v5417_v51 = vmul.f32 0.5, %v5403_v52 }
 0x574   : > { %v5434_v7 = vmul.f32 0.70710677, %v5405_v47  ;;  %v5409_v5 = vadd.f32 %v5408_v48, %v10248_v27  ;;  %v5431_v36 = vmul.f32 0.70710677, %v5360_v41  ;;  %v5364_v25 = vadd.f32 %v5363_v31, %v10248_v27  ;;  %v5365_v43 = vpop.f32.mrb[7].mxu0 }
 0x575   : > { %6031 = verf.f32 %v5433_v14  ;;  %v5432_v54 = vmul.f32 0.70710677, %v5362_v45  ;;  %v5441_v58 = vmul.f32 0.70710677, %v5407_v15  ;;  %v5366_v4 = vadd.f32 %v5365_v43, %v10248_v27 }
 0x576   : > { %6033 = verf.f32 %v5434_v7  ;;  %v5439_v53 = vmul.f32 0.70710677, %v5364_v25  ;;  %v5442_v63 = vmul.f32 0.70710677, %v5409_v5  ;;  %v5418_v35 = vmul.f32 0.5, %v5405_v47 }
 0x577   : > { %6035 = verf.f32 %v5431_v36  ;;  %v5440_v44 = vmul.f32 0.70710677, %v5366_v4  ;;  %v5415_v59 = vmul.f32 0.5, %v5360_v41  ;;  %v5416_v3 = vmul.f32 0.5, %v5362_v45 }
 0x578   : > { %6037 = verf.f32 %v5432_v54  ;;  %v5423_v16 = vmul.f32 0.5, %v5364_v25  ;;  %v5425_v17 = vmul.f32 0.5, %v5407_v15  ;;  %v5426_v26 = vmul.f32 0.5, %v5409_v5 }
 0x579   : > { %6039 = verf.f32 %v5439_v53  ;;  %v5424_v12 = vmul.f32 0.5, %v5366_v4 }
 0x57a   : > { %6041 = verf.f32 %v5441_v58 }
 0x57b   : > { %6043 = verf.f32 %v5442_v63 }
 0x57c   : > { %6045 = verf.f32 %v5440_v44 }
 0x57f   : > { %v6032_v40 = vpop.eup %6031 }
 0x580   : > { %v6034_v38 = vpop.eup %6033  ;;  %v5465_v39 = vadd.f32 1.0, %v6032_v40 }
 0x581   : > { %v6036_v33 = vpop.eup %6035  ;;  %v5466_v57 = vadd.f32 1.0, %v6034_v38 }
 0x582   : > { %v6038_v1 = vpop.eup %6037  ;;  %v5463_v55 = vadd.f32 1.0, %v6036_v33  ;;  %v5481_v20 = vmul.f32 %v5465_v39, %v5417_v51 }
 0x583   : > { %v6040_v27 = vpop.eup %6039  ;;  %v5464_v62 = vadd.f32 1.0, %v6038_v1  ;;  %v5482_v2 = vmul.f32 %v5466_v57, %v5418_v35 }
 0x584   : > { %v6042_v30 = vpop.eup %6041  ;;  %v5479_v6 = vmul.f32 %v5463_v55, %v5415_v59  ;;  %5497 = vst [vmem:[%s10272_s17 + $0x30] sm:$0xff] %v5481_v20  ;;  %v5471_v0 = vadd.f32 1.0, %v6040_v27 }
 0x585   : > { %v6044_v9 = vpop.eup %6043  ;;  %v5480_v61 = vmul.f32 %v5464_v62, %v5416_v3  ;;  %5498 = vst [vmem:[%s10272_s17 + $0x38] sm:$0xff] %v5482_v2  ;;  %v5473_v11 = vadd.f32 1.0, %v6042_v30 }
 0x586   : > { %v6046_v32 = vpop.eup %6045  ;;  %5495 = vst [vmem:[%s10272_s17 + $0x20] sm:$0xff] %v5479_v6  ;;  %v5487_v13 = vmul.f32 %v5471_v0, %v5423_v16  ;;  %v5474_v56 = vadd.f32 1.0, %v6044_v9 }
 0x587   : > { %5496 = vst [vmem:[%s10272_s17 + $0x28] sm:$0xff] %v5480_v61  ;;  %v5489_v49 = vmul.f32 %v5473_v11, %v5425_v17  ;;  %v5472_v21 = vadd.f32 1.0, %v6046_v32 }
 0x588   : > { %5503 = vst [vmem:[%s10272_s17 + $0x60] sm:$0xff] %v5487_v13  ;;  %v5490_v46 = vmul.f32 %v5474_v56, %v5426_v26 }
 0x589   : > { %5505 = vst [vmem:[%s10272_s17 + $0x70] sm:$0xff] %v5489_v49  ;;  %v5488_v28 = vmul.f32 %v5472_v21, %v5424_v12 }
 0x58a   : > { %5506 = vst [vmem:[%s10272_s17 + $0x78] sm:$0xff] %v5490_v46 }
 0x58b   : > { %5504 = vst [vmem:[%s10272_s17 + $0x68] sm:$0xff] %v5488_v28 }
 0x58c PF: > { %s13_s14 = sadd.s32 1, %s6275_s14   ;;  %s11372_s12 = smov %s6271_s13 }
 0x58d   : > { %p10_p5 = scmp.ge.s32.totalorder %s13_s14, 4   ;;  %s11373_s13 = smov %s11375_s15 }
 0x58f   :  { %12 = sbr.rel (!%p10_p5) target bundleno = 2 (0x2), region = 63 }

</bundles_post_ra>
